<compile_context>
chip_gen: v5e
topology: v5e:2x2
jax: 0.10.0
libtpu: 0.0.40
codegen_flags: <defaults>
</compile_context>

<pallas_src>
import functools

import numpy as np
import jax
import jax.numpy as jnp
from jax.experimental import pallas as pl
from jax.experimental.pallas import tpu as pltpu


# ----------------------------------------------------------------------------
# small helpers
# ----------------------------------------------------------------------------
def _round_up(x, m):
    return ((x + m - 1) // m) * m


_VMEM_LIMIT = 32 * 1024 * 1024


# ----------------------------------------------------------------------------
# Pallas kernel 1: fused matmul + bias (+ReLU), bf16 MXU operands, f32 accum.
# Grid = (M tiles, N tiles, K tiles); K innermost ("arbitrary") with a f32
# VMEM accumulator -> init at k==0, bias+ReLU+store at k==last.
# ----------------------------------------------------------------------------
def _matmul_bias_act_kernel(x_ref, w_ref, b_ref, o_ref, acc_ref, *, relu):
    @pl.when(pl.program_id(2) == 0)
    def _init():
        acc_ref[...] = jnp.zeros_like(acc_ref)

    acc_ref[...] += jnp.dot(
        x_ref[...].astype(jnp.bfloat16),          # bf16 operands -> native MXU
        w_ref[...].astype(jnp.bfloat16),
        preferred_element_type=jnp.float32)       # f32 accumulation

    @pl.when(pl.program_id(2) == pl.num_programs(2) - 1)
    def _finalize():                              # epilogue stays f32 (v5e safe)
        r = acc_ref[...] + b_ref[...]
        if relu:
            r = jnp.maximum(r, 0.0)
        o_ref[...] = r.astype(o_ref.dtype)


def matmul_bias_act(x, w, b, relu=False):
    """x: (M, K); w: (K, N); b: (N,) or (1, N)  ->  (M, N) f32.

    No pad/slice of x or the output: M uses cdiv grids with masked edge blocks,
    K/N use full-extent blocks when small.  K is zero-padded + tiled only when
    large (correctness: OOB in the contraction dim must not be read).
    """
    M, K = x.shape
    Kw, N = w.shape
    assert K == Kw, (K, Kw)
    b2 = b.reshape(1, N).astype(jnp.float32)

    tm = M if M <= 512 else 512
    tn = N if N <= 512 else 512
    if K <= 1024:
        tk = K
    else:
        tk = 512
        Kp = _round_up(K, tk)
        if Kp != K:
            x = jnp.pad(x, ((0, 0), (0, Kp - K)))
            w = jnp.pad(w, ((0, Kp - K), (0, 0)))
        K = Kp
    nm, nn, nk = pl.cdiv(M, tm), pl.cdiv(N, tn), pl.cdiv(K, tk)

    cost = pl.CostEstimate(
        flops=2 * M * N * K,
        transcendentals=0,
        bytes_accessed=int(x.size * x.dtype.itemsize + w.size * w.dtype.itemsize
                           + b2.size * 4 + M * N * 4))

    return pl.pallas_call(
        functools.partial(_matmul_bias_act_kernel, relu=relu),
        out_shape=jax.ShapeDtypeStruct((M, N), jnp.float32),
        grid=(nm, nn, nk),
        in_specs=[
            pl.BlockSpec((tm, tk), lambda i, j, k: (i, k)),
            pl.BlockSpec((tk, tn), lambda i, j, k: (k, j)),
            pl.BlockSpec((1, tn), lambda i, j, k: (0, j)),
        ],
        out_specs=pl.BlockSpec((tm, tn), lambda i, j, k: (i, j)),
        scratch_shapes=[pltpu.VMEM((tm, tn), jnp.float32)],
        compiler_params=pltpu.CompilerParams(
            dimension_semantics=("parallel", "parallel", "arbitrary"),
            vmem_limit_bytes=_VMEM_LIMIT),
        cost_estimate=cost,
    )(x, w, b2)


# ----------------------------------------------------------------------------
# Pallas kernel 2: lane-dense max-reduce over the leading axis.
# Used for every MaxPool2d window reduction (and the cross-view max fallback).
# ----------------------------------------------------------------------------
def _max_reduce_kernel(x_ref, o_ref):
    o_ref[...] = jnp.max(x_ref[...], axis=0)


def max_over_leading(x):
    """x: (K, ...) -> max over axis 0, shape x.shape[1:].  Lane-dense layout."""
    K = x.shape[0]
    tail_shape = x.shape[1:]
    L = int(np.prod(tail_shape))
    x2 = x.reshape(K, L)
    Lp = _round_up(L, 128)
    if Lp != L:                               # rare: only when L % 128 != 0
        x2 = jnp.pad(x2, ((0, 0), (0, Lp - L)))
    nrows = Lp // 128
    x3 = x2.reshape(K, nrows, 128)
    tr = nrows if nrows <= 512 else 512

    out = pl.pallas_call(
        _max_reduce_kernel,
        out_shape=jax.ShapeDtypeStruct((nrows, 128), x.dtype),
        grid=(pl.cdiv(nrows, tr),),
        in_specs=[pl.BlockSpec((K, tr, 128), lambda i: (0, i, 0))],
        out_specs=pl.BlockSpec((tr, 128), lambda i: (i, 0)),
        compiler_params=pltpu.CompilerParams(
            dimension_semantics=("parallel",),
            vmem_limit_bytes=_VMEM_LIMIT),
    )(x3)

    out = out.reshape(Lp)
    if Lp != L:
        out = out[:L]
    return out.reshape(tail_shape)


# ----------------------------------------------------------------------------
# Pallas kernel 3: fused head -> cross-view max + fc1(+ReLU) + fc2(+ReLU) + fc3
# Single launch for the latency-bound classifier tail.
# ----------------------------------------------------------------------------
def _head_kernel(y_ref, w1_ref, b1_ref, w2_ref, b2_ref, w3_ref, b3_ref, o_ref):
    pooled = jnp.max(y_ref[...], axis=0)                       # torch.max(y,1)[0]
    h = jnp.dot(pooled.astype(jnp.bfloat16), w1_ref[...].astype(jnp.bfloat16),
                preferred_element_type=jnp.float32) + b1_ref[...]
    h = jnp.maximum(h, 0.0)
    h = jnp.dot(h.astype(jnp.bfloat16), w2_ref[...].astype(jnp.bfloat16),
                preferred_element_type=jnp.float32) + b2_ref[...]
    h = jnp.maximum(h, 0.0)
    o = jnp.dot(h.astype(jnp.bfloat16), w3_ref[...].astype(jnp.bfloat16),
                preferred_element_type=jnp.float32) + b3_ref[...]
    o_ref[...] = o.astype(o_ref.dtype)


_HEAD_FUSE_BYTES = 8 * 1024 * 1024


def classifier_head(feats_views, p):
    """feats_views: (nviews, B, F) -> logits (B, nclasses)."""
    # TODO(synk): nn.Dropout layers are identity here (eval semantics).
    w1, b1 = p["fc1_w"], p["fc1_b"]
    w2, b2 = p["fc2_w"], p["fc2_b"]
    w3, b3 = p["fc3_w"], p["fc3_b"]
    _, B, _ = feats_views.shape
    wbytes = sum(int(np.prod(a.shape)) * a.dtype.itemsize for a in (w1, w2, w3))

    if wbytes <= _HEAD_FUSE_BYTES:
        nclasses = w3.shape[1]
        return pl.pallas_call(
            _head_kernel,
            out_shape=jax.ShapeDtypeStruct((B, nclasses), jnp.float32),
            compiler_params=pltpu.CompilerParams(vmem_limit_bytes=_VMEM_LIMIT),
        )(feats_views, w1, b1, w2, b2, w3, b3)

    # fallback for real-AlexNet-sized classifiers: tiled Pallas matmuls
    pooled = max_over_leading(feats_views)
    h = matmul_bias_act(pooled, w1, b1, relu=True)
    h = matmul_bias_act(h, w2, b2, relu=True)
    return matmul_bias_act(h, w3, b3, relu=False)


# ----------------------------------------------------------------------------
# conv / pool wrappers (patch extraction in XLA, compute in Pallas)
# ----------------------------------------------------------------------------
def conv2d_relu(x, w_mat, b, kh, kw, stride, pad, relu=True):
    """x: (N, H, W, Cin); w_mat: (Cin*kh*kw, Cout) in patch (Cin-major) order."""
    patches = jax.lax.conv_general_dilated_patches(
        x, filter_shape=(kh, kw), window_strides=(stride, stride),
        padding=((pad, pad), (pad, pad)),
        dimension_numbers=("NHWC", "HWIO", "NHWC"))
    Nn, Ho, Wo, K = patches.shape
    assert K == w_mat.shape[0], (K, w_mat.shape)
    y = matmul_bias_act(patches.reshape(Nn * Ho * Wo, K), w_mat, b, relu=relu)
    return y.reshape(Nn, Ho, Wo, w_mat.shape[1])


def maxpool2d(x, k, s):
    """x: (N, H, W, C) -> (N, Ho, Wo, C), kernel k, stride s."""
    N, H, W, C = x.shape
    Ho = (H - k) // s + 1
    Wo = (W - k) // s + 1
    cols = [x[:, di:di + s * (Ho - 1) + 1:s, dj:dj + s * (Wo - 1) + 1:s, :]
            for di in range(k) for dj in range(k)]
    win = jnp.stack(cols, axis=0)                  # (k*k, N, Ho, Wo, C)
    return max_over_leading(win)                   # lane-dense Pallas reduce


# ----------------------------------------------------------------------------
# camera geometry glue (Transform3d / look_at_rotation).  These feed only the
# untranslatable renderer, but are reproduced in plain JAX for fidelity.
# ----------------------------------------------------------------------------
PHI = (1.0 + np.sqrt(5.0)) / 2.0
DODECA_VERTICES = jnp.array(
    [[1, 1, 1], [1, 1, -1], [1, -1, 1], [1, -1, -1],
     [-1, 1, 1], [-1, 1, -1], [-1, -1, 1], [-1, -1, -1],
     [0, 1 / PHI, PHI], [0, 1 / PHI, -PHI], [0, -1 / PHI, PHI], [0, -1 / PHI, -PHI],
     [PHI, 0, 1 / PHI], [PHI, 0, -1 / PHI], [-PHI, 0, 1 / PHI], [-PHI, 0, -1 / PHI],
     [1 / PHI, PHI, 0], [-1 / PHI, PHI, 0], [1 / PHI, -PHI, 0], [-1 / PHI, -PHI, 0]],
    dtype=jnp.float32)

ANGLE_RANGE = 2.0 * np.pi
DISTANCE_RANGE = 3.0        # args.max_scale


def _rot_x(a):
    c, s = jnp.cos(a), jnp.sin(a)
    return jnp.array([[1, 0, 0], [0, c, -s], [0, s, c]], dtype=jnp.float32)


def _rot_y(a):
    c, s = jnp.cos(a), jnp.sin(a)
    return jnp.array([[c, 0, s], [0, 1, 0], [-s, 0, c]], dtype=jnp.float32)


def _rot_z(a):
    c, s = jnp.cos(a), jnp.sin(a)
    return jnp.array([[c, -s, 0], [s, c, 0], [0, 0, 1]], dtype=jnp.float32)


def transform_vertices(verts, cam):
    # TODO(synk): pytorch3d Transform3d uses a row-vector / transposed-rotation
    # convention; standard rotation matrices are used here (renderer is synthetic).
    v = verts * (cam[3] * DISTANCE_RANGE)
    v = v @ _rot_x(cam[0] * ANGLE_RANGE)
    v = v @ _rot_y(cam[1] * ANGLE_RANGE)
    v = v @ _rot_z(cam[2] * ANGLE_RANGE)
    return v


def _normalize(v, axis=-1, eps=1e-6):
    n = jnp.maximum(jnp.linalg.norm(v, axis=axis, keepdims=True), eps)
    return v / n


def look_at_rotation(cam_pos):
    up = jnp.broadcast_to(jnp.array([0.0, 1.0, 0.0], jnp.float32), cam_pos.shape)
    z = _normalize(-cam_pos)                      # at = origin
    x = _normalize(jnp.cross(up, z))
    y = _normalize(jnp.cross(z, x))
    return jnp.stack([x, y, z], axis=-1)          # (N, 3, 3)


# ----------------------------------------------------------------------------
# Scaled-down AlexNet (same structure as torchvision alexnet, reduced widths).
# Weights are synthetic, deterministic, pre-arranged once (Cin-major patch
# order) and pre-cast to bf16 so nothing is padded / re-laid-out per forward.
# ----------------------------------------------------------------------------
CFG = dict(C1=16, C2=32, C3=48, C4=32, C5=32, H1=64, H2=64)


def _conv_out(h, k, s, p):
    return (h + 2 * p - k) // s + 1


def feature_spatial(img):
    h = _conv_out(img, 11, 4, 2)
    h = _conv_out(h, 3, 2, 0)
    h = _conv_out(h, 5, 1, 2)
    h = _conv_out(h, 3, 2, 0)
    h = _conv_out(h, 3, 1, 1)
    h = _conv_out(h, 3, 1, 1)
    h = _conv_out(h, 3, 1, 1)
    h = _conv_out(h, 3, 2, 0)
    return h


def _conv_params(key, kh, kw, cin, cout):
    w = jax.random.normal(key, (kh, kw, cin, cout), jnp.float32) / np.sqrt(kh * kw * cin)
    # match conv_general_dilated_patches feature order: (Cin, kh, kw) flattened
    w_mat = jnp.transpose(w, (2, 0, 1, 3)).reshape(cin * kh * kw, cout).astype(jnp.bfloat16)
    return w_mat, jnp.zeros((1, cout), jnp.float32)


def _fc_params(key, fin, fout):
    w = (jax.random.normal(key, (fin, fout), jnp.float32) / np.sqrt(fin)).astype(jnp.bfloat16)
    return w, jnp.zeros((1, fout), jnp.float32)


def init_params(key, nclasses, flat_dim):
    ks = jax.random.split(key, 9)
    c = CFG
    p = {"camera_position": jax.random.uniform(ks[0], (4,), jnp.float32)}
    p["c1_w"], p["c1_b"] = _conv_params(ks[1], 11, 11, 3, c["C1"])
    p["c2_w"], p["c2_b"] = _conv_params(ks[2], 5, 5, c["C1"], c["C2"])
    p["c3_w"], p["c3_b"] = _conv_params(ks[3], 3, 3, c["C2"], c["C3"])
    p["c4_w"], p["c4_b"] = _conv_params(ks[4], 3, 3, c["C3"], c["C4"])
    p["c5_w"], p["c5_b"] = _conv_params(ks[5], 3, 3, c["C4"], c["C5"])
    p["fc1_w"], p["fc1_b"] = _fc_params(ks[6], flat_dim, c["H1"])
    p["fc2_w"], p["fc2_b"] = _fc_params(ks[7], c["H1"], c["H2"])
    p["fc3_w"], p["fc3_b"] = _fc_params(ks[8], c["H2"], nclasses)
    return p


def alexnet_features(x, p):
    x = conv2d_relu(x, p["c1_w"], p["c1_b"], 11, 11, stride=4, pad=2)
    x = maxpool2d(x, 3, 2)
    x = conv2d_relu(x, p["c2_w"], p["c2_b"], 5, 5, stride=1, pad=2)
    x = maxpool2d(x, 3, 2)
    x = conv2d_relu(x, p["c3_w"], p["c3_b"], 3, 3, stride=1, pad=1)
    x = conv2d_relu(x, p["c4_w"], p["c4_b"], 3, 3, stride=1, pad=1)
    x = conv2d_relu(x, p["c5_w"], p["c5_b"], 3, 3, stride=1, pad=1)
    x = maxpool2d(x, 3, 2)
    return x


def model_forward(images_nhwc, params, *, nviews):
    # --- camera branch (feeds only the renderer) -----------------------------
    verts = transform_vertices(DODECA_VERTICES, params["camera_position"])
    R = look_at_rotation(verts[:nviews])                                   # (nviews,3,3)
    T = -jnp.einsum("nji,nj->ni", R, verts[:nviews])                       # -bmm(R^T, v)
    del R, T
    # TODO(synk): pytorch3d MeshRenderer / Meshes / PointLights have no Pallas
    # equivalent; `images_nhwc` stands in for the rendered (nviews*B, H, W, 4) stack.

    # --- CNN branch -----------------------------------------------------------
    x = images_nhwc[..., :3]                                               # drop alpha
    feats = alexnet_features(x, params)                                    # (N*, h, w, C)
    Nstar, h, w, C = feats.shape
    B = Nstar // nviews
    # match torch flatten order: NCHW -> (B, nviews, C*h*w)
    feats_flat = jnp.transpose(feats, (0, 3, 1, 2)).reshape(B, nviews, C * h * w)
    feats_views = jnp.transpose(feats_flat, (1, 0, 2))                     # (nviews, B, F)
    return classifier_head(feats_views, params)                            # (B, nclasses)


# ----------------------------------------------------------------------------
if __name__ == "__main__":
    B = 2            # len(mesh)
    NVIEWS = 4       # args.nviews
    NCLASSES = 10
    IMG = 63         # small stand-in for the 224x224 renderer output

    hf = feature_spatial(IMG)
    flat_dim = CFG["C5"] * hf * hf

    key = jax.random.PRNGKey(0)
    kp, ki = jax.random.split(key)
    params = init_params(kp, NCLASSES, flat_dim)
    images = jax.random.uniform(ki, (NVIEWS * B, IMG, IMG, 4), jnp.float32)

    fwd = jax.jit(functools.partial(model_forward, nviews=NVIEWS))
    logits = fwd(images, params)
    jax.block_until_ready(logits)
    assert logits.shape == (B, NCLASSES)
    assert bool(jnp.all(jnp.isfinite(logits)))
    print("KERNEL_OK")
</pallas_src>

<mosaic_0001>
module attributes {stable_mosaic.version = 11 : i64} {
  func.func @_matmul_bias_act_kernel(%arg0: i32, %arg1: i32, %arg2: i32, %arg3: memref<512x363xf32, #tpu.memory_space<vmem>>, %arg4: memref<363x16xbf16, #tpu.memory_space<vmem>>, %arg5: memref<1x16xf32, #tpu.memory_space<vmem>>, %arg6: memref<512x16xf32, #tpu.memory_space<vmem>>, %arg7: memref<512x16xf32, #tpu.memory_space<vmem>>) attributes {dimension_semantics = [#tpu.dimension_semantics<parallel>, #tpu.dimension_semantics<parallel>, #tpu.dimension_semantics<arbitrary>], iteration_bounds = array<i64: 4, 1, 1>, scalar_prefetch = 0 : i64, scratch_operands = 1 : i64, tpu.core_type = #tpu.core_type<tc>, window_params = [{transform_indices = @transform_0, window_bounds = array<i64: 512, 363>}, {transform_indices = @transform_1, window_bounds = array<i64: 363, 16>}, {transform_indices = @transform_2, window_bounds = array<i64: 1, 16>}, {transform_indices = @transform_3, window_bounds = array<i64: 512, 16>}]} {
    %c0_i32 = arith.constant 0 : i32
    %0 = arith.cmpi eq, %arg2, %c0_i32 : i32
    %1 = arith.extui %0 : i1 to i32
    %c0_i32_0 = arith.constant 0 : i32
    %2 = arith.cmpi ne, %1, %c0_i32_0 : i32
    scf.if %2 {
      %cst_10 = arith.constant 0.000000e+00 : f32
      %13 = vector.broadcast %cst_10 : f32 to vector<512x16xf32>
      %c0_11 = arith.constant 0 : index
      %c0_12 = arith.constant 0 : index
      %14 = vector.load %arg7[%c0_11, %c0_12] : memref<512x16xf32, #tpu.memory_space<vmem>>, vector<512x16xf32>
      tpu.vector_store %arg7[%c0_11, %c0_12], %13 {strides = array<i32>} : memref<512x16xf32, #tpu.memory_space<vmem>>, vector<512x16xf32>,
    } else {
    }
    %c0 = arith.constant 0 : index
    %c0_1 = arith.constant 0 : index
    %3 = vector.load %arg7[%c0, %c0_1] : memref<512x16xf32, #tpu.memory_space<vmem>>, vector<512x16xf32>
    %c0_2 = arith.constant 0 : index
    %c0_3 = arith.constant 0 : index
    %4 = vector.load %arg3[%c0_2, %c0_3] : memref<512x363xf32, #tpu.memory_space<vmem>>, vector<512x363xf32>
    %5 = arith.truncf %4 : vector<512x363xf32> to vector<512x363xbf16>
    %c0_4 = arith.constant 0 : index
    %c0_5 = arith.constant 0 : index
    %6 = vector.load %arg4[%c0_4, %c0_5] : memref<363x16xbf16, #tpu.memory_space<vmem>>, vector<363x16xbf16>
    %cst = arith.constant dense<0.000000e+00> : vector<512x16xf32>
    %7 = tpu.matmul %5, %6, %cst {dimension_numbers = #tpu.dot_dimension_numbers<[1], [0], [0], [1], [0, 0, 1, 1], [], []>} : vector<512x363xbf16>, vector<363x16xbf16>, vector<512x16xf32> -> vector<512x16xf32>
    %8 = arith.addf %3, %7 : vector<512x16xf32>
    %c0_6 = arith.constant 0 : index
    %c0_7 = arith.constant 0 : index
    %9 = vector.load %arg7[%c0_6, %c0_7] : memref<512x16xf32, #tpu.memory_space<vmem>>, vector<512x16xf32>
    tpu.vector_store %arg7[%c0_6, %c0_7], %8 {strides = array<i32>} : memref<512x16xf32, #tpu.memory_space<vmem>>, vector<512x16xf32>,
    %c0_i32_8 = arith.constant 0 : i32
    %10 = arith.cmpi eq, %arg2, %c0_i32_8 : i32
    %11 = arith.extui %10 : i1 to i32
    %c0_i32_9 = arith.constant 0 : i32
    %12 = arith.cmpi ne, %11, %c0_i32_9 : i32
    scf.if %12 {
      %c0_10 = arith.constant 0 : index
      %c0_11 = arith.constant 0 : index
      %13 = vector.load %arg7[%c0_10, %c0_11] : memref<512x16xf32, #tpu.memory_space<vmem>>, vector<512x16xf32>
      %c0_12 = arith.constant 0 : index
      %c0_13 = arith.constant 0 : index
      %14 = vector.load %arg5[%c0_12, %c0_13] : memref<1x16xf32, #tpu.memory_space<vmem>>, vector<1x16xf32>
      %15 = vector.broadcast %14 : vector<1x16xf32> to vector<512x16xf32>
      %16 = arith.addf %13, %15 : vector<512x16xf32>
      %cst_14 = arith.constant 0.000000e+00 : f32
      %17 = vector.broadcast %cst_14 : f32 to vector<512x16xf32>
      %18 = arith.maximumf %16, %17 : vector<512x16xf32>
      %c0_15 = arith.constant 0 : index
      %c0_16 = arith.constant 0 : index
      %19 = vector.load %arg6[%c0_15, %c0_16] : memref<512x16xf32, #tpu.memory_space<vmem>>, vector<512x16xf32>
      tpu.vector_store %arg6[%c0_15, %c0_16], %18 {strides = array<i32>} : memref<512x16xf32, #tpu.memory_space<vmem>>, vector<512x16xf32>,
    } else {
    }
    return
  }
  func.func @transform_0(%arg0: i32, %arg1: i32, %arg2: i32) -> (i32, i32) {
    %c0_i32 = arith.constant 0 : i32
    return %arg0, %arg2 : i32, i32
  }
  func.func @transform_1(%arg0: i32, %arg1: i32, %arg2: i32) -> (i32, i32) {
    %c0_i32 = arith.constant 0 : i32
    return %arg2, %arg1 : i32, i32
  }
  func.func @transform_2(%arg0: i32, %arg1: i32, %arg2: i32) -> (i32, i32) {
    %c0_i32 = arith.constant 0 : i32
    %c0_i32_0 = arith.constant 0 : i32
    return %c0_i32, %arg1 : i32, i32
  }
  func.func @transform_3(%arg0: i32, %arg1: i32, %arg2: i32) -> (i32, i32) {
    %c0_i32 = arith.constant 0 : i32
    return %arg0, %arg1 : i32, i32
  }
}

module attributes {stable_mosaic.version = 11 : i64} {
  func.func @_max_reduce_kernel(%arg0: i32, %arg1: memref<9x49x128xf32, #tpu.memory_space<vmem>>, %arg2: memref<49x128xf32, #tpu.memory_space<vmem>>) attributes {dimension_semantics = [#tpu.dimension_semantics<parallel>], iteration_bounds = array<i64: 1>, scalar_prefetch = 0 : i64, scratch_operands = 0 : i64, tpu.core_type = #tpu.core_type<tc>, window_params = [{transform_indices = @transform_0, window_bounds = array<i64: 9, 49, 128>}, {transform_indices = @transform_1, window_bounds = array<i64: 49, 128>}]} {
    %c0 = arith.constant 0 : index
    %c0_0 = arith.constant 0 : index
    %c0_1 = arith.constant 0 : index
    %0 = vector.load %arg1[%c0, %c0_0, %c0_1] : memref<9x49x128xf32, #tpu.memory_space<vmem>>, vector<9x49x128xf32>
    %cst = arith.constant dense<0xFF800000> : vector<49x128xf32>
    %1 = vector.multi_reduction <maximumf>, %0, %cst [0] : vector<9x49x128xf32> to vector<49x128xf32>
    %c0_2 = arith.constant 0 : index
    %c0_3 = arith.constant 0 : index
    %2 = vector.load %arg2[%c0_2, %c0_3] : memref<49x128xf32, #tpu.memory_space<vmem>>, vector<49x128xf32>
    tpu.vector_store %arg2[%c0_2, %c0_3], %1 {strides = array<i32>} : memref<49x128xf32, #tpu.memory_space<vmem>>, vector<49x128xf32>,
    return
  }
  func.func @transform_0(%arg0: i32) -> (i32, i32, i32) {
    %c0_i32 = arith.constant 0 : i32
    %c0_i32_0 = arith.constant 0 : i32
    %c0_i32_1 = arith.constant 0 : i32
    return %c0_i32, %arg0, %c0_i32_0 : i32, i32, i32
  }
  func.func @transform_1(%arg0: i32) -> (i32, i32) {
    %c0_i32 = arith.constant 0 : i32
    %c0_i32_0 = arith.constant 0 : i32
    return %arg0, %c0_i32 : i32, i32
  }
}

module attributes {stable_mosaic.version = 11 : i64} {
  func.func @_matmul_bias_act_kernel(%arg0: i32, %arg1: i32, %arg2: i32, %arg3: memref<392x400xf32, #tpu.memory_space<vmem>>, %arg4: memref<400x32xbf16, #tpu.memory_space<vmem>>, %arg5: memref<1x32xf32, #tpu.memory_space<vmem>>, %arg6: memref<392x32xf32, #tpu.memory_space<vmem>>, %arg7: memref<392x32xf32, #tpu.memory_space<vmem>>) attributes {dimension_semantics = [#tpu.dimension_semantics<parallel>, #tpu.dimension_semantics<parallel>, #tpu.dimension_semantics<arbitrary>], iteration_bounds = array<i64: 1, 1, 1>, scalar_prefetch = 0 : i64, scratch_operands = 1 : i64, tpu.core_type = #tpu.core_type<tc>, window_params = [{transform_indices = @transform_0, window_bounds = array<i64: 392, 400>}, {transform_indices = @transform_1, window_bounds = array<i64: 400, 32>}, {transform_indices = @transform_2, window_bounds = array<i64: 1, 32>}, {transform_indices = @transform_3, window_bounds = array<i64: 392, 32>}]} {
    %c0_i32 = arith.constant 0 : i32
    %0 = arith.cmpi eq, %arg2, %c0_i32 : i32
    %1 = arith.extui %0 : i1 to i32
    %c0_i32_0 = arith.constant 0 : i32
    %2 = arith.cmpi ne, %1, %c0_i32_0 : i32
    scf.if %2 {
      %cst_10 = arith.constant 0.000000e+00 : f32
      %13 = vector.broadcast %cst_10 : f32 to vector<392x32xf32>
      %c0_11 = arith.constant 0 : index
      %c0_12 = arith.constant 0 : index
      %14 = vector.load %arg7[%c0_11, %c0_12] : memref<392x32xf32, #tpu.memory_space<vmem>>, vector<392x32xf32>
      tpu.vector_store %arg7[%c0_11, %c0_12], %13 {strides = array<i32>} : memref<392x32xf32, #tpu.memory_space<vmem>>, vector<392x32xf32>,
    } else {
    }
    %c0 = arith.constant 0 : index
    %c0_1 = arith.constant 0 : index
    %3 = vector.load %arg7[%c0, %c0_1] : memref<392x32xf32, #tpu.memory_space<vmem>>, vector<392x32xf32>
    %c0_2 = arith.constant 0 : index
    %c0_3 = arith.constant 0 : index
    %4 = vector.load %arg3[%c0_2, %c0_3] : memref<392x400xf32, #tpu.memory_space<vmem>>, vector<392x400xf32>
    %5 = arith.truncf %4 : vector<392x400xf32> to vector<392x400xbf16>
    %c0_4 = arith.constant 0 : index
    %c0_5 = arith.constant 0 : index
    %6 = vector.load %arg4[%c0_4, %c0_5] : memref<400x32xbf16, #tpu.memory_space<vmem>>, vector<400x32xbf16>
    %cst = arith.constant dense<0.000000e+00> : vector<392x32xf32>
    %7 = tpu.matmul %5, %6, %cst {dimension_numbers = #tpu.dot_dimension_numbers<[1], [0], [0], [1], [0, 0, 1, 1], [], []>} : vector<392x400xbf16>, vector<400x32xbf16>, vector<392x32xf32> -> vector<392x32xf32>
    %8 = arith.addf %3, %7 : vector<392x32xf32>
    %c0_6 = arith.constant 0 : index
    %c0_7 = arith.constant 0 : index
    %9 = vector.load %arg7[%c0_6, %c0_7] : memref<392x32xf32, #tpu.memory_space<vmem>>, vector<392x32xf32>
    tpu.vector_store %arg7[%c0_6, %c0_7], %8 {strides = array<i32>} : memref<392x32xf32, #tpu.memory_space<vmem>>, vector<392x32xf32>,
    %c0_i32_8 = arith.constant 0 : i32
    %10 = arith.cmpi eq, %arg2, %c0_i32_8 : i32
    %11 = arith.extui %10 : i1 to i32
    %c0_i32_9 = arith.constant 0 : i32
    %12 = arith.cmpi ne, %11, %c0_i32_9 : i32
    scf.if %12 {
      %c0_10 = arith.constant 0 : index
      %c0_11 = arith.constant 0 : index
      %13 = vector.load %arg7[%c0_10, %c0_11] : memref<392x32xf32, #tpu.memory_space<vmem>>, vector<392x32xf32>
      %c0_12 = arith.constant 0 : index
      %c0_13 = arith.constant 0 : index
      %14 = vector.load %arg5[%c0_12, %c0_13] : memref<1x32xf32, #tpu.memory_space<vmem>>, vector<1x32xf32>
      %15 = vector.broadcast %14 : vector<1x32xf32> to vector<392x32xf32>
      %16 = arith.addf %13, %15 : vector<392x32xf32>
      %cst_14 = arith.constant 0.000000e+00 : f32
      %17 = vector.broadcast %cst_14 : f32 to vector<392x32xf32>
      %18 = arith.maximumf %16, %17 : vector<392x32xf32>
      %c0_15 = arith.constant 0 : index
      %c0_16 = arith.constant 0 : index
      %19 = vector.load %arg6[%c0_15, %c0_16] : memref<392x32xf32, #tpu.memory_space<vmem>>, vector<392x32xf32>
      tpu.vector_store %arg6[%c0_15, %c0_16], %18 {strides = array<i32>} : memref<392x32xf32, #tpu.memory_space<vmem>>, vector<392x32xf32>,
    } else {
    }
    return
  }
  func.func @transform_0(%arg0: i32, %arg1: i32, %arg2: i32) -> (i32, i32) {
    %c0_i32 = arith.constant 0 : i32
    return %arg0, %arg2 : i32, i32
  }
  func.func @transform_1(%arg0: i32, %arg1: i32, %arg2: i32) -> (i32, i32) {
    %c0_i32 = arith.constant 0 : i32
    return %arg2, %arg1 : i32, i32
  }
  func.func @transform_2(%arg0: i32, %arg1: i32, %arg2: i32) -> (i32, i32) {
    %c0_i32 = arith.constant 0 : i32
    %c0_i32_0 = arith.constant 0 : i32
    return %c0_i32, %arg1 : i32, i32
  }
  func.func @transform_3(%arg0: i32, %arg1: i32, %arg2: i32) -> (i32, i32) {
    %c0_i32 = arith.constant 0 : i32
    return %arg0, %arg1 : i32, i32
  }
}

module attributes {stable_mosaic.version = 11 : i64} {
  func.func @_max_reduce_kernel(%arg0: i32, %arg1: memref<9x18x128xf32, #tpu.memory_space<vmem>>, %arg2: memref<18x128xf32, #tpu.memory_space<vmem>>) attributes {dimension_semantics = [#tpu.dimension_semantics<parallel>], iteration_bounds = array<i64: 1>, scalar_prefetch = 0 : i64, scratch_operands = 0 : i64, tpu.core_type = #tpu.core_type<tc>, window_params = [{transform_indices = @transform_0, window_bounds = array<i64: 9, 18, 128>}, {transform_indices = @transform_1, window_bounds = array<i64: 18, 128>}]} {
    %c0 = arith.constant 0 : index
    %c0_0 = arith.constant 0 : index
    %c0_1 = arith.constant 0 : index
    %0 = vector.load %arg1[%c0, %c0_0, %c0_1] : memref<9x18x128xf32, #tpu.memory_space<vmem>>, vector<9x18x128xf32>
    %cst = arith.constant dense<0xFF800000> : vector<18x128xf32>
    %1 = vector.multi_reduction <maximumf>, %0, %cst [0] : vector<9x18x128xf32> to vector<18x128xf32>
    %c0_2 = arith.constant 0 : index
    %c0_3 = arith.constant 0 : index
    %2 = vector.load %arg2[%c0_2, %c0_3] : memref<18x128xf32, #tpu.memory_space<vmem>>, vector<18x128xf32>
    tpu.vector_store %arg2[%c0_2, %c0_3], %1 {strides = array<i32>} : memref<18x128xf32, #tpu.memory_space<vmem>>, vector<18x128xf32>,
    return
  }
  func.func @transform_0(%arg0: i32) -> (i32, i32, i32) {
    %c0_i32 = arith.constant 0 : i32
    %c0_i32_0 = arith.constant 0 : i32
    %c0_i32_1 = arith.constant 0 : i32
    return %c0_i32, %arg0, %c0_i32_0 : i32, i32, i32
  }
  func.func @transform_1(%arg0: i32) -> (i32, i32) {
    %c0_i32 = arith.constant 0 : i32
    %c0_i32_0 = arith.constant 0 : i32
    return %arg0, %c0_i32 : i32, i32
  }
}

module attributes {stable_mosaic.version = 11 : i64} {
  func.func @_matmul_bias_act_kernel(%arg0: i32, %arg1: i32, %arg2: i32, %arg3: memref<72x288xf32, #tpu.memory_space<vmem>>, %arg4: memref<288x48xbf16, #tpu.memory_space<vmem>>, %arg5: memref<1x48xf32, #tpu.memory_space<vmem>>, %arg6: memref<72x48xf32, #tpu.memory_space<vmem>>, %arg7: memref<72x48xf32, #tpu.memory_space<vmem>>) attributes {dimension_semantics = [#tpu.dimension_semantics<parallel>, #tpu.dimension_semantics<parallel>, #tpu.dimension_semantics<arbitrary>], iteration_bounds = array<i64: 1, 1, 1>, scalar_prefetch = 0 : i64, scratch_operands = 1 : i64, tpu.core_type = #tpu.core_type<tc>, window_params = [{transform_indices = @transform_0, window_bounds = array<i64: 72, 288>}, {transform_indices = @transform_1, window_bounds = array<i64: 288, 48>}, {transform_indices = @transform_2, window_bounds = array<i64: 1, 48>}, {transform_indices = @transform_3, window_bounds = array<i64: 72, 48>}]} {
    %c0_i32 = arith.constant 0 : i32
    %0 = arith.cmpi eq, %arg2, %c0_i32 : i32
    %1 = arith.extui %0 : i1 to i32
    %c0_i32_0 = arith.constant 0 : i32
    %2 = arith.cmpi ne, %1, %c0_i32_0 : i32
    scf.if %2 {
      %cst_10 = arith.constant 0.000000e+00 : f32
      %13 = vector.broadcast %cst_10 : f32 to vector<72x48xf32>
      %c0_11 = arith.constant 0 : index
      %c0_12 = arith.constant 0 : index
      %14 = vector.load %arg7[%c0_11, %c0_12] : memref<72x48xf32, #tpu.memory_space<vmem>>, vector<72x48xf32>
      tpu.vector_store %arg7[%c0_11, %c0_12], %13 {strides = array<i32>} : memref<72x48xf32, #tpu.memory_space<vmem>>, vector<72x48xf32>,
    } else {
    }
    %c0 = arith.constant 0 : index
    %c0_1 = arith.constant 0 : index
    %3 = vector.load %arg7[%c0, %c0_1] : memref<72x48xf32, #tpu.memory_space<vmem>>, vector<72x48xf32>
    %c0_2 = arith.constant 0 : index
    %c0_3 = arith.constant 0 : index
    %4 = vector.load %arg3[%c0_2, %c0_3] : memref<72x288xf32, #tpu.memory_space<vmem>>, vector<72x288xf32>
    %5 = arith.truncf %4 : vector<72x288xf32> to vector<72x288xbf16>
    %c0_4 = arith.constant 0 : index
    %c0_5 = arith.constant 0 : index
    %6 = vector.load %arg4[%c0_4, %c0_5] : memref<288x48xbf16, #tpu.memory_space<vmem>>, vector<288x48xbf16>
    %cst = arith.constant dense<0.000000e+00> : vector<72x48xf32>
    %7 = tpu.matmul %5, %6, %cst {dimension_numbers = #tpu.dot_dimension_numbers<[1], [0], [0], [1], [0, 0, 1, 1], [], []>} : vector<72x288xbf16>, vector<288x48xbf16>, vector<72x48xf32> -> vector<72x48xf32>
    %8 = arith.addf %3, %7 : vector<72x48xf32>
    %c0_6 = arith.constant 0 : index
    %c0_7 = arith.constant 0 : index
    %9 = vector.load %arg7[%c0_6, %c0_7] : memref<72x48xf32, #tpu.memory_space<vmem>>, vector<72x48xf32>
    tpu.vector_store %arg7[%c0_6, %c0_7], %8 {strides = array<i32>} : memref<72x48xf32, #tpu.memory_space<vmem>>, vector<72x48xf32>,
    %c0_i32_8 = arith.constant 0 : i32
    %10 = arith.cmpi eq, %arg2, %c0_i32_8 : i32
    %11 = arith.extui %10 : i1 to i32
    %c0_i32_9 = arith.constant 0 : i32
    %12 = arith.cmpi ne, %11, %c0_i32_9 : i32
    scf.if %12 {
      %c0_10 = arith.constant 0 : index
      %c0_11 = arith.constant 0 : index
      %13 = vector.load %arg7[%c0_10, %c0_11] : memref<72x48xf32, #tpu.memory_space<vmem>>, vector<72x48xf32>
      %c0_12 = arith.constant 0 : index
      %c0_13 = arith.constant 0 : index
      %14 = vector.load %arg5[%c0_12, %c0_13] : memref<1x48xf32, #tpu.memory_space<vmem>>, vector<1x48xf32>
      %15 = vector.broadcast %14 : vector<1x48xf32> to vector<72x48xf32>
      %16 = arith.addf %13, %15 : vector<72x48xf32>
      %cst_14 = arith.constant 0.000000e+00 : f32
      %17 = vector.broadcast %cst_14 : f32 to vector<72x48xf32>
      %18 = arith.maximumf %16, %17 : vector<72x48xf32>
      %c0_15 = arith.constant 0 : index
      %c0_16 = arith.constant 0 : index
      %19 = vector.load %arg6[%c0_15, %c0_16] : memref<72x48xf32, #tpu.memory_space<vmem>>, vector<72x48xf32>
      tpu.vector_store %arg6[%c0_15, %c0_16], %18 {strides = array<i32>} : memref<72x48xf32, #tpu.memory_space<vmem>>, vector<72x48xf32>,
    } else {
    }
    return
  }
  func.func @transform_0(%arg0: i32, %arg1: i32, %arg2: i32) -> (i32, i32) {
    %c0_i32 = arith.constant 0 : i32
    return %arg0, %arg2 : i32, i32
  }
  func.func @transform_1(%arg0: i32, %arg1: i32, %arg2: i32) -> (i32, i32) {
    %c0_i32 = arith.constant 0 : i32
    return %arg2, %arg1 : i32, i32
  }
  func.func @transform_2(%arg0: i32, %arg1: i32, %arg2: i32) -> (i32, i32) {
    %c0_i32 = arith.constant 0 : i32
    %c0_i32_0 = arith.constant 0 : i32
    return %c0_i32, %arg1 : i32, i32
  }
  func.func @transform_3(%arg0: i32, %arg1: i32, %arg2: i32) -> (i32, i32) {
    %c0_i32 = arith.constant 0 : i32
    return %arg0, %arg1 : i32, i32
  }
}

module attributes {stable_mosaic.version = 11 : i64} {
  func.func @_matmul_bias_act_kernel(%arg0: i32, %arg1: i32, %arg2: i32, %arg3: memref<72x432xf32, #tpu.memory_space<vmem>>, %arg4: memref<432x32xbf16, #tpu.memory_space<vmem>>, %arg5: memref<1x32xf32, #tpu.memory_space<vmem>>, %arg6: memref<72x32xf32, #tpu.memory_space<vmem>>, %arg7: memref<72x32xf32, #tpu.memory_space<vmem>>) attributes {dimension_semantics = [#tpu.dimension_semantics<parallel>, #tpu.dimension_semantics<parallel>, #tpu.dimension_semantics<arbitrary>], iteration_bounds = array<i64: 1, 1, 1>, scalar_prefetch = 0 : i64, scratch_operands = 1 : i64, tpu.core_type = #tpu.core_type<tc>, window_params = [{transform_indices = @transform_0, window_bounds = array<i64: 72, 432>}, {transform_indices = @transform_1, window_bounds = array<i64: 432, 32>}, {transform_indices = @transform_2, window_bounds = array<i64: 1, 32>}, {transform_indices = @transform_3, window_bounds = array<i64: 72, 32>}]} {
    %c0_i32 = arith.constant 0 : i32
    %0 = arith.cmpi eq, %arg2, %c0_i32 : i32
    %1 = arith.extui %0 : i1 to i32
    %c0_i32_0 = arith.constant 0 : i32
    %2 = arith.cmpi ne, %1, %c0_i32_0 : i32
    scf.if %2 {
      %cst_10 = arith.constant 0.000000e+00 : f32
      %13 = vector.broadcast %cst_10 : f32 to vector<72x32xf32>
      %c0_11 = arith.constant 0 : index
      %c0_12 = arith.constant 0 : index
      %14 = vector.load %arg7[%c0_11, %c0_12] : memref<72x32xf32, #tpu.memory_space<vmem>>, vector<72x32xf32>
      tpu.vector_store %arg7[%c0_11, %c0_12], %13 {strides = array<i32>} : memref<72x32xf32, #tpu.memory_space<vmem>>, vector<72x32xf32>,
    } else {
    }
    %c0 = arith.constant 0 : index
    %c0_1 = arith.constant 0 : index
    %3 = vector.load %arg7[%c0, %c0_1] : memref<72x32xf32, #tpu.memory_space<vmem>>, vector<72x32xf32>
    %c0_2 = arith.constant 0 : index
    %c0_3 = arith.constant 0 : index
    %4 = vector.load %arg3[%c0_2, %c0_3] : memref<72x432xf32, #tpu.memory_space<vmem>>, vector<72x432xf32>
    %5 = arith.truncf %4 : vector<72x432xf32> to vector<72x432xbf16>
    %c0_4 = arith.constant 0 : index
    %c0_5 = arith.constant 0 : index
    %6 = vector.load %arg4[%c0_4, %c0_5] : memref<432x32xbf16, #tpu.memory_space<vmem>>, vector<432x32xbf16>
    %cst = arith.constant dense<0.000000e+00> : vector<72x32xf32>
    %7 = tpu.matmul %5, %6, %cst {dimension_numbers = #tpu.dot_dimension_numbers<[1], [0], [0], [1], [0, 0, 1, 1], [], []>} : vector<72x432xbf16>, vector<432x32xbf16>, vector<72x32xf32> -> vector<72x32xf32>
    %8 = arith.addf %3, %7 : vector<72x32xf32>
    %c0_6 = arith.constant 0 : index
    %c0_7 = arith.constant 0 : index
    %9 = vector.load %arg7[%c0_6, %c0_7] : memref<72x32xf32, #tpu.memory_space<vmem>>, vector<72x32xf32>
    tpu.vector_store %arg7[%c0_6, %c0_7], %8 {strides = array<i32>} : memref<72x32xf32, #tpu.memory_space<vmem>>, vector<72x32xf32>,
    %c0_i32_8 = arith.constant 0 : i32
    %10 = arith.cmpi eq, %arg2, %c0_i32_8 : i32
    %11 = arith.extui %10 : i1 to i32
    %c0_i32_9 = arith.constant 0 : i32
    %12 = arith.cmpi ne, %11, %c0_i32_9 : i32
    scf.if %12 {
      %c0_10 = arith.constant 0 : index
      %c0_11 = arith.constant 0 : index
      %13 = vector.load %arg7[%c0_10, %c0_11] : memref<72x32xf32, #tpu.memory_space<vmem>>, vector<72x32xf32>
      %c0_12 = arith.constant 0 : index
      %c0_13 = arith.constant 0 : index
      %14 = vector.load %arg5[%c0_12, %c0_13] : memref<1x32xf32, #tpu.memory_space<vmem>>, vector<1x32xf32>
      %15 = vector.broadcast %14 : vector<1x32xf32> to vector<72x32xf32>
      %16 = arith.addf %13, %15 : vector<72x32xf32>
      %cst_14 = arith.constant 0.000000e+00 : f32
      %17 = vector.broadcast %cst_14 : f32 to vector<72x32xf32>
      %18 = arith.maximumf %16, %17 : vector<72x32xf32>
      %c0_15 = arith.constant 0 : index
      %c0_16 = arith.constant 0 : index
      %19 = vector.load %arg6[%c0_15, %c0_16] : memref<72x32xf32, #tpu.memory_space<vmem>>, vector<72x32xf32>
      tpu.vector_store %arg6[%c0_15, %c0_16], %18 {strides = array<i32>} : memref<72x32xf32, #tpu.memory_space<vmem>>, vector<72x32xf32>,
    } else {
    }
    return
  }
  func.func @transform_0(%arg0: i32, %arg1: i32, %arg2: i32) -> (i32, i32) {
    %c0_i32 = arith.constant 0 : i32
    return %arg0, %arg2 : i32, i32
  }
  func.func @transform_1(%arg0: i32, %arg1: i32, %arg2: i32) -> (i32, i32) {
    %c0_i32 = arith.constant 0 : i32
    return %arg2, %arg1 : i32, i32
  }
  func.func @transform_2(%arg0: i32, %arg1: i32, %arg2: i32) -> (i32, i32) {
    %c0_i32 = arith.constant 0 : i32
    %c0_i32_0 = arith.constant 0 : i32
    return %c0_i32, %arg1 : i32, i32
  }
  func.func @transform_3(%arg0: i32, %arg1: i32, %arg2: i32) -> (i32, i32) {
    %c0_i32 = arith.constant 0 : i32
    return %arg0, %arg1 : i32, i32
  }
}

module attributes {stable_mosaic.version = 11 : i64} {
  func.func @_matmul_bias_act_kernel(%arg0: i32, %arg1: i32, %arg2: i32, %arg3: memref<72x288xf32, #tpu.memory_space<vmem>>, %arg4: memref<288x32xbf16, #tpu.memory_space<vmem>>, %arg5: memref<1x32xf32, #tpu.memory_space<vmem>>, %arg6: memref<72x32xf32, #tpu.memory_space<vmem>>, %arg7: memref<72x32xf32, #tpu.memory_space<vmem>>) attributes {dimension_semantics = [#tpu.dimension_semantics<parallel>, #tpu.dimension_semantics<parallel>, #tpu.dimension_semantics<arbitrary>], iteration_bounds = array<i64: 1, 1, 1>, scalar_prefetch = 0 : i64, scratch_operands = 1 : i64, tpu.core_type = #tpu.core_type<tc>, window_params = [{transform_indices = @transform_0, window_bounds = array<i64: 72, 288>}, {transform_indices = @transform_1, window_bounds = array<i64: 288, 32>}, {transform_indices = @transform_2, window_bounds = array<i64: 1, 32>}, {transform_indices = @transform_3, window_bounds = array<i64: 72, 32>}]} {
    %c0_i32 = arith.constant 0 : i32
    %0 = arith.cmpi eq, %arg2, %c0_i32 : i32
    %1 = arith.extui %0 : i1 to i32
    %c0_i32_0 = arith.constant 0 : i32
    %2 = arith.cmpi ne, %1, %c0_i32_0 : i32
    scf.if %2 {
      %cst_10 = arith.constant 0.000000e+00 : f32
      %13 = vector.broadcast %cst_10 : f32 to vector<72x32xf32>
      %c0_11 = arith.constant 0 : index
      %c0_12 = arith.constant 0 : index
      %14 = vector.load %arg7[%c0_11, %c0_12] : memref<72x32xf32, #tpu.memory_space<vmem>>, vector<72x32xf32>
      tpu.vector_store %arg7[%c0_11, %c0_12], %13 {strides = array<i32>} : memref<72x32xf32, #tpu.memory_space<vmem>>, vector<72x32xf32>,
    } else {
    }
    %c0 = arith.constant 0 : index
    %c0_1 = arith.constant 0 : index
    %3 = vector.load %arg7[%c0, %c0_1] : memref<72x32xf32, #tpu.memory_space<vmem>>, vector<72x32xf32>
    %c0_2 = arith.constant 0 : index
    %c0_3 = arith.constant 0 : index
    %4 = vector.load %arg3[%c0_2, %c0_3] : memref<72x288xf32, #tpu.memory_space<vmem>>, vector<72x288xf32>
    %5 = arith.truncf %4 : vector<72x288xf32> to vector<72x288xbf16>
    %c0_4 = arith.constant 0 : index
    %c0_5 = arith.constant 0 : index
    %6 = vector.load %arg4[%c0_4, %c0_5] : memref<288x32xbf16, #tpu.memory_space<vmem>>, vector<288x32xbf16>
    %cst = arith.constant dense<0.000000e+00> : vector<72x32xf32>
    %7 = tpu.matmul %5, %6, %cst {dimension_numbers = #tpu.dot_dimension_numbers<[1], [0], [0], [1], [0, 0, 1, 1], [], []>} : vector<72x288xbf16>, vector<288x32xbf16>, vector<72x32xf32> -> vector<72x32xf32>
    %8 = arith.addf %3, %7 : vector<72x32xf32>
    %c0_6 = arith.constant 0 : index
    %c0_7 = arith.constant 0 : index
    %9 = vector.load %arg7[%c0_6, %c0_7] : memref<72x32xf32, #tpu.memory_space<vmem>>, vector<72x32xf32>
    tpu.vector_store %arg7[%c0_6, %c0_7], %8 {strides = array<i32>} : memref<72x32xf32, #tpu.memory_space<vmem>>, vector<72x32xf32>,
    %c0_i32_8 = arith.constant 0 : i32
    %10 = arith.cmpi eq, %arg2, %c0_i32_8 : i32
    %11 = arith.extui %10 : i1 to i32
    %c0_i32_9 = arith.constant 0 : i32
    %12 = arith.cmpi ne, %11, %c0_i32_9 : i32
    scf.if %12 {
      %c0_10 = arith.constant 0 : index
      %c0_11 = arith.constant 0 : index
      %13 = vector.load %arg7[%c0_10, %c0_11] : memref<72x32xf32, #tpu.memory_space<vmem>>, vector<72x32xf32>
      %c0_12 = arith.constant 0 : index
      %c0_13 = arith.constant 0 : index
      %14 = vector.load %arg5[%c0_12, %c0_13] : memref<1x32xf32, #tpu.memory_space<vmem>>, vector<1x32xf32>
      %15 = vector.broadcast %14 : vector<1x32xf32> to vector<72x32xf32>
      %16 = arith.addf %13, %15 : vector<72x32xf32>
      %cst_14 = arith.constant 0.000000e+00 : f32
      %17 = vector.broadcast %cst_14 : f32 to vector<72x32xf32>
      %18 = arith.maximumf %16, %17 : vector<72x32xf32>
      %c0_15 = arith.constant 0 : index
      %c0_16 = arith.constant 0 : index
      %19 = vector.load %arg6[%c0_15, %c0_16] : memref<72x32xf32, #tpu.memory_space<vmem>>, vector<72x32xf32>
      tpu.vector_store %arg6[%c0_15, %c0_16], %18 {strides = array<i32>} : memref<72x32xf32, #tpu.memory_space<vmem>>, vector<72x32xf32>,
    } else {
    }
    return
  }
  func.func @transform_0(%arg0: i32, %arg1: i32, %arg2: i32) -> (i32, i32) {
    %c0_i32 = arith.constant 0 : i32
    return %arg0, %arg2 : i32, i32
  }
  func.func @transform_1(%arg0: i32, %arg1: i32, %arg2: i32) -> (i32, i32) {
    %c0_i32 = arith.constant 0 : i32
    return %arg2, %arg1 : i32, i32
  }
  func.func @transform_2(%arg0: i32, %arg1: i32, %arg2: i32) -> (i32, i32) {
    %c0_i32 = arith.constant 0 : i32
    %c0_i32_0 = arith.constant 0 : i32
    return %c0_i32, %arg1 : i32, i32
  }
  func.func @transform_3(%arg0: i32, %arg1: i32, %arg2: i32) -> (i32, i32) {
    %c0_i32 = arith.constant 0 : i32
    return %arg0, %arg1 : i32, i32
  }
}

module attributes {stable_mosaic.version = 11 : i64} {
  func.func @_max_reduce_kernel(%arg0: i32, %arg1: memref<9x2x128xf32, #tpu.memory_space<vmem>>, %arg2: memref<2x128xf32, #tpu.memory_space<vmem>>) attributes {dimension_semantics = [#tpu.dimension_semantics<parallel>], iteration_bounds = array<i64: 1>, scalar_prefetch = 0 : i64, scratch_operands = 0 : i64, tpu.core_type = #tpu.core_type<tc>, window_params = [{transform_indices = @transform_0, window_bounds = array<i64: 9, 2, 128>}, {transform_indices = @transform_1, window_bounds = array<i64: 2, 128>}]} {
    %c0 = arith.constant 0 : index
    %c0_0 = arith.constant 0 : index
    %c0_1 = arith.constant 0 : index
    %0 = vector.load %arg1[%c0, %c0_0, %c0_1] : memref<9x2x128xf32, #tpu.memory_space<vmem>>, vector<9x2x128xf32>
    %cst = arith.constant dense<0xFF800000> : vector<2x128xf32>
    %1 = vector.multi_reduction <maximumf>, %0, %cst [0] : vector<9x2x128xf32> to vector<2x128xf32>
    %c0_2 = arith.constant 0 : index
    %c0_3 = arith.constant 0 : index
    %2 = vector.load %arg2[%c0_2, %c0_3] : memref<2x128xf32, #tpu.memory_space<vmem>>, vector<2x128xf32>
    tpu.vector_store %arg2[%c0_2, %c0_3], %1 {strides = array<i32>} : memref<2x128xf32, #tpu.memory_space<vmem>>, vector<2x128xf32>,
    return
  }
  func.func @transform_0(%arg0: i32) -> (i32, i32, i32) {
    %c0_i32 = arith.constant 0 : i32
    %c0_i32_0 = arith.constant 0 : i32
    %c0_i32_1 = arith.constant 0 : i32
    return %c0_i32, %arg0, %c0_i32_0 : i32, i32, i32
  }
  func.func @transform_1(%arg0: i32) -> (i32, i32) {
    %c0_i32 = arith.constant 0 : i32
    %c0_i32_0 = arith.constant 0 : i32
    return %arg0, %c0_i32 : i32, i32
  }
}

module attributes {stable_mosaic.version = 11 : i64} {
  func.func @_head_kernel(%arg0: memref<4x2x32xf32, #tpu.memory_space<vmem>>, %arg1: memref<32x64xbf16, #tpu.memory_space<vmem>>, %arg2: memref<1x64xf32, #tpu.memory_space<vmem>>, %arg3: memref<64x64xbf16, #tpu.memory_space<vmem>>, %arg4: memref<1x64xf32, #tpu.memory_space<vmem>>, %arg5: memref<64x10xbf16, #tpu.memory_space<vmem>>, %arg6: memref<1x10xf32, #tpu.memory_space<vmem>>, %arg7: memref<2x10xf32, #tpu.memory_space<vmem>>) attributes {dimension_semantics = [], scalar_prefetch = 0 : i64, scratch_operands = 0 : i64, tpu.core_type = #tpu.core_type<tc>} {
    %c0 = arith.constant 0 : index
    %c0_0 = arith.constant 0 : index
    %c0_1 = arith.constant 0 : index
    %0 = vector.load %arg0[%c0, %c0_0, %c0_1] : memref<4x2x32xf32, #tpu.memory_space<vmem>>, vector<4x2x32xf32>
    %cst = arith.constant dense<0xFF800000> : vector<2x32xf32>
    %1 = vector.multi_reduction <maximumf>, %0, %cst [0] : vector<4x2x32xf32> to vector<2x32xf32>
    %2 = arith.truncf %1 : vector<2x32xf32> to vector<2x32xbf16>
    %c0_2 = arith.constant 0 : index
    %c0_3 = arith.constant 0 : index
    %3 = vector.load %arg1[%c0_2, %c0_3] : memref<32x64xbf16, #tpu.memory_space<vmem>>, vector<32x64xbf16>
    %cst_4 = arith.constant dense<0.000000e+00> : vector<2x64xf32>
    %4 = tpu.matmul %2, %3, %cst_4 {dimension_numbers = #tpu.dot_dimension_numbers<[1], [0], [0], [1], [0, 0, 1, 1], [], []>} : vector<2x32xbf16>, vector<32x64xbf16>, vector<2x64xf32> -> vector<2x64xf32>
    %c0_5 = arith.constant 0 : index
    %c0_6 = arith.constant 0 : index
    %5 = vector.load %arg2[%c0_5, %c0_6] : memref<1x64xf32, #tpu.memory_space<vmem>>, vector<1x64xf32>
    %6 = vector.broadcast %5 : vector<1x64xf32> to vector<2x64xf32>
    %7 = arith.addf %4, %6 : vector<2x64xf32>
    %cst_7 = arith.constant 0.000000e+00 : f32
    %8 = vector.broadcast %cst_7 : f32 to vector<2x64xf32>
    %9 = arith.maximumf %7, %8 : vector<2x64xf32>
    %10 = arith.truncf %9 : vector<2x64xf32> to vector<2x64xbf16>
    %c0_8 = arith.constant 0 : index
    %c0_9 = arith.constant 0 : index
    %11 = vector.load %arg3[%c0_8, %c0_9] : memref<64x64xbf16, #tpu.memory_space<vmem>>, vector<64x64xbf16>
    %cst_10 = arith.constant dense<0.000000e+00> : vector<2x64xf32>
    %12 = tpu.matmul %10, %11, %cst_10 {dimension_numbers = #tpu.dot_dimension_numbers<[1], [0], [0], [1], [0, 0, 1, 1], [], []>} : vector<2x64xbf16>, vector<64x64xbf16>, vector<2x64xf32> -> vector<2x64xf32>
    %c0_11 = arith.constant 0 : index
    %c0_12 = arith.constant 0 : index
    %13 = vector.load %arg4[%c0_11, %c0_12] : memref<1x64xf32, #tpu.memory_space<vmem>>, vector<1x64xf32>
    %14 = vector.broadcast %13 : vector<1x64xf32> to vector<2x64xf32>
    %15 = arith.addf %12, %14 : vector<2x64xf32>
    %cst_13 = arith.constant 0.000000e+00 : f32
    %16 = vector.broadcast %cst_13 : f32 to vector<2x64xf32>
    %17 = arith.maximumf %15, %16 : vector<2x64xf32>
    %18 = arith.truncf %17 : vector<2x64xf32> to vector<2x64xbf16>
    %c0_14 = arith.constant 0 : index
    %c0_15 = arith.constant 0 : index
    %19 = vector.load %arg5[%c0_14, %c0_15] : memref<64x10xbf16, #tpu.memory_space<vmem>>, vector<64x10xbf16>
    %cst_16 = arith.constant dense<0.000000e+00> : vector<2x10xf32>
    %20 = tpu.matmul %18, %19, %cst_16 {dimension_numbers = #tpu.dot_dimension_numbers<[1], [0], [0], [1], [0, 0, 1, 1], [], []>} : vector<2x64xbf16>, vector<64x10xbf16>, vector<2x10xf32> -> vector<2x10xf32>
    %c0_17 = arith.constant 0 : index
    %c0_18 = arith.constant 0 : index
    %21 = vector.load %arg6[%c0_17, %c0_18] : memref<1x10xf32, #tpu.memory_space<vmem>>, vector<1x10xf32>
    %22 = vector.broadcast %21 : vector<1x10xf32> to vector<2x10xf32>
    %23 = arith.addf %20, %22 : vector<2x10xf32>
    %c0_19 = arith.constant 0 : index
    %c0_20 = arith.constant 0 : index
    %24 = vector.load %arg7[%c0_19, %c0_20] : memref<2x10xf32, #tpu.memory_space<vmem>>, vector<2x10xf32>
    tpu.vector_store %arg7[%c0_19, %c0_20], %23 {strides = array<i32>} : memref<2x10xf32, #tpu.memory_space<vmem>>, vector<2x10xf32>,
    return
  }
}

</mosaic_0001>

<bundles_post_ra>
// kernel: model_forward.9
= control target key start
LH: loop header
LB: loop body
LE: loop exit
PB: predicated region body
PF: predicated region fallthrough
CT: control target
= control target key end

     0   :  { %s2717_s12 = smov 0   ;;  %s2719_s13 = smov 0   ;;  %s3750_s0 = inlined_call_operand.vmem [shape: f32[1800,363], index: 0, kind: input, shape index: {}]   ;;  %s3751_s1 = inlined_call_operand.vmem [shape: bf16[363,16], index: 1, kind: input, shape index: {}]   ;;  %s3752_s2 = inlined_call_operand.vmem [shape: f32[1,16], index: 2, kind: input, shape index: {}]   ;;  %s3753_s3 = inlined_call_operand.vmem [shape: f32[1800,16], index: 3, kind: output, shape index: {}]  }
   0x1   :  { %s2721_s14 = smov 0   ;;  %s2723_s15 = smov 0  }
   0x2   :  { %s2725_s16 = smov 0  }
   0x3 LB: > { %s2282_s17 = sadd.s32 4294967295, %s2661_s16   ;;  %s32_s18 = sadd.s32 1, %s2657_s15  ;;  %s2661_s16 = sphi %s2725_s16, %s13_s16   ;;  %s2657_s15 = sphi %s2723_s15, %s3763_s15   ;;  %s2653_s14 = sphi %s2721_s14, %s3762_s14   ;;  %s2649_s13 = sphi %s2719_s13, %s3761_s13   ;;  %s2645_s12 = sphi %s2717_s12, %s3760_s12  }
   0x4   : > { %p34_p0 = scmp.ge.s32.totalorder %s32_s18, 4  ;;  %s123_s19 = sadd.s32 1, %s2649_s13 }
   0x5   : > { %p133_p1 = scmp.ne.s32.totalorder %s2649_s13, %s2645_s12  ;;  %p134_p2 = scmp.eq.s32.totalorder %s2282_s17, 3 }
   0x6   : > { %s3765_s18 = smov (%p34_p0, %s32_s18), 0  ;;  %p2288_p4 = scmp.ge.s32.totalorder %s2661_s16, 1 }
   0x7   : > { %p2749_p3 = por %p134_p2, %p133_p1  ;;  %s118_s21 = ssub.s32 %s2657_s15, %s3765_s18 }
   0x8   : > { %p201_p5 = scmp.lt.s32.totalorder %s2661_s16, 5  ;;  %p121_p6 = scmp.eq.s32.totalorder %s118_s21, 0 }
   0xa   : > { %p202_p7 = pnand %p2288_p4, %p201_p5 }
   0xb   : > { %s2758_s22 = scalar_select %p121_p6, %s2649_s13, %s123_s19  }
   0xc   : > { %205 = sbr.rel (%p202_p7) target bundleno = 655 (0x28f), region = 32  ;;  %s2801_s21 = sshll.u32 (!%p202_p7), %s2653_s14, 6 }
   0xd   : > { %p252_p8 = scmp.lt.s32.totalorder (!%p202_p7), %s2801_s21, 224 }
  0x11   : > { %v2440_v0 = vld [vmem:[%s3751_s1 + $0x38] sm:$0xff]  ;;  %v2382_v2 = vld [vmem:[%s3751_s1 + $0xb0] sm:$0xf]  ;;  %vm986_vm0 = vcmask 1044480   ;;  %vm987_vm1 = vcmask 1045504   ;;  %v2695_v5 = vmov 65535  }
  0x12   : > { %v2766_v1 = vld [vmem:[%s3751_s1 + $0x78] sm:$0xff]  ;;  %v2455_v3 = vld [vmem:[%s3751_s1 + $0xb0] sm:$0x30]  ;;  %2459 = vmatpush.bf16.msra.mxu3 %v2440_v0  ;;  %993 = vmatpush.bf16.msra.mxu0 %v2440_v0  ;;  %v988_v6 = vsel %vm986_vm0, 4294967295, %v2695_v5  ;;  %v2789_v11 = vld [vmem:[%s3751_s1 + $0xa8] sm:$0xff]  ;;  %s253_s6 = scalar_select %p252_p8, %s2801_s21, 224 }
  0x13   : > { %v2383_v4 = vor.u32 %v2455_v3, %v2382_v2  ;;  %v2439_v7 = vld [vmem:[%s3751_s1 + $0x30] sm:$0xff]  ;;  %1162 = vmatpush.bf16.msra.mxu1 %v2766_v1  ;;  %v989_v8 = vsel %vm987_vm1, %v988_v6, 0  ;;  %v2438_v12 = vld [vmem:[%s3751_s1 + $0x28] sm:$0xff]  ;;  %v2807_v14 = vld [vmem:[%s3751_s1 + $0xa0] sm:$0xff]  ;;  %vm889_vm2 = vcmask 875520   ;;  %vm289_vm3 = vcmask 130048  }
  0x14   : > { %v2781_v9 = vld [vmem:[%s3751_s1 + $0x70] sm:$0xff]  ;;  %v2798_v13 = vld [vmem:[%s3751_s1 + $0x68] sm:$0xff]  ;;  %v2437_v15 = vld [vmem:[%s3751_s1 + $0x20] sm:$0xff]  ;;  %s2482_s19 = smul.u32 24, %s253_s6  ;;  %s1900_s28 = ssub.s32 (%p2749_p3), 225, %s2801_s21 }
  0x15   : > { %v2783_v10 = vand.u32 %v2383_v4, %v989_v8  ;;  %v2817_v16 = vld [vmem:[%s3751_s1 + $0x60] sm:$0xff]  ;;  %v2823_v17 = vld [vmem:[%s3751_s1 + $0x98] sm:$0xff]  ;;  %v2837_v20 = vld [vmem:[%s3751_s1 + $0x90] sm:$0xff]  ;;  %s2456_s29 = sshll.u32 (%p2749_p3), %s2653_s14, 9  ;;  %p1901_p9 = scmp.lt.s32.totalorder (%p2749_p3), %s1900_s28, 64 }
  0x16   : > { %2460 = vmatpush.bf16.msra.mxu3 %v2439_v7  ;;  %994 = vmatpush.bf16.msra.mxu0 %v2439_v7  ;;  %v2436_v18 = vld [vmem:[%s3751_s1 + $0x18] sm:$0xff]  ;;  %v2435_v21 = vld [vmem:[%s3751_s1 + $0x10] sm:$0xff]  ;;  %v2849_v23 = vld [vmem:[%s3751_s1 + $0x88] sm:$0xff]  ;;  %s2857_s4 = scalar_lea.vmem %s3750_s0, %s2482_s19  ;;  %s242_s19 = sand.u32 1, %s2645_s12  }
  0x17   : > { %1332 = vmatpush.bf16.msra.mxu2 %v2783_v10  ;;  %1163 = vmatpush.bf16.msra.mxu1 %v2781_v9  ;;  %v2444_v19 = vld [vmem:[%s3751_s1 + $0x58] sm:$0xff]  ;;  %v2443_v22 = vld [vmem:[%s3751_s1 + $0x50] sm:$0xff]  ;;  %v2434_v24 = vld [vmem:[%s3751_s1 + $0x8] sm:$0xff]  ;;  %s2289_s12 = sshll.u32 %s242_s19, 9  ;;  %s3610_s5 = scalar_lea.vmem (%p2749_p3), %s3753_s3, %s2456_s29  }
  0x18   : > { %v2442_v25 = vld [vmem:[%s3751_s1 + $0x48] sm:$0xff]  ;;  %v2865_v26 = vld [vmem:[%s3751_s1 + $0x80] sm:$0xff]  ;;  %v420_v28 = vld [vmem:[%s2857_s4 + $0x10] sm:$0xff]  ;;  %s3096_s25 = scalar_lea.vmem [#allocation3], %s2289_s12  }
  0x19   : > { %v2433_v27 = vld [vmem:[%s3751_s1] sm:$0xff]  ;;  %v423_v29 = vld [vmem:[%s2857_s4 + $0x28] sm:$0xff]  ;;  %v565_v32 = vld [vmem:[%s2857_s4 + $0x498] sm:$0xff] }
  0x1a   : > { %2461 = vmatpush.bf16.msra.mxu3 %v2438_v12  ;;  %995 = vmatpush.bf16.msra.mxu0 %v2438_v12  ;;  %v2441_v30 = vld [vmem:[%s3751_s1 + $0x40] sm:$0xff]  ;;  %v421_v34 = vld [vmem:[%s2857_s4 + $0x18] sm:$0xff]  ;;  %v419_v35 = vld [vmem:[%s2857_s4 + $0x8] sm:$0xff]  ;;  %v612_v37 = vpack.c.bf16 %v423_v29, %v420_v28 }
  0x1b   : > { %1333 = vmatpush.bf16.msra.mxu2 %v2789_v11  ;;  %1164 = vmatpush.bf16.msra.mxu1 %v2798_v13  ;;  %v562_v31 = vld [vmem:[%s2857_s4 + $0x480] sm:$0xff]  ;;  %v429_v42 = vld [vmem:[%s2857_s4 + $0x58] sm:$0xff]  ;;  %v568_v43 = vld [vmem:[%s2857_s4 + $0x4b0] sm:$0xff] }
  0x1c   : > { %v418_v33 = vld [vmem:[%s2857_s4] sm:$0xff]  ;;  %v682_v38 = vpack.c.bf16 %v565_v32, %v562_v31  ;;  %v571_v44 = vld [vmem:[%s2857_s4 + $0x4c8] sm:$0xff]  ;;  %v424_v45 = vld [vmem:[%s2857_s4 + $0x30] sm:$0xff] }
  0x1d   : > { %v422_v36 = vld [vmem:[%s2857_s4 + $0x20] sm:$0xff]  ;;  %v610_v39 = vpack.c.bf16 %v421_v34, %v418_v33  ;;  %v427_v46 = vld [vmem:[%s2857_s4 + $0x48] sm:$0xff]  ;;  %v425_v47 = vld [vmem:[%s2857_s4 + $0x38] sm:$0xff]  ;;  %v685_v50 = vpack.c.bf16 %v571_v44, %v568_v43 }
  0x1e   : > { %2462 = vmatpush.bf16.msra.mxu3 %v2437_v15  ;;  %996 = vmatpush.bf16.msra.mxu0 %v2437_v15  ;;  %v611_v40 = vpack.c.bf16 %v422_v36, %v419_v35  ;;  %v426_v41 = vld [vmem:[%s2857_s4 + $0x40] sm:$0xff]  ;;  %v428_v48 = vld [vmem:[%s2857_s4 + $0x50] sm:$0xff]  ;;  %v613_v51 = vpack.c.bf16 %v427_v46, %v424_v45  ;;  %v435_v54 = vld [vmem:[%s2857_s4 + $0x88] sm:$0xff] }
  0x1f   : > { %1334 = vmatpush.bf16.msra.mxu2 %v2807_v14  ;;  %1165 = vmatpush.bf16.msra.mxu1 %v2817_v16  ;;  %v615_v49 = vpack.c.bf16 %v429_v42, %v426_v41  ;;  %v614_v52 = vpack.c.bf16 %v428_v48, %v425_v47  ;;  %v432_v53 = vld [vmem:[%s2857_s4 + $0x70] sm:$0xff]  ;;  %v574_v55 = vld [vmem:[%s2857_s4 + $0x4e0] sm:$0xff]  ;;  %v577_v56 = vld [vmem:[%s2857_s4 + $0x4f8] sm:$0xff] }
  0x20   : > { %v430_v57 = vld [vmem:[%s2857_s4 + $0x60] sm:$0xff]  ;;  %v433_v58 = vld [vmem:[%s2857_s4 + $0x78] sm:$0xff]  ;;  %v431_v59 = vld [vmem:[%s2857_s4 + $0x68] sm:$0xff]  ;;  %v618_v61 = vpack.c.bf16 %v435_v54, %v432_v53  ;;  %v688_v62 = vpack.c.bf16 %v577_v56, %v574_v55 }
  0x21   : > { %v434_v60 = vld [vmem:[%s2857_s4 + $0x80] sm:$0xff]  ;;  %v616_v63 = vpack.c.bf16 %v433_v58, %v430_v57  ;;  %v441_v2 = vld [vmem:[%s2857_s4 + $0xb8] sm:$0xff]  ;;  %v580_v3 = vld [vmem:[%s2857_s4 + $0x510] sm:$0xff] }
  0x22   : > { %2463 = vmatpush.bf16.msra.mxu3 %v2436_v18  ;;  %997 = vmatpush.bf16.msra.mxu0 %v2436_v18  ;;  %v617_v0 = vpack.c.bf16 %v434_v60, %v431_v59  ;;  %v583_v4 = vld [vmem:[%s2857_s4 + $0x528] sm:$0xff]  ;;  %v436_v5 = vld [vmem:[%s2857_s4 + $0x90] sm:$0xff]  ;;  %v437_v7 = vld [vmem:[%s2857_s4 + $0x98] sm:$0xff] }
  0x23   : > { %1335 = vmatpush.bf16.msra.mxu2 %v2823_v17  ;;  %1166 = vmatpush.bf16.msra.mxu1 %v2444_v19  ;;  %v439_v6 = vld [vmem:[%s2857_s4 + $0xa8] sm:$0xff]  ;;  %v440_v8 = vld [vmem:[%s2857_s4 + $0xb0] sm:$0xff]  ;;  %v586_v15 = vld [vmem:[%s2857_s4 + $0x540] sm:$0xff] }
  0x24   : > { %v620_v12 = vpack.c.bf16 %v440_v8, %v437_v7  ;;  %v445_v18 = vld [vmem:[%s2857_s4 + $0xd8] sm:$0xff]  ;;  %v595_v28 = vld [vmem:[%s2857_s4 + $0x588] sm:$0xff]  ;;  %v448_v29 = vld [vmem:[%s2857_s4 + $0xf0] sm:$0xff] }
  0x25   : > { %v449_v31 = vld [vmem:[%s2857_s4 + $0xf8] sm:$0xff]  ;;  %v452_v32 = vld [vmem:[%s2857_s4 + $0x110] sm:$0xff]  ;;  %v454_v41 = vld [vmem:[%s2857_s4 + $0x120] sm:$0xff] }
  0x26   : > { %2464 = vmatpush.bf16.msra.mxu3 %v2435_v21  ;;  %998 = vmatpush.bf16.msra.mxu0 %v2435_v21  ;;  %v626_v36 = vpack.c.bf16 %v452_v32, %v449_v31  ;;  %v457_v42 = vld [vmem:[%s2857_s4 + $0x138] sm:$0xff]  ;;  %v455_v43 = vld [vmem:[%s2857_s4 + $0x128] sm:$0xff]  ;;  %v458_v44 = vld [vmem:[%s2857_s4 + $0x140] sm:$0xff] }
  0x27   : > { %1336 = vmatpush.bf16.msra.mxu2 %v2837_v20  ;;  %1167 = vmatpush.bf16.msra.mxu1 %v2443_v22  ;;  %v628_v47 = vpack.c.bf16 %v457_v42, %v454_v41  ;;  %v629_v48 = vpack.c.bf16 %v458_v44, %v455_v43  ;;  %v607_v53 = vld [vmem:[%s2857_s4 + $0x5e8] sm:$0xff]  ;;  %v460_v54 = vld [vmem:[%s2857_s4 + $0x150] sm:$0xff]  ;;  %v461_v56 = vld [vmem:[%s2857_s4 + $0x158] sm:$0xff] }
  0x28   : > { %v463_v55 = vld [vmem:[%s2857_s4 + $0x168] sm:$0xff]  ;;  %v464_v57 = vld [vmem:[%s2857_s4 + $0x170] sm:$0xff] }
  0x29   : > { %v631_v60 = vpack.c.bf16 %v463_v55, %v460_v54  ;;  %v575_v54 = vld [vmem:[%s2857_s4 + $0x4e8] sm:$0xff]  ;;  %v578_v55 = vld [vmem:[%s2857_s4 + $0x500] sm:$0xff] }
  0x2a   : > { %2465 = vmatpush.bf16.msra.mxu3 %v2434_v24  ;;  %999 = vmatpush.bf16.msra.mxu0 %v2434_v24 }
  0x2b   : > { %1337 = vmatpush.bf16.msra.mxu2 %v2849_v23  ;;  %1168 = vmatpush.bf16.msra.mxu1 %v2442_v25 }
  0x2e   : > { %2466 = vmatpush.bf16.msra.mxu3 %v2433_v27  ;;  %1000 = vmatpush.bf16.msra.mxu0 %v2433_v27  ;;  %v592_v27 = vld [vmem:[%s2857_s4 + $0x570] sm:$0xff] }
  0x2f   : > { %1338 = vmatpush.bf16.msra.mxu2 %v2865_v26  ;;  %1169 = vmatpush.bf16.msra.mxu1 %v2441_v30  ;;  %v697_v34 = vpack.c.bf16 %v595_v28, %v592_v27  ;;  %v476_v27 = vld [vmem:[%s2857_s4 + $0x1d0] sm:$0xff] }
  0x31   : > { %1121 = vmatmul.bf16.vlgmr.msra.gmra.mxu3 %v682_v38  ;;  %1001 = vmatmul.bf16.vlgmr.msra.gmra.mxu0 %v610_v39  ;;  %v459_v38 = vld [vmem:[%s2857_s4 + $0x148] sm:$0xff]  ;;  %v598_v39 = vld [vmem:[%s2857_s4 + $0x5a0] sm:$0xff] }
  0x32   : > { %2467 = vmatpush.bf16.msrb.mxu3 %v2766_v1  ;;  %2384 = vmatmul.msk.bf16.vlgmr.msra.gmra.mxu2 %vm889_vm2, %v612_v37  ;;  %v438_v1 = vld [vmem:[%s2857_s4 + $0xa0] sm:$0xff]  ;;  %v456_v37 = vld [vmem:[%s2857_s4 + $0x130] sm:$0xff] }
  0x33   : > { %1170 = vmatmul.bf16.vlgmr.msra.gmra.mxu1 %v611_v40  ;;  %v601_v40 = vld [vmem:[%s2857_s4 + $0x5b8] sm:$0xff]  ;;  %v630_v45 = vpack.c.bf16 %v459_v38, %v456_v37 }
  0x34   : > { %v700_v46 = vpack.c.bf16 %v601_v40, %v598_v39 }
  0x36   : > { %2468 = vmatpush.bf16.msrb.mxu3 %v2781_v9  ;;  %v621_v9 = vpack.c.bf16 %v441_v2, %v438_v1  ;;  %v566_v1 = vld [vmem:[%s2857_s4 + $0x4a0] sm:$0xff] }
  0x37   : > { %v466_v2 = vld [vmem:[%s2857_s4 + $0x180] sm:$0xff] }
  0x3a   : > { %2469 = vmatpush.bf16.msrb.mxu3 %v2798_v13  ;;  %v444_v13 = vld [vmem:[%s2857_s4 + $0xd0] sm:$0xff] }
  0x3e   : > { %2470 = vmatpush.bf16.msrb.mxu3 %v2817_v16  ;;  %v589_v16 = vld [vmem:[%s2857_s4 + $0x558] sm:$0xff] }
  0x41   : > { %1126 = vmatmul.bf16.gmra.mxu3 %v685_v50  ;;  %1006 = vmatmul.bf16.gmra.mxu0 %v613_v51  ;;  %v462_v50 = vld [vmem:[%s2857_s4 + $0x160] sm:$0xff]  ;;  %v465_v51 = vld [vmem:[%s2857_s4 + $0x178] sm:$0xff] }
  0x42   : > { %2471 = vmatpush.bf16.msrb.mxu3 %v2444_v19  ;;  %2385 = vmatmul.msk.bf16.gmra.mxu2 %vm889_vm2, %v615_v49  ;;  %v443_v19 = vld [vmem:[%s2857_s4 + $0xc8] sm:$0xff]  ;;  %v2696_v49 = vmov 0.0   ;;  %v633_v58 = vpack.c.bf16 %v465_v51, %v462_v50  ;;  %v480_v51 = vld [vmem:[%s2857_s4 + $0x1f0] sm:$0xff] }
  0x43   : > { %1175 = vmatmul.bf16.gmra.mxu1 %v614_v52  ;;  %290 = vst.msk [vmem:[#allocation2] sm:$0xff] %vm289_vm3, %v2696_v49  ;;  %v604_v52 = vld [vmem:[%s2857_s4 + $0x5d0] sm:$0xff] }
  0x44   : > { %291 = vst.msk [vmem:[#allocation2 + $0x8] sm:$0xff] %vm289_vm3, %v2696_v49  ;;  %v703_v59 = vpack.c.bf16 %v607_v53, %v604_v52  ;;  %v483_v52 = vld [vmem:[%s2857_s4 + $0x208] sm:$0xff] }
  0x45   : > { %292 = vst.msk [vmem:[#allocation2 + $0x10] sm:$0xff] %vm289_vm3, %v2696_v49 }
  0x46   : > { %2472 = vmatpush.bf16.msrb.mxu3 %v2443_v22  ;;  %v694_v22 = vpack.c.bf16 %v589_v16, %v586_v15  ;;  %293 = vst.msk [vmem:[#allocation2 + $0x18] sm:$0xff] %vm289_vm3, %v2696_v49 }
  0x47   : > { %294 = vst.msk [vmem:[#allocation2 + $0x20] sm:$0xff] %vm289_vm3, %v2696_v49 }
  0x48   : > { %295 = vst.msk [vmem:[#allocation2 + $0x28] sm:$0xff] %vm289_vm3, %v2696_v49 }
  0x49   : > { %296 = vst.msk [vmem:[#allocation2 + $0x30] sm:$0xff] %vm289_vm3, %v2696_v49 }
  0x4a   : > { %2473 = vmatpush.bf16.msrb.mxu3 %v2442_v25  ;;  %v450_v25 = vld [vmem:[%s2857_s4 + $0x100] sm:$0xff]  ;;  %297 = vst.msk [vmem:[#allocation2 + $0x38] sm:$0xff] %vm289_vm3, %v2696_v49 }
  0x4b   : > { %298 = vst.msk [vmem:[#allocation2 + $0x40] sm:$0xff] %vm289_vm3, %v2696_v49 }
  0x4c   : > { %299 = vst.msk [vmem:[#allocation2 + $0x48] sm:$0xff] %vm289_vm3, %v2696_v49 }
  0x4d   : > { %300 = vst.msk [vmem:[#allocation2 + $0x50] sm:$0xff] %vm289_vm3, %v2696_v49 }
  0x4e   : > { %2474 = vmatpush.bf16.msrb.mxu3 %v2441_v30  ;;  %v451_v30 = vld [vmem:[%s2857_s4 + $0x108] sm:$0xff]  ;;  %301 = vst.msk [vmem:[#allocation2 + $0x58] sm:$0xff] %vm289_vm3, %v2696_v49 }
  0x4f   : > { %v625_v35 = vpack.c.bf16 %v451_v30, %v448_v29  ;;  %302 = vst.msk [vmem:[#allocation2 + $0x60] sm:$0xff] %vm289_vm3, %v2696_v49  ;;  %v3074_v30 = vld [vmem:[%s3752_s2] ss:$0 sm:$0xff] }
  0x50   : > { %303 = vst.msk [vmem:[#allocation2 + $0x68] sm:$0xff] %vm289_vm3, %v2696_v49 }
  0x51   : > { %1131 = vmatmul.bf16.gmra.mxu3 %v688_v62  ;;  %1011 = vmatmul.bf16.gmra.mxu0 %v616_v63  ;;  %304 = vst.msk [vmem:[#allocation2 + $0x70] sm:$0xff] %vm289_vm3, %v2696_v49  ;;  %v468_v62 = vld [vmem:[%s2857_s4 + $0x190] sm:$0xff]  ;;  %v471_v63 = vld [vmem:[%s2857_s4 + $0x1a8] sm:$0xff] }
  0x52   : > { %2475 = vmatpush.bf16.msra.mxu3 %v2783_v10  ;;  %2386 = vmatmul.msk.bf16.gmra.mxu2 %vm889_vm2, %v618_v61  ;;  %v691_v10 = vpack.c.bf16 %v583_v4, %v580_v3  ;;  %v632_v61 = vpack.c.bf16 %v464_v57, %v461_v56  ;;  %305 = vst.msk [vmem:[#allocation2 + $0x78] sm:$0xff] %vm289_vm3, %v2696_v49  ;;  %v469_v3 = vld [vmem:[%s2857_s4 + $0x198] sm:$0xff]  ;;  %v467_v4 = vld [vmem:[%s2857_s4 + $0x188] sm:$0xff]  ;;  %v478_v56 = vld [vmem:[%s2857_s4 + $0x1e0] sm:$0xff] }
  0x53   : > { %1180 = vmatmul.bf16.gmra.mxu1 %v617_v0  ;;  %306 = vst.msk [vmem:[#allocation2 + $0x80] sm:$0xff] %vm289_vm3, %v2696_v49  ;;  %v563_v0 = vld [vmem:[%s2857_s4 + $0x488] sm:$0xff]  ;;  %v634_v8 = vpack.c.bf16 %v469_v3, %v466_v2  ;;  %v481_v57 = vld [vmem:[%s2857_s4 + $0x1f8] sm:$0xff]  ;;  %v689_v2 = vpack.c.bf16 %v578_v55, %v575_v54  ;;  %v360_v54 = vld [vmem:[#allocation2 + $0x30] sm:$0xff] }
  0x54   : > { %307 = vst.msk [vmem:[#allocation2 + $0x88] sm:$0xff] %vm289_vm3, %v2696_v49  ;;  %v683_v7 = vpack.c.bf16 %v566_v1, %v563_v0  ;;  %v642_v1 = vpack.c.bf16 %v483_v52, %v480_v51 }
  0x55   : > { %308 = vst.msk [vmem:[#allocation2 + $0x90] sm:$0xff] %vm289_vm3, %v2696_v49 }
  0x56   : > { %2476 = vmatpush.bf16.msra.mxu3 %v2789_v11  ;;  %v619_v11 = vpack.c.bf16 %v439_v6, %v436_v5  ;;  %309 = vst.msk [vmem:[#allocation2 + $0x98] sm:$0xff] %vm289_vm3, %v2696_v49  ;;  %v470_v5 = vld [vmem:[%s2857_s4 + $0x1a0] sm:$0xff]  ;;  %v636_v6 = vpack.c.bf16 %v471_v63, %v468_v62 }
  0x57   : > { %310 = vst.msk [vmem:[#allocation2 + $0xa0] sm:$0xff] %vm289_vm3, %v2696_v49 }
  0x58   : > { %311 = vst.msk [vmem:[#allocation2 + $0xa8] sm:$0xff] %vm289_vm3, %v2696_v49 }
  0x59   : > { %312 = vst.msk [vmem:[#allocation2 + $0xb0] sm:$0xff] %vm289_vm3, %v2696_v49 }
  0x5a   : > { %2477 = vmatpush.bf16.msra.mxu3 %v2807_v14  ;;  %v447_v14 = vld [vmem:[%s2857_s4 + $0xe8] sm:$0xff]  ;;  %313 = vst.msk [vmem:[#allocation2 + $0xb8] sm:$0xff] %vm289_vm3, %v2696_v49 }
  0x5b   : > { %v624_v21 = vpack.c.bf16 %v447_v14, %v444_v13  ;;  %314 = vst.msk [vmem:[#allocation2 + $0xc0] sm:$0xff] %vm289_vm3, %v2696_v49  ;;  %v354_v13 = vld [vmem:[#allocation2] sm:$0xff] }
  0x5c   : > { %315 = vst.msk [vmem:[#allocation2 + $0xc8] sm:$0xff] %vm289_vm3, %v2696_v49 }
  0x5d   : > { %316 = vst.msk [vmem:[#allocation2 + $0xd0] sm:$0xff] %vm289_vm3, %v2696_v49 }
  0x5e   : > { %2478 = vmatpush.bf16.msra.mxu3 %v2823_v17  ;;  %v442_v17 = vld [vmem:[%s2857_s4 + $0xc0] sm:$0xff]  ;;  %317 = vst.msk [vmem:[#allocation2 + $0xd8] sm:$0xff] %vm289_vm3, %v2696_v49 }
  0x5f   : > { %318 = vst.msk [vmem:[#allocation2 + $0xe0] sm:$0xff] %vm289_vm3, %v2696_v49 }
  0x60   : > { %319 = vst.msk [vmem:[#allocation2 + $0xe8] sm:$0xff] %vm289_vm3, %v2696_v49 }
  0x61   : > { %1136 = vmatmul.bf16.gmra.mxu3 %v691_v10  ;;  %1016 = vmatmul.bf16.gmra.mxu0 %v619_v11  ;;  %320 = vst.msk [vmem:[#allocation2 + $0xf0] sm:$0xff] %vm289_vm3, %v2696_v49 }
  0x62   : > { %2479 = vmatpush.bf16.msra.mxu3 %v2837_v20  ;;  %2387 = vmatmul.msk.bf16.gmra.mxu2 %vm889_vm2, %v621_v9  ;;  %v446_v20 = vld [vmem:[%s2857_s4 + $0xe0] sm:$0xff]  ;;  %321 = vst.msk [vmem:[#allocation2 + $0xf8] sm:$0xff] %vm289_vm3, %v2696_v49  ;;  %v635_v9 = vpack.c.bf16 %v470_v5, %v467_v4  ;;  %v640_v4 = vpack.c.bf16 %v481_v57, %v478_v56 }
  0x63   : > { %1185 = vmatmul.bf16.gmra.mxu1 %v620_v12  ;;  %v623_v24 = vpack.c.bf16 %v446_v20, %v443_v19  ;;  %322 = vst.msk [vmem:[#allocation2 + $0x100] sm:$0xff] %vm289_vm3, %v2696_v49  ;;  %v474_v20 = vld [vmem:[%s2857_s4 + $0x1c0] sm:$0xff] }
  0x64   : > { %323 = vst.msk [vmem:[#allocation2 + $0x108] sm:$0xff] %vm289_vm3, %v2696_v49 }
  0x65   : > { %324 = vst.msk [vmem:[#allocation2 + $0x110] sm:$0xff] %vm289_vm3, %v2696_v49 }
  0x66   : > { %2480 = vmatpush.bf16.msra.mxu3 %v2849_v23  ;;  %v622_v23 = vpack.c.bf16 %v445_v18, %v442_v17  ;;  %325 = vst.msk [vmem:[#allocation2 + $0x118] sm:$0xff] %vm289_vm3, %v2696_v49 }
  0x67   : > { %326 = vst.msk [vmem:[#allocation2 + $0x120] sm:$0xff] %vm289_vm3, %v2696_v49 }
  0x68   : > { %327 = vst.msk [vmem:[#allocation2 + $0x128] sm:$0xff] %vm289_vm3, %v2696_v49 }
  0x69   : > { %328 = vst.msk [vmem:[#allocation2 + $0x130] sm:$0xff] %vm289_vm3, %v2696_v49 }
  0x6a   : > { %2481 = vmatpush.bf16.msra.mxu3 %v2865_v26  ;;  %v453_v26 = vld [vmem:[%s2857_s4 + $0x118] sm:$0xff]  ;;  %329 = vst.msk [vmem:[#allocation2 + $0x138] sm:$0xff] %vm289_vm3, %v2696_v49 }
  0x6b   : > { %v627_v33 = vpack.c.bf16 %v453_v26, %v450_v25  ;;  %330 = vst.msk [vmem:[#allocation2 + $0x140] sm:$0xff] %vm289_vm3, %v2696_v49  ;;  %v475_v25 = vld [vmem:[%s2857_s4 + $0x1c8] sm:$0xff]  ;;  %v473_v26 = vld [vmem:[%s2857_s4 + $0x1b8] sm:$0xff] }
  0x6c   : > { %331 = vst.msk [vmem:[#allocation2 + $0x148] sm:$0xff] %vm289_vm3, %v2696_v49 }
  0x6d   : > { %332 = vst.msk [vmem:[#allocation2 + $0x150] sm:$0xff] %vm289_vm3, %v2696_v49 }
  0x6e   : > { %333 = vst.msk [vmem:[#allocation2 + $0x158] sm:$0xff] %vm289_vm3, %v2696_v49 }
  0x6f   : > { %334 = vst.msk [vmem:[#allocation2 + $0x160] sm:$0xff] %vm289_vm3, %v2696_v49 }
  0x70   : > { %335 = vst.msk [vmem:[#allocation2 + $0x168] sm:$0xff] %vm289_vm3, %v2696_v49 }
  0x71   : > { %1141 = vmatmul.bf16.gmra.mxu3 %v694_v22  ;;  %1021 = vmatmul.bf16.gmra.mxu0 %v622_v23  ;;  %v569_v22 = vld [vmem:[%s2857_s4 + $0x4b8] sm:$0xff]  ;;  %v572_v23 = vld [vmem:[%s2857_s4 + $0x4d0] sm:$0xff]  ;;  %336 = vst.msk [vmem:[#allocation2 + $0x170] sm:$0xff] %vm289_vm3, %v2696_v49 }
  0x72   : > { %2388 = vmatmul.msk.bf16.gmra.mxu2 %vm889_vm2, %v624_v21  ;;  %v477_v21 = vld [vmem:[%s2857_s4 + $0x1d8] sm:$0xff]  ;;  %v686_v32 = vpack.c.bf16 %v572_v23, %v569_v22  ;;  %337 = vst.msk [vmem:[#allocation2 + $0x178] sm:$0xff] %vm289_vm3, %v2696_v49 }
  0x73   : > { %1190 = vmatmul.bf16.gmra.mxu1 %v623_v24  ;;  %v472_v24 = vld [vmem:[%s2857_s4 + $0x1b0] sm:$0xff]  ;;  %v639_v31 = vpack.c.bf16 %v477_v21, %v474_v20  ;;  %338 = vst.msk [vmem:[#allocation2 + $0x180] sm:$0xff] %vm289_vm3, %v2696_v49  ;;  %v489_v22 = vld [vmem:[%s2857_s4 + $0x238] sm:$0xff] }
  0x74   : > { %339 = vst.msk [vmem:[#allocation2 + $0x188] sm:$0xff] %vm289_vm3, %v2696_v49  ;;  %v581_v23 = vld [vmem:[%s2857_s4 + $0x518] sm:$0xff] }
  0x75   : > { %340 = vst.msk [vmem:[#allocation2 + $0x190] sm:$0xff] %vm289_vm3, %v2696_v49 }
  0x76   : > { %341 = vst.msk [vmem:[#allocation2 + $0x198] sm:$0xff] %vm289_vm3, %v2696_v49 }
  0x77   : > { %342 = vst.msk [vmem:[#allocation2 + $0x1a0] sm:$0xff] %vm289_vm3, %v2696_v49 }
  0x78   : > { %343 = vst.msk [vmem:[#allocation2 + $0x1a8] sm:$0xff] %vm289_vm3, %v2696_v49 }
  0x79   : > { %344 = vst.msk [vmem:[#allocation2 + $0x1b0] sm:$0xff] %vm289_vm3, %v2696_v49 }
  0x7a   : > { %345 = vst.msk [vmem:[#allocation2 + $0x1b8] sm:$0xff] %vm289_vm3, %v2696_v49 }
  0x7b   : > { %346 = vst.msk [vmem:[#allocation2 + $0x1c0] sm:$0xff] %vm289_vm3, %v2696_v49 }
  0x7c   : > { %347 = vst.msk [vmem:[#allocation2 + $0x1c8] sm:$0xff] %vm289_vm3, %v2696_v49 }
  0x7d   : > { %348 = vst.msk [vmem:[#allocation2 + $0x1d0] sm:$0xff] %vm289_vm3, %v2696_v49 }
  0x7e   : > { %349 = vst.msk [vmem:[#allocation2 + $0x1d8] sm:$0xff] %vm289_vm3, %v2696_v49 }
  0x7f   : > { %350 = vst.msk [vmem:[#allocation2 + $0x1e0] sm:$0xff] %vm289_vm3, %v2696_v49 }
  0x80   : > { %351 = vst.msk [vmem:[#allocation2 + $0x1e8] sm:$0xff] %vm289_vm3, %v2696_v49 }
  0x81   : > { %1146 = vmatmul.bf16.gmra.mxu3 %v697_v34  ;;  %1026 = vmatmul.bf16.gmra.mxu0 %v625_v35  ;;  %v638_v34 = vpack.c.bf16 %v476_v27, %v473_v26  ;;  %352 = vst.msk [vmem:[#allocation2 + $0x1f0] sm:$0xff] %vm289_vm3, %v2696_v49  ;;  %v584_v26 = vld [vmem:[%s2857_s4 + $0x530] sm:$0xff] }
  0x82   : > { %2389 = vmatmul.msk.bf16.gmra.mxu2 %vm889_vm2, %v627_v33  ;;  %v637_v33 = vpack.c.bf16 %v475_v25, %v472_v24  ;;  %353 = vst.msk [vmem:[#allocation2 + $0x1f8] sm:$0xff] %vm289_vm3, %v2696_v49  ;;  %v484_v27 = vld [vmem:[%s2857_s4 + $0x210] sm:$0xff] }
  0x83   : > { %1195 = vmatmul.bf16.gmra.mxu1 %v626_v36 }
  0x91   : > { %1151 = vmatmul.bf16.gmra.mxu3 %v700_v46  ;;  %1031 = vmatmul.bf16.gmra.mxu0 %v628_v47  ;;  %v355_v46 = vld [vmem:[#allocation2 + $0x8] sm:$0xff] }
  0x92   : > { %2390 = vmatmul.msk.bf16.gmra.mxu2 %vm889_vm2, %v630_v45 }
  0x93   : > { %1200 = vmatmul.bf16.gmra.mxu1 %v629_v48  ;;  %v356_v48 = vld [vmem:[#allocation2 + $0x10] sm:$0xff] }
  0xa1   : > { %1156 = vmatmul.bf16.gmra.mxu3 %v703_v59  ;;  %1036 = vmatmul.bf16.gmra.mxu0 %v631_v60  ;;  %v482_v59 = vld [vmem:[%s2857_s4 + $0x200] sm:$0xff]  ;;  %v357_v60 = vld [vmem:[#allocation2 + $0x18] sm:$0xff] }
  0xa2   : > { %2391 = vmatmul.msk.bf16.gmra.mxu2 %vm889_vm2, %v633_v58  ;;  %v479_v58 = vld [vmem:[%s2857_s4 + $0x1e8] sm:$0xff] }
  0xa3   : > { %1205 = vmatmul.bf16.gmra.mxu1 %v632_v61  ;;  %v641_v5 = vpack.c.bf16 %v482_v59, %v479_v58 }
  0xae   : > { %v1002_v10 = vpop.f32.mrf.mxu0 }
  0xb0   : > { %v1171_v11 = vpop.f32.mrf.mxu1 }
  0xb1   : > { %v1172_v12 = vadd.f32 %v1171_v11, %v1002_v10  ;;  %1290 = vmatmul.bf16.vlgmr.msrb.gmra.mxu3 %v683_v7  ;;  %1041 = vmatmul.bf16.gmra.mxu0 %v634_v8  ;;  %v358_v10 = vld [vmem:[#allocation2 + $0x20] sm:$0xff] }
  0xb2   : > { %2392 = vmatmul.msk.bf16.gmra.mxu2 %vm889_vm2, %v636_v6 }
  0xb3   : > { %1210 = vmatmul.bf16.gmra.mxu1 %v635_v9 }
  0xb4   : > { %v3043_v15 = vpop.f32.mrf.mxu3 }
  0xb5   : > { %v1340_v14 = vpop.f32.mrf.mxu2 }
  0xb6   : > { %v1341_v16 = vadd.f32 %v1340_v14, %v1172_v12  ;;  %v1004_v18 = vpop.f32.mrf.mxu0 }
  0xb8   : > { %v1500_v17 = vadd.f32 %v1341_v16, %v354_v13  ;;  %v1173_v19 = vpop.f32.mrf.mxu1 }
  0xb9   : > { %v1174_v42 = vadd.f32 %v1173_v19, %v1004_v18  ;;  %v486_v18 = vld [vmem:[%s2857_s4 + $0x220] sm:$0xff] }
  0xba   : > { %1565 = vst.msk [vmem:[#allocation2] sm:$0xff] %vm289_vm3, %v1500_v17 }
  0xbc   : > { %v3069_v29 = vpop.f32.mrf.mxu3 }
  0xbd   : > { %v1342_v28 = vpop.f32.mrf.mxu2 }
  0xbe   : > { %v1007_v35 = vpop.f32.mrf.mxu0  ;;  %v1343_v47 = vadd.f32 %v1342_v28, %v1174_v42  ;;  %v645_v42 = vpack.c.bf16 %v489_v22, %v486_v18 }
  0xc0   : > { %v1176_v36 = vpop.f32.mrf.mxu1  ;;  %v1501_v63 = vadd.f32 %v1343_v47, %v355_v46 }
  0xc1   : > { %v1632_v37 = vld [vmem:[#allocation2] sm:$0xff]  ;;  %1295 = vmatmul.bf16.gmra.mxu3 %v686_v32  ;;  %1046 = vmatmul.bf16.gmra.mxu0 %v637_v33  ;;  %v1177_v43 = vadd.f32 %v1176_v36, %v1007_v35  ;;  %v487_v32 = vld [vmem:[%s2857_s4 + $0x228] sm:$0xff]  ;;  %v485_v33 = vld [vmem:[%s2857_s4 + $0x218] sm:$0xff] }
  0xc2   : > { %v1700_v38 = vadd.f32 %v3074_v30, %v1632_v37  ;;  %2393 = vmatmul.msk.bf16.gmra.mxu2 %vm889_vm2, %v639_v31  ;;  %1566 = vst.msk [vmem:[#allocation2 + $0x8] sm:$0xff] %vm289_vm3, %v1501_v63  ;;  %v359_v36 = vld [vmem:[#allocation2 + $0x28] sm:$0xff] }
  0xc3   : > { %1215 = vmatmul.bf16.gmra.mxu1 %v638_v34  ;;  %v488_v34 = vld [vmem:[%s2857_s4 + $0x230] sm:$0xff] }
  0xc4   : > { %v1764_v39 = vmax.f32 %v1700_v38, 0.0  ;;  %v3094_v41 = vpop.f32.mrf.mxu3 }
  0xc5   : > { %v1345_v40 = vpop.f32.mrf.mxu2 }
  0xc6   : > { %1828 = vst.msk [vmem:[%s3096_s25] sm:$0xff] %vm289_vm3, %v1764_v39  ;;  %v1009_v44 = vpop.f32.mrf.mxu0  ;;  %v1346_v53 = vadd.f32 %v1345_v40, %v1177_v43  ;;  %v692_v43 = vpack.c.bf16 %v584_v26, %v581_v23  ;;  %v362_v26 = vld [vmem:[#allocation2 + $0x40] sm:$0xff] }
  0xc8   : > { %v1178_v45 = vpop.f32.mrf.mxu1  ;;  %v1502_v3 = vadd.f32 %v1346_v53, %v356_v48 }
  0xc9   : > { %v1179_v50 = vadd.f32 %v1178_v45, %v1009_v44  ;;  %v1633_v17 = vld [vmem:[#allocation2 + $0x8] sm:$0xff]  ;;  %v643_v44 = vpack.c.bf16 %v487_v32, %v484_v27  ;;  %v644_v45 = vpack.c.bf16 %v488_v34, %v485_v33 }
  0xca   : > { %1567 = vst.msk [vmem:[#allocation2 + $0x10] sm:$0xff] %vm289_vm3, %v1502_v3  ;;  %v1701_v19 = vadd.f32 %v3074_v30, %v1633_v17  ;;  %v587_v3 = vld [vmem:[%s2857_s4 + $0x548] sm:$0xff] }
  0xcc   : > { %v3122_v62 = vpop.f32.mrf.mxu3  ;;  %v1765_v28 = vmax.f32 %v1701_v19, 0.0 }
  0xcd   : > { %v1347_v61 = vpop.f32.mrf.mxu2 }
  0xce   : > { %v1348_v0 = vadd.f32 %v1347_v61, %v1179_v50  ;;  %v1012_v7 = vpop.f32.mrf.mxu0  ;;  %1829 = vst.msk [vmem:[%s3096_s25 + $0x8] sm:$0xff] %vm289_vm3, %v1765_v28 }
  0xd0   : > { %v1503_v6 = vadd.f32 %v1348_v0, %v357_v60  ;;  %v1181_v8 = vpop.f32.mrf.mxu1 }
  0xd1   : > { %v1182_v9 = vadd.f32 %v1181_v8, %v1012_v7  ;;  %1300 = vmatmul.bf16.gmra.mxu3 %v689_v2  ;;  %1051 = vmatmul.bf16.gmra.mxu0 %v640_v4  ;;  %v1634_v20 = vld [vmem:[#allocation2 + $0x10] sm:$0xff]  ;;  %v495_v2 = vld [vmem:[%s2857_s4 + $0x268] sm:$0xff]  ;;  %v590_v4 = vld [vmem:[%s2857_s4 + $0x560] sm:$0xff] }
  0xd2   : > { %2394 = vmatmul.msk.bf16.gmra.mxu2 %vm889_vm2, %v642_v1  ;;  %1568 = vst.msk [vmem:[#allocation2 + $0x18] sm:$0xff] %vm289_vm3, %v1503_v6  ;;  %v1702_v24 = vadd.f32 %v3074_v30, %v1634_v20  ;;  %v492_v1 = vld [vmem:[%s2857_s4 + $0x250] sm:$0xff]  ;;  %v493_v7 = vld [vmem:[%s2857_s4 + $0x258] sm:$0xff]  ;;  %v491_v8 = vld [vmem:[%s2857_s4 + $0x248] sm:$0xff] }
  0xd3   : > { %1220 = vmatmul.bf16.gmra.mxu1 %v641_v5  ;;  %v490_v5 = vld [vmem:[%s2857_s4 + $0x240] sm:$0xff] }
  0xd4   : > { %v3136_v12 = vpop.f32.mrf.mxu3  ;;  %v1766_v35 = vmax.f32 %v1702_v24, 0.0  ;;  %v646_v17 = vpack.c.bf16 %v493_v7, %v490_v5 }
  0xd5   : > { %v1350_v11 = vpop.f32.mrf.mxu2 }
  0xd6   : > { %v1351_v49 = vadd.f32 %v1350_v11, %v1182_v9  ;;  %v1014_v14 = vpop.f32.mrf.mxu0  ;;  %1830 = vst.msk [vmem:[%s3096_s25 + $0x10] sm:$0xff] %vm289_vm3, %v1766_v35  ;;  %v494_v9 = vld [vmem:[%s2857_s4 + $0x260] sm:$0xff] }
  0xd7   : > { %v647_v18 = vpack.c.bf16 %v494_v9, %v491_v8 }
  0xd8   : > { %v1504_v13 = vadd.f32 %v1351_v49, %v358_v10  ;;  %v1183_v16 = vpop.f32.mrf.mxu1  ;;  %v361_v10 = vld [vmem:[#allocation2 + $0x38] sm:$0xff] }
  0xd9   : > { %v1184_v21 = vadd.f32 %v1183_v16, %v1014_v14  ;;  %v1635_v25 = vld [vmem:[#allocation2 + $0x18] sm:$0xff]  ;;  %v648_v14 = vpack.c.bf16 %v495_v2, %v492_v1  ;;  %v695_v16 = vpack.c.bf16 %v590_v4, %v587_v3  ;;  %v364_v3 = vld [vmem:[#allocation2 + $0x50] sm:$0xff] }
  0xda   : > { %1569 = vst.msk [vmem:[#allocation2 + $0x20] sm:$0xff] %vm289_vm3, %v1504_v13  ;;  %v1703_v31 = vadd.f32 %v3074_v30, %v1635_v25 }
  0xdc   : > { %v3150_v38 = vpop.f32.mrf.mxu3  ;;  %v1767_v39 = vmax.f32 %v1703_v31, 0.0 }
  0xdd   : > { %v1352_v37 = vpop.f32.mrf.mxu2 }
  0xde   : > { %v1353_v40 = vadd.f32 %v1352_v37, %v1184_v21  ;;  %1831 = vst.msk [vmem:[%s3096_s25 + $0x18] sm:$0xff] %vm289_vm3, %v1767_v39  ;;  %v1017_v47 = vpop.f32.mrf.mxu0  ;;  %v498_v39 = vld [vmem:[%s2857_s4 + $0x280] sm:$0xff] }
  0xe0   : > { %v1505_v46 = vadd.f32 %v1353_v40, %v359_v36  ;;  %v1186_v48 = vpop.f32.mrf.mxu1  ;;  %v501_v40 = vld [vmem:[%s2857_s4 + $0x298] sm:$0xff] }
  0xe1   : > { %v1636_v50 = vld [vmem:[#allocation2 + $0x20] sm:$0xff]  ;;  %v1187_v52 = vadd.f32 %v1186_v48, %v1017_v47  ;;  %1305 = vmatmul.bf16.gmra.mxu3 %v692_v43  ;;  %1056 = vmatmul.bf16.gmra.mxu0 %v643_v44  ;;  %v596_v43 = vld [vmem:[%s2857_s4 + $0x590] sm:$0xff]  ;;  %v497_v47 = vld [vmem:[%s2857_s4 + $0x278] sm:$0xff] }
  0xe2   : > { %v1704_v51 = vadd.f32 %v3074_v30, %v1636_v50  ;;  %1570 = vst.msk [vmem:[#allocation2 + $0x28] sm:$0xff] %vm289_vm3, %v1505_v46  ;;  %2395 = vmatmul.msk.bf16.gmra.mxu2 %vm889_vm2, %v645_v42  ;;  %v593_v42 = vld [vmem:[%s2857_s4 + $0x578] sm:$0xff]  ;;  %v496_v44 = vld [vmem:[%s2857_s4 + $0x270] sm:$0xff]  ;;  %v499_v46 = vld [vmem:[%s2857_s4 + $0x288] sm:$0xff] }
  0xe3   : > { %1225 = vmatmul.bf16.gmra.mxu1 %v644_v45  ;;  %v500_v48 = vld [vmem:[%s2857_s4 + $0x290] sm:$0xff]  ;;  %v363_v50 = vld [vmem:[#allocation2 + $0x48] sm:$0xff] }
  0xe4   : > { %v1768_v53 = vmax.f32 %v1704_v51, 0.0  ;;  %v3161_v56 = vpop.f32.mrf.mxu3 }
  0xe5   : > { %v1355_v55 = vpop.f32.mrf.mxu2 }
  0xe6   : > { %1832 = vst.msk [vmem:[%s3096_s25 + $0x20] sm:$0xff] %vm289_vm3, %v1768_v53  ;;  %v1356_v57 = vadd.f32 %v1355_v55, %v1187_v52  ;;  %v1019_v59 = vpop.f32.mrf.mxu0  ;;  %v698_v55 = vpack.c.bf16 %v596_v43, %v593_v42 }
  0xe8   : > { %v1506_v58 = vadd.f32 %v1356_v57, %v360_v54  ;;  %v1188_v60 = vpop.f32.mrf.mxu1  ;;  %v651_v54 = vpack.c.bf16 %v501_v40, %v498_v39  ;;  %v649_v57 = vpack.c.bf16 %v499_v46, %v496_v44  ;;  %v366_v44 = vld [vmem:[#allocation2 + $0x60] sm:$0xff] }
  0xe9   : > { %v1637_v61 = vld [vmem:[#allocation2 + $0x28] sm:$0xff]  ;;  %v1189_v0 = vadd.f32 %v1188_v60, %v1019_v59 }
  0xea   : > { %v1705_v63 = vadd.f32 %v3074_v30, %v1637_v61  ;;  %1571 = vst.msk [vmem:[#allocation2 + $0x30] sm:$0xff] %vm289_vm3, %v1506_v58  ;;  %v650_v58 = vpack.c.bf16 %v500_v48, %v497_v47 }
  0xec   : > { %v1769_v6 = vmax.f32 %v1705_v63, 0.0  ;;  %v3175_v49 = vpop.f32.mrf.mxu3 }
  0xed   : > { %v1357_v11 = vpop.f32.mrf.mxu2 }
  0xee   : > { %1833 = vst.msk [vmem:[%s3096_s25 + $0x28] sm:$0xff] %vm289_vm3, %v1769_v6  ;;  %v1358_v13 = vadd.f32 %v1357_v11, %v1189_v0  ;;  %v1022_v20 = vpop.f32.mrf.mxu0 }
  0xf0   : > { %v1507_v19 = vadd.f32 %v1358_v13, %v361_v10  ;;  %v1191_v21 = vpop.f32.mrf.mxu1 }
  0xf1   : > { %v1638_v22 = vld [vmem:[#allocation2 + $0x30] sm:$0xff]  ;;  %v1192_v24 = vadd.f32 %v1191_v21, %v1022_v20  ;;  %1310 = vmatmul.bf16.gmra.mxu3 %v695_v16  ;;  %1061 = vmatmul.bf16.gmra.mxu0 %v646_v17  ;;  %v507_v16 = vld [vmem:[%s2857_s4 + $0x2c8] sm:$0xff]  ;;  %v505_v21 = vld [vmem:[%s2857_s4 + $0x2b8] sm:$0xff] }
  0xf2   : > { %v1706_v23 = vadd.f32 %v3074_v30, %v1638_v22  ;;  %1572 = vst.msk [vmem:[#allocation2 + $0x38] sm:$0xff] %vm289_vm3, %v1507_v19  ;;  %2396 = vmatmul.msk.bf16.gmra.mxu2 %vm889_vm2, %v648_v14  ;;  %v504_v14 = vld [vmem:[%s2857_s4 + $0x2b0] sm:$0xff]  ;;  %v599_v17 = vld [vmem:[%s2857_s4 + $0x5a8] sm:$0xff]  ;;  %v502_v19 = vld [vmem:[%s2857_s4 + $0x2a0] sm:$0xff] }
  0xf3   : > { %1230 = vmatmul.bf16.gmra.mxu1 %v647_v18  ;;  %v602_v18 = vld [vmem:[%s2857_s4 + $0x5c0] sm:$0xff]  ;;  %v503_v22 = vld [vmem:[%s2857_s4 + $0x2a8] sm:$0xff] }
  0xf4   : > { %v1770_v25 = vmax.f32 %v1706_v23, 0.0  ;;  %v3182_v28 = vpop.f32.mrf.mxu3  ;;  %v506_v23 = vld [vmem:[%s2857_s4 + $0x2c0] sm:$0xff] }
  0xf5   : > { %v1360_v27 = vpop.f32.mrf.mxu2 }
  0xf6   : > { %1834 = vst.msk [vmem:[%s3096_s25 + $0x30] sm:$0xff] %vm289_vm3, %v1770_v25  ;;  %v1361_v31 = vadd.f32 %v1360_v27, %v1192_v24  ;;  %v1024_v33 = vpop.f32.mrf.mxu0  ;;  %v365_v24 = vld [vmem:[#allocation2 + $0x58] sm:$0xff] }
  0xf8   : > { %v1508_v32 = vadd.f32 %v1361_v31, %v362_v26  ;;  %v1193_v34 = vpop.f32.mrf.mxu1  ;;  %v654_v31 = vpack.c.bf16 %v507_v16, %v504_v14 }
  0xf9   : > { %v1639_v35 = vld [vmem:[#allocation2 + $0x38] sm:$0xff]  ;;  %v1194_v37 = vadd.f32 %v1193_v34, %v1024_v33  ;;  %v652_v33 = vpack.c.bf16 %v505_v21, %v502_v19  ;;  %v653_v34 = vpack.c.bf16 %v506_v23, %v503_v22  ;;  %v368_v21 = vld [vmem:[#allocation2 + $0x70] sm:$0xff] }
  0xfa   : > { %v1707_v36 = vadd.f32 %v3074_v30, %v1639_v35  ;;  %1573 = vst.msk [vmem:[#allocation2 + $0x40] sm:$0xff] %vm289_vm3, %v1508_v32  ;;  %v701_v32 = vpack.c.bf16 %v602_v18, %v599_v17 }
  0xfc   : > { %v1771_v45 = vmax.f32 %v1707_v36, 0.0  ;;  %v3196_v52 = vpop.f32.mrf.mxu3 }
  0xfd   : > { %v1362_v51 = vpop.f32.mrf.mxu2 }
  0xfe   : > { %1835 = vst.msk [vmem:[%s3096_s25 + $0x38] sm:$0xff] %vm289_vm3, %v1771_v45  ;;  %v1363_v53 = vadd.f32 %v1362_v51, %v1194_v37  ;;  %v1027_v60 = vpop.f32.mrf.mxu0 }
 0x100   : > { %v1509_v59 = vadd.f32 %v1363_v53, %v363_v50  ;;  %v1196_v61 = vpop.f32.mrf.mxu1 }
 0x101   : > { %v1640_v63 = vld [vmem:[#allocation2 + $0x40] sm:$0xff]  ;;  %v1197_v1 = vadd.f32 %v1196_v61, %v1027_v60  ;;  %1315 = vmatmul.bf16.gmra.mxu3 %v698_v55  ;;  %1066 = vmatmul.bf16.gmra.mxu0 %v649_v57  ;;  %v608_v60 = vld [vmem:[%s2857_s4 + $0x5f0] sm:$0xff] }
 0x102   : > { %v1708_v0 = vadd.f32 %v3074_v30, %v1640_v63  ;;  %1574 = vst.msk [vmem:[#allocation2 + $0x48] sm:$0xff] %vm289_vm3, %v1509_v59  ;;  %2397 = vmatmul.msk.bf16.gmra.mxu2 %vm889_vm2, %v651_v54  ;;  %v510_v57 = vld [vmem:[%s2857_s4 + $0x2e0] sm:$0xff]  ;;  %v605_v59 = vld [vmem:[%s2857_s4 + $0x5d8] sm:$0xff]  ;;  %v508_v61 = vld [vmem:[%s2857_s4 + $0x2d0] sm:$0xff] }
 0x103   : > { %1235 = vmatmul.bf16.gmra.mxu1 %v650_v58  ;;  %v513_v58 = vld [vmem:[%s2857_s4 + $0x2f8] sm:$0xff] }
 0x104   : > { %v1772_v2 = vmax.f32 %v1708_v0, 0.0  ;;  %v3203_v5 = vpop.f32.mrf.mxu3  ;;  %v511_v0 = vld [vmem:[%s2857_s4 + $0x2e8] sm:$0xff] }
 0x105   : > { %v1365_v4 = vpop.f32.mrf.mxu2 }
 0x106   : > { %1836 = vst.msk [vmem:[%s3096_s25 + $0x40] sm:$0xff] %vm289_vm3, %v1772_v2  ;;  %v1366_v6 = vadd.f32 %v1365_v4, %v1197_v1  ;;  %v1029_v8 = vpop.f32.mrf.mxu0  ;;  %v509_v1 = vld [vmem:[%s2857_s4 + $0x2d8] sm:$0xff]  ;;  %v512_v2 = vld [vmem:[%s2857_s4 + $0x2f0] sm:$0xff] }
 0x108   : > { %v1510_v7 = vadd.f32 %v1366_v6, %v364_v3  ;;  %v1198_v9 = vpop.f32.mrf.mxu1  ;;  %v367_v3 = vld [vmem:[#allocation2 + $0x68] sm:$0xff] }
 0x109   : > { %v1641_v10 = vld [vmem:[#allocation2 + $0x48] sm:$0xff]  ;;  %v1199_v13 = vadd.f32 %v1198_v9, %v1029_v8  ;;  %v657_v8 = vpack.c.bf16 %v513_v58, %v510_v57  ;;  %v704_v9 = vpack.c.bf16 %v608_v60, %v605_v59 }
 0x10a   : > { %v1709_v11 = vadd.f32 %v3074_v30, %v1641_v10  ;;  %1575 = vst.msk [vmem:[#allocation2 + $0x50] sm:$0xff] %vm289_vm3, %v1510_v7  ;;  %v655_v10 = vpack.c.bf16 %v511_v0, %v508_v61 }
 0x10c   : > { %v1773_v20 = vmax.f32 %v1709_v11, 0.0  ;;  %v3217_v26 = vpop.f32.mrf.mxu3  ;;  %v656_v11 = vpack.c.bf16 %v512_v2, %v509_v1  ;;  %v370_v2 = vld [vmem:[#allocation2 + $0x80] sm:$0xff] }
 0x10d   : > { %v1367_v25 = vpop.f32.mrf.mxu2 }
 0x10e   : > { %1837 = vst.msk [vmem:[%s3096_s25 + $0x48] sm:$0xff] %vm289_vm3, %v1773_v20  ;;  %v1368_v27 = vadd.f32 %v1367_v25, %v1199_v13  ;;  %v1032_v36 = vpop.f32.mrf.mxu0 }
 0x110   : > { %v1511_v35 = vadd.f32 %v1368_v27, %v365_v24  ;;  %v1201_v37 = vpop.f32.mrf.mxu1 }
 0x111   : > { %v1642_v39 = vld [vmem:[#allocation2 + $0x50] sm:$0xff]  ;;  %v1202_v42 = vadd.f32 %v1201_v37, %v1032_v36  ;;  %1320 = vmatmul.bf16.gmra.mxu3 %v701_v32  ;;  %1071 = vmatmul.bf16.gmra.mxu0 %v652_v33  ;;  %v519_v36 = vld [vmem:[%s2857_s4 + $0x328] sm:$0xff]  ;;  %v570_v37 = vld [vmem:[%s2857_s4 + $0x4c0] sm:$0xff] }
 0x112   : > { %v1710_v40 = vadd.f32 %v3074_v30, %v1642_v39  ;;  %1576 = vst.msk [vmem:[#allocation2 + $0x58] sm:$0xff] %vm289_vm3, %v1511_v35  ;;  %2398 = vmatmul.msk.bf16.gmra.mxu2 %vm889_vm2, %v654_v31  ;;  %v516_v35 = vld [vmem:[%s2857_s4 + $0x310] sm:$0xff]  ;;  %v573_v39 = vld [vmem:[%s2857_s4 + $0x4d8] sm:$0xff] }
 0x113   : > { %1240 = vmatmul.bf16.gmra.mxu1 %v653_v34 }
 0x114   : > { %v1774_v43 = vmax.f32 %v1710_v40, 0.0  ;;  %v3224_v46 = vpop.f32.mrf.mxu3  ;;  %v514_v40 = vld [vmem:[%s2857_s4 + $0x300] sm:$0xff] }
 0x115   : > { %v1370_v45 = vpop.f32.mrf.mxu2 }
 0x116   : > { %1838 = vst.msk [vmem:[%s3096_s25 + $0x50] sm:$0xff] %vm289_vm3, %v1774_v43  ;;  %v1371_v47 = vadd.f32 %v1370_v45, %v1202_v42  ;;  %v1034_v50 = vpop.f32.mrf.mxu0  ;;  %v517_v43 = vld [vmem:[%s2857_s4 + $0x318] sm:$0xff]  ;;  %v518_v45 = vld [vmem:[%s2857_s4 + $0x320] sm:$0xff] }
 0x118   : > { %v1512_v48 = vadd.f32 %v1371_v47, %v366_v44  ;;  %v1203_v51 = vpop.f32.mrf.mxu1  ;;  %v515_v44 = vld [vmem:[%s2857_s4 + $0x308] sm:$0xff]  ;;  %v369_v47 = vld [vmem:[#allocation2 + $0x78] sm:$0xff] }
 0x119   : > { %v1643_v53 = vld [vmem:[#allocation2 + $0x58] sm:$0xff]  ;;  %v1204_v55 = vadd.f32 %v1203_v51, %v1034_v50  ;;  %v659_v57 = vpack.c.bf16 %v518_v45, %v515_v44 }
 0x11a   : > { %v1711_v54 = vadd.f32 %v3074_v30, %v1643_v53  ;;  %1577 = vst.msk [vmem:[#allocation2 + $0x60] sm:$0xff] %vm289_vm3, %v1512_v48  ;;  %v660_v53 = vpack.c.bf16 %v519_v36, %v516_v35 }
 0x11c   : > { %v1775_v63 = vmax.f32 %v1711_v54, 0.0  ;;  %v3238_v6 = vpop.f32.mrf.mxu3  ;;  %v687_v54 = vpack.c.bf16 %v573_v39, %v570_v37 }
 0x11d   : > { %v1372_v4 = vpop.f32.mrf.mxu2 }
 0x11e   : > { %1839 = vst.msk [vmem:[%s3096_s25 + $0x58] sm:$0xff] %vm289_vm3, %v1775_v63  ;;  %v1373_v7 = vadd.f32 %v1372_v4, %v1204_v55  ;;  %v1037_v14 = vpop.f32.mrf.mxu0  ;;  %v658_v55 = vpack.c.bf16 %v517_v43, %v514_v40 }
 0x120   : > { %v1513_v13 = vadd.f32 %v1373_v7, %v367_v3  ;;  %v1206_v16 = vpop.f32.mrf.mxu1 }
 0x121   : > { %v1644_v17 = vld [vmem:[#allocation2 + $0x60] sm:$0xff]  ;;  %v1207_v19 = vadd.f32 %v1206_v16, %v1037_v14  ;;  %1325 = vmatmul.bf16.gmra.mxu3 %v704_v9  ;;  %1076 = vmatmul.bf16.gmra.mxu0 %v655_v10 }
 0x122   : > { %v1712_v18 = vadd.f32 %v3074_v30, %v1644_v17  ;;  %1578 = vst.msk [vmem:[#allocation2 + $0x68] sm:$0xff] %vm289_vm3, %v1513_v13  ;;  %2399 = vmatmul.msk.bf16.gmra.mxu2 %vm889_vm2, %v657_v8  ;;  %v522_v16 = vld [vmem:[%s2857_s4 + $0x340] sm:$0xff]  ;;  %v525_v17 = vld [vmem:[%s2857_s4 + $0x358] sm:$0xff] }
 0x123   : > { %1245 = vmatmul.bf16.gmra.mxu1 %v656_v11 }
 0x124   : > { %v1776_v20 = vmax.f32 %v1712_v18, 0.0  ;;  %v3245_v23 = vpop.f32.mrf.mxu3  ;;  %v576_v18 = vld [vmem:[%s2857_s4 + $0x4f0] sm:$0xff] }
 0x125   : > { %v1375_v22 = vpop.f32.mrf.mxu2 }
 0x126   : > { %1840 = vst.msk [vmem:[%s3096_s25 + $0x60] sm:$0xff] %vm289_vm3, %v1776_v20  ;;  %v1376_v24 = vadd.f32 %v1375_v22, %v1207_v19  ;;  %v1039_v27 = vpop.f32.mrf.mxu0  ;;  %v579_v19 = vld [vmem:[%s2857_s4 + $0x508] sm:$0xff]  ;;  %v520_v20 = vld [vmem:[%s2857_s4 + $0x330] sm:$0xff] }
 0x127   : > { %v523_v22 = vld [vmem:[%s2857_s4 + $0x348] sm:$0xff]  ;;  %v690_v35 = vpack.c.bf16 %v579_v19, %v576_v18 }
 0x128   : > { %v1514_v25 = vadd.f32 %v1376_v24, %v368_v21  ;;  %v1208_v31 = vpop.f32.mrf.mxu1  ;;  %v521_v24 = vld [vmem:[%s2857_s4 + $0x338] sm:$0xff]  ;;  %v661_v36 = vpack.c.bf16 %v523_v22, %v520_v20 }
 0x129   : > { %v1645_v32 = vld [vmem:[#allocation2 + $0x68] sm:$0xff]  ;;  %v1209_v34 = vadd.f32 %v1208_v31, %v1039_v27 }
 0x12a   : > { %v1713_v33 = vadd.f32 %v3074_v30, %v1645_v32  ;;  %1579 = vst.msk [vmem:[#allocation2 + $0x70] sm:$0xff] %vm289_vm3, %v1514_v25  ;;  %v524_v25 = vld [vmem:[%s2857_s4 + $0x350] sm:$0xff]  ;;  %v371_v27 = vld [vmem:[#allocation2 + $0x88] sm:$0xff] }
 0x12b   : > { %v662_v37 = vpack.c.bf16 %v524_v25, %v521_v24 }
 0x12c   : > { %v1777_v42 = vmax.f32 %v1713_v33, 0.0  ;;  %v3259_v50 = vpop.f32.mrf.mxu3 }
 0x12d   : > { %v1377_v48 = vpop.f32.mrf.mxu2 }
 0x12e   : > { %1841 = vst.msk [vmem:[%s3096_s25 + $0x68] sm:$0xff] %vm289_vm3, %v1777_v42  ;;  %v1378_v51 = vadd.f32 %v1377_v48, %v1209_v34  ;;  %v1042_v59 = vpop.f32.mrf.mxu0  ;;  %v663_v34 = vpack.c.bf16 %v525_v17, %v522_v16  ;;  %v372_v48 = vld [vmem:[#allocation2 + $0x90] sm:$0xff] }
 0x130   : > { %v1515_v58 = vadd.f32 %v1378_v51, %v369_v47  ;;  %v1211_v60 = vpop.f32.mrf.mxu1 }
 0x131   : > { %v1646_v61 = vld [vmem:[#allocation2 + $0x70] sm:$0xff]  ;;  %v1212_v0 = vadd.f32 %v1211_v60, %v1042_v59  ;;  %2409 = vmatmul.msk.bf16.vlgmr.msra.gmra.mxu3 %vm889_vm2, %v687_v54  ;;  %1081 = vmatmul.bf16.gmra.mxu0 %v658_v55 }
 0x132   : > { %v1714_v63 = vadd.f32 %v3074_v30, %v1646_v61  ;;  %1580 = vst.msk [vmem:[#allocation2 + $0x78] sm:$0xff] %vm289_vm3, %v1515_v58  ;;  %2400 = vmatmul.msk.bf16.gmra.mxu2 %vm889_vm2, %v660_v53 }
 0x133   : > { %1250 = vmatmul.bf16.gmra.mxu1 %v659_v57 }
 0x134   : > { %v1778_v1 = vmax.f32 %v1714_v63, 0.0  ;;  %v3267_v4 = vpop.f32.mrf.mxu3  ;;  %v528_v63 = vld [vmem:[%s2857_s4 + $0x370] sm:$0xff] }
 0x135   : > { %v1380_v3 = vpop.f32.mrf.mxu2 }
 0x136   : > { %1842 = vst.msk [vmem:[%s3096_s25 + $0x70] sm:$0xff] %vm289_vm3, %v1778_v1  ;;  %v1381_v7 = vadd.f32 %v1380_v3, %v1212_v0  ;;  %v1044_v9 = vpop.f32.mrf.mxu0  ;;  %v531_v0 = vld [vmem:[%s2857_s4 + $0x388] sm:$0xff]  ;;  %v582_v1 = vld [vmem:[%s2857_s4 + $0x520] sm:$0xff] }
 0x137   : > { %v526_v3 = vld [vmem:[%s2857_s4 + $0x360] sm:$0xff]  ;;  %v666_v17 = vpack.c.bf16 %v531_v0, %v528_v63 }
 0x138   : > { %v1516_v8 = vadd.f32 %v1381_v7, %v370_v2  ;;  %v1213_v10 = vpop.f32.mrf.mxu1  ;;  %v585_v2 = vld [vmem:[%s2857_s4 + $0x538] sm:$0xff] }
 0x139   : > { %v1647_v11 = vld [vmem:[#allocation2 + $0x78] sm:$0xff]  ;;  %v1214_v14 = vadd.f32 %v1213_v10, %v1044_v9  ;;  %v527_v9 = vld [vmem:[%s2857_s4 + $0x368] sm:$0xff]  ;;  %v530_v10 = vld [vmem:[%s2857_s4 + $0x380] sm:$0xff]  ;;  %v693_v18 = vpack.c.bf16 %v585_v2, %v582_v1 }
 0x13a   : > { %v1715_v13 = vadd.f32 %v3074_v30, %v1647_v11  ;;  %1581 = vst.msk [vmem:[#allocation2 + $0x80] sm:$0xff] %vm289_vm3, %v1516_v8  ;;  %v529_v8 = vld [vmem:[%s2857_s4 + $0x378] sm:$0xff]  ;;  %v665_v20 = vpack.c.bf16 %v530_v10, %v527_v9 }
 0x13b   : > { %v373_v11 = vld [vmem:[#allocation2 + $0x98] sm:$0xff]  ;;  %v664_v19 = vpack.c.bf16 %v529_v8, %v526_v3 }
 0x13c   : > { %v1779_v21 = vmax.f32 %v1715_v13, 0.0  ;;  %v3281_v32 = vpop.f32.mrf.mxu3 }
 0x13d   : > { %v1382_v31 = vpop.f32.mrf.mxu2 }
 0x13e   : > { %1843 = vst.msk [vmem:[%s3096_s25 + $0x78] sm:$0xff] %vm289_vm3, %v1779_v21  ;;  %v1383_v33 = vadd.f32 %v1382_v31, %v1214_v14  ;;  %v1047_v40 = vpop.f32.mrf.mxu0 }
 0x140   : > { %v1517_v39 = vadd.f32 %v1383_v33, %v371_v27  ;;  %v1216_v42 = vpop.f32.mrf.mxu1 }
 0x141   : > { %v1648_v43 = vld [vmem:[#allocation2 + $0x80] sm:$0xff]  ;;  %v1217_v45 = vadd.f32 %v1216_v42, %v1047_v40  ;;  %2410 = vmatmul.msk.bf16.gmra.mxu3 %vm889_vm2, %v690_v35  ;;  %1086 = vmatmul.bf16.gmra.mxu0 %v661_v36 }
 0x142   : > { %v1716_v44 = vadd.f32 %v3074_v30, %v1648_v43  ;;  %1582 = vst.msk [vmem:[#allocation2 + $0x88] sm:$0xff] %vm289_vm3, %v1517_v39  ;;  %2401 = vmatmul.msk.bf16.gmra.mxu2 %vm889_vm2, %v663_v34  ;;  %v374_v34 = vld [vmem:[#allocation2 + $0xa0] sm:$0xff] }
 0x143   : > { %1255 = vmatmul.bf16.gmra.mxu1 %v662_v37 }
 0x144   : > { %v1780_v47 = vmax.f32 %v1716_v44, 0.0  ;;  %v3289_v53 = vpop.f32.mrf.mxu3 }
 0x145   : > { %v1385_v51 = vpop.f32.mrf.mxu2 }
 0x146   : > { %1844 = vst.msk [vmem:[%s3096_s25 + $0x80] sm:$0xff] %vm289_vm3, %v1780_v47  ;;  %v1386_v54 = vadd.f32 %v1385_v51, %v1217_v45  ;;  %v1049_v57 = vpop.f32.mrf.mxu0  ;;  %v534_v47 = vld [vmem:[%s2857_s4 + $0x3a0] sm:$0xff]  ;;  %v588_v51 = vld [vmem:[%s2857_s4 + $0x550] sm:$0xff] }
 0x148   : > { %v1518_v55 = vadd.f32 %v1386_v54, %v372_v48  ;;  %v1218_v58 = vpop.f32.mrf.mxu1  ;;  %v537_v48 = vld [vmem:[%s2857_s4 + $0x3b8] sm:$0xff]  ;;  %v591_v54 = vld [vmem:[%s2857_s4 + $0x568] sm:$0xff] }
 0x149   : > { %v1649_v59 = vld [vmem:[#allocation2 + $0x88] sm:$0xff]  ;;  %v1219_v61 = vadd.f32 %v1218_v58, %v1049_v57  ;;  %v669_v2 = vpack.c.bf16 %v537_v48, %v534_v47  ;;  %v696_v3 = vpack.c.bf16 %v591_v54, %v588_v51  ;;  %v542_v47 = vld [vmem:[%s2857_s4 + $0x3e0] sm:$0xff]  ;;  %v377_v48 = vld [vmem:[#allocation2 + $0xb8] sm:$0xff] }
 0x14a   : > { %v1717_v60 = vadd.f32 %v3074_v30, %v1649_v59  ;;  %1583 = vst.msk [vmem:[#allocation2 + $0x90] sm:$0xff] %vm289_vm3, %v1518_v55  ;;  %v532_v55 = vld [vmem:[%s2857_s4 + $0x390] sm:$0xff]  ;;  %v535_v58 = vld [vmem:[%s2857_s4 + $0x3a8] sm:$0xff]  ;;  %v533_v59 = vld [vmem:[%s2857_s4 + $0x398] sm:$0xff] }
 0x14c   : > { %v1781_v7 = vmax.f32 %v1717_v60, 0.0  ;;  %v3303_v14 = vpop.f32.mrf.mxu3  ;;  %v536_v60 = vld [vmem:[%s2857_s4 + $0x3b0] sm:$0xff] }
 0x14d   : > { %v1387_v13 = vpop.f32.mrf.mxu2  ;;  %v668_v8 = vpack.c.bf16 %v536_v60, %v533_v59 }
 0x14e   : > { %1845 = vst.msk [vmem:[%s3096_s25 + $0x88] sm:$0xff] %vm289_vm3, %v1781_v7  ;;  %v1388_v16 = vadd.f32 %v1387_v13, %v1219_v61  ;;  %v1052_v22 = vpop.f32.mrf.mxu0  ;;  %v375_v61 = vld [vmem:[#allocation2 + $0xa8] sm:$0xff]  ;;  %v667_v7 = vpack.c.bf16 %v535_v58, %v532_v55 }
 0x150   : > { %v1519_v21 = vadd.f32 %v1388_v16, %v373_v11  ;;  %v1221_v24 = vpop.f32.mrf.mxu1 }
 0x151   : > { %v1650_v25 = vld [vmem:[#allocation2 + $0x90] sm:$0xff]  ;;  %v1222_v31 = vadd.f32 %v1221_v24, %v1052_v22  ;;  %2411 = vmatmul.msk.bf16.gmra.mxu3 %vm889_vm2, %v693_v18  ;;  %1091 = vmatmul.bf16.gmra.mxu0 %v664_v19 }
 0x152   : > { %v1718_v27 = vadd.f32 %v3074_v30, %v1650_v25  ;;  %1584 = vst.msk [vmem:[#allocation2 + $0x98] sm:$0xff] %vm289_vm3, %v1519_v21  ;;  %2402 = vmatmul.msk.bf16.gmra.mxu2 %vm889_vm2, %v666_v17  ;;  %v376_v19 = vld [vmem:[#allocation2 + $0xb0] sm:$0xff] }
 0x153   : > { %1260 = vmatmul.bf16.gmra.mxu1 %v665_v20 }
 0x154   : > { %v1782_v33 = vmax.f32 %v1718_v27, 0.0  ;;  %v3311_v36 = vpop.f32.mrf.mxu3 }
 0x155   : > { %v1390_v35 = vpop.f32.mrf.mxu2 }
 0x156   : > { %1846 = vst.msk [vmem:[%s3096_s25 + $0x90] sm:$0xff] %vm289_vm3, %v1782_v33  ;;  %v1391_v37 = vadd.f32 %v1390_v35, %v1222_v31  ;;  %v1054_v40 = vpop.f32.mrf.mxu0  ;;  %v540_v35 = vld [vmem:[%s2857_s4 + $0x3d0] sm:$0xff] }
 0x158   : > { %v1520_v39 = vadd.f32 %v1391_v37, %v374_v34  ;;  %v1223_v42 = vpop.f32.mrf.mxu1  ;;  %v543_v37 = vld [vmem:[%s2857_s4 + $0x3e8] sm:$0xff] }
 0x159   : > { %v1651_v43 = vld [vmem:[#allocation2 + $0x98] sm:$0xff]  ;;  %v1224_v45 = vadd.f32 %v1223_v42, %v1054_v40  ;;  %v538_v42 = vld [vmem:[%s2857_s4 + $0x3c0] sm:$0xff] }
 0x15a   : > { %v1719_v44 = vadd.f32 %v3074_v30, %v1651_v43  ;;  %1585 = vst.msk [vmem:[#allocation2 + $0xa0] sm:$0xff] %vm289_vm3, %v1520_v39  ;;  %v594_v39 = vld [vmem:[%s2857_s4 + $0x580] sm:$0xff]  ;;  %v597_v40 = vld [vmem:[%s2857_s4 + $0x598] sm:$0xff] }
 0x15b   : > { %v699_v58 = vpack.c.bf16 %v597_v40, %v594_v39  ;;  %v548_v39 = vld [vmem:[%s2857_s4 + $0x410] sm:$0xff]  ;;  %v379_v40 = vld [vmem:[#allocation2 + $0xc8] sm:$0xff] }
 0x15c   : > { %v1783_v57 = vmax.f32 %v1719_v44, 0.0  ;;  %v3325_v0 = vpop.f32.mrf.mxu3  ;;  %v541_v44 = vld [vmem:[%s2857_s4 + $0x3d8] sm:$0xff] }
 0x15d   : > { %v1392_v63 = vpop.f32.mrf.mxu2  ;;  %v670_v59 = vpack.c.bf16 %v541_v44, %v538_v42 }
 0x15e   : > { %1847 = vst.msk [vmem:[%s3096_s25 + $0x98] sm:$0xff] %vm289_vm3, %v1783_v57  ;;  %v1393_v1 = vadd.f32 %v1392_v63, %v1224_v45  ;;  %v1057_v10 = vpop.f32.mrf.mxu0  ;;  %v539_v45 = vld [vmem:[%s2857_s4 + $0x3c8] sm:$0xff]  ;;  %v672_v57 = vpack.c.bf16 %v543_v37, %v540_v35  ;;  %v545_v37 = vld [vmem:[%s2857_s4 + $0x3f8] sm:$0xff] }
 0x15f   : > { %v671_v60 = vpack.c.bf16 %v542_v47, %v539_v45  ;;  %v547_v35 = vld [vmem:[%s2857_s4 + $0x408] sm:$0xff] }
 0x160   : > { %v1521_v9 = vadd.f32 %v1393_v1, %v375_v61  ;;  %v1226_v11 = vpop.f32.mrf.mxu1 }
 0x161   : > { %v1652_v13 = vld [vmem:[#allocation2 + $0xa0] sm:$0xff]  ;;  %v1227_v17 = vadd.f32 %v1226_v11, %v1057_v10  ;;  %2412 = vmatmul.msk.bf16.gmra.mxu3 %vm889_vm2, %v696_v3  ;;  %1096 = vmatmul.bf16.gmra.mxu0 %v667_v7 }
 0x162   : > { %v1720_v16 = vadd.f32 %v3074_v30, %v1652_v13  ;;  %1586 = vst.msk [vmem:[#allocation2 + $0xa8] sm:$0xff] %vm289_vm3, %v1521_v9  ;;  %2403 = vmatmul.msk.bf16.gmra.mxu2 %vm889_vm2, %v669_v2  ;;  %v378_v9 = vld [vmem:[#allocation2 + $0xc0] sm:$0xff] }
 0x163   : > { %1265 = vmatmul.bf16.gmra.mxu1 %v668_v8 }
 0x164   : > { %v1784_v18 = vmax.f32 %v1720_v16, 0.0  ;;  %v3333_v21 = vpop.f32.mrf.mxu3 }
 0x165   : > { %v1395_v20 = vpop.f32.mrf.mxu2 }
 0x166   : > { %1848 = vst.msk [vmem:[%s3096_s25 + $0xa0] sm:$0xff] %vm289_vm3, %v1784_v18  ;;  %v1396_v22 = vadd.f32 %v1395_v20, %v1227_v17  ;;  %v1059_v25 = vpop.f32.mrf.mxu0 }
 0x168   : > { %v1522_v24 = vadd.f32 %v1396_v22, %v376_v19  ;;  %v1228_v27 = vpop.f32.mrf.mxu1  ;;  %v3362_v19 = vld [vmem:[%s3752_s2] ss:$0 sm:$0xff] }
 0x169   : > { %v1653_v31 = vld [vmem:[#allocation2 + $0xa8] sm:$0xff]  ;;  %v1229_v34 = vadd.f32 %v1228_v27, %v1059_v25  ;;  %v549_v25 = vld [vmem:[%s2857_s4 + $0x418] sm:$0xff]  ;;  %v600_v27 = vld [vmem:[%s2857_s4 + $0x5b0] sm:$0xff] }
 0x16a   : > { %v1721_v33 = vadd.f32 %v3074_v30, %v1653_v31  ;;  %1587 = vst.msk [vmem:[#allocation2 + $0xb0] sm:$0xff] %vm289_vm3, %v1522_v24  ;;  %v546_v24 = vld [vmem:[%s2857_s4 + $0x400] sm:$0xff]  ;;  %v603_v31 = vld [vmem:[%s2857_s4 + $0x5c8] sm:$0xff] }
 0x16b   : > { %v675_v45 = vpack.c.bf16 %v549_v25, %v546_v24  ;;  %v702_v47 = vpack.c.bf16 %v603_v31, %v600_v27  ;;  %v550_v24 = vld [vmem:[%s2857_s4 + $0x420] sm:$0xff]  ;;  %v553_v27 = vld [vmem:[%s2857_s4 + $0x438] sm:$0xff]  ;;  %v551_v31 = vld [vmem:[%s2857_s4 + $0x428] sm:$0xff] }
 0x16c   : > { %v1785_v43 = vmax.f32 %v1721_v33, 0.0  ;;  %v3347_v54 = vpop.f32.mrf.mxu3  ;;  %v544_v33 = vld [vmem:[%s2857_s4 + $0x3f0] sm:$0xff] }
 0x16d   : > { %v1397_v51 = vpop.f32.mrf.mxu2 }
 0x16e   : > { %1849 = vst.msk [vmem:[%s3096_s25 + $0xa8] sm:$0xff] %vm289_vm3, %v1785_v43  ;;  %v1398_v55 = vadd.f32 %v1397_v51, %v1229_v34  ;;  %v1062_v63 = vpop.f32.mrf.mxu0  ;;  %v674_v51 = vpack.c.bf16 %v548_v39, %v545_v37 }
 0x170   : > { %v1523_v61 = vadd.f32 %v1398_v55, %v377_v48  ;;  %v1231_v1 = vpop.f32.mrf.mxu1  ;;  %v673_v48 = vpack.c.bf16 %v547_v35, %v544_v33  ;;  %v554_v33 = vld [vmem:[%s2857_s4 + $0x440] sm:$0xff] }
 0x171   : > { %v1654_v2 = vld [vmem:[#allocation2 + $0xb0] sm:$0xff]  ;;  %v1232_v7 = vadd.f32 %v1231_v1, %v1062_v63  ;;  %2413 = vmatmul.msk.bf16.gmra.mxu3 %vm889_vm2, %v699_v58  ;;  %1101 = vmatmul.bf16.gmra.mxu0 %v670_v59 }
 0x172   : > { %v1722_v3 = vadd.f32 %v3074_v30, %v1654_v2  ;;  %1588 = vst.msk [vmem:[#allocation2 + $0xb8] sm:$0xff] %vm289_vm3, %v1523_v61  ;;  %2404 = vmatmul.msk.bf16.gmra.mxu2 %vm889_vm2, %v672_v57  ;;  %v380_v1 = vld [vmem:[#allocation2 + $0xd0] sm:$0xff] }
 0x173   : > { %1270 = vmatmul.bf16.gmra.mxu1 %v671_v60 }
 0x174   : > { %v1786_v8 = vmax.f32 %v1722_v3, 0.0  ;;  %v3355_v11 = vpop.f32.mrf.mxu3 }
 0x175   : > { %v1400_v10 = vpop.f32.mrf.mxu2 }
 0x176   : > { %1850 = vst.msk [vmem:[%s3096_s25 + $0xb0] sm:$0xff] %vm289_vm3, %v1786_v8  ;;  %v1401_v30 = vadd.f32 %v1400_v10, %v1232_v7  ;;  %v1064_v16 = vpop.f32.mrf.mxu0 }
 0x178   : > { %v1524_v13 = vadd.f32 %v1401_v30, %v378_v9  ;;  %v1233_v17 = vpop.f32.mrf.mxu1 }
 0x179   : > { %v1655_v18 = vld [vmem:[#allocation2 + $0xb8] sm:$0xff]  ;;  %v1234_v22 = vadd.f32 %v1233_v17, %v1064_v16  ;;  %v552_v17 = vld [vmem:[%s2857_s4 + $0x430] sm:$0xff] }
 0x17a   : > { %v1723_v20 = vadd.f32 %v3362_v19, %v1655_v18  ;;  %1589 = vst.msk [vmem:[#allocation2 + $0xc0] sm:$0xff] %vm289_vm3, %v1524_v13  ;;  %v555_v18 = vld [vmem:[%s2857_s4 + $0x448] sm:$0xff] }
 0x17c   : > { %v1787_v34 = vmax.f32 %v1723_v20, 0.0  ;;  %v3374_v43 = vpop.f32.mrf.mxu3  ;;  %v606_v20 = vld [vmem:[%s2857_s4 + $0x5e0] sm:$0xff] }
 0x17d   : > { %v1402_v42 = vpop.f32.mrf.mxu2 }
 0x17e   : > { %1851 = vst.msk [vmem:[%s3096_s25 + $0xb8] sm:$0xff] %vm289_vm3, %v1787_v34  ;;  %v1403_v44 = vadd.f32 %v1402_v42, %v1234_v22  ;;  %v1067_v57 = vpop.f32.mrf.mxu0  ;;  %v609_v22 = vld [vmem:[%s2857_s4 + $0x5f8] sm:$0xff] }
 0x17f   : > { %v381_v34 = vld [vmem:[#allocation2 + $0xd8] sm:$0xff]  ;;  %v705_v42 = vpack.c.bf16 %v609_v22, %v606_v20  ;;  %v559_v20 = vld [vmem:[%s2857_s4 + $0x468] sm:$0xff] }
 0x180   : > { %v1525_v55 = vadd.f32 %v1403_v44, %v379_v40  ;;  %v1236_v58 = vpop.f32.mrf.mxu1  ;;  %v678_v40 = vpack.c.bf16 %v555_v18, %v552_v17  ;;  %v676_v44 = vpack.c.bf16 %v553_v27, %v550_v24  ;;  %v556_v17 = vld [vmem:[%s2857_s4 + $0x450] sm:$0xff]  ;;  %v557_v22 = vld [vmem:[%s2857_s4 + $0x458] sm:$0xff] }
 0x181   : > { %v1656_v59 = vld [vmem:[#allocation2 + $0xc0] sm:$0xff]  ;;  %v1237_v61 = vadd.f32 %v1236_v58, %v1067_v57  ;;  %2414 = vmatmul.msk.bf16.gmra.mxu3 %vm889_vm2, %v702_v47  ;;  %1106 = vmatmul.bf16.gmra.mxu0 %v673_v48  ;;  %v560_v24 = vld [vmem:[%s2857_s4 + $0x470] sm:$0xff] }
 0x182   : > { %v1724_v60 = vadd.f32 %v3362_v19, %v1656_v59  ;;  %1590 = vst.msk [vmem:[#allocation2 + $0xc8] sm:$0xff] %vm289_vm3, %v1525_v55  ;;  %2405 = vmatmul.msk.bf16.gmra.mxu2 %vm889_vm2, %v675_v45  ;;  %v677_v45 = vpack.c.bf16 %v554_v33, %v551_v31 }
 0x183   : > { %1275 = vmatmul.bf16.gmra.mxu1 %v674_v51 }
 0x184   : > { %v1788_v63 = vmax.f32 %v1724_v60, 0.0  ;;  %v3382_v3 = vpop.f32.mrf.mxu3  ;;  %v382_v60 = vld [vmem:[#allocation2 + $0xe0] sm:$0xff] }
 0x185   : > { %v1405_v2 = vpop.f32.mrf.mxu2 }
 0x186   : > { %1852 = vst.msk [vmem:[%s3096_s25 + $0xc0] sm:$0xff] %vm289_vm3, %v1788_v63  ;;  %v1406_v7 = vadd.f32 %v1405_v2, %v1237_v61  ;;  %v1069_v9 = vpop.f32.mrf.mxu0 }
 0x188   : > { %v1526_v8 = vadd.f32 %v1406_v7, %v380_v1  ;;  %v1238_v10 = vpop.f32.mrf.mxu1 }
 0x189   : > { %v1657_v30 = vld [vmem:[#allocation2 + $0xc8] sm:$0xff]  ;;  %v1239_v16 = vadd.f32 %v1238_v10, %v1069_v9 }
 0x18a   : > { %v1725_v13 = vadd.f32 %v3362_v19, %v1657_v30  ;;  %1591 = vst.msk [vmem:[#allocation2 + $0xd0] sm:$0xff] %vm289_vm3, %v1526_v8 }
 0x18c   : > { %v1789_v25 = vmax.f32 %v1725_v13, 0.0  ;;  %v3396_v37 = vpop.f32.mrf.mxu3  ;;  %v558_v13 = vld [vmem:[%s2857_s4 + $0x460] sm:$0xff] }
 0x18d   : > { %v1407_v35 = vpop.f32.mrf.mxu2 }
 0x18e   : > { %1853 = vst.msk [vmem:[%s3096_s25 + $0xc8] sm:$0xff] %vm289_vm3, %v1789_v25  ;;  %v1408_v39 = vadd.f32 %v1407_v35, %v1239_v16  ;;  %v1072_v48 = vpop.f32.mrf.mxu0  ;;  %v561_v16 = vld [vmem:[%s2857_s4 + $0x478] sm:$0xff]  ;;  %v383_v25 = vld [vmem:[#allocation2 + $0xe8] sm:$0xff]  ;;  %v679_v35 = vpack.c.bf16 %v559_v20, %v556_v17 }
 0x190   : > { %v1527_v47 = vadd.f32 %v1408_v39, %v381_v34  ;;  %v1241_v51 = vpop.f32.mrf.mxu1  ;;  %v681_v34 = vpack.c.bf16 %v561_v16, %v558_v13  ;;  %v680_v39 = vpack.c.bf16 %v560_v24, %v557_v22  ;;  %v385_v13 = vld [vmem:[#allocation2 + $0xf8] sm:$0xff] }
 0x191   : > { %v1658_v55 = vld [vmem:[#allocation2 + $0xd0] sm:$0xff]  ;;  %v1242_v58 = vadd.f32 %v1241_v51, %v1072_v48  ;;  %2415 = vmatmul.msk.bf16.gmra.mxu3 %vm889_vm2, %v705_v42  ;;  %1111 = vmatmul.bf16.gmra.mxu0 %v676_v44 }
 0x192   : > { %v1726_v57 = vadd.f32 %v3362_v19, %v1658_v55  ;;  %1592 = vst.msk [vmem:[#allocation2 + $0xd8] sm:$0xff] %vm289_vm3, %v1527_v47  ;;  %2406 = vmatmul.msk.bf16.gmra.mxu2 %vm889_vm2, %v678_v40  ;;  %v384_v55 = vld [vmem:[#allocation2 + $0xf0] sm:$0xff] }
 0x193   : > { %1280 = vmatmul.bf16.gmra.mxu1 %v677_v45 }
 0x194   : > { %v1790_v59 = vmax.f32 %v1726_v57, 0.0  ;;  %v3404_v63 = vpop.f32.mrf.mxu3 }
 0x195   : > { %v1410_v61 = vpop.f32.mrf.mxu2 }
 0x196   : > { %1854 = vst.msk [vmem:[%s3096_s25 + $0xd0] sm:$0xff] %vm289_vm3, %v1790_v59  ;;  %v1411_v1 = vadd.f32 %v1410_v61, %v1242_v58  ;;  %v1074_v7 = vpop.f32.mrf.mxu0 }
 0x198   : > { %v1528_v2 = vadd.f32 %v1411_v1, %v382_v60  ;;  %v1243_v8 = vpop.f32.mrf.mxu1 }
 0x199   : > { %v1659_v9 = vld [vmem:[#allocation2 + $0xd8] sm:$0xff]  ;;  %v1244_v30 = vadd.f32 %v1243_v8, %v1074_v7 }
 0x19a   : > { %v1727_v10 = vadd.f32 %v3362_v19, %v1659_v9  ;;  %1593 = vst.msk [vmem:[#allocation2 + $0xe0] sm:$0xff] %vm289_vm3, %v1528_v2  ;;  %v564_v9 = vld [vmem:[%s2857_s4 + $0x490] sm:$0xff] }
 0x19c   : > { %v1791_v18 = vmax.f32 %v1727_v10, 0.0  ;;  %v3416_v31 = vpop.f32.mrf.mxu3  ;;  %v567_v10 = vld [vmem:[%s2857_s4 + $0x4a8] sm:$0xff] }
 0x19d   : > { %v1412_v27 = vpop.f32.mrf.mxu2  ;;  %v684_v20 = vpack.c.bf16 %v567_v10, %v564_v9 }
 0x19e   : > { %1855 = vst.msk [vmem:[%s3096_s25 + $0xd8] sm:$0xff] %vm289_vm3, %v1791_v18  ;;  %v1413_v33 = vadd.f32 %v1412_v27, %v1244_v30  ;;  %v1077_v42 = vpop.f32.mrf.mxu0 }
 0x1a0   : > { %v1529_v40 = vadd.f32 %v1413_v33, %v383_v25  ;;  %v1246_v44 = vpop.f32.mrf.mxu1 }
 0x1a1   : > { %v1660_v45 = vld [vmem:[#allocation2 + $0xe0] sm:$0xff]  ;;  %v1247_v48 = vadd.f32 %v1246_v44, %v1077_v42  ;;  %1116 = vmatmul.bf16.gmra.mxu0 %v679_v35  ;;  %v1297_v35 = vadd.f32 %v3289_v53, %v3094_v41  ;;  %v404_v44 = vld [vmem:[#allocation2 + $0x190] sm:$0xff]  ;;  %v1299_v53 = vadd.f32 %v3303_v14, %v3122_v62 }
 0x1a2   : > { %v1728_v47 = vadd.f32 %v3362_v19, %v1660_v45  ;;  %1594 = vst.msk [vmem:[#allocation2 + $0xe8] sm:$0xff] %vm289_vm3, %v1529_v40  ;;  %2407 = vmatmul.msk.bf16.gmra.mxu2 %vm889_vm2, %v681_v34  ;;  %v386_v40 = vld [vmem:[#allocation2 + $0x100] sm:$0xff] }
 0x1a3   : > { %1285 = vmatmul.bf16.gmra.mxu1 %v680_v39 }
 0x1a4   : > { %v1792_v51 = vmax.f32 %v1728_v47, 0.0  ;;  %v3423_v58 = vpop.f32.mrf.mxu3 }
 0x1a5   : > { %v1415_v57 = vpop.f32.mrf.mxu2 }
 0x1a6   : > { %1856 = vst.msk [vmem:[%s3096_s25 + $0xe0] sm:$0xff] %vm289_vm3, %v1792_v51  ;;  %v1416_v59 = vadd.f32 %v1415_v57, %v1247_v48  ;;  %v1079_v61 = vpop.f32.mrf.mxu0 }
 0x1a8   : > { %v1530_v60 = vadd.f32 %v1416_v59, %v384_v55  ;;  %v1248_v1 = vpop.f32.mrf.mxu1 }
 0x1a9   : > { %v1661_v2 = vld [vmem:[#allocation2 + $0xe8] sm:$0xff]  ;;  %v1249_v8 = vadd.f32 %v1248_v1, %v1079_v61 }
 0x1aa   : > { %v1729_v7 = vadd.f32 %v3362_v19, %v1661_v2  ;;  %1595 = vst.msk [vmem:[#allocation2 + $0xf0] sm:$0xff] %vm289_vm3, %v1530_v60  ;;  %v387_v2 = vld [vmem:[#allocation2 + $0x108] sm:$0xff] }
 0x1ac   : > { %v1793_v30 = vmax.f32 %v1729_v7, 0.0  ;;  %v3431_v17 = vpop.f32.mrf.mxu3 }
 0x1ad   : > { %v1417_v16 = vpop.f32.mrf.mxu2 }
 0x1ae   : > { %1857 = vst.msk [vmem:[%s3096_s25 + $0xe8] sm:$0xff] %vm289_vm3, %v1793_v30  ;;  %v1418_v18 = vadd.f32 %v1417_v16, %v1249_v8  ;;  %v1082_v24 = vpop.f32.mrf.mxu0  ;;  %v405_v8 = vld [vmem:[#allocation2 + $0x198] sm:$0xff] }
 0x1b0   : > { %v1531_v22 = vadd.f32 %v1418_v18, %v385_v13  ;;  %v1251_v25 = vpop.f32.mrf.mxu1 }
 0x1b1   : > { %v1662_v27 = vld [vmem:[#allocation2 + $0xf0] sm:$0xff]  ;;  %v1252_v34 = vadd.f32 %v1251_v25, %v1082_v24 }
 0x1b2   : > { %v1730_v33 = vadd.f32 %v3362_v19, %v1662_v27  ;;  %1596 = vst.msk [vmem:[#allocation2 + $0xf8] sm:$0xff] %vm289_vm3, %v1531_v22  ;;  %2408 = vmatmul.msk.bf16.gmra.mxu2 %vm889_vm2, %v684_v20  ;;  %v1302_v27 = vadd.f32 %v3311_v36, %v3136_v12 }
 0x1b4   : > { %v1794_v39 = vmax.f32 %v1730_v33, 0.0  ;;  %v1465_v45 = vpop.f32.mrf.mxu3 }
 0x1b5   : > { %v1420_v42 = vpop.f32.mrf.mxu2  ;;  %v1466_v48 = vadd.f32 %v1465_v45, %v1297_v35  ;;  %v388_v35 = vld [vmem:[#allocation2 + $0x110] sm:$0xff] }
 0x1b6   : > { %1858 = vst.msk [vmem:[%s3096_s25 + $0xf0] sm:$0xff] %vm289_vm3, %v1794_v39  ;;  %v1421_v47 = vadd.f32 %v1420_v42, %v1252_v34  ;;  %v1084_v57 = vpop.f32.mrf.mxu0 }
 0x1b7   : > { %v1550_v55 = vadd.f32 %v1466_v48, %v404_v44 }
 0x1b8   : > { %v1532_v51 = vadd.f32 %v1421_v47, %v386_v40  ;;  %v1253_v59 = vpop.f32.mrf.mxu1  ;;  %v406_v40 = vld [vmem:[#allocation2 + $0x1a0] sm:$0xff] }
 0x1b9   : > { %v1663_v60 = vld [vmem:[#allocation2 + $0xf8] sm:$0xff]  ;;  %v1254_v41 = vadd.f32 %v1253_v59, %v1084_v57  ;;  %1615 = vst.msk [vmem:[#allocation2 + $0x190] sm:$0xff] %vm289_vm3, %v1550_v55 }
 0x1ba   : > { %v1731_v61 = vadd.f32 %v3362_v19, %v1663_v60  ;;  %1597 = vst.msk [vmem:[#allocation2 + $0x100] sm:$0xff] %vm289_vm3, %v1532_v51 }
 0x1bc   : > { %v1795_v1 = vmax.f32 %v1731_v61, 0.0  ;;  %v1467_v9 = vpop.f32.mrf.mxu3  ;;  %v1304_v61 = vadd.f32 %v3325_v0, %v3150_v38 }
 0x1bd   : > { %v1422_v7 = vpop.f32.mrf.mxu2  ;;  %v1468_v30 = vadd.f32 %v1467_v9, %v1299_v53 }
 0x1be   : > { %1859 = vst.msk [vmem:[%s3096_s25 + $0xf8] sm:$0xff] %vm289_vm3, %v1795_v1  ;;  %v1423_v10 = vadd.f32 %v1422_v7, %v1254_v41  ;;  %v1087_v18 = vpop.f32.mrf.mxu0  ;;  %v389_v1 = vld [vmem:[#allocation2 + $0x118] sm:$0xff]  ;;  %v407_v7 = vld [vmem:[#allocation2 + $0x1a8] sm:$0xff] }
 0x1bf   : > { %v1551_v16 = vadd.f32 %v1468_v30, %v405_v8 }
 0x1c0   : > { %v1533_v13 = vadd.f32 %v1423_v10, %v387_v2  ;;  %v1256_v20 = vpop.f32.mrf.mxu1  ;;  %v1682_v25 = vld [vmem:[#allocation2 + $0x190] sm:$0xff] }
 0x1c1   : > { %v1664_v22 = vld [vmem:[#allocation2 + $0x100] sm:$0xff]  ;;  %v1257_v62 = vadd.f32 %v1256_v20, %v1087_v18  ;;  %v1750_v14 = vadd.f32 %v3362_v19, %v1682_v25  ;;  %1616 = vst.msk [vmem:[#allocation2 + $0x198] sm:$0xff] %vm289_vm3, %v1551_v16  ;;  %v1307_v25 = vadd.f32 %v3333_v21, %v3161_v56 }
 0x1c2   : > { %v1732_v24 = vadd.f32 %v3362_v19, %v1664_v22  ;;  %1598 = vst.msk [vmem:[#allocation2 + $0x108] sm:$0xff] %vm289_vm3, %v1533_v13 }
 0x1c3   : > { %v1814_v34 = vmax.f32 %v1750_v14, 0.0 }
 0x1c4   : > { %v1796_v33 = vmax.f32 %v1732_v24, 0.0  ;;  %v1470_v42 = vpop.f32.mrf.mxu3 }
 0x1c5   : > { %v1425_v39 = vpop.f32.mrf.mxu2  ;;  %v1471_v45 = vadd.f32 %v1470_v42, %v1302_v27  ;;  %1878 = vst.msk [vmem:[%s3096_s25 + $0x190] sm:$0xff] %vm289_vm3, %v1814_v34  ;;  %v390_v27 = vld [vmem:[#allocation2 + $0x120] sm:$0xff]  ;;  %v408_v34 = vld [vmem:[#allocation2 + $0x1b0] sm:$0xff] }
 0x1c6   : > { %1860 = vst.msk [vmem:[%s3096_s25 + $0x100] sm:$0xff] %vm289_vm3, %v1796_v33  ;;  %v1426_v44 = vadd.f32 %v1425_v39, %v1257_v62  ;;  %v1089_v51 = vpop.f32.mrf.mxu0 }
 0x1c7   : > { %v1552_v48 = vadd.f32 %v1471_v45, %v406_v40 }
 0x1c8   : > { %v1534_v47 = vadd.f32 %v1426_v44, %v388_v35  ;;  %v1258_v55 = vpop.f32.mrf.mxu1  ;;  %v1683_v36 = vld [vmem:[#allocation2 + $0x198] sm:$0xff] }
 0x1c9   : > { %v1665_v57 = vld [vmem:[#allocation2 + $0x108] sm:$0xff]  ;;  %v1259_v59 = vadd.f32 %v1258_v55, %v1089_v51  ;;  %v1751_v60 = vadd.f32 %v3362_v19, %v1683_v36  ;;  %1617 = vst.msk [vmem:[#allocation2 + $0x1a0] sm:$0xff] %vm289_vm3, %v1552_v48 }
 0x1ca   : > { %v1733_v12 = vadd.f32 %v3362_v19, %v1665_v57  ;;  %1599 = vst.msk [vmem:[#allocation2 + $0x110] sm:$0xff] %vm289_vm3, %v1534_v47  ;;  %v1309_v57 = vadd.f32 %v3347_v54, %v3175_v49 }
 0x1cb   : > { %v1815_v53 = vmax.f32 %v1751_v60, 0.0 }
 0x1cc   : > { %v1797_v41 = vmax.f32 %v1733_v12, 0.0  ;;  %v1472_v8 = vpop.f32.mrf.mxu3 }
 0x1cd   : > { %v1427_v2 = vpop.f32.mrf.mxu2  ;;  %v1473_v10 = vadd.f32 %v1472_v8, %v1304_v61  ;;  %1879 = vst.msk [vmem:[%s3096_s25 + $0x198] sm:$0xff] %vm289_vm3, %v1815_v53  ;;  %v409_v61 = vld [vmem:[#allocation2 + $0x1b8] sm:$0xff] }
 0x1ce   : > { %1861 = vst.msk [vmem:[%s3096_s25 + $0x108] sm:$0xff] %vm289_vm3, %v1797_v41  ;;  %v1428_v9 = vadd.f32 %v1427_v2, %v1259_v59  ;;  %v1092_v16 = vpop.f32.mrf.mxu0  ;;  %v391_v59 = vld [vmem:[#allocation2 + $0x128] sm:$0xff] }
 0x1cf   : > { %v1553_v13 = vadd.f32 %v1473_v10, %v407_v7 }
 0x1d0   : > { %v1535_v30 = vadd.f32 %v1428_v9, %v389_v1  ;;  %v1261_v18 = vpop.f32.mrf.mxu1  ;;  %v1684_v0 = vld [vmem:[#allocation2 + $0x1a0] sm:$0xff] }
 0x1d1   : > { %v1666_v20 = vld [vmem:[#allocation2 + $0x110] sm:$0xff]  ;;  %v1262_v22 = vadd.f32 %v1261_v18, %v1092_v16  ;;  %v1752_v24 = vadd.f32 %v3362_v19, %v1684_v0  ;;  %1618 = vst.msk [vmem:[#allocation2 + $0x1a8] sm:$0xff] %vm289_vm3, %v1553_v13  ;;  %v1312_v16 = vadd.f32 %v3355_v11, %v3182_v28 }
 0x1d2   : > { %v1734_v38 = vadd.f32 %v3362_v19, %v1666_v20  ;;  %1600 = vst.msk [vmem:[#allocation2 + $0x118] sm:$0xff] %vm289_vm3, %v1535_v30 }
 0x1d3   : > { %v1816_v14 = vmax.f32 %v1752_v24, 0.0 }
 0x1d4   : > { %v1798_v62 = vmax.f32 %v1734_v38, 0.0  ;;  %v1475_v35 = vpop.f32.mrf.mxu3  ;;  %v392_v38 = vld [vmem:[#allocation2 + $0x130] sm:$0xff] }
 0x1d5   : > { %v1430_v33 = vpop.f32.mrf.mxu2  ;;  %v1476_v40 = vadd.f32 %v1475_v35, %v1307_v25  ;;  %1880 = vst.msk [vmem:[%s3096_s25 + $0x1a0] sm:$0xff] %vm289_vm3, %v1816_v14 }
 0x1d6   : > { %1862 = vst.msk [vmem:[%s3096_s25 + $0x110] sm:$0xff] %vm289_vm3, %v1798_v62  ;;  %v1431_v39 = vadd.f32 %v1430_v33, %v1262_v22  ;;  %v1094_v45 = vpop.f32.mrf.mxu0  ;;  %v410_v22 = vld [vmem:[#allocation2 + $0x1c0] sm:$0xff] }
 0x1d7   : > { %v1554_v44 = vadd.f32 %v1476_v40, %v408_v34 }
 0x1d8   : > { %v1536_v42 = vadd.f32 %v1431_v39, %v390_v27  ;;  %v1263_v47 = vpop.f32.mrf.mxu1  ;;  %v1685_v21 = vld [vmem:[#allocation2 + $0x1a8] sm:$0xff] }
 0x1d9   : > { %v1667_v48 = vld [vmem:[#allocation2 + $0x118] sm:$0xff]  ;;  %v1264_v51 = vadd.f32 %v1263_v47, %v1094_v45  ;;  %v1753_v55 = vadd.f32 %v3362_v19, %v1685_v21  ;;  %1619 = vst.msk [vmem:[#allocation2 + $0x1b0] sm:$0xff] %vm289_vm3, %v1554_v44 }
 0x1da   : > { %v1735_v56 = vadd.f32 %v3362_v19, %v1667_v48  ;;  %1601 = vst.msk [vmem:[#allocation2 + $0x120] sm:$0xff] %vm289_vm3, %v1536_v42  ;;  %v1314_v42 = vadd.f32 %v3374_v43, %v3196_v52  ;;  %v393_v47 = vld [vmem:[#allocation2 + $0x138] sm:$0xff] }
 0x1db   : > { %v1817_v36 = vmax.f32 %v1753_v55, 0.0 }
 0x1dc   : > { %v1799_v12 = vmax.f32 %v1735_v56, 0.0  ;;  %v1477_v41 = vpop.f32.mrf.mxu3  ;;  %v411_v56 = vld [vmem:[#allocation2 + $0x1c8] sm:$0xff] }
 0x1dd   : > { %v1432_v60 = vpop.f32.mrf.mxu2  ;;  %v1478_v1 = vadd.f32 %v1477_v41, %v1309_v57  ;;  %1881 = vst.msk [vmem:[%s3096_s25 + $0x1a8] sm:$0xff] %vm289_vm3, %v1817_v36 }
 0x1de   : > { %1863 = vst.msk [vmem:[%s3096_s25 + $0x118] sm:$0xff] %vm289_vm3, %v1799_v12  ;;  %v1433_v53 = vadd.f32 %v1432_v60, %v1264_v51  ;;  %v1097_v8 = vpop.f32.mrf.mxu0 }
 0x1df   : > { %v1555_v7 = vadd.f32 %v1478_v1, %v409_v61 }
 0x1e0   : > { %v1537_v2 = vadd.f32 %v1433_v53, %v391_v59  ;;  %v1266_v9 = vpop.f32.mrf.mxu1  ;;  %v1686_v54 = vld [vmem:[#allocation2 + $0x1b0] sm:$0xff]  ;;  %v1317_v53 = vadd.f32 %v3382_v3, %v3203_v5 }
 0x1e1   : > { %v1668_v10 = vld [vmem:[#allocation2 + $0x120] sm:$0xff]  ;;  %v1267_v30 = vadd.f32 %v1266_v9, %v1097_v8  ;;  %v1754_v13 = vadd.f32 %v3362_v19, %v1686_v54  ;;  %1620 = vst.msk [vmem:[#allocation2 + $0x1b8] sm:$0xff] %vm289_vm3, %v1555_v7  ;;  %v412_v9 = vld [vmem:[#allocation2 + $0x1d0] sm:$0xff] }
 0x1e2   : > { %v1736_v49 = vadd.f32 %v3362_v19, %v1668_v10  ;;  %1602 = vst.msk [vmem:[#allocation2 + $0x128] sm:$0xff] %vm289_vm3, %v1537_v2  ;;  %v394_v7 = vld [vmem:[#allocation2 + $0x140] sm:$0xff] }
 0x1e3   : > { %v1818_v20 = vmax.f32 %v1754_v13, 0.0 }
 0x1e4   : > { %v1800_v18 = vmax.f32 %v1736_v49, 0.0  ;;  %v1480_v24 = vpop.f32.mrf.mxu3 }
 0x1e5   : > { %v1435_v0 = vpop.f32.mrf.mxu2  ;;  %v1481_v62 = vadd.f32 %v1480_v24, %v1312_v16  ;;  %1882 = vst.msk [vmem:[%s3096_s25 + $0x1b0] sm:$0xff] %vm289_vm3, %v1818_v20 }
 0x1e6   : > { %1864 = vst.msk [vmem:[%s3096_s25 + $0x120] sm:$0xff] %vm289_vm3, %v1800_v18  ;;  %v1436_v25 = vadd.f32 %v1435_v0, %v1267_v30  ;;  %v1099_v33 = vpop.f32.mrf.mxu0 }
 0x1e7   : > { %v1556_v27 = vadd.f32 %v1481_v62, %v410_v22  ;;  %v1319_v22 = vadd.f32 %v3396_v37, %v3217_v26  ;;  %v395_v62 = vld [vmem:[#allocation2 + $0x148] sm:$0xff] }
 0x1e8   : > { %v1538_v14 = vadd.f32 %v1436_v25, %v392_v38  ;;  %v1268_v34 = vpop.f32.mrf.mxu1  ;;  %v1687_v11 = vld [vmem:[#allocation2 + $0x1b8] sm:$0xff] }
 0x1e9   : > { %v1669_v35 = vld [vmem:[#allocation2 + $0x128] sm:$0xff]  ;;  %v1269_v39 = vadd.f32 %v1268_v34, %v1099_v33  ;;  %v1755_v40 = vadd.f32 %v3362_v19, %v1687_v11  ;;  %1621 = vst.msk [vmem:[#allocation2 + $0x1c0] sm:$0xff] %vm289_vm3, %v1556_v27  ;;  %v413_v27 = vld [vmem:[#allocation2 + $0x1d8] sm:$0xff] }
 0x1ea   : > { %v1737_v28 = vadd.f32 %v3362_v19, %v1669_v35  ;;  %1603 = vst.msk [vmem:[#allocation2 + $0x130] sm:$0xff] %vm289_vm3, %v1538_v14 }
 0x1eb   : > { %v1819_v45 = vmax.f32 %v1755_v40, 0.0 }
 0x1ec   : > { %v1801_v44 = vmax.f32 %v1737_v28, 0.0  ;;  %v1482_v21 = vpop.f32.mrf.mxu3 }
 0x1ed   : > { %v1437_v48 = vpop.f32.mrf.mxu2  ;;  %v1483_v55 = vadd.f32 %v1482_v21, %v1314_v42  ;;  %1883 = vst.msk [vmem:[%s3096_s25 + $0x1b8] sm:$0xff] %vm289_vm3, %v1819_v45  ;;  %v396_v21 = vld [vmem:[#allocation2 + $0x150] sm:$0xff] }
 0x1ee   : > { %1865 = vst.msk [vmem:[%s3096_s25 + $0x128] sm:$0xff] %vm289_vm3, %v1801_v44  ;;  %v1438_v51 = vadd.f32 %v1437_v48, %v1269_v39  ;;  %v1102_v36 = vpop.f32.mrf.mxu0 }
 0x1ef   : > { %v1557_v12 = vadd.f32 %v1483_v55, %v411_v56  ;;  %v414_v55 = vld [vmem:[#allocation2 + $0x1e0] sm:$0xff] }
 0x1f0   : > { %v1539_v57 = vadd.f32 %v1438_v51, %v393_v47  ;;  %v1271_v59 = vpop.f32.mrf.mxu1  ;;  %v1688_v43 = vld [vmem:[#allocation2 + $0x1c0] sm:$0xff]  ;;  %v1322_v47 = vadd.f32 %v3404_v63, %v3224_v46 }
 0x1f1   : > { %v1670_v60 = vld [vmem:[#allocation2 + $0x130] sm:$0xff]  ;;  %v1272_v61 = vadd.f32 %v1271_v59, %v1102_v36  ;;  %v1756_v41 = vadd.f32 %v3362_v19, %v1688_v43  ;;  %1622 = vst.msk [vmem:[#allocation2 + $0x1c8] sm:$0xff] %vm289_vm3, %v1557_v12 }
 0x1f2   : > { %v1738_v52 = vadd.f32 %v3362_v19, %v1670_v60  ;;  %1604 = vst.msk [vmem:[#allocation2 + $0x138] sm:$0xff] %vm289_vm3, %v1539_v57 }
 0x1f3   : > { %v1820_v2 = vmax.f32 %v1756_v41, 0.0 }
 0x1f4   : > { %v1802_v1 = vmax.f32 %v1738_v52, 0.0  ;;  %v1485_v10 = vpop.f32.mrf.mxu3 }
 0x1f5   : > { %v1440_v8 = vpop.f32.mrf.mxu2  ;;  %v1486_v54 = vadd.f32 %v1485_v10, %v1317_v53  ;;  %1884 = vst.msk [vmem:[%s3096_s25 + $0x1c0] sm:$0xff] %vm289_vm3, %v1820_v2  ;;  %v415_v10 = vld [vmem:[#allocation2 + $0x1e8] sm:$0xff] }
 0x1f6   : > { %1866 = vst.msk [vmem:[%s3096_s25 + $0x130] sm:$0xff] %vm289_vm3, %v1802_v1  ;;  %v1441_v49 = vadd.f32 %v1440_v8, %v1272_v61  ;;  %v1104_v16 = vpop.f32.mrf.mxu0  ;;  %v1324_v1 = vadd.f32 %v3416_v31, %v3238_v6  ;;  %v397_v8 = vld [vmem:[#allocation2 + $0x158] sm:$0xff] }
 0x1f7   : > { %v1558_v13 = vadd.f32 %v1486_v54, %v412_v9 }
 0x1f8   : > { %v1540_v30 = vadd.f32 %v1441_v49, %v394_v7  ;;  %v1273_v18 = vpop.f32.mrf.mxu1  ;;  %v1689_v3 = vld [vmem:[#allocation2 + $0x1c8] sm:$0xff] }
 0x1f9   : > { %v1671_v20 = vld [vmem:[#allocation2 + $0x138] sm:$0xff]  ;;  %v1274_v38 = vadd.f32 %v1273_v18, %v1104_v16  ;;  %v1757_v0 = vadd.f32 %v3362_v19, %v1689_v3  ;;  %1623 = vst.msk [vmem:[#allocation2 + $0x1d0] sm:$0xff] %vm289_vm3, %v1558_v13 }
 0x1fa   : > { %v1739_v5 = vadd.f32 %v3362_v19, %v1671_v20  ;;  %1605 = vst.msk [vmem:[#allocation2 + $0x140] sm:$0xff] %vm289_vm3, %v1540_v30 }
 0x1fb   : > { %v1821_v25 = vmax.f32 %v1757_v0, 0.0  ;;  %v1327_v0 = vadd.f32 %v3423_v58, %v3245_v23 }
 0x1fc   : > { %v1803_v24 = vmax.f32 %v1739_v5, 0.0  ;;  %v1487_v33 = vpop.f32.mrf.mxu3 }
 0x1fd   : > { %v1442_v14 = vpop.f32.mrf.mxu2  ;;  %v1488_v35 = vadd.f32 %v1487_v33, %v1319_v22  ;;  %1885 = vst.msk [vmem:[%s3096_s25 + $0x1c8] sm:$0xff] %vm289_vm3, %v1821_v25  ;;  %v398_v25 = vld [vmem:[#allocation2 + $0x160] sm:$0xff] }
 0x1fe   : > { %1867 = vst.msk [vmem:[%s3096_s25 + $0x138] sm:$0xff] %vm289_vm3, %v1803_v24  ;;  %v1443_v34 = vadd.f32 %v1442_v14, %v1274_v38  ;;  %v1107_v39 = vpop.f32.mrf.mxu0  ;;  %v416_v14 = vld [vmem:[#allocation2 + $0x1f0] sm:$0xff] }
 0x1ff   : > { %v1559_v11 = vadd.f32 %v1488_v35, %v413_v27 }
 0x200   : > { %v1541_v28 = vadd.f32 %v1443_v34, %v395_v62  ;;  %v1276_v40 = vpop.f32.mrf.mxu1  ;;  %v1690_v37 = vld [vmem:[#allocation2 + $0x1d0] sm:$0xff] }
 0x201   : > { %v1672_v42 = vld [vmem:[#allocation2 + $0x140] sm:$0xff]  ;;  %v1277_v44 = vadd.f32 %v1276_v40, %v1107_v39  ;;  %v1758_v45 = vadd.f32 %v3362_v19, %v1690_v37  ;;  %1624 = vst.msk [vmem:[#allocation2 + $0x1d8] sm:$0xff] %vm289_vm3, %v1559_v11  ;;  %v1329_v37 = vadd.f32 %v3431_v17, %v3259_v50 }
 0x202   : > { %v1740_v26 = vadd.f32 %v3362_v19, %v1672_v42  ;;  %1606 = vst.msk [vmem:[#allocation2 + $0x148] sm:$0xff] %vm289_vm3, %v1541_v28 }
 0x203   : > { %v1822_v56 = vmax.f32 %v1758_v45, 0.0 }
 0x204   : > { %v1804_v48 = vmax.f32 %v1740_v26, 0.0  ;;  %v1490_v57 = vpop.f32.mrf.mxu3 }
 0x205   : > { %v1445_v51 = vpop.f32.mrf.mxu2  ;;  %v1491_v36 = vadd.f32 %v1490_v57, %v1322_v47  ;;  %1886 = vst.msk [vmem:[%s3096_s25 + $0x1d0] sm:$0xff] %vm289_vm3, %v1822_v56  ;;  %v399_v47 = vld [vmem:[#allocation2 + $0x168] sm:$0xff]  ;;  %v417_v56 = vld [vmem:[#allocation2 + $0x1f8] sm:$0xff] }
 0x206   : > { %1868 = vst.msk [vmem:[%s3096_s25 + $0x140] sm:$0xff] %vm289_vm3, %v1804_v48  ;;  %v1446_v12 = vadd.f32 %v1445_v51, %v1277_v44  ;;  %v1109_v52 = vpop.f32.mrf.mxu0 }
 0x207   : > { %v1560_v60 = vadd.f32 %v1491_v36, %v414_v55 }
 0x208   : > { %v1542_v59 = vadd.f32 %v1446_v12, %v396_v21  ;;  %v1278_v43 = vpop.f32.mrf.mxu1  ;;  %v1691_v63 = vld [vmem:[#allocation2 + $0x1d8] sm:$0xff] }
 0x209   : > { %v1673_v61 = vld [vmem:[#allocation2 + $0x148] sm:$0xff]  ;;  %v1279_v41 = vadd.f32 %v1278_v43, %v1109_v52  ;;  %v1759_v53 = vadd.f32 %v3362_v19, %v1691_v63  ;;  %1625 = vst.msk [vmem:[#allocation2 + $0x1e0] sm:$0xff] %vm289_vm3, %v1560_v60  ;;  %v400_v63 = vld [vmem:[#allocation2 + $0x170] sm:$0xff] }
 0x20a   : > { %v1741_v46 = vadd.f32 %v3362_v19, %v1673_v61  ;;  %1607 = vst.msk [vmem:[#allocation2 + $0x150] sm:$0xff] %vm289_vm3, %v1542_v59 }
 0x20b   : > { %v1823_v7 = vmax.f32 %v1759_v53, 0.0 }
 0x20c   : > { %v1805_v2 = vmax.f32 %v1741_v46, 0.0  ;;  %v1492_v49 = vpop.f32.mrf.mxu3 }
 0x20d   : > { %v1447_v9 = vpop.f32.mrf.mxu2  ;;  %v1493_v30 = vadd.f32 %v1492_v49, %v1324_v1  ;;  %1887 = vst.msk [vmem:[%s3096_s25 + $0x1d8] sm:$0xff] %vm289_vm3, %v1823_v7 }
 0x20e   : > { %1869 = vst.msk [vmem:[%s3096_s25 + $0x148] sm:$0xff] %vm289_vm3, %v1805_v2  ;;  %v1448_v54 = vadd.f32 %v1447_v9, %v1279_v41  ;;  %v1112_v18 = vpop.f32.mrf.mxu0 }
 0x20f   : > { %v1561_v16 = vadd.f32 %v1493_v30, %v415_v10 }
 0x210   : > { %v1543_v13 = vadd.f32 %v1448_v54, %v397_v8  ;;  %v1281_v20 = vpop.f32.mrf.mxu1  ;;  %v1692_v31 = vld [vmem:[#allocation2 + $0x1e0] sm:$0xff] }
 0x211   : > { %v1674_v5 = vld [vmem:[#allocation2 + $0x150] sm:$0xff]  ;;  %v1282_v3 = vadd.f32 %v1281_v20, %v1112_v18  ;;  %v1760_v38 = vadd.f32 %v3362_v19, %v1692_v31  ;;  %1626 = vst.msk [vmem:[#allocation2 + $0x1e8] sm:$0xff] %vm289_vm3, %v1561_v16  ;;  %v401_v16 = vld [vmem:[#allocation2 + $0x178] sm:$0xff] }
 0x212   : > { %v1742_v6 = vadd.f32 %v3362_v19, %v1674_v5  ;;  %1608 = vst.msk [vmem:[#allocation2 + $0x158] sm:$0xff] %vm289_vm3, %v1543_v13 }
 0x213   : > { %v1824_v24 = vmax.f32 %v1760_v38, 0.0 }
 0x214   : > { %v1806_v22 = vmax.f32 %v1742_v6, 0.0  ;;  %v1495_v27 = vpop.f32.mrf.mxu3 }
 0x215   : > { %v1450_v62 = vpop.f32.mrf.mxu2  ;;  %v1496_v34 = vadd.f32 %v1495_v27, %v1327_v0  ;;  %1888 = vst.msk [vmem:[%s3096_s25 + $0x1e0] sm:$0xff] %vm289_vm3, %v1824_v24  ;;  %v402_v0 = vld [vmem:[#allocation2 + $0x180] sm:$0xff]  ;;  %v1294_v27 = vadd.f32 %v3281_v32, %v3069_v29 }
 0x216   : > { %1870 = vst.msk [vmem:[%s3096_s25 + $0x150] sm:$0xff] %vm289_vm3, %v1806_v22  ;;  %v1451_v33 = vadd.f32 %v1450_v62, %v1282_v3  ;;  %v1114_v11 = vpop.f32.mrf.mxu0  ;;  %v1292_v3 = vadd.f32 %v3267_v4, %v3043_v15 }
 0x217   : > { %v1562_v28 = vadd.f32 %v1496_v34, %v416_v14  ;;  %v403_v34 = vld [vmem:[#allocation2 + $0x188] sm:$0xff] }
 0x218   : > { %v1544_v35 = vadd.f32 %v1451_v33, %v398_v25  ;;  %v1283_v39 = vpop.f32.mrf.mxu1  ;;  %v1693_v58 = vld [vmem:[#allocation2 + $0x1e8] sm:$0xff] }
 0x219   : > { %v1675_v40 = vld [vmem:[#allocation2 + $0x158] sm:$0xff]  ;;  %v1284_v42 = vadd.f32 %v1283_v39, %v1114_v11  ;;  %v1761_v26 = vadd.f32 %v3362_v19, %v1693_v58  ;;  %1627 = vst.msk [vmem:[#allocation2 + $0x1f0] sm:$0xff] %vm289_vm3, %v1562_v28 }
 0x21a   : > { %v1743_v23 = vadd.f32 %v3362_v19, %v1675_v40  ;;  %1609 = vst.msk [vmem:[#allocation2 + $0x160] sm:$0xff] %vm289_vm3, %v1544_v35 }
 0x21b   : > { %v1825_v45 = vmax.f32 %v1761_v26, 0.0 }
 0x21c   : > { %v1807_v44 = vmax.f32 %v1743_v23, 0.0  ;;  %v1497_v21 = vpop.f32.mrf.mxu3 }
 0x21d   : > { %v1452_v48 = vpop.f32.mrf.mxu2  ;;  %v1498_v55 = vadd.f32 %v1497_v21, %v1329_v37  ;;  %1889 = vst.msk [vmem:[%s3096_s25 + $0x1e8] sm:$0xff] %vm289_vm3, %v1825_v45 }
 0x21e   : > { %1871 = vst.msk [vmem:[%s3096_s25 + $0x158] sm:$0xff] %vm289_vm3, %v1807_v44  ;;  %v1453_v51 = vadd.f32 %v1452_v48, %v1284_v42  ;;  %v1117_v36 = vpop.f32.mrf.mxu0 }
 0x21f   : > { %v1563_v12 = vadd.f32 %v1498_v55, %v417_v56 }
 0x220   : > { %v1545_v57 = vadd.f32 %v1453_v51, %v399_v47  ;;  %v1286_v59 = vpop.f32.mrf.mxu1  ;;  %v1694_v17 = vld [vmem:[#allocation2 + $0x1f0] sm:$0xff] }
 0x221   : > { %v1676_v60 = vld [vmem:[#allocation2 + $0x160] sm:$0xff]  ;;  %v1287_v52 = vadd.f32 %v1286_v59, %v1117_v36  ;;  %v1762_v43 = vadd.f32 %v3362_v19, %v1694_v17  ;;  %1628 = vst.msk [vmem:[#allocation2 + $0x1f8] sm:$0xff] %vm289_vm3, %v1563_v12 }
 0x222   : > { %v1744_v50 = vadd.f32 %v3362_v19, %v1676_v60  ;;  %1610 = vst.msk [vmem:[#allocation2 + $0x168] sm:$0xff] %vm289_vm3, %v1545_v57 }
 0x223   : > { %v1826_v46 = vmax.f32 %v1762_v43, 0.0 }
 0x224   : > { %v1808_v61 = vmax.f32 %v1744_v50, 0.0 }
 0x225   : > { %v1455_v41 = vpop.f32.mrf.mxu2  ;;  %1890 = vst.msk [vmem:[%s3096_s25 + $0x1f0] sm:$0xff] %vm289_vm3, %v1826_v46 }
 0x226   : > { %1872 = vst.msk [vmem:[%s3096_s25 + $0x160] sm:$0xff] %vm289_vm3, %v1808_v61  ;;  %v1456_v53 = vadd.f32 %v1455_v41, %v1287_v52  ;;  %v1119_v2 = vpop.f32.mrf.mxu0 }
 0x228   : > { %v1546_v1 = vadd.f32 %v1456_v53, %v400_v63  ;;  %v1288_v7 = vpop.f32.mrf.mxu1  ;;  %v1695_v10 = vld [vmem:[#allocation2 + $0x1f8] sm:$0xff] }
 0x229   : > { %v1677_v8 = vld [vmem:[#allocation2 + $0x168] sm:$0xff]  ;;  %v1289_v49 = vadd.f32 %v1288_v7, %v1119_v2  ;;  %v1763_v54 = vadd.f32 %v3362_v19, %v1695_v10 }
 0x22a   : > { %v1745_v9 = vadd.f32 %v3362_v19, %v1677_v8  ;;  %1611 = vst.msk [vmem:[#allocation2 + $0x170] sm:$0xff] %vm289_vm3, %v1546_v1 }
 0x22b   : > { %v1827_v13 = vmax.f32 %v1763_v54, 0.0 }
 0x22c   : > { %v1809_v30 = vmax.f32 %v1745_v9, 0.0 }
 0x22d   : > { %v1457_v18 = vpop.f32.mrf.mxu2  ;;  %1891 = vst.msk [vmem:[%s3096_s25 + $0x1f8] sm:$0xff] %vm289_vm3, %v1827_v13 }
 0x22e   : > { %1873 = vst.msk [vmem:[%s3096_s25 + $0x168] sm:$0xff] %vm289_vm3, %v1809_v30  ;;  %v1458_v20 = vadd.f32 %v1457_v18, %v1289_v49 }
 0x230   : > { %v1547_v5 = vadd.f32 %v1458_v20, %v401_v16 }
 0x231   : > { %v1678_v6 = vld [vmem:[#allocation2 + $0x170] sm:$0xff] }
 0x232   : > { %v1746_v31 = vadd.f32 %v3362_v19, %v1678_v6  ;;  %1612 = vst.msk [vmem:[#allocation2 + $0x178] sm:$0xff] %vm289_vm3, %v1547_v5 }
 0x234   : > { %v1810_v38 = vmax.f32 %v1746_v31, 0.0 }
 0x235   : > { %v1460_v22 = vpop.f32.mrf.mxu2 }
 0x236   : > { %1874 = vst.msk [vmem:[%s3096_s25 + $0x170] sm:$0xff] %vm289_vm3, %v1810_v38  ;;  %v1461_v24 = vadd.f32 %v1460_v22, %v1292_v3 }
 0x238   : > { %v1548_v25 = vadd.f32 %v1461_v24, %v402_v0 }
 0x239   : > { %v1679_v62 = vld [vmem:[#allocation2 + $0x178] sm:$0xff] }
 0x23a   : > { %v1747_v14 = vadd.f32 %v3362_v19, %v1679_v62  ;;  %1613 = vst.msk [vmem:[#allocation2 + $0x180] sm:$0xff] %vm289_vm3, %v1548_v25 }
 0x23c   : > { %v1811_v33 = vmax.f32 %v1747_v14, 0.0 }
 0x23d   : > { %v1462_v15 = vpop.f32.mrf.mxu2 }
 0x23e   : > { %1875 = vst.msk [vmem:[%s3096_s25 + $0x178] sm:$0xff] %vm289_vm3, %v1811_v33  ;;  %v1463_v4 = vadd.f32 %v1462_v15, %v1294_v27 }
 0x240   : > { %v1549_v35 = vadd.f32 %v1463_v4, %v403_v34 }
 0x241   : > { %v1680_v28 = vld [vmem:[#allocation2 + $0x180] sm:$0xff] }
 0x242   : > { %v1748_v11 = vadd.f32 %v3362_v19, %v1680_v28  ;;  %1614 = vst.msk [vmem:[#allocation2 + $0x188] sm:$0xff] %vm289_vm3, %v1549_v35 }
 0x244   : > { %v1812_v39 = vmax.f32 %v1748_v11, 0.0 }
 0x246   : > { %1876 = vst.msk [vmem:[%s3096_s25 + $0x180] sm:$0xff] %vm289_vm3, %v1812_v39 }
 0x249   : > { %v1681_v40 = vld [vmem:[#allocation2 + $0x188] sm:$0xff] }
 0x24a   : > { %v1749_v23 = vadd.f32 %v3362_v19, %v1681_v40  ;;  %1898 = sbr.rel (!%p2749_p3) target bundleno = 655 (0x28f), region = 44 }
 0x24c   : > { %v1813_v58 = vmax.f32 %v1749_v23, 0.0 }
 0x24e   : > { %1877 = vst.msk [vmem:[%s3096_s25 + $0x188] sm:$0xff] %vm289_vm3, %v1813_v58 }
 0x24f   : > { %s3767_s28 = smov (!%p1901_p9, %s1900_s28), 64 }
 0x250   : > { %s2418_s6 = sshll.u32 %s3767_s28, 3 }
 0x251   : > { %p2421_p10 = scmp.eq.s32.totalorder %s2418_s6, 0 }
 0x252   : > { %s3616_s7 = sshrl.u32 (!%p2421_p10), %s3767_s28, 5 }
 0x253   : > { %1910 = sbr.rel (%p2421_p10) target bundleno = 655 (0x28f), region = 48  ;;  %p2422_p11 = scmp.le.s32.totalorder (!%p2421_p10), %s3616_s7, 0 }
 0x258   : > { %2209 = sbr.rel (%p2422_p11) target bundleno = 638 (0x27e), region = 130  ;;  %s3755_s14 = smov (!%p2422_p11), %s3610_s5 }
 0x259   : > { %s3756_s20 = smov (!%p2422_p11), %s3096_s25  ;;  %s3625_s21 = smov (!%p2422_p11), 0  }
 0x25a   : > { %s3627_s8 = smov (!%p2422_p11), 0  }
 0x25d LB: >> { %v2035_v29 = vld [vmem:[%s2669_s20] sm:$0xff]  ;;  %v2037_v32 = vld [vmem:[%s2669_s20 + $0x8] sm:$0xff]  ;;  %v2039_v19 = vld [vmem:[%s2669_s20 + $0x10] sm:$0xff]  ;;  %s2099_s9 = sadd.s32 1, %s2673_s21  ;;  %s2029_s8 = sadd.s32 1, %s2677_s8   ;;  %s2677_s8 = sphi %s3627_s8, %s2029_s8   ;;  %s2673_s21 = sphi %s3625_s21, %s3759_s21   ;;  %s2669_s20 = sphi %s3756_s20, %s3758_s20   ;;  %s2665_s14 = sphi %s3755_s14, %s3757_s14  }
 0x25e   : >> { %2036 = vst [vmem:[%s2665_s14] sm:$0xff] %v2035_v29  ;;  %v2041_v42 = vld [vmem:[%s2669_s20 + $0x18] sm:$0xff]  ;;  %p2100_p12 = scmp.ge.s32.totalorder %s2099_s9, %s3616_s7  ;;  %v2043_v26 = vld [vmem:[%s2669_s20 + $0x20] sm:$0xff]  ;;  %v2045_v37 = vld [vmem:[%s2669_s20 + $0x28] sm:$0xff]  ;;  %p2028_p13 = scmp.ge.s32.totalorder %s2029_s8, %s3616_s7 }
 0x25f   : >> { %2038 = vst [vmem:[%s2665_s14 + $0x8] sm:$0xff] %v2037_v32  ;;  %v2047_v44 = vld [vmem:[%s2669_s20 + $0x30] sm:$0xff]  ;;  %v2049_v45 = vld [vmem:[%s2669_s20 + $0x38] sm:$0xff]  ;;  %v2051_v47 = vld [vmem:[%s2669_s20 + $0x40] sm:$0xff] }
 0x260   : >> { %2040 = vst [vmem:[%s2665_s14 + $0x10] sm:$0xff] %v2039_v19  ;;  %s3769_s9 = smov (%p2100_p12, %s2099_s9), 0  ;;  %v2053_v48 = vld [vmem:[%s2669_s20 + $0x48] sm:$0xff]  ;;  %v2055_v56 = vld [vmem:[%s2669_s20 + $0x50] sm:$0xff]  ;;  %v2057_v21 = vld [vmem:[%s2669_s20 + $0x58] sm:$0xff] }
 0x261   : >> { %2042 = vst [vmem:[%s2665_s14 + $0x18] sm:$0xff] %v2041_v42  ;;  %s2423_s10 = sshll.u32 %s3769_s9, 8  ;;  %v2059_v51 = vld [vmem:[%s2669_s20 + $0x60] sm:$0xff]  ;;  %v2061_v55 = vld [vmem:[%s2669_s20 + $0x68] sm:$0xff]  ;;  %v2063_v57 = vld [vmem:[%s2669_s20 + $0x70] sm:$0xff]  ;;  %s3759_s21 = smov %s3769_s9 }
 0x262   : >> { %2044 = vst [vmem:[%s2665_s14 + $0x20] sm:$0xff] %v2043_v26  ;;  %s3659_s11 = scalar_lea.vmem %s3096_s25, %s2423_s10 [#allocation3]   ;;  %s3662_s17 = scalar_lea.vmem %s3610_s5, %s2423_s10   ;;  %v2065_v12 = vld [vmem:[%s2669_s20 + $0x78] sm:$0xff]  ;;  %v2067_v36 = vld [vmem:[%s2669_s20 + $0x80] sm:$0xff]  ;;  %v2069_v59 = vld [vmem:[%s2669_s20 + $0x88] sm:$0xff] }
 0x263   : >> { %2046 = vst [vmem:[%s2665_s14 + $0x28] sm:$0xff] %v2045_v37  ;;  %v2071_v60 = vld [vmem:[%s2669_s20 + $0x90] sm:$0xff]  ;;  %v2073_v50 = vld [vmem:[%s2669_s20 + $0x98] sm:$0xff]  ;;  %v2075_v17 = vld [vmem:[%s2669_s20 + $0xa0] sm:$0xff] }
 0x264   : >> { %2048 = vst [vmem:[%s2665_s14 + $0x30] sm:$0xff] %v2047_v44  ;;  %v2077_v52 = vld [vmem:[%s2669_s20 + $0xa8] sm:$0xff]  ;;  %v2079_v43 = vld [vmem:[%s2669_s20 + $0xb0] sm:$0xff]  ;;  %v2081_v61 = vld [vmem:[%s2669_s20 + $0xb8] sm:$0xff] }
 0x265   : >> { %2050 = vst [vmem:[%s2665_s14 + $0x38] sm:$0xff] %v2049_v45  ;;  %v2083_v46 = vld [vmem:[%s2669_s20 + $0xc0] sm:$0xff]  ;;  %v2085_v63 = vld [vmem:[%s2669_s20 + $0xc8] sm:$0xff]  ;;  %v2087_v41 = vld [vmem:[%s2669_s20 + $0xd0] sm:$0xff] }
 0x266   : >> { %2052 = vst [vmem:[%s2665_s14 + $0x40] sm:$0xff] %v2051_v47  ;;  %v2089_v53 = vld [vmem:[%s2669_s20 + $0xd8] sm:$0xff]  ;;  %v2091_v1 = vld [vmem:[%s2669_s20 + $0xe0] sm:$0xff]  ;;  %v2093_v2 = vld [vmem:[%s2669_s20 + $0xe8] sm:$0xff] }
 0x267   : >> { %2054 = vst [vmem:[%s2665_s14 + $0x48] sm:$0xff] %v2053_v48  ;;  %v2095_v7 = vld [vmem:[%s2669_s20 + $0xf0] sm:$0xff]  ;;  %v2097_v8 = vld [vmem:[%s2669_s20 + $0xf8] sm:$0xff]  ;;  %s3758_s20 = smov %s3659_s11 }
 0x268   : >> { %2056 = vst [vmem:[%s2665_s14 + $0x50] sm:$0xff] %v2055_v56 }
 0x269   : >> { %2058 = vst [vmem:[%s2665_s14 + $0x58] sm:$0xff] %v2057_v21 }
 0x26a   : >> { %2060 = vst [vmem:[%s2665_s14 + $0x60] sm:$0xff] %v2059_v51 }
 0x26b   : >> { %2062 = vst [vmem:[%s2665_s14 + $0x68] sm:$0xff] %v2061_v55 }
 0x26c   : >> { %2064 = vst [vmem:[%s2665_s14 + $0x70] sm:$0xff] %v2063_v57 }
 0x26d   : >> { %2066 = vst [vmem:[%s2665_s14 + $0x78] sm:$0xff] %v2065_v12 }
 0x26e   : >> { %2068 = vst [vmem:[%s2665_s14 + $0x80] sm:$0xff] %v2067_v36 }
 0x26f   : >> { %2070 = vst [vmem:[%s2665_s14 + $0x88] sm:$0xff] %v2069_v59 }
 0x270   : >> { %2072 = vst [vmem:[%s2665_s14 + $0x90] sm:$0xff] %v2071_v60 }
 0x271   : >> { %2074 = vst [vmem:[%s2665_s14 + $0x98] sm:$0xff] %v2073_v50 }
 0x272   : >> { %2076 = vst [vmem:[%s2665_s14 + $0xa0] sm:$0xff] %v2075_v17 }
 0x273   : >> { %2078 = vst [vmem:[%s2665_s14 + $0xa8] sm:$0xff] %v2077_v52 }
 0x274   : >> { %2080 = vst [vmem:[%s2665_s14 + $0xb0] sm:$0xff] %v2079_v43 }
 0x275   : >> { %2082 = vst [vmem:[%s2665_s14 + $0xb8] sm:$0xff] %v2081_v61 }
 0x276   : >> { %2084 = vst [vmem:[%s2665_s14 + $0xc0] sm:$0xff] %v2083_v46 }
 0x277   : >> { %2086 = vst [vmem:[%s2665_s14 + $0xc8] sm:$0xff] %v2085_v63 }
 0x278   : >> { %2088 = vst [vmem:[%s2665_s14 + $0xd0] sm:$0xff] %v2087_v41 }
 0x279   : >> { %2090 = vst [vmem:[%s2665_s14 + $0xd8] sm:$0xff] %v2089_v53  ;;  %2031 = sbr.rel (!%p2028_p13) target bundleno = 605 (0x25d), region = 136 }
 0x27a   : >> { %2092 = vst [vmem:[%s2665_s14 + $0xe0] sm:$0xff] %v2091_v1 }
 0x27b   : >> { %2094 = vst [vmem:[%s2665_s14 + $0xe8] sm:$0xff] %v2093_v2 }
 0x27c   : >> { %2096 = vst [vmem:[%s2665_s14 + $0xf0] sm:$0xff] %v2095_v7 }
 0x27d   : >> { %2098 = vst [vmem:[%s2665_s14 + $0xf8] sm:$0xff] %v2097_v8  ;;  %s3757_s14 = smov %s3662_s17 }
 0x27e PF: > { %s3727_s19 = sand.u32 31, %s3767_s28   ;;  %s2457_s23 = sshll.u32 %s3616_s7, 8 }
 0x27f   : > { %s2110_s24 = scalar_lea.vmem %s3096_s25, %s2457_s23 [#allocation3]   ;;  %s2112_s12 = scalar_lea.vmem %s3610_s5, %s2457_s23  }
 0x280   : > { %p2428_p0 = scmp.le.s32.totalorder %s3727_s19, 0 }
 0x281   : > { %s2679_s26 = smov (!%p2428_p0), %s2112_s12   ;;  %s2683_s27 = smov (!%p2428_p0), %s2110_s24  }
 0x282   : > { %2223 = sbr.rel (%p2428_p0) target bundleno = 655 (0x28f), region = 141  ;;  %s2687_s29 = smov (!%p2428_p0), 0  }
 0x283   : > { %s2691_s30 = smov (!%p2428_p0), 0  }
 0x287 LB: >> { %v2122_v9 = vld [vmem:[%s2685_s27] sm:$0xff]  ;;  %s2124_s28 = sadd.s32 1, %s2689_s29  ;;  %s2116_s30 = sadd.s32 1, %s2693_s30   ;;  %s2693_s30 = sphi %s2691_s30, %s2116_s30   ;;  %s2689_s29 = sphi %s2687_s29, %s2688_s29   ;;  %s2685_s27 = sphi %s2683_s27, %s2129_s27   ;;  %s2681_s26 = sphi %s2679_s26, %s2130_s26  }
 0x288   : >> { %2123 = vst [vmem:[%s2681_s26] sm:$0xff] %v2122_v9  ;;  %p2125_p1 = scmp.ge.s32.totalorder %s2124_s28, %s3727_s19  ;;  %p2115_p2 = scmp.ge.s32.totalorder %s2116_s30, %s3727_s19 }
 0x28a   : >> { %s3771_s28 = smov (%p2125_p1, %s2124_s28), 0  ;;  %2118 = sbr.rel (!%p2115_p2) target bundleno = 647 (0x287), region = 147 }
 0x28b   : >> { %s2429_s25 = sshll.u32 %s3771_s28, 3  ;;  %s2688_s29 = smov %s3771_s28  }
 0x28c   : >> { %s2129_s27 = scalar_lea.vmem %s2110_s24, %s2429_s25 [#allocation3]   ;;  %s2130_s26 = scalar_lea.vmem %s2112_s12, %s2429_s25  }
 0x28f PF: > { %s13_s16 = sadd.s32 1, %s2661_s16   ;;  %s3760_s12 = smov %s2649_s13 }
 0x290   : > { %p10_p3 = scmp.ge.s32.totalorder %s13_s16, 6   ;;  %s3761_s13 = smov %s2758_s22 }
 0x291   : > { %s3762_s14 = smov %s2657_s15  ;;  %s3763_s15 = smov %s3765_s18 }
 0x292   :  { %12 = sbr.rel (!%p10_p3) target bundleno = 3 (0x3), region = 158 }

// kernel: model_forward.10
= control target key start
LH: loop header
LB: loop body
LE: loop exit
PB: predicated region body
PF: predicated region fallthrough
CT: control target
= control target key end

     0   :  { %vm119_vm0 = vcmask 1040384   ;;  %s377_s0 = inlined_call_operand.vmem [shape: f32[9,49,128], index: 0, kind: input, shape index: {}]   ;;  %s378_s1 = inlined_call_operand.vmem [shape: f32[49,128], index: 1, kind: output, shape index: {}]  }
   0x1   :  { %v8_v0 = vld [vmem:[%s377_s0] sm:$0xff]  ;;  %v15_v1 = vld [vmem:[%s377_s0 + $0x38] sm:$0xff]  ;;  %v22_v2 = vld [vmem:[%s377_s0 + $0x70] sm:$0xff] }
   0x2   :  { %v71_v3 = vmax.f32 %v8_v0, %v15_v1  ;;  %v29_v4 = vld [vmem:[%s377_s0 + $0xa8] sm:$0xff]  ;;  %v16_v7 = vld [vmem:[%s377_s0 + $0x40] sm:$0xff]  ;;  %v23_v8 = vld [vmem:[%s377_s0 + $0x78] sm:$0xff] }
   0x3   :  { %v9_v6 = vld [vmem:[%s377_s0 + $0x8] sm:$0xff]  ;;  %v36_v9 = vld [vmem:[%s377_s0 + $0xe0] sm:$0xff]  ;;  %v43_v11 = vld [vmem:[%s377_s0 + $0x118] sm:$0xff] }
   0x4   :  { %v72_v5 = vmax.f32 %v71_v3, %v22_v2  ;;  %v79_v10 = vmax.f32 %v9_v6, %v16_v7  ;;  %v30_v13 = vld [vmem:[%s377_s0 + $0xb0] sm:$0xff]  ;;  %v17_v16 = vld [vmem:[%s377_s0 + $0x48] sm:$0xff]  ;;  %v24_v17 = vld [vmem:[%s377_s0 + $0x80] sm:$0xff] }
   0x5   :  { %v10_v15 = vld [vmem:[%s377_s0 + $0x10] sm:$0xff]  ;;  %v37_v19 = vld [vmem:[%s377_s0 + $0xe8] sm:$0xff]  ;;  %v44_v22 = vld [vmem:[%s377_s0 + $0x120] sm:$0xff] }
   0x6   :  { %v73_v12 = vmax.f32 %v72_v5, %v29_v4  ;;  %v80_v14 = vmax.f32 %v79_v10, %v23_v8  ;;  %v87_v20 = vmax.f32 %v10_v15, %v17_v16  ;;  %v50_v21 = vld [vmem:[%s377_s0 + $0x150] sm:$0xff]  ;;  %v31_v24 = vld [vmem:[%s377_s0 + $0xb8] sm:$0xff]  ;;  %v25_v29 = vld [vmem:[%s377_s0 + $0x88] sm:$0xff] }
   0x7   :  { %v11_v27 = vld [vmem:[%s377_s0 + $0x18] sm:$0xff]  ;;  %v18_v28 = vld [vmem:[%s377_s0 + $0x50] sm:$0xff]  ;;  %v57_v30 = vld [vmem:[%s377_s0 + $0x188] sm:$0xff] }
   0x8   :  { %v74_v18 = vmax.f32 %v73_v12, %v36_v9  ;;  %v81_v23 = vmax.f32 %v80_v14, %v30_v13  ;;  %v88_v26 = vmax.f32 %v87_v20, %v24_v17  ;;  %v64_v31 = vld [vmem:[%s377_s0 + $0x1c0] sm:$0xff]  ;;  %v38_v33 = vld [vmem:[%s377_s0 + $0xf0] sm:$0xff]  ;;  %v95_v34 = vmax.f32 %v11_v27, %v18_v28  ;;  %v51_v36 = vld [vmem:[%s377_s0 + $0x158] sm:$0xff] }
   0x9   :  { %v45_v37 = vld [vmem:[%s377_s0 + $0x128] sm:$0xff]  ;;  %v32_v39 = vld [vmem:[%s377_s0 + $0xc0] sm:$0xff]  ;;  %v19_v43 = vld [vmem:[%s377_s0 + $0x58] sm:$0xff] }
   0xa   :  { %v75_v25 = vmax.f32 %v74_v18, %v43_v11  ;;  %v82_v32 = vmax.f32 %v81_v23, %v37_v19  ;;  %v89_v38 = vmax.f32 %v88_v26, %v31_v24  ;;  %v96_v41 = vmax.f32 %v95_v34, %v25_v29  ;;  %v12_v42 = vld [vmem:[%s377_s0 + $0x20] sm:$0xff]  ;;  %v26_v44 = vld [vmem:[%s377_s0 + $0x90] sm:$0xff]  ;;  %v65_v47 = vld [vmem:[%s377_s0 + $0x1c8] sm:$0xff] }
   0xb   :  { %v58_v46 = vld [vmem:[%s377_s0 + $0x190] sm:$0xff]  ;;  %v39_v49 = vld [vmem:[%s377_s0 + $0xf8] sm:$0xff]  ;;  %v103_v50 = vmax.f32 %v12_v42, %v19_v43  ;;  %v52_v52 = vld [vmem:[%s377_s0 + $0x160] sm:$0xff] }
   0xc   :  { %v76_v35 = vmax.f32 %v75_v25, %v50_v21  ;;  %v83_v40 = vmax.f32 %v82_v32, %v44_v22  ;;  %v90_v48 = vmax.f32 %v89_v38, %v38_v33  ;;  %v46_v53 = vld [vmem:[%s377_s0 + $0x130] sm:$0xff]  ;;  %v97_v54 = vmax.f32 %v96_v41, %v32_v39  ;;  %v33_v55 = vld [vmem:[%s377_s0 + $0xc8] sm:$0xff]  ;;  %v20_v60 = vld [vmem:[%s377_s0 + $0x60] sm:$0xff] }
   0xd   :  { %v104_v58 = vmax.f32 %v103_v50, %v26_v44  ;;  %v13_v59 = vld [vmem:[%s377_s0 + $0x28] sm:$0xff]  ;;  %v27_v61 = vld [vmem:[%s377_s0 + $0x98] sm:$0xff]  ;;  %v66_v0 = vld [vmem:[%s377_s0 + $0x1d0] sm:$0xff] }
   0xe   :  { %v77_v45 = vmax.f32 %v76_v35, %v57_v30  ;;  %v84_v51 = vmax.f32 %v83_v40, %v51_v36  ;;  %v91_v57 = vmax.f32 %v90_v48, %v45_v37  ;;  %v59_v63 = vld [vmem:[%s377_s0 + $0x198] sm:$0xff]  ;;  %v98_v1 = vmax.f32 %v97_v54, %v39_v49  ;;  %v40_v2 = vld [vmem:[%s377_s0 + $0x100] sm:$0xff]  ;;  %v53_v5 = vld [vmem:[%s377_s0 + $0x168] sm:$0xff] }
   0xf   :  { %v111_v3 = vmax.f32 %v13_v59, %v20_v60  ;;  %v47_v6 = vld [vmem:[%s377_s0 + $0x138] sm:$0xff]  ;;  %v105_v7 = vmax.f32 %v104_v58, %v33_v55  ;;  %v34_v8 = vld [vmem:[%s377_s0 + $0xd0] sm:$0xff]  ;;  %v21_v13 = vld [vmem:[%s377_s0 + $0x68] sm:$0x1] }
  0x10   :  { %v78_v56 = vmax.f32 %v77_v45, %v64_v31  ;;  %v85_v62 = vmax.f32 %v84_v51, %v58_v46  ;;  %v92_v4 = vmax.f32 %v91_v57, %v52_v52  ;;  %v99_v10 = vmax.f32 %v98_v1, %v46_v53  ;;  %v14_v12 = vld [vmem:[%s377_s0 + $0x30] sm:$0x1]  ;;  %v28_v14 = vld [vmem:[%s377_s0 + $0xa0] sm:$0x1]  ;;  %v41_v18 = vld [vmem:[%s377_s0 + $0x108] sm:$0xff] }
  0x11   :  { %v112_v11 = vmax.f32 %v111_v3, %v27_v61  ;;  %v60_v16 = vld [vmem:[%s377_s0 + $0x1a0] sm:$0xff]  ;;  %v106_v17 = vmax.f32 %v105_v7, %v40_v2  ;;  %v54_v20 = vld [vmem:[%s377_s0 + $0x170] sm:$0xff]  ;;  %v35_v22 = vld [vmem:[%s377_s0 + $0xd8] sm:$0x1]  ;;  %v120_v23 = vsel %vm119_vm0, %v14_v12, -inf  ;;  %v121_v28 = vsel %vm119_vm0, %v21_v13, -inf }
  0x12   :  { %137 = vst [vmem:[%s378_s1] sm:$0xff] %v78_v56  ;;  %v86_v9 = vmax.f32 %v85_v62, %v65_v47  ;;  %v93_v15 = vmax.f32 %v92_v4, %v59_v63  ;;  %v100_v19 = vmax.f32 %v99_v10, %v53_v5  ;;  %v67_v25 = vld [vmem:[%s377_s0 + $0x1d8] sm:$0xff]  ;;  %v48_v27 = vld [vmem:[%s377_s0 + $0x140] sm:$0xff]  ;;  %v123_v29 = vsel %vm119_vm0, %v28_v14, -inf  ;;  %v61_v31 = vld [vmem:[%s377_s0 + $0x1a8] sm:$0xff] }
  0x13   :  { %v113_v21 = vmax.f32 %v112_v11, %v34_v8  ;;  %v107_v26 = vmax.f32 %v106_v17, %v47_v6  ;;  %v42_v33 = vld [vmem:[%s377_s0 + $0x110] sm:$0x1]  ;;  %v122_v34 = vmax.f32 %v120_v23, %v121_v28  ;;  %v55_v36 = vld [vmem:[%s377_s0 + $0x178] sm:$0xff]  ;;  %v125_v37 = vsel %vm119_vm0, %v35_v22, -inf  ;;  %v68_v39 = vld [vmem:[%s377_s0 + $0x1e0] sm:$0xff] }
  0x14   :  { %138 = vst [vmem:[%s378_s1 + $0x8] sm:$0xff] %v86_v9  ;;  %v94_v24 = vmax.f32 %v93_v15, %v66_v0  ;;  %v101_v30 = vmax.f32 %v100_v19, %v60_v16  ;;  %v49_v41 = vld [vmem:[%s377_s0 + $0x148] sm:$0x1]  ;;  %v62_v44 = vld [vmem:[%s377_s0 + $0x1b0] sm:$0xff]  ;;  %v127_v45 = vsel %vm119_vm0, %v42_v33, -inf }
  0x15   :  { %v114_v32 = vmax.f32 %v113_v21, %v41_v18  ;;  %v108_v35 = vmax.f32 %v107_v26, %v54_v20  ;;  %v124_v42 = vmax.f32 %v122_v34, %v123_v29  ;;  %v56_v47 = vld [vmem:[%s377_s0 + $0x180] sm:$0x1]  ;;  %v69_v50 = vld [vmem:[%s377_s0 + $0x1e8] sm:$0xff]  ;;  %v129_v51 = vsel %vm119_vm0, %v49_v41, -inf  ;;  %v63_v53 = vld [vmem:[%s377_s0 + $0x1b8] sm:$0x1] }
  0x16   :  { %139 = vst [vmem:[%s378_s1 + $0x10] sm:$0xff] %v94_v24  ;;  %v102_v38 = vmax.f32 %v101_v30, %v67_v25  ;;  %v131_v55 = vsel %vm119_vm0, %v56_v47, -inf  ;;  %v70_v57 = vld [vmem:[%s377_s0 + $0x1f0] sm:$0x1]  ;;  %v133_v59 = vsel %vm119_vm0, %v63_v53, -inf }
  0x17   :  { %v115_v40 = vmax.f32 %v114_v32, %v48_v27  ;;  %v109_v43 = vmax.f32 %v108_v35, %v61_v31  ;;  %v126_v48 = vmax.f32 %v124_v42, %v125_v37  ;;  %v135_v61 = vsel %vm119_vm0, %v70_v57, -inf }
  0x18   :  { %140 = vst [vmem:[%s378_s1 + $0x18] sm:$0xff] %v102_v38 }
  0x19   :  { %v116_v46 = vmax.f32 %v115_v40, %v55_v36  ;;  %v110_v49 = vmax.f32 %v109_v43, %v68_v39  ;;  %v128_v54 = vmax.f32 %v126_v48, %v127_v45 }
  0x1b   :  { %v117_v52 = vmax.f32 %v116_v46, %v62_v44  ;;  %141 = vst [vmem:[%s378_s1 + $0x20] sm:$0xff] %v110_v49  ;;  %v130_v58 = vmax.f32 %v128_v54, %v129_v51 }
  0x1d   :  { %v118_v56 = vmax.f32 %v117_v52, %v69_v50  ;;  %v132_v60 = vmax.f32 %v130_v58, %v131_v55 }
  0x1f   :  { %142 = vst [vmem:[%s378_s1 + $0x28] sm:$0xff] %v118_v56  ;;  %v134_v62 = vmax.f32 %v132_v60, %v133_v59 }
  0x21   :  { %v136_v63 = vmax.f32 %v134_v62, %v135_v61 }
  0x23   :  { %143 = vst [vmem:[%s378_s1 + $0x30] sm:$0x1] %v136_v63 }

// kernel: model_forward.11
= control target key start
LH: loop header
LB: loop body
LE: loop exit
PB: predicated region body
PF: predicated region fallthrough
CT: control target
= control target key end

     0   :  { %vm614_vm0 = vcmask 130048   ;;  %vm19_vm1 = vcmask 261120   ;;  %s2882_s1 = inlined_call_operand.vmem [shape: bf16[400,32], index: 1, kind: input, shape index: {}]   ;;  %s2883_s0 = inlined_call_operand.vmem [shape: f32[392,400], index: 0, kind: input, shape index: {}]   ;;  %s2884_s2 = inlined_call_operand.vmem [shape: f32[1,32], index: 2, kind: input, shape index: {}]   ;;  %s2885_s3 = inlined_call_operand.vmem [shape: f32[392,32], index: 3, kind: output, shape index: {}]  }
   0x1   :  { %v1660_v0 = vld [vmem:[%s2882_s1 + $0x38] sm:$0xff]  ;;  %v1659_v3 = vld [vmem:[%s2882_s1 + $0x30] sm:$0xff]  ;;  %v1658_v6 = vld [vmem:[%s2882_s1 + $0x28] sm:$0xff] }
   0x2   :  { %v1668_v1 = vld [vmem:[%s2882_s1 + $0x78] sm:$0xff]  ;;  %690 = vmatpush.bf16.msra.mxu0 %v1660_v0  ;;  %v1667_v4 = vld [vmem:[%s2882_s1 + $0x70] sm:$0xff]  ;;  %v1666_v7 = vld [vmem:[%s2882_s1 + $0x68] sm:$0xff] }
   0x3   :  { %v1676_v2 = vld [vmem:[%s2882_s1 + $0xb8] sm:$0xff]  ;;  %823 = vmatpush.bf16.msra.mxu1 %v1668_v1  ;;  %v1675_v5 = vld [vmem:[%s2882_s1 + $0xb0] sm:$0xff]  ;;  %v1677_v8 = vld [vmem:[%s2882_s1 + $0xc0] sm:$0xff] }
   0x4   :  { %956 = vmatpush.bf16.msra.mxu2 %v1676_v2  ;;  %v1674_v9 = vld [vmem:[%s2882_s1 + $0xa8] sm:$0xff]  ;;  %v121_v10 = vld [vmem:[%s2883_s0 + $0x18] sm:$0xff]  ;;  %1096 = vmatpush.bf16.msra.mxu3 %v1677_v8  ;;  %v1657_v13 = vld [vmem:[%s2882_s1 + $0x20] sm:$0xff] }
   0x5   :  { %v125_v11 = vld [vmem:[%s2883_s0 + $0x38] sm:$0xff]  ;;  %v1665_v14 = vld [vmem:[%s2882_s1 + $0x60] sm:$0xff]  ;;  %v1655_v19 = vld [vmem:[%s2882_s1 + $0x10] sm:$0xff] }
   0x6   :  { %691 = vmatpush.bf16.msra.mxu0 %v1659_v3  ;;  %v317_v12 = vpack.c.bf16 %v125_v11, %v121_v10  ;;  %v1673_v15 = vld [vmem:[%s2882_s1 + $0xa0] sm:$0xff]  ;;  %v1656_v16 = vld [vmem:[%s2882_s1 + $0x18] sm:$0xff]  ;;  %v1663_v20 = vld [vmem:[%s2882_s1 + $0x50] sm:$0xff] }
   0x7   :  { %824 = vmatpush.bf16.msra.mxu1 %v1667_v4  ;;  %v1664_v17 = vld [vmem:[%s2882_s1 + $0x58] sm:$0xff]  ;;  %v1671_v21 = vld [vmem:[%s2882_s1 + $0x90] sm:$0xff]  ;;  %v1654_v24 = vld [vmem:[%s2882_s1 + $0x8] sm:$0xff] }
   0x8   :  { %957 = vmatpush.bf16.msra.mxu2 %v1675_v5  ;;  %1628 = vmatmul.msk.bf16.vlgmr.msra.gmra.mxu3 %vm614_vm0, %v317_v12  ;;  %v1672_v18 = vld [vmem:[%s2882_s1 + $0x98] sm:$0xff]  ;;  %v1662_v25 = vld [vmem:[%s2882_s1 + $0x48] sm:$0xff]  ;;  %v1653_v28 = vld [vmem:[%s2882_s1] sm:$0xff] }
   0x9   :  { %v129_v22 = vld [vmem:[%s2883_s0 + $0x58] sm:$0xff]  ;;  %v1670_v26 = vld [vmem:[%s2882_s1 + $0x88] sm:$0xff]  ;;  %v1661_v29 = vld [vmem:[%s2882_s1 + $0x40] sm:$0xff] }
   0xa   :  { %692 = vmatpush.bf16.msra.mxu0 %v1658_v6  ;;  %v133_v23 = vld [vmem:[%s2883_s0 + $0x78] sm:$0xff]  ;;  %v118_v30 = vld [vmem:[%s2883_s0] sm:$0xff]  ;;  %v119_v32 = vld [vmem:[%s2883_s0 + $0x8] sm:$0xff] }
   0xb   :  { %825 = vmatpush.bf16.msra.mxu1 %v1666_v7  ;;  %v321_v27 = vpack.c.bf16 %v133_v23, %v129_v22  ;;  %v122_v31 = vld [vmem:[%s2883_s0 + $0x20] sm:$0xff]  ;;  %v123_v33 = vld [vmem:[%s2883_s0 + $0x28] sm:$0xff]  ;;  %v120_v35 = vld [vmem:[%s2883_s0 + $0x10] sm:$0xff] }
   0xc   :  { %958 = vmatpush.bf16.msra.mxu2 %v1674_v9  ;;  %v1669_v34 = vld [vmem:[%s2882_s1 + $0x80] sm:$0xff]  ;;  %v124_v36 = vld [vmem:[%s2883_s0 + $0x30] sm:$0xff]  ;;  %v314_v37 = vpack.c.bf16 %v122_v31, %v118_v30  ;;  %v315_v38 = vpack.c.bf16 %v123_v33, %v119_v32  ;;  %v137_v40 = vld [vmem:[%s2883_s0 + $0x98] sm:$0xff] }
   0xd   :  { %v316_v39 = vpack.c.bf16 %v124_v36, %v120_v35  ;;  %v141_v41 = vld [vmem:[%s2883_s0 + $0xb8] sm:$0xff]  ;;  %v126_v43 = vld [vmem:[%s2883_s0 + $0x40] sm:$0xff]  ;;  %v127_v45 = vld [vmem:[%s2883_s0 + $0x48] sm:$0xff] }
   0xe   :  { %693 = vmatpush.bf16.msra.mxu0 %v1657_v13  ;;  %v325_v42 = vpack.c.bf16 %v141_v41, %v137_v40  ;;  %v130_v44 = vld [vmem:[%s2883_s0 + $0x60] sm:$0xff]  ;;  %v131_v46 = vld [vmem:[%s2883_s0 + $0x68] sm:$0xff]  ;;  %v128_v47 = vld [vmem:[%s2883_s0 + $0x50] sm:$0xff] }
   0xf   :  { %826 = vmatpush.bf16.msra.mxu1 %v1665_v14  ;;  %v132_v48 = vld [vmem:[%s2883_s0 + $0x70] sm:$0xff]  ;;  %v318_v49 = vpack.c.bf16 %v130_v44, %v126_v43  ;;  %v319_v50 = vpack.c.bf16 %v131_v46, %v127_v45  ;;  %v145_v52 = vld [vmem:[%s2883_s0 + $0xd8] sm:$0xff]  ;;  %v134_v55 = vld [vmem:[%s2883_s0 + $0x80] sm:$0xff] }
  0x10   :  { %959 = vmatpush.bf16.msra.mxu2 %v1673_v15  ;;  %v320_v51 = vpack.c.bf16 %v132_v48, %v128_v47  ;;  %v149_v53 = vld [vmem:[%s2883_s0 + $0xf8] sm:$0xff]  ;;  %v138_v56 = vld [vmem:[%s2883_s0 + $0xa0] sm:$0xff]  ;;  %v135_v57 = vld [vmem:[%s2883_s0 + $0x88] sm:$0xff]  ;;  %v1681_v48 = vmov 0.0  }
  0x11   :  { %v329_v54 = vpack.c.bf16 %v149_v53, %v145_v52  ;;  %v139_v58 = vld [vmem:[%s2883_s0 + $0xa8] sm:$0xff]  ;;  %v136_v59 = vld [vmem:[%s2883_s0 + $0x90] sm:$0xff]  ;;  %v322_v61 = vpack.c.bf16 %v138_v56, %v134_v55  ;;  %v153_v0 = vld [vmem:[%s2883_s0 + $0x118] sm:$0xff]  ;;  %20 = vst.msk [vmem:[#allocation2] sm:$0xff] %vm19_vm1, %v1681_v48 }
  0x12   :  { %694 = vmatpush.bf16.msra.mxu0 %v1656_v16  ;;  %v140_v60 = vld [vmem:[%s2883_s0 + $0xb0] sm:$0xff]  ;;  %v323_v62 = vpack.c.bf16 %v139_v58, %v135_v57  ;;  %v157_v1 = vld [vmem:[%s2883_s0 + $0x138] sm:$0xff]  ;;  %v142_v3 = vld [vmem:[%s2883_s0 + $0xc0] sm:$0xff]  ;;  %21 = vst.msk [vmem:[#allocation2 + $0x8] sm:$0xff] %vm19_vm1, %v1681_v48 }
  0x13   :  { %827 = vmatpush.bf16.msra.mxu1 %v1664_v17  ;;  %v324_v63 = vpack.c.bf16 %v140_v60, %v136_v59  ;;  %v333_v2 = vpack.c.bf16 %v157_v1, %v153_v0  ;;  %v146_v4 = vld [vmem:[%s2883_s0 + $0xe0] sm:$0xff]  ;;  %v143_v5 = vld [vmem:[%s2883_s0 + $0xc8] sm:$0xff]  ;;  %v144_v7 = vld [vmem:[%s2883_s0 + $0xd0] sm:$0xff]  ;;  %22 = vst.msk [vmem:[#allocation2 + $0x10] sm:$0xff] %vm19_vm1, %v1681_v48 }
  0x14   :  { %960 = vmatpush.bf16.msra.mxu2 %v1672_v18  ;;  %v147_v6 = vld [vmem:[%s2883_s0 + $0xe8] sm:$0xff]  ;;  %v148_v8 = vld [vmem:[%s2883_s0 + $0xf0] sm:$0xff]  ;;  %v326_v9 = vpack.c.bf16 %v146_v4, %v142_v3  ;;  %v161_v12 = vld [vmem:[%s2883_s0 + $0x158] sm:$0xff]  ;;  %23 = vst.msk [vmem:[#allocation2 + $0x18] sm:$0xff] %vm19_vm1, %v1681_v48 }
  0x15   :  { %v327_v10 = vpack.c.bf16 %v147_v6, %v143_v5  ;;  %v328_v11 = vpack.c.bf16 %v148_v8, %v144_v7  ;;  %v165_v13 = vld [vmem:[%s2883_s0 + $0x178] sm:$0xff]  ;;  %v150_v15 = vld [vmem:[%s2883_s0 + $0x100] sm:$0xff]  ;;  %v151_v17 = vld [vmem:[%s2883_s0 + $0x108] sm:$0xff]  ;;  %24 = vst.msk [vmem:[#allocation2 + $0x20] sm:$0xff] %vm19_vm1, %v1681_v48 }
  0x16   :  { %695 = vmatpush.bf16.msra.mxu0 %v1655_v19  ;;  %v337_v14 = vpack.c.bf16 %v165_v13, %v161_v12  ;;  %v154_v16 = vld [vmem:[%s2883_s0 + $0x120] sm:$0xff]  ;;  %v155_v18 = vld [vmem:[%s2883_s0 + $0x128] sm:$0xff]  ;;  %v152_v19 = vld [vmem:[%s2883_s0 + $0x110] sm:$0xff]  ;;  %25 = vst.msk [vmem:[#allocation2 + $0x28] sm:$0xff] %vm19_vm1, %v1681_v48 }
  0x17   :  { %828 = vmatpush.bf16.msra.mxu1 %v1663_v20  ;;  %v156_v20 = vld [vmem:[%s2883_s0 + $0x130] sm:$0xff]  ;;  %v331_v22 = vpack.c.bf16 %v155_v18, %v151_v17  ;;  %v163_v30 = vld [vmem:[%s2883_s0 + $0x168] sm:$0xff]  ;;  %v177_v36 = vld [vmem:[%s2883_s0 + $0x1d8] sm:$0xff]  ;;  %26 = vst.msk [vmem:[#allocation2 + $0x30] sm:$0xff] %vm19_vm1, %v1681_v48 }
  0x18   :  { %961 = vmatpush.bf16.msra.mxu2 %v1671_v21  ;;  %1629 = vmatmul.msk.bf16.gmra.mxu3 %vm614_vm0, %v321_v27  ;;  %v330_v21 = vpack.c.bf16 %v154_v16, %v150_v15  ;;  %v332_v23 = vpack.c.bf16 %v156_v20, %v152_v19  ;;  %v158_v27 = vld [vmem:[%s2883_s0 + $0x140] sm:$0xff]  ;;  %v160_v31 = vld [vmem:[%s2883_s0 + $0x150] sm:$0xff]  ;;  %v167_v41 = vld [vmem:[%s2883_s0 + $0x188] sm:$0xff]  ;;  %27 = vst.msk [vmem:[#allocation2 + $0x38] sm:$0xff] %vm19_vm1, %v1681_v48 }
  0x19   :  { %v164_v32 = vld [vmem:[%s2883_s0 + $0x170] sm:$0xff]  ;;  %v170_v40 = vld [vmem:[%s2883_s0 + $0x1a0] sm:$0xff]  ;;  %v179_v55 = vld [vmem:[%s2883_s0 + $0x1e8] sm:$0xff]  ;;  %28 = vst.msk [vmem:[#allocation2 + $0x40] sm:$0xff] %vm19_vm1, %v1681_v48 }
  0x1a   :  { %696 = vmatpush.bf16.msra.mxu0 %v1654_v24  ;;  %v169_v24 = vld [vmem:[%s2883_s0 + $0x198] sm:$0xff]  ;;  %v336_v35 = vpack.c.bf16 %v164_v32, %v160_v31  ;;  %v168_v43 = vld [vmem:[%s2883_s0 + $0x190] sm:$0xff]  ;;  %v174_v52 = vld [vmem:[%s2883_s0 + $0x1c0] sm:$0xff]  ;;  %29 = vst.msk [vmem:[#allocation2 + $0x48] sm:$0xff] %vm19_vm1, %v1681_v48 }
  0x1b   :  { %829 = vmatpush.bf16.msra.mxu1 %v1662_v25  ;;  %v173_v25 = vld [vmem:[%s2883_s0 + $0x1b8] sm:$0xff]  ;;  %v172_v44 = vld [vmem:[%s2883_s0 + $0x1b0] sm:$0xff]  ;;  %v178_v53 = vld [vmem:[%s2883_s0 + $0x1e0] sm:$0xff]  ;;  %30 = vst.msk [vmem:[#allocation2 + $0x50] sm:$0xff] %vm19_vm1, %v1681_v48 }
  0x1c   :  { %962 = vmatpush.bf16.msra.mxu2 %v1670_v26  ;;  %v341_v26 = vpack.c.bf16 %v173_v25, %v169_v24  ;;  %v340_v47 = vpack.c.bf16 %v172_v44, %v168_v43  ;;  %v176_v56 = vld [vmem:[%s2883_s0 + $0x1d0] sm:$0xff]  ;;  %v342_v58 = vpack.c.bf16 %v178_v53, %v174_v52  ;;  %31 = vst.msk [vmem:[#allocation2 + $0x58] sm:$0xff] %vm19_vm1, %v1681_v48  ;;  %v186_v3 = vld [vmem:[%s2883_s0 + $0x220] sm:$0xff]  ;;  %v183_v4 = vld [vmem:[%s2883_s0 + $0x208] sm:$0xff] }
  0x1d   :  { %v180_v57 = vld [vmem:[%s2883_s0 + $0x1f0] sm:$0xff]  ;;  %32 = vst.msk [vmem:[#allocation2 + $0x60] sm:$0xff] %vm19_vm1, %v1681_v48  ;;  %v187_v5 = vld [vmem:[%s2883_s0 + $0x228] sm:$0xff]  ;;  %v201_v15 = vld [vmem:[%s2883_s0 + $0x298] sm:$0xff] }
  0x1e   :  { %697 = vmatpush.bf16.msra.mxu0 %v1653_v28  ;;  %v162_v28 = vld [vmem:[%s2883_s0 + $0x160] sm:$0xff]  ;;  %v344_v60 = vpack.c.bf16 %v180_v57, %v176_v56  ;;  %33 = vst.msk [vmem:[#allocation2 + $0x68] sm:$0xff] %vm19_vm1, %v1681_v48  ;;  %v184_v6 = vld [vmem:[%s2883_s0 + $0x210] sm:$0xff]  ;;  %v205_v16 = vld [vmem:[%s2883_s0 + $0x2b8] sm:$0xff] }
  0x1f   :  { %830 = vmatpush.bf16.msra.mxu1 %v1661_v29  ;;  %v159_v29 = vld [vmem:[%s2883_s0 + $0x148] sm:$0xff]  ;;  %v334_v33 = vpack.c.bf16 %v162_v28, %v158_v27  ;;  %34 = vst.msk [vmem:[#allocation2 + $0x70] sm:$0xff] %vm19_vm1, %v1681_v48  ;;  %v188_v7 = vld [vmem:[%s2883_s0 + $0x230] sm:$0xff]  ;;  %v190_v25 = vld [vmem:[%s2883_s0 + $0x240] sm:$0xff] }
  0x20   :  { %963 = vmatpush.bf16.msra.mxu2 %v1669_v34  ;;  %v335_v34 = vpack.c.bf16 %v163_v30, %v159_v29  ;;  %35 = vst.msk [vmem:[#allocation2 + $0x78] sm:$0xff] %vm19_vm1, %v1681_v48  ;;  %v348_v12 = vpack.c.bf16 %v188_v7, %v184_v6  ;;  %v194_v27 = vld [vmem:[%s2883_s0 + $0x260] sm:$0xff]  ;;  %v191_v28 = vld [vmem:[%s2883_s0 + $0x248] sm:$0xff]  ;;  %v192_v30 = vld [vmem:[%s2883_s0 + $0x250] sm:$0xff] }
  0x21   :  { %698 = vmatmul.bf16.vlgmr.msra.gmra.mxu0 %v314_v37  ;;  %v181_v37 = vld [vmem:[%s2883_s0 + $0x1f8] sm:$0xff]  ;;  %36 = vst.msk [vmem:[#allocation2 + $0x80] sm:$0xff] %vm19_vm1, %v1681_v48  ;;  %v195_v29 = vld [vmem:[%s2883_s0 + $0x268] sm:$0xff]  ;;  %v196_v31 = vld [vmem:[%s2883_s0 + $0x270] sm:$0xff] }
  0x22   :  { %831 = vmatmul.bf16.vlgmr.msra.gmra.mxu1 %v315_v38  ;;  %v345_v38 = vpack.c.bf16 %v181_v37, %v177_v36  ;;  %37 = vst.msk [vmem:[#allocation2 + $0x88] sm:$0xff] %vm19_vm1, %v1681_v48  ;;  %v71_v56 = vld [vmem:[#allocation2 + $0x10] sm:$0xff] }
  0x23   :  { %964 = vmatmul.bf16.vlgmr.msra.gmra.mxu2 %v316_v39  ;;  %v166_v39 = vld [vmem:[%s2883_s0 + $0x180] sm:$0xff]  ;;  %38 = vst.msk [vmem:[#allocation2 + $0x90] sm:$0xff] %vm19_vm1, %v1681_v48 }
  0x24   :  { %v338_v45 = vpack.c.bf16 %v170_v40, %v166_v39  ;;  %39 = vst.msk [vmem:[#allocation2 + $0x98] sm:$0xff] %vm19_vm1, %v1681_v48  ;;  %v352_v39 = vpack.c.bf16 %v196_v31, %v192_v30  ;;  %v70_v40 = vld [vmem:[#allocation2 + $0x8] sm:$0xff]  ;;  %v206_v31 = vld [vmem:[%s2883_s0 + $0x2c0] sm:$0xff] }
  0x25   :  { %40 = vst.msk [vmem:[#allocation2 + $0xa0] sm:$0xff] %vm19_vm1, %v1681_v48 }
  0x26   :  { %41 = vst.msk [vmem:[#allocation2 + $0xa8] sm:$0xff] %vm19_vm1, %v1681_v48 }
  0x27   :  { %42 = vst.msk [vmem:[#allocation2 + $0xb0] sm:$0xff] %vm19_vm1, %v1681_v48 }
  0x28   :  { %1630 = vmatmul.msk.bf16.gmra.mxu3 %vm614_vm0, %v325_v42  ;;  %v171_v42 = vld [vmem:[%s2883_s0 + $0x1a8] sm:$0xff]  ;;  %43 = vst.msk [vmem:[#allocation2 + $0xb8] sm:$0xff] %vm19_vm1, %v1681_v48 }
  0x29   :  { %v339_v46 = vpack.c.bf16 %v171_v42, %v167_v41  ;;  %44 = vst.msk [vmem:[#allocation2 + $0xc0] sm:$0xff] %vm19_vm1, %v1681_v48  ;;  %v2136_v42 = vld [vmem:[%s2884_s2] ss:$0 sm:$0xff] }
  0x2a   :  { %45 = vst.msk [vmem:[#allocation2 + $0xc8] sm:$0xff] %vm19_vm1, %v1681_v48 }
  0x2b   :  { %46 = vst.msk [vmem:[#allocation2 + $0xd0] sm:$0xff] %vm19_vm1, %v1681_v48 }
  0x2c   :  { %47 = vst.msk [vmem:[#allocation2 + $0xd8] sm:$0xff] %vm19_vm1, %v1681_v48 }
  0x2d   :  { %48 = vst.msk [vmem:[#allocation2 + $0xe0] sm:$0xff] %vm19_vm1, %v1681_v48 }
  0x2e   :  { %49 = vst.msk [vmem:[#allocation2 + $0xe8] sm:$0xff] %vm19_vm1, %v1681_v48 }
  0x2f   :  { %50 = vst.msk [vmem:[#allocation2 + $0xf0] sm:$0xff] %vm19_vm1, %v1681_v48 }
  0x30   :  { %51 = vst.msk [vmem:[#allocation2 + $0xf8] sm:$0xff] %vm19_vm1, %v1681_v48 }
  0x31   :  { %703 = vmatmul.bf16.gmra.mxu0 %v318_v49  ;;  %v185_v49 = vld [vmem:[%s2883_s0 + $0x218] sm:$0xff]  ;;  %52 = vst.msk [vmem:[#allocation2 + $0x100] sm:$0xff] %vm19_vm1, %v1681_v48 }
  0x32   :  { %836 = vmatmul.bf16.gmra.mxu1 %v319_v50  ;;  %v189_v50 = vld [vmem:[%s2883_s0 + $0x238] sm:$0xff]  ;;  %53 = vst.msk [vmem:[#allocation2 + $0x108] sm:$0xff] %vm19_vm1, %v1681_v48 }
  0x33   :  { %969 = vmatmul.bf16.gmra.mxu2 %v320_v51  ;;  %v349_v51 = vpack.c.bf16 %v189_v50, %v185_v49  ;;  %54 = vst.msk [vmem:[#allocation2 + $0x110] sm:$0xff] %vm19_vm1, %v1681_v48  ;;  %v209_v49 = vld [vmem:[%s2883_s0 + $0x2d8] sm:$0xff] }
  0x34   :  { %55 = vst.msk [vmem:[#allocation2 + $0x118] sm:$0xff] %vm19_vm1, %v1681_v48  ;;  %v213_v50 = vld [vmem:[%s2883_s0 + $0x2f8] sm:$0xff] }
  0x35   :  { %56 = vst.msk [vmem:[#allocation2 + $0x120] sm:$0xff] %vm19_vm1, %v1681_v48 }
  0x36   :  { %57 = vst.msk [vmem:[#allocation2 + $0x128] sm:$0xff] %vm19_vm1, %v1681_v48 }
  0x37   :  { %58 = vst.msk [vmem:[#allocation2 + $0x130] sm:$0xff] %vm19_vm1, %v1681_v48 }
  0x38   :  { %1631 = vmatmul.msk.bf16.gmra.mxu3 %vm614_vm0, %v329_v54  ;;  %v175_v54 = vld [vmem:[%s2883_s0 + $0x1c8] sm:$0xff]  ;;  %59 = vst.msk [vmem:[#allocation2 + $0x138] sm:$0xff] %vm19_vm1, %v1681_v48 }
  0x39   :  { %v343_v59 = vpack.c.bf16 %v179_v55, %v175_v54  ;;  %60 = vst.msk [vmem:[#allocation2 + $0x140] sm:$0xff] %vm19_vm1, %v1681_v48 }
  0x3a   :  { %61 = vst.msk [vmem:[#allocation2 + $0x148] sm:$0xff] %vm19_vm1, %v1681_v48 }
  0x3b   :  { %62 = vst.msk [vmem:[#allocation2 + $0x150] sm:$0xff] %vm19_vm1, %v1681_v48 }
  0x3c   :  { %63 = vst.msk [vmem:[#allocation2 + $0x158] sm:$0xff] %vm19_vm1, %v1681_v48 }
  0x3d   :  { %64 = vst.msk [vmem:[#allocation2 + $0x160] sm:$0xff] %vm19_vm1, %v1681_v48 }
  0x3e   :  { %65 = vst.msk [vmem:[#allocation2 + $0x168] sm:$0xff] %vm19_vm1, %v1681_v48 }
  0x3f   :  { %66 = vst.msk [vmem:[#allocation2 + $0x170] sm:$0xff] %vm19_vm1, %v1681_v48 }
  0x40   :  { %67 = vst.msk [vmem:[#allocation2 + $0x178] sm:$0xff] %vm19_vm1, %v1681_v48 }
  0x41   :  { %708 = vmatmul.bf16.gmra.mxu0 %v322_v61  ;;  %68 = vst.msk [vmem:[#allocation2 + $0x180] sm:$0xff] %vm19_vm1, %v1681_v48  ;;  %v361_v48 = vpack.c.bf16 %v213_v50, %v209_v49 }
  0x42   :  { %841 = vmatmul.bf16.gmra.mxu1 %v323_v62  ;;  %v193_v62 = vld [vmem:[%s2883_s0 + $0x258] sm:$0xff] }
  0x43   :  { %974 = vmatmul.bf16.gmra.mxu2 %v324_v63  ;;  %v197_v63 = vld [vmem:[%s2883_s0 + $0x278] sm:$0xff] }
  0x44   :  { %v353_v1 = vpack.c.bf16 %v197_v63, %v193_v62  ;;  %v199_v62 = vld [vmem:[%s2883_s0 + $0x288] sm:$0xff] }
  0x45   :  { %v203_v63 = vld [vmem:[%s2883_s0 + $0x2a8] sm:$0xff] }
  0x46   :  { %v355_v7 = vpack.c.bf16 %v203_v63, %v199_v62 }
  0x48   :  { %1632 = vmatmul.msk.bf16.gmra.mxu3 %vm614_vm0, %v333_v2  ;;  %v182_v2 = vld [vmem:[%s2883_s0 + $0x200] sm:$0xff] }
  0x49   :  { %v346_v8 = vpack.c.bf16 %v186_v3, %v182_v2  ;;  %v204_v2 = vld [vmem:[%s2883_s0 + $0x2b0] sm:$0xff] }
  0x51   :  { %713 = vmatmul.bf16.gmra.mxu0 %v326_v9  ;;  %v347_v9 = vpack.c.bf16 %v187_v5, %v183_v4 }
  0x52   :  { %846 = vmatmul.bf16.gmra.mxu1 %v327_v10 }
  0x53   :  { %979 = vmatmul.bf16.gmra.mxu2 %v328_v11 }
  0x58   :  { %1633 = vmatmul.msk.bf16.gmra.mxu3 %vm614_vm0, %v337_v14 }
  0x61   :  { %718 = vmatmul.bf16.gmra.mxu0 %v330_v21  ;;  %v69_v21 = vld [vmem:[#allocation2] sm:$0xff] }
  0x62   :  { %851 = vmatmul.bf16.gmra.mxu1 %v331_v22 }
  0x63   :  { %984 = vmatmul.bf16.gmra.mxu2 %v332_v23  ;;  %v357_v23 = vpack.c.bf16 %v205_v16, %v201_v15 }
  0x68   :  { %1634 = vmatmul.msk.bf16.gmra.mxu3 %vm614_vm0, %v341_v26 }
  0x71   :  { %723 = vmatmul.bf16.gmra.mxu0 %v334_v33 }
  0x72   :  { %856 = vmatmul.bf16.gmra.mxu1 %v335_v34  ;;  %v350_v34 = vpack.c.bf16 %v194_v27, %v190_v25  ;;  %v73_v27 = vld [vmem:[#allocation2 + $0x20] sm:$0xff] }
  0x73   :  { %989 = vmatmul.bf16.gmra.mxu2 %v336_v35  ;;  %v351_v35 = vpack.c.bf16 %v195_v29, %v191_v28 }
  0x78   :  { %1635 = vmatmul.msk.bf16.gmra.mxu3 %vm614_vm0, %v345_v38 }
  0x81   :  { %728 = vmatmul.bf16.gmra.mxu0 %v338_v45 }
  0x82   :  { %861 = vmatmul.bf16.gmra.mxu1 %v339_v46 }
  0x83   :  { %994 = vmatmul.bf16.gmra.mxu2 %v340_v47 }
  0x88   :  { %1636 = vmatmul.msk.bf16.gmra.mxu3 %vm614_vm0, %v349_v51 }
  0x8b   :  { %v1098_v61 = vpop.f32.mrf.mxu3 }
  0x91   :  { %733 = vmatmul.bf16.gmra.mxu0 %v342_v58 }
  0x92   :  { %866 = vmatmul.bf16.gmra.mxu1 %v343_v59  ;;  %v198_v59 = vld [vmem:[%s2883_s0 + $0x280] sm:$0xff] }
  0x93   :  { %999 = vmatmul.bf16.gmra.mxu2 %v344_v60  ;;  %v2032_v0 = vpop.f32.mrf.mxu3 }
  0x98   :  { %1637 = vmatmul.msk.bf16.gmra.mxu3 %vm614_vm0, %v353_v1  ;;  %v200_v1 = vld [vmem:[%s2883_s0 + $0x290] sm:$0xff] }
  0x9b   :  { %v2071_v13 = vpop.f32.mrf.mxu3 }
  0x9e   :  { %v699_v10 = vpop.f32.mrf.mxu0 }
  0x9f   :  { %v832_v11 = vpop.f32.mrf.mxu1 }
  0xa0   :  { %v833_v14 = vadd.f32 %v832_v11, %v699_v10 }
  0xa1   :  { %738 = vmatmul.bf16.gmra.mxu0 %v346_v8 }
  0xa2   :  { %871 = vmatmul.bf16.gmra.mxu1 %v347_v9 }
  0xa3   :  { %1004 = vmatmul.bf16.gmra.mxu2 %v348_v12  ;;  %v2095_v22 = vpop.f32.mrf.mxu3  ;;  %v356_v12 = vpack.c.bf16 %v204_v2, %v200_v1 }
  0xa6   :  { %v965_v17 = vpop.f32.mrf.mxu2  ;;  %v701_v19 = vpop.f32.mrf.mxu0 }
  0xa7   :  { %v966_v18 = vadd.f32 %v965_v17, %v833_v14  ;;  %v834_v20 = vpop.f32.mrf.mxu1 }
  0xa8   :  { %1638 = vmatmul.msk.bf16.gmra.mxu3 %vm614_vm0, %v357_v23  ;;  %v835_v32 = vadd.f32 %v834_v20, %v701_v19  ;;  %v217_v20 = vld [vmem:[%s2883_s0 + $0x318] sm:$0xff] }
  0xa9   :  { %v1099_v24 = vadd.f32 %v1098_v61, %v966_v18  ;;  %v202_v61 = vld [vmem:[%s2883_s0 + $0x2a0] sm:$0xff] }
  0xaa   :  { %v354_v6 = vpack.c.bf16 %v202_v61, %v198_v59  ;;  %v229_v59 = vld [vmem:[%s2883_s0 + $0x378] sm:$0xff] }
  0xab   :  { %v1222_v26 = vadd.f32 %v1099_v24, %v69_v21  ;;  %v2131_v41 = vpop.f32.mrf.mxu3  ;;  %v221_v21 = vld [vmem:[%s2883_s0 + $0x338] sm:$0xff] }
  0xac   :  { %v365_v29 = vpack.c.bf16 %v221_v21, %v217_v20 }
  0xad   :  { %1272 = vst.msk [vmem:[#allocation2] sm:$0xff] %vm19_vm1, %v1222_v26 }
  0xae   :  { %v967_v33 = vpop.f32.mrf.mxu2  ;;  %v704_v37 = vpop.f32.mrf.mxu0 }
  0xaf   :  { %v968_v36 = vadd.f32 %v967_v33, %v835_v32  ;;  %v837_v38 = vpop.f32.mrf.mxu1  ;;  %v210_v33 = vld [vmem:[%s2883_s0 + $0x2e0] sm:$0xff] }
  0xb0   :  { %v838_v45 = vadd.f32 %v837_v38, %v704_v37  ;;  %v208_v37 = vld [vmem:[%s2883_s0 + $0x2d0] sm:$0xff] }
  0xb1   :  { %v1101_v43 = vadd.f32 %v2032_v0, %v968_v36  ;;  %743 = vmatmul.bf16.gmra.mxu0 %v350_v34  ;;  %v207_v34 = vld [vmem:[%s2883_s0 + $0x2c8] sm:$0xff]  ;;  %v212_v38 = vld [vmem:[%s2883_s0 + $0x2f0] sm:$0xff] }
  0xb2   :  { %876 = vmatmul.bf16.gmra.mxu1 %v351_v35  ;;  %v211_v35 = vld [vmem:[%s2883_s0 + $0x2e8] sm:$0xff]  ;;  %v360_v50 = vpack.c.bf16 %v212_v38, %v208_v37 }
  0xb3   :  { %v1223_v44 = vadd.f32 %v1101_v43, %v70_v40  ;;  %1009 = vmatmul.bf16.gmra.mxu2 %v352_v39  ;;  %v2155_v57 = vpop.f32.mrf.mxu3  ;;  %v358_v43 = vpack.c.bf16 %v210_v33, %v206_v31  ;;  %v237_v31 = vld [vmem:[%s2883_s0 + $0x3b8] sm:$0xff] }
  0xb4   :  { %v1324_v46 = vld [vmem:[#allocation2] sm:$0xff] }
  0xb5   :  { %v1377_v47 = vadd.f32 %v2136_v42, %v1324_v46  ;;  %1273 = vst.msk [vmem:[#allocation2 + $0x8] sm:$0xff] %vm19_vm1, %v1223_v44  ;;  %v359_v44 = vpack.c.bf16 %v211_v35, %v207_v34 }
  0xb6   :  { %v970_v51 = vpop.f32.mrf.mxu2  ;;  %v706_v54 = vpop.f32.mrf.mxu0 }
  0xb7   :  { %v1426_v52 = vmax.f32 %v1377_v47, 0.0  ;;  %v971_v53 = vadd.f32 %v970_v51, %v838_v45  ;;  %v839_v55 = vpop.f32.mrf.mxu1  ;;  %v74_v51 = vld [vmem:[#allocation2 + $0x28] sm:$0xff] }
  0xb8   :  { %1639 = vmatmul.msk.bf16.gmra.mxu3 %vm614_vm0, %v361_v48  ;;  %v840_v4 = vadd.f32 %v839_v55, %v706_v54 }
  0xb9   :  { %1475 = vst.msk [vmem:[%s2885_s3] sm:$0xff] %vm19_vm1, %v1426_v52  ;;  %v1104_v58 = vadd.f32 %v2071_v13, %v971_v53  ;;  %v72_v13 = vld [vmem:[#allocation2 + $0x18] sm:$0xff] }
  0xbb   :  { %v1224_v60 = vadd.f32 %v1104_v58, %v71_v56  ;;  %v2183_v14 = vpop.f32.mrf.mxu3  ;;  %v225_v58 = vld [vmem:[%s2883_s0 + $0x358] sm:$0xff] }
  0xbc   :  { %v1325_v0 = vld [vmem:[#allocation2 + $0x8] sm:$0xff]  ;;  %v369_v2 = vpack.c.bf16 %v229_v59, %v225_v58 }
  0xbd   :  { %v1378_v3 = vadd.f32 %v2136_v42, %v1325_v0  ;;  %1274 = vst.msk [vmem:[#allocation2 + $0x10] sm:$0xff] %vm19_vm1, %v1224_v60  ;;  %v75_v0 = vld [vmem:[#allocation2 + $0x30] sm:$0xff] }
  0xbe   :  { %v972_v5 = vpop.f32.mrf.mxu2  ;;  %v709_v10 = vpop.f32.mrf.mxu0 }
  0xbf   :  { %v1427_v8 = vmax.f32 %v1378_v3, 0.0  ;;  %v973_v9 = vadd.f32 %v972_v5, %v840_v4  ;;  %v842_v11 = vpop.f32.mrf.mxu1  ;;  %v214_v4 = vld [vmem:[%s2883_s0 + $0x300] sm:$0xff] }
  0xc0   :  { %v843_v17 = vadd.f32 %v842_v11, %v709_v10  ;;  %v216_v10 = vld [vmem:[%s2883_s0 + $0x310] sm:$0xff] }
  0xc1   :  { %1476 = vst.msk [vmem:[%s2885_s3 + $0x8] sm:$0xff] %vm19_vm1, %v1427_v8  ;;  %v1106_v15 = vadd.f32 %v2095_v22, %v973_v9  ;;  %748 = vmatmul.bf16.gmra.mxu0 %v354_v6  ;;  %v218_v6 = vld [vmem:[%s2883_s0 + $0x320] sm:$0xff]  ;;  %v219_v8 = vld [vmem:[%s2883_s0 + $0x328] sm:$0xff]  ;;  %v220_v11 = vld [vmem:[%s2883_s0 + $0x330] sm:$0xff] }
  0xc2   :  { %881 = vmatmul.bf16.gmra.mxu1 %v355_v7  ;;  %v215_v7 = vld [vmem:[%s2883_s0 + $0x308] sm:$0xff]  ;;  %v364_v21 = vpack.c.bf16 %v220_v11, %v216_v10 }
  0xc3   :  { %v1225_v16 = vadd.f32 %v1106_v15, %v72_v13  ;;  %1014 = vmatmul.bf16.gmra.mxu2 %v356_v12  ;;  %v2198_v28 = vpop.f32.mrf.mxu3  ;;  %v362_v15 = vpack.c.bf16 %v218_v6, %v214_v4  ;;  %v245_v4 = vld [vmem:[%s2883_s0 + $0x3f8] sm:$0xff] }
  0xc4   :  { %v1326_v18 = vld [vmem:[#allocation2 + $0x10] sm:$0xff] }
  0xc5   :  { %v1379_v19 = vadd.f32 %v2136_v42, %v1326_v18  ;;  %1275 = vst.msk [vmem:[#allocation2 + $0x18] sm:$0xff] %vm19_vm1, %v1225_v16  ;;  %v363_v16 = vpack.c.bf16 %v219_v8, %v215_v7 }
  0xc6   :  { %v975_v23 = vpop.f32.mrf.mxu2  ;;  %v711_v25 = vpop.f32.mrf.mxu0 }
  0xc7   :  { %v1428_v22 = vmax.f32 %v1379_v19, 0.0  ;;  %v976_v24 = vadd.f32 %v975_v23, %v843_v17  ;;  %v844_v26 = vpop.f32.mrf.mxu1  ;;  %v76_v23 = vld [vmem:[#allocation2 + $0x38] sm:$0xff] }
  0xc8   :  { %1640 = vmatmul.msk.bf16.gmra.mxu3 %vm614_vm0, %v365_v29  ;;  %v845_v40 = vadd.f32 %v844_v26, %v711_v25 }
  0xc9   :  { %1477 = vst.msk [vmem:[%s2885_s3 + $0x10] sm:$0xff] %vm19_vm1, %v1428_v22  ;;  %v1109_v30 = vadd.f32 %v2131_v41, %v976_v24 }
  0xcb   :  { %v1226_v32 = vadd.f32 %v1109_v30, %v73_v27  ;;  %v2226_v52 = vpop.f32.mrf.mxu3  ;;  %v233_v30 = vld [vmem:[%s2883_s0 + $0x398] sm:$0xff] }
  0xcc   :  { %v1327_v36 = vld [vmem:[#allocation2 + $0x18] sm:$0xff]  ;;  %v373_v38 = vpack.c.bf16 %v237_v31, %v233_v30 }
  0xcd   :  { %v1380_v39 = vadd.f32 %v2136_v42, %v1327_v36  ;;  %1276 = vst.msk [vmem:[#allocation2 + $0x20] sm:$0xff] %vm19_vm1, %v1226_v32  ;;  %v77_v36 = vld [vmem:[#allocation2 + $0x40] sm:$0xff] }
  0xce   :  { %v977_v41 = vpop.f32.mrf.mxu2  ;;  %v714_v47 = vpop.f32.mrf.mxu0 }
  0xcf   :  { %v1429_v45 = vmax.f32 %v1380_v39, 0.0  ;;  %v978_v46 = vadd.f32 %v977_v41, %v845_v40  ;;  %v847_v49 = vpop.f32.mrf.mxu1  ;;  %v222_v40 = vld [vmem:[%s2883_s0 + $0x340] sm:$0xff] }
  0xd0   :  { %v848_v55 = vadd.f32 %v847_v49, %v714_v47  ;;  %v224_v47 = vld [vmem:[%s2883_s0 + $0x350] sm:$0xff] }
  0xd1   :  { %1478 = vst.msk [vmem:[%s2885_s3 + $0x18] sm:$0xff] %vm19_vm1, %v1429_v45  ;;  %v1111_v53 = vadd.f32 %v2155_v57, %v978_v46  ;;  %753 = vmatmul.bf16.gmra.mxu0 %v358_v43  ;;  %v226_v43 = vld [vmem:[%s2883_s0 + $0x360] sm:$0xff]  ;;  %v227_v45 = vld [vmem:[%s2883_s0 + $0x368] sm:$0xff]  ;;  %v228_v49 = vld [vmem:[%s2883_s0 + $0x370] sm:$0xff] }
  0xd2   :  { %886 = vmatmul.bf16.gmra.mxu1 %v359_v44  ;;  %v223_v44 = vld [vmem:[%s2883_s0 + $0x348] sm:$0xff]  ;;  %v368_v59 = vpack.c.bf16 %v228_v49, %v224_v47 }
  0xd3   :  { %v1227_v54 = vadd.f32 %v1111_v53, %v74_v51  ;;  %1019 = vmatmul.bf16.gmra.mxu2 %v360_v50  ;;  %v2241_v1 = vpop.f32.mrf.mxu3  ;;  %v366_v53 = vpack.c.bf16 %v226_v43, %v222_v40  ;;  %v253_v40 = vld [vmem:[%s2883_s0 + $0x438] sm:$0xff] }
  0xd4   :  { %v1328_v56 = vld [vmem:[#allocation2 + $0x20] sm:$0xff] }
  0xd5   :  { %v1381_v48 = vadd.f32 %v2136_v42, %v1328_v56  ;;  %1277 = vst.msk [vmem:[#allocation2 + $0x28] sm:$0xff] %vm19_vm1, %v1227_v54  ;;  %v367_v54 = vpack.c.bf16 %v227_v45, %v223_v44 }
  0xd6   :  { %v980_v60 = vpop.f32.mrf.mxu2  ;;  %v716_v62 = vpop.f32.mrf.mxu0 }
  0xd7   :  { %v1430_v57 = vmax.f32 %v1381_v48, 0.0  ;;  %v981_v61 = vadd.f32 %v980_v60, %v848_v55  ;;  %v849_v63 = vpop.f32.mrf.mxu1  ;;  %v78_v60 = vld [vmem:[#allocation2 + $0x48] sm:$0xff] }
  0xd8   :  { %1641 = vmatmul.msk.bf16.gmra.mxu3 %vm614_vm0, %v369_v2  ;;  %v850_v13 = vadd.f32 %v849_v63, %v716_v62 }
  0xd9   :  { %1479 = vst.msk [vmem:[%s2885_s3 + $0x20] sm:$0xff] %vm19_vm1, %v1430_v57  ;;  %v1114_v3 = vadd.f32 %v2183_v14, %v981_v61 }
  0xdb   :  { %v1228_v5 = vadd.f32 %v1114_v3, %v75_v0  ;;  %v2269_v22 = vpop.f32.mrf.mxu3  ;;  %v241_v3 = vld [vmem:[%s2883_s0 + $0x3d8] sm:$0xff] }
  0xdc   :  { %v1329_v9 = vld [vmem:[#allocation2 + $0x28] sm:$0xff]  ;;  %v377_v11 = vpack.c.bf16 %v245_v4, %v241_v3 }
  0xdd   :  { %v1382_v12 = vadd.f32 %v2136_v42, %v1329_v9  ;;  %1278 = vst.msk [vmem:[#allocation2 + $0x30] sm:$0xff] %vm19_vm1, %v1228_v5  ;;  %v79_v9 = vld [vmem:[#allocation2 + $0x50] sm:$0xff] }
  0xde   :  { %v982_v14 = vpop.f32.mrf.mxu2  ;;  %v719_v19 = vpop.f32.mrf.mxu0 }
  0xdf   :  { %v1431_v17 = vmax.f32 %v1382_v12, 0.0  ;;  %v983_v18 = vadd.f32 %v982_v14, %v850_v13  ;;  %v852_v20 = vpop.f32.mrf.mxu1  ;;  %v230_v13 = vld [vmem:[%s2883_s0 + $0x380] sm:$0xff] }
  0xe0   :  { %v853_v26 = vadd.f32 %v852_v20, %v719_v19  ;;  %v232_v19 = vld [vmem:[%s2883_s0 + $0x390] sm:$0xff] }
  0xe1   :  { %1480 = vst.msk [vmem:[%s2885_s3 + $0x28] sm:$0xff] %vm19_vm1, %v1431_v17  ;;  %v1116_v24 = vadd.f32 %v2198_v28, %v983_v18  ;;  %758 = vmatmul.bf16.gmra.mxu0 %v362_v15  ;;  %v234_v15 = vld [vmem:[%s2883_s0 + $0x3a0] sm:$0xff]  ;;  %v235_v17 = vld [vmem:[%s2883_s0 + $0x3a8] sm:$0xff]  ;;  %v236_v20 = vld [vmem:[%s2883_s0 + $0x3b0] sm:$0xff] }
  0xe2   :  { %891 = vmatmul.bf16.gmra.mxu1 %v363_v16  ;;  %v231_v16 = vld [vmem:[%s2883_s0 + $0x388] sm:$0xff]  ;;  %v372_v31 = vpack.c.bf16 %v236_v20, %v232_v19 }
  0xe3   :  { %v1229_v25 = vadd.f32 %v1116_v24, %v76_v23  ;;  %1024 = vmatmul.bf16.gmra.mxu2 %v364_v21  ;;  %v2284_v37 = vpop.f32.mrf.mxu3  ;;  %v370_v24 = vpack.c.bf16 %v234_v15, %v230_v13  ;;  %v261_v13 = vld [vmem:[%s2883_s0 + $0x478] sm:$0xff] }
  0xe4   :  { %v1330_v27 = vld [vmem:[#allocation2 + $0x30] sm:$0xff] }
  0xe5   :  { %v1383_v29 = vadd.f32 %v2136_v42, %v1330_v27  ;;  %1279 = vst.msk [vmem:[#allocation2 + $0x38] sm:$0xff] %vm19_vm1, %v1229_v25  ;;  %v371_v25 = vpack.c.bf16 %v235_v17, %v231_v16 }
  0xe6   :  { %v985_v32 = vpop.f32.mrf.mxu2  ;;  %v721_v34 = vpop.f32.mrf.mxu0 }
  0xe7   :  { %v1432_v28 = vmax.f32 %v1383_v29, 0.0  ;;  %v986_v33 = vadd.f32 %v985_v32, %v853_v26  ;;  %v854_v35 = vpop.f32.mrf.mxu1  ;;  %v80_v32 = vld [vmem:[#allocation2 + $0x58] sm:$0xff] }
  0xe8   :  { %1642 = vmatmul.msk.bf16.gmra.mxu3 %vm614_vm0, %v373_v38  ;;  %v855_v51 = vadd.f32 %v854_v35, %v721_v34 }
  0xe9   :  { %1481 = vst.msk [vmem:[%s2885_s3 + $0x30] sm:$0xff] %vm19_vm1, %v1432_v28  ;;  %v1119_v39 = vadd.f32 %v2226_v52, %v986_v33 }
  0xeb   :  { %v1230_v41 = vadd.f32 %v1119_v39, %v77_v36  ;;  %v2312_v57 = vpop.f32.mrf.mxu3  ;;  %v249_v39 = vld [vmem:[%s2883_s0 + $0x418] sm:$0xff] }
  0xec   :  { %v1331_v46 = vld [vmem:[#allocation2 + $0x38] sm:$0xff]  ;;  %v381_v49 = vpack.c.bf16 %v253_v40, %v249_v39 }
  0xed   :  { %v1384_v50 = vadd.f32 %v2136_v42, %v1331_v46  ;;  %1280 = vst.msk [vmem:[#allocation2 + $0x40] sm:$0xff] %vm19_vm1, %v1230_v41  ;;  %v81_v46 = vld [vmem:[#allocation2 + $0x60] sm:$0xff] }
  0xee   :  { %v987_v52 = vpop.f32.mrf.mxu2  ;;  %v724_v48 = vpop.f32.mrf.mxu0 }
  0xef   :  { %v1433_v55 = vmax.f32 %v1384_v50, 0.0  ;;  %v988_v56 = vadd.f32 %v987_v52, %v855_v51  ;;  %v857_v58 = vpop.f32.mrf.mxu1  ;;  %v238_v51 = vld [vmem:[%s2883_s0 + $0x3c0] sm:$0xff] }
  0xf0   :  { %v858_v63 = vadd.f32 %v857_v58, %v724_v48  ;;  %v240_v48 = vld [vmem:[%s2883_s0 + $0x3d0] sm:$0xff] }
  0xf1   :  { %1482 = vst.msk [vmem:[%s2885_s3 + $0x38] sm:$0xff] %vm19_vm1, %v1433_v55  ;;  %v1121_v61 = vadd.f32 %v2241_v1, %v988_v56  ;;  %763 = vmatmul.bf16.gmra.mxu0 %v366_v53  ;;  %v242_v53 = vld [vmem:[%s2883_s0 + $0x3e0] sm:$0xff]  ;;  %v243_v55 = vld [vmem:[%s2883_s0 + $0x3e8] sm:$0xff]  ;;  %v244_v58 = vld [vmem:[%s2883_s0 + $0x3f0] sm:$0xff] }
  0xf2   :  { %896 = vmatmul.bf16.gmra.mxu1 %v367_v54  ;;  %v239_v54 = vld [vmem:[%s2883_s0 + $0x3c8] sm:$0xff]  ;;  %v376_v4 = vpack.c.bf16 %v244_v58, %v240_v48 }
  0xf3   :  { %v1231_v62 = vadd.f32 %v1121_v61, %v78_v60  ;;  %1029 = vmatmul.bf16.gmra.mxu2 %v368_v59  ;;  %v2327_v10 = vpop.f32.mrf.mxu3  ;;  %v374_v61 = vpack.c.bf16 %v242_v53, %v238_v51  ;;  %v269_v51 = vld [vmem:[%s2883_s0 + $0x4b8] sm:$0xff] }
  0xf4   :  { %v1332_v0 = vld [vmem:[#allocation2 + $0x40] sm:$0xff] }
  0xf5   :  { %v1385_v2 = vadd.f32 %v2136_v42, %v1332_v0  ;;  %1281 = vst.msk [vmem:[#allocation2 + $0x48] sm:$0xff] %vm19_vm1, %v1231_v62  ;;  %v375_v62 = vpack.c.bf16 %v243_v55, %v239_v54 }
  0xf6   :  { %v990_v5 = vpop.f32.mrf.mxu2  ;;  %v726_v7 = vpop.f32.mrf.mxu0 }
  0xf7   :  { %v1434_v1 = vmax.f32 %v1385_v2, 0.0  ;;  %v991_v6 = vadd.f32 %v990_v5, %v858_v63  ;;  %v859_v8 = vpop.f32.mrf.mxu1  ;;  %v82_v5 = vld [vmem:[#allocation2 + $0x68] sm:$0xff] }
  0xf8   :  { %1643 = vmatmul.msk.bf16.gmra.mxu3 %vm614_vm0, %v377_v11  ;;  %v860_v23 = vadd.f32 %v859_v8, %v726_v7 }
  0xf9   :  { %1483 = vst.msk [vmem:[%s2885_s3 + $0x40] sm:$0xff] %vm19_vm1, %v1434_v1  ;;  %v1124_v12 = vadd.f32 %v2269_v22, %v991_v6 }
  0xfb   :  { %v1232_v14 = vadd.f32 %v1124_v12, %v79_v9  ;;  %v2355_v28 = vpop.f32.mrf.mxu3  ;;  %v257_v12 = vld [vmem:[%s2883_s0 + $0x458] sm:$0xff] }
  0xfc   :  { %v1333_v18 = vld [vmem:[#allocation2 + $0x48] sm:$0xff]  ;;  %v385_v20 = vpack.c.bf16 %v261_v13, %v257_v12 }
  0xfd   :  { %v1386_v21 = vadd.f32 %v2136_v42, %v1333_v18  ;;  %1282 = vst.msk [vmem:[#allocation2 + $0x50] sm:$0xff] %vm19_vm1, %v1232_v14  ;;  %v83_v18 = vld [vmem:[#allocation2 + $0x70] sm:$0xff] }
  0xfe   :  { %v992_v22 = vpop.f32.mrf.mxu2  ;;  %v729_v29 = vpop.f32.mrf.mxu0 }
  0xff   :  { %v1435_v26 = vmax.f32 %v1386_v21, 0.0  ;;  %v993_v27 = vadd.f32 %v992_v22, %v860_v23  ;;  %v862_v30 = vpop.f32.mrf.mxu1  ;;  %v246_v23 = vld [vmem:[%s2883_s0 + $0x400] sm:$0xff] }
 0x100   :  { %v863_v35 = vadd.f32 %v862_v30, %v729_v29  ;;  %v248_v29 = vld [vmem:[%s2883_s0 + $0x410] sm:$0xff] }
 0x101   :  { %1484 = vst.msk [vmem:[%s2885_s3 + $0x48] sm:$0xff] %vm19_vm1, %v1435_v26  ;;  %v1126_v33 = vadd.f32 %v2284_v37, %v993_v27  ;;  %768 = vmatmul.bf16.gmra.mxu0 %v370_v24  ;;  %v250_v24 = vld [vmem:[%s2883_s0 + $0x420] sm:$0xff]  ;;  %v251_v26 = vld [vmem:[%s2883_s0 + $0x428] sm:$0xff]  ;;  %v252_v30 = vld [vmem:[%s2883_s0 + $0x430] sm:$0xff] }
 0x102   :  { %901 = vmatmul.bf16.gmra.mxu1 %v371_v25  ;;  %v247_v25 = vld [vmem:[%s2883_s0 + $0x408] sm:$0xff]  ;;  %v380_v40 = vpack.c.bf16 %v252_v30, %v248_v29 }
 0x103   :  { %v1233_v34 = vadd.f32 %v1126_v33, %v80_v32  ;;  %1034 = vmatmul.bf16.gmra.mxu2 %v372_v31  ;;  %v2370_v47 = vpop.f32.mrf.mxu3  ;;  %v378_v33 = vpack.c.bf16 %v250_v24, %v246_v23  ;;  %v277_v23 = vld [vmem:[%s2883_s0 + $0x4f8] sm:$0xff] }
 0x104   :  { %v1334_v36 = vld [vmem:[#allocation2 + $0x50] sm:$0xff] }
 0x105   :  { %v1387_v38 = vadd.f32 %v2136_v42, %v1334_v36  ;;  %1283 = vst.msk [vmem:[#allocation2 + $0x58] sm:$0xff] %vm19_vm1, %v1233_v34  ;;  %v379_v34 = vpack.c.bf16 %v251_v26, %v247_v25 }
 0x106   :  { %v995_v41 = vpop.f32.mrf.mxu2  ;;  %v731_v44 = vpop.f32.mrf.mxu0 }
 0x107   :  { %v1436_v37 = vmax.f32 %v1387_v38, 0.0  ;;  %v996_v43 = vadd.f32 %v995_v41, %v863_v35  ;;  %v864_v45 = vpop.f32.mrf.mxu1  ;;  %v84_v41 = vld [vmem:[#allocation2 + $0x78] sm:$0xff] }
 0x108   :  { %1644 = vmatmul.msk.bf16.gmra.mxu3 %vm614_vm0, %v381_v49  ;;  %v865_v60 = vadd.f32 %v864_v45, %v731_v44 }
 0x109   :  { %1485 = vst.msk [vmem:[%s2885_s3 + $0x50] sm:$0xff] %vm19_vm1, %v1436_v37  ;;  %v1129_v50 = vadd.f32 %v2312_v57, %v996_v43 }
 0x10b   :  { %v1234_v52 = vadd.f32 %v1129_v50, %v81_v46  ;;  %v2398_v1 = vpop.f32.mrf.mxu3  ;;  %v265_v50 = vld [vmem:[%s2883_s0 + $0x498] sm:$0xff] }
 0x10c   :  { %v1335_v56 = vld [vmem:[#allocation2 + $0x58] sm:$0xff]  ;;  %v389_v58 = vpack.c.bf16 %v269_v51, %v265_v50 }
 0x10d   :  { %v1388_v59 = vadd.f32 %v2136_v42, %v1335_v56  ;;  %1284 = vst.msk [vmem:[#allocation2 + $0x60] sm:$0xff] %vm19_vm1, %v1234_v52  ;;  %v85_v56 = vld [vmem:[#allocation2 + $0x80] sm:$0xff] }
 0x10e   :  { %v997_v57 = vpop.f32.mrf.mxu2  ;;  %v734_v2 = vpop.f32.mrf.mxu0 }
 0x10f   :  { %v1437_v63 = vmax.f32 %v1388_v59, 0.0  ;;  %v998_v0 = vadd.f32 %v997_v57, %v865_v60  ;;  %v867_v3 = vpop.f32.mrf.mxu1  ;;  %v254_v60 = vld [vmem:[%s2883_s0 + $0x440] sm:$0xff] }
 0x110   :  { %v868_v8 = vadd.f32 %v867_v3, %v734_v2  ;;  %v256_v2 = vld [vmem:[%s2883_s0 + $0x450] sm:$0xff] }
 0x111   :  { %1486 = vst.msk [vmem:[%s2885_s3 + $0x58] sm:$0xff] %vm19_vm1, %v1437_v63  ;;  %v1131_v6 = vadd.f32 %v2327_v10, %v998_v0  ;;  %773 = vmatmul.bf16.gmra.mxu0 %v374_v61  ;;  %v258_v61 = vld [vmem:[%s2883_s0 + $0x460] sm:$0xff]  ;;  %v259_v63 = vld [vmem:[%s2883_s0 + $0x468] sm:$0xff]  ;;  %v260_v3 = vld [vmem:[%s2883_s0 + $0x470] sm:$0xff] }
 0x112   :  { %906 = vmatmul.bf16.gmra.mxu1 %v375_v62  ;;  %v255_v62 = vld [vmem:[%s2883_s0 + $0x448] sm:$0xff]  ;;  %v384_v13 = vpack.c.bf16 %v260_v3, %v256_v2 }
 0x113   :  { %v1235_v7 = vadd.f32 %v1131_v6, %v82_v5  ;;  %1039 = vmatmul.bf16.gmra.mxu2 %v376_v4  ;;  %v2413_v19 = vpop.f32.mrf.mxu3  ;;  %v382_v6 = vpack.c.bf16 %v258_v61, %v254_v60  ;;  %v285_v60 = vld [vmem:[%s2883_s0 + $0x538] sm:$0xff] }
 0x114   :  { %v1336_v9 = vld [vmem:[#allocation2 + $0x60] sm:$0xff] }
 0x115   :  { %v1389_v11 = vadd.f32 %v2136_v42, %v1336_v9  ;;  %1285 = vst.msk [vmem:[#allocation2 + $0x68] sm:$0xff] %vm19_vm1, %v1235_v7  ;;  %v383_v7 = vpack.c.bf16 %v259_v63, %v255_v62 }
 0x116   :  { %v1000_v14 = vpop.f32.mrf.mxu2  ;;  %v736_v16 = vpop.f32.mrf.mxu0 }
 0x117   :  { %v1438_v10 = vmax.f32 %v1389_v11, 0.0  ;;  %v1001_v15 = vadd.f32 %v1000_v14, %v868_v8  ;;  %v869_v17 = vpop.f32.mrf.mxu1  ;;  %v86_v14 = vld [vmem:[#allocation2 + $0x88] sm:$0xff] }
 0x118   :  { %1645 = vmatmul.msk.bf16.gmra.mxu3 %vm614_vm0, %v385_v20  ;;  %v870_v32 = vadd.f32 %v869_v17, %v736_v16 }
 0x119   :  { %1487 = vst.msk [vmem:[%s2885_s3 + $0x60] sm:$0xff] %vm19_vm1, %v1438_v10  ;;  %v1134_v21 = vadd.f32 %v2355_v28, %v1001_v15 }
 0x11b   :  { %v1236_v22 = vadd.f32 %v1134_v21, %v83_v18  ;;  %v2441_v37 = vpop.f32.mrf.mxu3  ;;  %v273_v21 = vld [vmem:[%s2883_s0 + $0x4d8] sm:$0xff] }
 0x11c   :  { %v1337_v27 = vld [vmem:[#allocation2 + $0x68] sm:$0xff]  ;;  %v393_v30 = vpack.c.bf16 %v277_v23, %v273_v21 }
 0x11d   :  { %v1390_v31 = vadd.f32 %v2136_v42, %v1337_v27  ;;  %1286 = vst.msk [vmem:[#allocation2 + $0x70] sm:$0xff] %vm19_vm1, %v1236_v22  ;;  %v87_v27 = vld [vmem:[#allocation2 + $0x90] sm:$0xff] }
 0x11e   :  { %v1002_v28 = vpop.f32.mrf.mxu2  ;;  %v739_v38 = vpop.f32.mrf.mxu0 }
 0x11f   :  { %v1439_v35 = vmax.f32 %v1390_v31, 0.0  ;;  %v1003_v36 = vadd.f32 %v1002_v28, %v870_v32  ;;  %v872_v39 = vpop.f32.mrf.mxu1  ;;  %v262_v32 = vld [vmem:[%s2883_s0 + $0x480] sm:$0xff] }
 0x120   :  { %v873_v45 = vadd.f32 %v872_v39, %v739_v38  ;;  %v264_v38 = vld [vmem:[%s2883_s0 + $0x490] sm:$0xff] }
 0x121   :  { %1488 = vst.msk [vmem:[%s2885_s3 + $0x68] sm:$0xff] %vm19_vm1, %v1439_v35  ;;  %v1136_v43 = vadd.f32 %v2370_v47, %v1003_v36  ;;  %778 = vmatmul.bf16.gmra.mxu0 %v378_v33  ;;  %v266_v33 = vld [vmem:[%s2883_s0 + $0x4a0] sm:$0xff]  ;;  %v267_v35 = vld [vmem:[%s2883_s0 + $0x4a8] sm:$0xff]  ;;  %v268_v39 = vld [vmem:[%s2883_s0 + $0x4b0] sm:$0xff] }
 0x122   :  { %911 = vmatmul.bf16.gmra.mxu1 %v379_v34  ;;  %v263_v34 = vld [vmem:[%s2883_s0 + $0x488] sm:$0xff]  ;;  %v388_v51 = vpack.c.bf16 %v268_v39, %v264_v38 }
 0x123   :  { %v1237_v44 = vadd.f32 %v1136_v43, %v84_v41  ;;  %1044 = vmatmul.bf16.gmra.mxu2 %v380_v40  ;;  %v2456_v48 = vpop.f32.mrf.mxu3  ;;  %v386_v43 = vpack.c.bf16 %v266_v33, %v262_v32  ;;  %v293_v32 = vld [vmem:[%s2883_s0 + $0x578] sm:$0xff] }
 0x124   :  { %v1338_v46 = vld [vmem:[#allocation2 + $0x70] sm:$0xff] }
 0x125   :  { %v1391_v49 = vadd.f32 %v2136_v42, %v1338_v46  ;;  %1287 = vst.msk [vmem:[#allocation2 + $0x78] sm:$0xff] %vm19_vm1, %v1237_v44  ;;  %v387_v44 = vpack.c.bf16 %v267_v35, %v263_v34 }
 0x126   :  { %v1005_v52 = vpop.f32.mrf.mxu2  ;;  %v741_v54 = vpop.f32.mrf.mxu0 }
 0x127   :  { %v1440_v47 = vmax.f32 %v1391_v49, 0.0  ;;  %v1006_v53 = vadd.f32 %v1005_v52, %v873_v45  ;;  %v874_v55 = vpop.f32.mrf.mxu1  ;;  %v88_v52 = vld [vmem:[#allocation2 + $0x98] sm:$0xff] }
 0x128   :  { %1646 = vmatmul.msk.bf16.gmra.mxu3 %vm614_vm0, %v389_v58  ;;  %v875_v5 = vadd.f32 %v874_v55, %v741_v54 }
 0x129   :  { %1489 = vst.msk [vmem:[%s2885_s3 + $0x70] sm:$0xff] %vm19_vm1, %v1440_v47  ;;  %v1139_v59 = vadd.f32 %v2398_v1, %v1006_v53 }
 0x12b   :  { %v1238_v57 = vadd.f32 %v1139_v59, %v85_v56  ;;  %v2484_v10 = vpop.f32.mrf.mxu3  ;;  %v281_v59 = vld [vmem:[%s2883_s0 + $0x518] sm:$0xff] }
 0x12c   :  { %v1339_v0 = vld [vmem:[#allocation2 + $0x78] sm:$0xff]  ;;  %v397_v3 = vpack.c.bf16 %v285_v60, %v281_v59 }
 0x12d   :  { %v1392_v4 = vadd.f32 %v2136_v42, %v1339_v0  ;;  %1288 = vst.msk [vmem:[#allocation2 + $0x80] sm:$0xff] %vm19_vm1, %v1238_v57  ;;  %v89_v0 = vld [vmem:[#allocation2 + $0xa0] sm:$0xff] }
 0x12e   :  { %v1007_v1 = vpop.f32.mrf.mxu2  ;;  %v744_v11 = vpop.f32.mrf.mxu0 }
 0x12f   :  { %v1441_v8 = vmax.f32 %v1392_v4, 0.0  ;;  %v1008_v9 = vadd.f32 %v1007_v1, %v875_v5  ;;  %v877_v12 = vpop.f32.mrf.mxu1  ;;  %v270_v5 = vld [vmem:[%s2883_s0 + $0x4c0] sm:$0xff] }
 0x130   :  { %v878_v17 = vadd.f32 %v877_v12, %v744_v11  ;;  %v272_v11 = vld [vmem:[%s2883_s0 + $0x4d0] sm:$0xff] }
 0x131   :  { %1490 = vst.msk [vmem:[%s2885_s3 + $0x78] sm:$0xff] %vm19_vm1, %v1441_v8  ;;  %v1141_v15 = vadd.f32 %v2413_v19, %v1008_v9  ;;  %783 = vmatmul.bf16.gmra.mxu0 %v382_v6  ;;  %v274_v6 = vld [vmem:[%s2883_s0 + $0x4e0] sm:$0xff]  ;;  %v275_v8 = vld [vmem:[%s2883_s0 + $0x4e8] sm:$0xff]  ;;  %v276_v12 = vld [vmem:[%s2883_s0 + $0x4f0] sm:$0xff] }
 0x132   :  { %916 = vmatmul.bf16.gmra.mxu1 %v383_v7  ;;  %v271_v7 = vld [vmem:[%s2883_s0 + $0x4c8] sm:$0xff]  ;;  %v392_v23 = vpack.c.bf16 %v276_v12, %v272_v11 }
 0x133   :  { %v1239_v16 = vadd.f32 %v1141_v15, %v86_v14  ;;  %1049 = vmatmul.bf16.gmra.mxu2 %v384_v13  ;;  %v2499_v29 = vpop.f32.mrf.mxu3  ;;  %v390_v15 = vpack.c.bf16 %v274_v6, %v270_v5  ;;  %v301_v5 = vld [vmem:[%s2883_s0 + $0x5b8] sm:$0xff] }
 0x134   :  { %v1340_v18 = vld [vmem:[#allocation2 + $0x80] sm:$0xff] }
 0x135   :  { %v1393_v20 = vadd.f32 %v2136_v42, %v1340_v18  ;;  %1289 = vst.msk [vmem:[#allocation2 + $0x88] sm:$0xff] %vm19_vm1, %v1239_v16  ;;  %v391_v16 = vpack.c.bf16 %v275_v8, %v271_v7 }
 0x136   :  { %v1010_v22 = vpop.f32.mrf.mxu2  ;;  %v746_v25 = vpop.f32.mrf.mxu0 }
 0x137   :  { %v1442_v19 = vmax.f32 %v1393_v20, 0.0  ;;  %v1011_v24 = vadd.f32 %v1010_v22, %v878_v17  ;;  %v879_v26 = vpop.f32.mrf.mxu1  ;;  %v90_v22 = vld [vmem:[#allocation2 + $0xa8] sm:$0xff] }
 0x138   :  { %1647 = vmatmul.msk.bf16.gmra.mxu3 %vm614_vm0, %v393_v30  ;;  %v880_v41 = vadd.f32 %v879_v26, %v746_v25 }
 0x139   :  { %1491 = vst.msk [vmem:[%s2885_s3 + $0x80] sm:$0xff] %vm19_vm1, %v1442_v19  ;;  %v1144_v31 = vadd.f32 %v2441_v37, %v1011_v24 }
 0x13b   :  { %v1240_v28 = vadd.f32 %v1144_v31, %v87_v27  ;;  %v2527_v47 = vpop.f32.mrf.mxu3  ;;  %v289_v31 = vld [vmem:[%s2883_s0 + $0x558] sm:$0xff] }
 0x13c   :  { %v1341_v36 = vld [vmem:[#allocation2 + $0x88] sm:$0xff]  ;;  %v401_v39 = vpack.c.bf16 %v293_v32, %v289_v31 }
 0x13d   :  { %v1394_v40 = vadd.f32 %v2136_v42, %v1341_v36  ;;  %1290 = vst.msk [vmem:[#allocation2 + $0x90] sm:$0xff] %vm19_vm1, %v1240_v28  ;;  %v91_v36 = vld [vmem:[#allocation2 + $0xb0] sm:$0xff] }
 0x13e   :  { %v1012_v37 = vpop.f32.mrf.mxu2  ;;  %v749_v49 = vpop.f32.mrf.mxu0 }
 0x13f   :  { %v1443_v45 = vmax.f32 %v1394_v40, 0.0  ;;  %v1013_v46 = vadd.f32 %v1012_v37, %v880_v41  ;;  %v882_v50 = vpop.f32.mrf.mxu1  ;;  %v278_v41 = vld [vmem:[%s2883_s0 + $0x500] sm:$0xff] }
 0x140   :  { %v883_v55 = vadd.f32 %v882_v50, %v749_v49  ;;  %v280_v49 = vld [vmem:[%s2883_s0 + $0x510] sm:$0xff] }
 0x141   :  { %1492 = vst.msk [vmem:[%s2885_s3 + $0x88] sm:$0xff] %vm19_vm1, %v1443_v45  ;;  %v1146_v53 = vadd.f32 %v2456_v48, %v1013_v46  ;;  %788 = vmatmul.bf16.gmra.mxu0 %v386_v43  ;;  %v282_v43 = vld [vmem:[%s2883_s0 + $0x520] sm:$0xff]  ;;  %v283_v45 = vld [vmem:[%s2883_s0 + $0x528] sm:$0xff]  ;;  %v284_v50 = vld [vmem:[%s2883_s0 + $0x530] sm:$0xff] }
 0x142   :  { %921 = vmatmul.bf16.gmra.mxu1 %v387_v44  ;;  %v279_v44 = vld [vmem:[%s2883_s0 + $0x508] sm:$0xff]  ;;  %v396_v60 = vpack.c.bf16 %v284_v50, %v280_v49 }
 0x143   :  { %v1241_v54 = vadd.f32 %v1146_v53, %v88_v52  ;;  %1054 = vmatmul.bf16.gmra.mxu2 %v388_v51  ;;  %v2542_v2 = vpop.f32.mrf.mxu3  ;;  %v394_v53 = vpack.c.bf16 %v282_v43, %v278_v41  ;;  %v309_v41 = vld [vmem:[%s2883_s0 + $0x5f8] sm:$0xff] }
 0x144   :  { %v1342_v56 = vld [vmem:[#allocation2 + $0x90] sm:$0xff] }
 0x145   :  { %v1395_v58 = vadd.f32 %v2136_v42, %v1342_v56  ;;  %1291 = vst.msk [vmem:[#allocation2 + $0x98] sm:$0xff] %vm19_vm1, %v1241_v54  ;;  %v395_v54 = vpack.c.bf16 %v283_v45, %v279_v44 }
 0x146   :  { %v1015_v57 = vpop.f32.mrf.mxu2  ;;  %v751_v62 = vpop.f32.mrf.mxu0 }
 0x147   :  { %v1444_v48 = vmax.f32 %v1395_v58, 0.0  ;;  %v1016_v61 = vadd.f32 %v1015_v57, %v883_v55  ;;  %v884_v63 = vpop.f32.mrf.mxu1  ;;  %v92_v57 = vld [vmem:[#allocation2 + $0xb8] sm:$0xff] }
 0x148   :  { %1648 = vmatmul.msk.bf16.gmra.mxu3 %vm614_vm0, %v397_v3  ;;  %v885_v14 = vadd.f32 %v884_v63, %v751_v62 }
 0x149   :  { %1493 = vst.msk [vmem:[%s2885_s3 + $0x90] sm:$0xff] %vm19_vm1, %v1444_v48  ;;  %v1149_v4 = vadd.f32 %v2484_v10, %v1016_v61 }
 0x14b   :  { %v1242_v1 = vadd.f32 %v1149_v4, %v89_v0  ;;  %v2570_v19 = vpop.f32.mrf.mxu3  ;;  %v297_v4 = vld [vmem:[%s2883_s0 + $0x598] sm:$0xff] }
 0x14c   :  { %v1343_v9 = vld [vmem:[#allocation2 + $0x98] sm:$0xff]  ;;  %v405_v12 = vpack.c.bf16 %v301_v5, %v297_v4 }
 0x14d   :  { %v1396_v13 = vadd.f32 %v2136_v42, %v1343_v9  ;;  %1292 = vst.msk [vmem:[#allocation2 + $0xa0] sm:$0xff] %vm19_vm1, %v1242_v1  ;;  %v93_v9 = vld [vmem:[#allocation2 + $0xc0] sm:$0xff] }
 0x14e   :  { %v1017_v10 = vpop.f32.mrf.mxu2  ;;  %v754_v20 = vpop.f32.mrf.mxu0 }
 0x14f   :  { %v1445_v17 = vmax.f32 %v1396_v13, 0.0  ;;  %v1018_v18 = vadd.f32 %v1017_v10, %v885_v14  ;;  %v887_v21 = vpop.f32.mrf.mxu1  ;;  %v286_v13 = vld [vmem:[%s2883_s0 + $0x540] sm:$0xff] }
 0x150   :  { %v888_v26 = vadd.f32 %v887_v21, %v754_v20  ;;  %v290_v10 = vld [vmem:[%s2883_s0 + $0x560] sm:$0xff]  ;;  %v292_v20 = vld [vmem:[%s2883_s0 + $0x570] sm:$0xff] }
 0x151   :  { %1494 = vst.msk [vmem:[%s2885_s3 + $0x98] sm:$0xff] %vm19_vm1, %v1445_v17  ;;  %v1151_v24 = vadd.f32 %v2499_v29, %v1018_v18  ;;  %793 = vmatmul.bf16.gmra.mxu0 %v390_v15  ;;  %v287_v15 = vld [vmem:[%s2883_s0 + $0x548] sm:$0xff]  ;;  %v288_v18 = vld [vmem:[%s2883_s0 + $0x550] sm:$0xff]  ;;  %v2657_v21 = vld [vmem:[%s2884_s2] ss:$0 sm:$0xff] }
 0x152   :  { %926 = vmatmul.bf16.gmra.mxu1 %v391_v16  ;;  %v291_v16 = vld [vmem:[%s2883_s0 + $0x568] sm:$0xff]  ;;  %v400_v32 = vpack.c.bf16 %v292_v20, %v288_v18 }
 0x153   :  { %v1243_v25 = vadd.f32 %v1151_v24, %v90_v22  ;;  %1059 = vmatmul.bf16.gmra.mxu2 %v392_v23  ;;  %v2585_v38 = vpop.f32.mrf.mxu3  ;;  %v398_v24 = vpack.c.bf16 %v290_v10, %v286_v13 }
 0x154   :  { %v1344_v27 = vld [vmem:[#allocation2 + $0xa0] sm:$0xff] }
 0x155   :  { %v1397_v30 = vadd.f32 %v2136_v42, %v1344_v27  ;;  %1293 = vst.msk [vmem:[#allocation2 + $0xa8] sm:$0xff] %vm19_vm1, %v1243_v25  ;;  %v399_v25 = vpack.c.bf16 %v291_v16, %v287_v15 }
 0x156   :  { %v1020_v28 = vpop.f32.mrf.mxu2  ;;  %v756_v34 = vpop.f32.mrf.mxu0 }
 0x157   :  { %v1446_v29 = vmax.f32 %v1397_v30, 0.0  ;;  %v1021_v33 = vadd.f32 %v1020_v28, %v888_v26  ;;  %v889_v35 = vpop.f32.mrf.mxu1  ;;  %v94_v28 = vld [vmem:[#allocation2 + $0xc8] sm:$0xff] }
 0x158   :  { %1649 = vmatmul.msk.bf16.gmra.mxu3 %vm614_vm0, %v401_v39  ;;  %v890_v52 = vadd.f32 %v889_v35, %v756_v34 }
 0x159   :  { %1495 = vst.msk [vmem:[%s2885_s3 + $0xa0] sm:$0xff] %vm19_vm1, %v1446_v29  ;;  %v1154_v40 = vadd.f32 %v2527_v47, %v1021_v33 }
 0x15b   :  { %v1244_v37 = vadd.f32 %v1154_v40, %v91_v36  ;;  %v2613_v48 = vpop.f32.mrf.mxu3  ;;  %v305_v40 = vld [vmem:[%s2883_s0 + $0x5d8] sm:$0xff] }
 0x15c   :  { %v1345_v46 = vld [vmem:[#allocation2 + $0xa8] sm:$0xff]  ;;  %v409_v50 = vpack.c.bf16 %v309_v41, %v305_v40 }
 0x15d   :  { %v1398_v51 = vadd.f32 %v2136_v42, %v1345_v46  ;;  %1294 = vst.msk [vmem:[#allocation2 + $0xb0] sm:$0xff] %vm19_vm1, %v1244_v37  ;;  %v95_v46 = vld [vmem:[#allocation2 + $0xd0] sm:$0xff]  ;;  %v98_v41 = vld [vmem:[#allocation2 + $0xe8] sm:$0xff] }
 0x15e   :  { %v1022_v47 = vpop.f32.mrf.mxu2  ;;  %v759_v58 = vpop.f32.mrf.mxu0 }
 0x15f   :  { %v1447_v55 = vmax.f32 %v1398_v51, 0.0  ;;  %v1023_v56 = vadd.f32 %v1022_v47, %v890_v52  ;;  %v892_v59 = vpop.f32.mrf.mxu1  ;;  %v294_v52 = vld [vmem:[%s2883_s0 + $0x580] sm:$0xff] }
 0x160   :  { %v893_v63 = vadd.f32 %v892_v59, %v759_v58  ;;  %v296_v58 = vld [vmem:[%s2883_s0 + $0x590] sm:$0xff] }
 0x161   :  { %1496 = vst.msk [vmem:[%s2885_s3 + $0xa8] sm:$0xff] %vm19_vm1, %v1447_v55  ;;  %v1156_v61 = vadd.f32 %v2542_v2, %v1023_v56  ;;  %798 = vmatmul.bf16.gmra.mxu0 %v394_v53  ;;  %v298_v53 = vld [vmem:[%s2883_s0 + $0x5a0] sm:$0xff]  ;;  %v299_v55 = vld [vmem:[%s2883_s0 + $0x5a8] sm:$0xff]  ;;  %v300_v59 = vld [vmem:[%s2883_s0 + $0x5b0] sm:$0xff] }
 0x162   :  { %931 = vmatmul.bf16.gmra.mxu1 %v395_v54  ;;  %v295_v54 = vld [vmem:[%s2883_s0 + $0x588] sm:$0xff]  ;;  %v404_v5 = vpack.c.bf16 %v300_v59, %v296_v58  ;;  %v310_v58 = vld [vmem:[%s2883_s0 + $0x600] sm:$0xff] }
 0x163   :  { %v1245_v62 = vadd.f32 %v1156_v61, %v92_v57  ;;  %1064 = vmatmul.bf16.gmra.mxu2 %v396_v60  ;;  %v2628_v11 = vpop.f32.mrf.mxu3  ;;  %v402_v61 = vpack.c.bf16 %v298_v53, %v294_v52  ;;  %v311_v59 = vld [vmem:[%s2883_s0 + $0x608] sm:$0xff] }
 0x164   :  { %v1346_v0 = vld [vmem:[#allocation2 + $0xb0] sm:$0xff] }
 0x165   :  { %v1399_v3 = vadd.f32 %v2136_v42, %v1346_v0  ;;  %1295 = vst.msk [vmem:[#allocation2 + $0xb8] sm:$0xff] %vm19_vm1, %v1245_v62  ;;  %v403_v62 = vpack.c.bf16 %v299_v55, %v295_v54  ;;  %v99_v54 = vld [vmem:[#allocation2 + $0xf0] sm:$0xff] }
 0x166   :  { %v1025_v1 = vpop.f32.mrf.mxu2  ;;  %v761_v7 = vpop.f32.mrf.mxu0 }
 0x167   :  { %v1448_v2 = vmax.f32 %v1399_v3, 0.0  ;;  %v1026_v6 = vadd.f32 %v1025_v1, %v893_v63  ;;  %v894_v8 = vpop.f32.mrf.mxu1  ;;  %v96_v1 = vld [vmem:[#allocation2 + $0xd8] sm:$0xff] }
 0x168   :  { %1650 = vmatmul.msk.bf16.gmra.mxu3 %vm614_vm0, %v405_v12  ;;  %v895_v22 = vadd.f32 %v894_v8, %v761_v7 }
 0x169   :  { %1497 = vst.msk [vmem:[%s2885_s3 + $0xb0] sm:$0xff] %vm19_vm1, %v1448_v2  ;;  %v1159_v42 = vadd.f32 %v2570_v19, %v1026_v6 }
 0x16b   :  { %v1246_v14 = vadd.f32 %v1159_v42, %v93_v9  ;;  %v2661_v29 = vpop.f32.mrf.mxu3  ;;  %v313_v42 = vld [vmem:[%s2883_s0 + $0x618] sm:$0xff] }
 0x16c   :  { %v1347_v17 = vld [vmem:[#allocation2 + $0xb8] sm:$0xff]  ;;  %v413_v18 = vpack.c.bf16 %v313_v42, %v313_v42 }
 0x16d   :  { %v1400_v23 = vadd.f32 %v2657_v21, %v1347_v17  ;;  %1296 = vst.msk [vmem:[#allocation2 + $0xc0] sm:$0xff] %vm19_vm1, %v1246_v14 }
 0x16e   :  { %v1027_v19 = vpop.f32.mrf.mxu2  ;;  %v764_v30 = vpop.f32.mrf.mxu0 }
 0x16f   :  { %v1449_v26 = vmax.f32 %v1400_v23, 0.0  ;;  %v1028_v27 = vadd.f32 %v1027_v19, %v895_v22  ;;  %v897_v31 = vpop.f32.mrf.mxu1  ;;  %v302_v23 = vld [vmem:[%s2883_s0 + $0x5c0] sm:$0xff] }
 0x170   :  { %v898_v35 = vadd.f32 %v897_v31, %v764_v30  ;;  %v306_v19 = vld [vmem:[%s2883_s0 + $0x5e0] sm:$0xff]  ;;  %v308_v30 = vld [vmem:[%s2883_s0 + $0x5f0] sm:$0xff] }
 0x171   :  { %1498 = vst.msk [vmem:[%s2885_s3 + $0xb8] sm:$0xff] %vm19_vm1, %v1449_v26  ;;  %v1161_v33 = vadd.f32 %v2585_v38, %v1028_v27  ;;  %803 = vmatmul.bf16.gmra.mxu0 %v398_v24  ;;  %v303_v24 = vld [vmem:[%s2883_s0 + $0x5c8] sm:$0xff]  ;;  %v304_v27 = vld [vmem:[%s2883_s0 + $0x5d0] sm:$0xff] }
 0x172   :  { %936 = vmatmul.bf16.gmra.mxu1 %v399_v25  ;;  %v307_v25 = vld [vmem:[%s2883_s0 + $0x5e8] sm:$0xff]  ;;  %v408_v40 = vpack.c.bf16 %v308_v30, %v304_v27 }
 0x173   :  { %v1247_v34 = vadd.f32 %v1161_v33, %v94_v28  ;;  %1069 = vmatmul.bf16.gmra.mxu2 %v400_v32  ;;  %v2676_v49 = vpop.f32.mrf.mxu3  ;;  %v407_v33 = vpack.c.bf16 %v307_v25, %v303_v24 }
 0x174   :  { %v1348_v36 = vld [vmem:[#allocation2 + $0xc0] sm:$0xff] }
 0x175   :  { %v1401_v39 = vadd.f32 %v2657_v21, %v1348_v36  ;;  %1297 = vst.msk [vmem:[#allocation2 + $0xc8] sm:$0xff] %vm19_vm1, %v1247_v34 }
 0x176   :  { %v1030_v37 = vpop.f32.mrf.mxu2  ;;  %v766_v44 = vpop.f32.mrf.mxu0 }
 0x177   :  { %v1450_v38 = vmax.f32 %v1401_v39, 0.0  ;;  %v1031_v43 = vadd.f32 %v1030_v37, %v898_v35  ;;  %v899_v45 = vpop.f32.mrf.mxu1 }
 0x178   :  { %1651 = vmatmul.msk.bf16.gmra.mxu3 %vm614_vm0, %v409_v50  ;;  %v900_v57 = vadd.f32 %v899_v45, %v766_v44 }
 0x179   :  { %1499 = vst.msk [vmem:[%s2885_s3 + $0xc0] sm:$0xff] %vm19_vm1, %v1450_v38  ;;  %v1164_v51 = vadd.f32 %v2613_v48, %v1031_v43 }
 0x17b   :  { %v1248_v47 = vadd.f32 %v1164_v51, %v95_v46  ;;  %v1173_v2 = vpop.f32.mrf.mxu3 }
 0x17c   :  { %v1349_v56 = vld [vmem:[#allocation2 + $0xc8] sm:$0xff] }
 0x17d   :  { %v1402_v60 = vadd.f32 %v2657_v21, %v1349_v56  ;;  %1298 = vst.msk [vmem:[#allocation2 + $0xd0] sm:$0xff] %vm19_vm1, %v1248_v47 }
 0x17e   :  { %v1032_v48 = vpop.f32.mrf.mxu2  ;;  %v769_v3 = vpop.f32.mrf.mxu0 }
 0x17f   :  { %v1451_v63 = vmax.f32 %v1402_v60, 0.0  ;;  %v1033_v0 = vadd.f32 %v1032_v48, %v900_v57  ;;  %v902_v4 = vpop.f32.mrf.mxu1  ;;  %v312_v57 = vld [vmem:[%s2883_s0 + $0x610] sm:$0xff] }
 0x180   :  { %v903_v8 = vadd.f32 %v902_v4, %v769_v3 }
 0x181   :  { %1500 = vst.msk [vmem:[%s2885_s3 + $0xc8] sm:$0xff] %vm19_vm1, %v1451_v63  ;;  %v1166_v6 = vadd.f32 %v2628_v11, %v1033_v0  ;;  %808 = vmatmul.bf16.gmra.mxu0 %v402_v61  ;;  %v97_v11 = vld [vmem:[#allocation2 + $0xe0] sm:$0xff]  ;;  %v410_v63 = vpack.c.bf16 %v310_v58, %v310_v58  ;;  %v411_v0 = vpack.c.bf16 %v311_v59, %v311_v59 }
 0x182   :  { %941 = vmatmul.bf16.gmra.mxu1 %v403_v62 }
 0x183   :  { %v1249_v7 = vadd.f32 %v1166_v6, %v96_v1  ;;  %1074 = vmatmul.bf16.gmra.mxu2 %v404_v5  ;;  %v2714_v17 = vpop.f32.mrf.mxu3  ;;  %v100_v6 = vld [vmem:[#allocation2 + $0xf8] sm:$0xff] }
 0x184   :  { %v1350_v9 = vld [vmem:[#allocation2 + $0xd0] sm:$0xff] }
 0x185   :  { %v1403_v12 = vadd.f32 %v2657_v21, %v1350_v9  ;;  %1299 = vst.msk [vmem:[#allocation2 + $0xd8] sm:$0xff] %vm19_vm1, %v1249_v7 }
 0x186   :  { %v1035_v13 = vpop.f32.mrf.mxu2  ;;  %v771_v15 = vpop.f32.mrf.mxu0 }
 0x187   :  { %v1452_v14 = vmax.f32 %v1403_v12, 0.0  ;;  %v1036_v10 = vadd.f32 %v1035_v13, %v903_v8  ;;  %v904_v16 = vpop.f32.mrf.mxu1 }
 0x188   :  { %1652 = vmatmul.msk.bf16.gmra.mxu3 %vm614_vm0, %v413_v18  ;;  %v905_v32 = vadd.f32 %v904_v16, %v771_v15  ;;  %v101_v18 = vld [vmem:[#allocation2 + $0x100] sm:$0xff] }
 0x189   :  { %1501 = vst.msk [vmem:[%s2885_s3 + $0xd0] sm:$0xff] %vm19_vm1, %v1452_v14  ;;  %v1169_v20 = vadd.f32 %v2661_v29, %v1036_v10  ;;  %v406_v29 = vpack.c.bf16 %v306_v19, %v302_v23 }
 0x18b   :  { %v1250_v22 = vadd.f32 %v1169_v20, %v97_v11  ;;  %v1178_v37 = vpop.f32.mrf.mxu3 }
 0x18c   :  { %v1351_v26 = vld [vmem:[#allocation2 + $0xd8] sm:$0xff] }
 0x18d   :  { %v1404_v31 = vadd.f32 %v2657_v21, %v1351_v26  ;;  %1300 = vst.msk [vmem:[#allocation2 + $0xe0] sm:$0xff] %vm19_vm1, %v1250_v22 }
 0x18e   :  { %v1037_v28 = vpop.f32.mrf.mxu2  ;;  %v774_v36 = vpop.f32.mrf.mxu0 }
 0x18f   :  { %v1453_v34 = vmax.f32 %v1404_v31, 0.0  ;;  %v1038_v35 = vadd.f32 %v1037_v28, %v905_v32  ;;  %v907_v39 = vpop.f32.mrf.mxu1  ;;  %v102_v32 = vld [vmem:[#allocation2 + $0x108] sm:$0xff] }
 0x190   :  { %v908_v44 = vadd.f32 %v907_v39, %v774_v36 }
 0x191   :  { %1502 = vst.msk [vmem:[%s2885_s3 + $0xd8] sm:$0xff] %vm19_vm1, %v1453_v34  ;;  %v1171_v38 = vadd.f32 %v2676_v49, %v1038_v35  ;;  %813 = vmatmul.bf16.gmra.mxu0 %v406_v29 }
 0x192   :  { %946 = vmatmul.bf16.gmra.mxu1 %v407_v33 }
 0x193   :  { %v1251_v43 = vadd.f32 %v1171_v38, %v98_v41  ;;  %1079 = vmatmul.bf16.gmra.mxu2 %v408_v40  ;;  %v1180_v55 = vpop.f32.mrf.mxu3 }
 0x194   :  { %v1352_v45 = vld [vmem:[#allocation2 + $0xe0] sm:$0xff] }
 0x195   :  { %v1405_v46 = vadd.f32 %v2657_v21, %v1352_v45  ;;  %1301 = vst.msk [vmem:[#allocation2 + $0xe8] sm:$0xff] %vm19_vm1, %v1251_v43  ;;  %v103_v43 = vld [vmem:[#allocation2 + $0x110] sm:$0xff] }
 0x196   :  { %v1040_v50 = vpop.f32.mrf.mxu2  ;;  %v776_v47 = vpop.f32.mrf.mxu0 }
 0x197   :  { %v1454_v51 = vmax.f32 %v1405_v46, 0.0  ;;  %v1041_v52 = vadd.f32 %v1040_v50, %v908_v44  ;;  %v909_v53 = vpop.f32.mrf.mxu1 }
 0x198   :  { %v910_v61 = vadd.f32 %v909_v53, %v776_v47 }
 0x199   :  { %1503 = vst.msk [vmem:[%s2885_s3 + $0xe0] sm:$0xff] %vm19_vm1, %v1454_v51  ;;  %v1174_v49 = vadd.f32 %v1173_v2, %v1041_v52  ;;  %v412_v2 = vpack.c.bf16 %v312_v57, %v312_v57 }
 0x19b   :  { %v1252_v56 = vadd.f32 %v1174_v49, %v99_v54  ;;  %v1183_v7 = vpop.f32.mrf.mxu3 }
 0x19c   :  { %v1353_v60 = vld [vmem:[#allocation2 + $0xe8] sm:$0xff] }
 0x19d   :  { %v1406_v48 = vadd.f32 %v2657_v21, %v1353_v60  ;;  %1302 = vst.msk [vmem:[#allocation2 + $0xf0] sm:$0xff] %vm19_vm1, %v1252_v56  ;;  %v104_v56 = vld [vmem:[#allocation2 + $0x118] sm:$0xff] }
 0x19e   :  { %v1042_v62 = vpop.f32.mrf.mxu2  ;;  %v779_v5 = vpop.f32.mrf.mxu0 }
 0x19f   :  { %v1455_v3 = vmax.f32 %v1406_v48, 0.0  ;;  %v1043_v4 = vadd.f32 %v1042_v62, %v910_v61  ;;  %v912_v1 = vpop.f32.mrf.mxu1 }
 0x1a0   :  { %v913_v12 = vadd.f32 %v912_v1, %v779_v5  ;;  %v105_v5 = vld [vmem:[#allocation2 + $0x120] sm:$0xff] }
 0x1a1   :  { %1504 = vst.msk [vmem:[%s2885_s3 + $0xe8] sm:$0xff] %vm19_vm1, %v1455_v3  ;;  %v1176_v8 = vadd.f32 %v2714_v17, %v1043_v4  ;;  %818 = vmatmul.bf16.gmra.mxu0 %v410_v63 }
 0x1a2   :  { %951 = vmatmul.bf16.gmra.mxu1 %v411_v0 }
 0x1a3   :  { %v1253_v9 = vadd.f32 %v1176_v8, %v100_v6  ;;  %1084 = vmatmul.bf16.gmra.mxu2 %v412_v2  ;;  %v1185_v20 = vpop.f32.mrf.mxu3 }
 0x1a4   :  { %v1354_v42 = vld [vmem:[#allocation2 + $0xf0] sm:$0xff] }
 0x1a5   :  { %v1407_v13 = vadd.f32 %v2657_v21, %v1354_v42  ;;  %1303 = vst.msk [vmem:[#allocation2 + $0xf8] sm:$0xff] %vm19_vm1, %v1253_v9 }
 0x1a6   :  { %v1045_v14 = vpop.f32.mrf.mxu2  ;;  %v781_v16 = vpop.f32.mrf.mxu0 }
 0x1a7   :  { %v1456_v10 = vmax.f32 %v1407_v13, 0.0  ;;  %v1046_v15 = vadd.f32 %v1045_v14, %v913_v12  ;;  %v914_v11 = vpop.f32.mrf.mxu1 }
 0x1a8   :  { %v915_v24 = vadd.f32 %v914_v11, %v781_v16 }
 0x1a9   :  { %1505 = vst.msk [vmem:[%s2885_s3 + $0xf0] sm:$0xff] %vm19_vm1, %v1456_v10  ;;  %v1179_v17 = vadd.f32 %v1178_v37, %v1046_v15  ;;  %v106_v15 = vld [vmem:[#allocation2 + $0x128] sm:$0xff] }
 0x1ab   :  { %v1254_v23 = vadd.f32 %v1179_v17, %v101_v18  ;;  %v1188_v28 = vpop.f32.mrf.mxu3 }
 0x1ac   :  { %v1355_v22 = vld [vmem:[#allocation2 + $0xf8] sm:$0xff] }
 0x1ad   :  { %v1408_v19 = vadd.f32 %v2657_v21, %v1355_v22  ;;  %1304 = vst.msk [vmem:[#allocation2 + $0x100] sm:$0xff] %vm19_vm1, %v1254_v23 }
 0x1ae   :  { %v1047_v25 = vpop.f32.mrf.mxu2  ;;  %v784_v30 = vpop.f32.mrf.mxu0 }
 0x1af   :  { %v1457_v26 = vmax.f32 %v1408_v19, 0.0  ;;  %v1048_v27 = vadd.f32 %v1047_v25, %v915_v24  ;;  %v917_v31 = vpop.f32.mrf.mxu1 }
 0x1b0   :  { %v918_v34 = vadd.f32 %v917_v31, %v784_v30 }
 0x1b1   :  { %1506 = vst.msk [vmem:[%s2885_s3 + $0xf8] sm:$0xff] %vm19_vm1, %v1457_v26  ;;  %v1181_v29 = vadd.f32 %v1180_v55, %v1048_v27  ;;  %v107_v27 = vld [vmem:[#allocation2 + $0x130] sm:$0xff] }
 0x1b3   :  { %v1255_v33 = vadd.f32 %v1181_v29, %v102_v32  ;;  %v1190_v44 = vpop.f32.mrf.mxu3 }
 0x1b4   :  { %v1356_v35 = vld [vmem:[#allocation2 + $0x100] sm:$0xff] }
 0x1b5   :  { %v1409_v36 = vadd.f32 %v2657_v21, %v1356_v35  ;;  %1305 = vst.msk [vmem:[#allocation2 + $0x108] sm:$0xff] %vm19_vm1, %v1255_v33 }
 0x1b6   :  { %v1050_v39 = vpop.f32.mrf.mxu2  ;;  %v786_v37 = vpop.f32.mrf.mxu0 }
 0x1b7   :  { %v1458_v40 = vmax.f32 %v1409_v36, 0.0  ;;  %v1051_v41 = vadd.f32 %v1050_v39, %v918_v34  ;;  %v919_v38 = vpop.f32.mrf.mxu1 }
 0x1b8   :  { %v920_v52 = vadd.f32 %v919_v38, %v786_v37 }
 0x1b9   :  { %1507 = vst.msk [vmem:[%s2885_s3 + $0x100] sm:$0xff] %vm19_vm1, %v1458_v40  ;;  %v1184_v45 = vadd.f32 %v1183_v7, %v1051_v41  ;;  %v108_v41 = vld [vmem:[#allocation2 + $0x138] sm:$0xff] }
 0x1bb   :  { %v1256_v46 = vadd.f32 %v1184_v45, %v103_v43  ;;  %v1193_v58 = vpop.f32.mrf.mxu3 }
 0x1bc   :  { %v1357_v50 = vld [vmem:[#allocation2 + $0x108] sm:$0xff] }
 0x1bd   :  { %v1410_v51 = vadd.f32 %v2657_v21, %v1357_v50  ;;  %1306 = vst.msk [vmem:[#allocation2 + $0x110] sm:$0xff] %vm19_vm1, %v1256_v46 }
 0x1be   :  { %v1052_v47 = vpop.f32.mrf.mxu2  ;;  %v789_v55 = vpop.f32.mrf.mxu0 }
 0x1bf   :  { %v1459_v53 = vmax.f32 %v1410_v51, 0.0  ;;  %v1053_v54 = vadd.f32 %v1052_v47, %v920_v52  ;;  %v922_v49 = vpop.f32.mrf.mxu1 }
 0x1c0   :  { %v923_v57 = vadd.f32 %v922_v49, %v789_v55 }
 0x1c1   :  { %1508 = vst.msk [vmem:[%s2885_s3 + $0x108] sm:$0xff] %vm19_vm1, %v1459_v53  ;;  %v1186_v59 = vadd.f32 %v1185_v20, %v1053_v54  ;;  %v109_v54 = vld [vmem:[#allocation2 + $0x140] sm:$0xff] }
 0x1c3   :  { %v1257_v60 = vadd.f32 %v1186_v59, %v104_v56  ;;  %v1195_v1 = vpop.f32.mrf.mxu3 }
 0x1c4   :  { %v1358_v48 = vld [vmem:[#allocation2 + $0x110] sm:$0xff] }
 0x1c5   :  { %v1411_v61 = vadd.f32 %v2657_v21, %v1358_v48  ;;  %1307 = vst.msk [vmem:[#allocation2 + $0x118] sm:$0xff] %vm19_vm1, %v1257_v60 }
 0x1c6   :  { %v1055_v62 = vpop.f32.mrf.mxu2  ;;  %v791_v3 = vpop.f32.mrf.mxu0 }
 0x1c7   :  { %v1460_v63 = vmax.f32 %v1411_v61, 0.0  ;;  %v1056_v0 = vadd.f32 %v1055_v62, %v923_v57  ;;  %v924_v4 = vpop.f32.mrf.mxu1 }
 0x1c8   :  { %v925_v9 = vadd.f32 %v924_v4, %v791_v3 }
 0x1c9   :  { %1509 = vst.msk [vmem:[%s2885_s3 + $0x110] sm:$0xff] %vm19_vm1, %v1460_v63  ;;  %v1189_v2 = vadd.f32 %v1188_v28, %v1056_v0  ;;  %v110_v0 = vld [vmem:[#allocation2 + $0x148] sm:$0xff] }
 0x1cb   :  { %v1258_v6 = vadd.f32 %v1189_v2, %v105_v5  ;;  %v1198_v16 = vpop.f32.mrf.mxu3 }
 0x1cc   :  { %v1359_v7 = vld [vmem:[#allocation2 + $0x118] sm:$0xff] }
 0x1cd   :  { %v1412_v8 = vadd.f32 %v2657_v21, %v1359_v7  ;;  %1308 = vst.msk [vmem:[#allocation2 + $0x120] sm:$0xff] %vm19_vm1, %v1258_v6 }
 0x1ce   :  { %v1057_v12 = vpop.f32.mrf.mxu2  ;;  %v794_v14 = vpop.f32.mrf.mxu0 }
 0x1cf   :  { %v1461_v42 = vmax.f32 %v1412_v8, 0.0  ;;  %v1058_v13 = vadd.f32 %v1057_v12, %v925_v9  ;;  %v927_v10 = vpop.f32.mrf.mxu1 }
 0x1d0   :  { %v928_v20 = vadd.f32 %v927_v10, %v794_v14 }
 0x1d1   :  { %1510 = vst.msk [vmem:[%s2885_s3 + $0x118] sm:$0xff] %vm19_vm1, %v1461_v42  ;;  %v1191_v11 = vadd.f32 %v1190_v44, %v1058_v13  ;;  %v111_v13 = vld [vmem:[#allocation2 + $0x150] sm:$0xff] }
 0x1d3   :  { %v1259_v18 = vadd.f32 %v1191_v11, %v106_v15  ;;  %v1200_v30 = vpop.f32.mrf.mxu3 }
 0x1d4   :  { %v1360_v17 = vld [vmem:[#allocation2 + $0x120] sm:$0xff] }
 0x1d5   :  { %v1413_v23 = vadd.f32 %v2657_v21, %v1360_v17  ;;  %1309 = vst.msk [vmem:[#allocation2 + $0x128] sm:$0xff] %vm19_vm1, %v1259_v18 }
 0x1d6   :  { %v1060_v22 = vpop.f32.mrf.mxu2  ;;  %v796_v25 = vpop.f32.mrf.mxu0 }
 0x1d7   :  { %v1462_v19 = vmax.f32 %v1413_v23, 0.0  ;;  %v1061_v24 = vadd.f32 %v1060_v22, %v928_v20  ;;  %v929_v26 = vpop.f32.mrf.mxu1 }
 0x1d8   :  { %v930_v33 = vadd.f32 %v929_v26, %v796_v25 }
 0x1d9   :  { %1511 = vst.msk [vmem:[%s2885_s3 + $0x120] sm:$0xff] %vm19_vm1, %v1462_v19  ;;  %v1194_v31 = vadd.f32 %v1193_v58, %v1061_v24  ;;  %v112_v24 = vld [vmem:[#allocation2 + $0x158] sm:$0xff] }
 0x1db   :  { %v1260_v32 = vadd.f32 %v1194_v31, %v107_v27  ;;  %v1203_v37 = vpop.f32.mrf.mxu3 }
 0x1dc   :  { %v1361_v28 = vld [vmem:[#allocation2 + $0x128] sm:$0xff] }
 0x1dd   :  { %v1414_v29 = vadd.f32 %v2657_v21, %v1361_v28  ;;  %1310 = vst.msk [vmem:[#allocation2 + $0x130] sm:$0xff] %vm19_vm1, %v1260_v32 }
 0x1de   :  { %v1062_v34 = vpop.f32.mrf.mxu2  ;;  %v799_v39 = vpop.f32.mrf.mxu0 }
 0x1df   :  { %v1463_v35 = vmax.f32 %v1414_v29, 0.0  ;;  %v1063_v36 = vadd.f32 %v1062_v34, %v930_v33  ;;  %v932_v40 = vpop.f32.mrf.mxu1 }
 0x1e0   :  { %v933_v44 = vadd.f32 %v932_v40, %v799_v39 }
 0x1e1   :  { %1512 = vst.msk [vmem:[%s2885_s3 + $0x128] sm:$0xff] %vm19_vm1, %v1463_v35  ;;  %v1196_v38 = vadd.f32 %v1195_v1, %v1063_v36  ;;  %v113_v36 = vld [vmem:[#allocation2 + $0x160] sm:$0xff] }
 0x1e3   :  { %v1261_v43 = vadd.f32 %v1196_v38, %v108_v41  ;;  %v1205_v55 = vpop.f32.mrf.mxu3 }
 0x1e4   :  { %v1362_v45 = vld [vmem:[#allocation2 + $0x130] sm:$0xff] }
 0x1e5   :  { %v1415_v46 = vadd.f32 %v2657_v21, %v1362_v45  ;;  %1311 = vst.msk [vmem:[#allocation2 + $0x138] sm:$0xff] %vm19_vm1, %v1261_v43 }
 0x1e6   :  { %v1065_v50 = vpop.f32.mrf.mxu2  ;;  %v801_v47 = vpop.f32.mrf.mxu0 }
 0x1e7   :  { %v1464_v51 = vmax.f32 %v1415_v46, 0.0  ;;  %v1066_v52 = vadd.f32 %v1065_v50, %v933_v44  ;;  %v934_v53 = vpop.f32.mrf.mxu1 }
 0x1e8   :  { %v935_v60 = vadd.f32 %v934_v53, %v801_v47 }
 0x1e9   :  { %1513 = vst.msk [vmem:[%s2885_s3 + $0x130] sm:$0xff] %vm19_vm1, %v1464_v51  ;;  %v1199_v49 = vadd.f32 %v1198_v16, %v1066_v52  ;;  %v114_v52 = vld [vmem:[#allocation2 + $0x168] sm:$0xff] }
 0x1eb   :  { %v1262_v56 = vadd.f32 %v1199_v49, %v109_v54  ;;  %v1208_v3 = vpop.f32.mrf.mxu3 }
 0x1ec   :  { %v1363_v58 = vld [vmem:[#allocation2 + $0x138] sm:$0xff] }
 0x1ed   :  { %v1416_v59 = vadd.f32 %v2657_v21, %v1363_v58  ;;  %1312 = vst.msk [vmem:[#allocation2 + $0x140] sm:$0xff] %vm19_vm1, %v1262_v56 }
 0x1ee   :  { %v1067_v57 = vpop.f32.mrf.mxu2  ;;  %v804_v62 = vpop.f32.mrf.mxu0 }
 0x1ef   :  { %v1465_v48 = vmax.f32 %v1416_v59, 0.0  ;;  %v1068_v61 = vadd.f32 %v1067_v57, %v935_v60  ;;  %v937_v63 = vpop.f32.mrf.mxu1 }
 0x1f0   :  { %v938_v1 = vadd.f32 %v937_v63, %v804_v62 }
 0x1f1   :  { %1514 = vst.msk [vmem:[%s2885_s3 + $0x138] sm:$0xff] %vm19_vm1, %v1465_v48  ;;  %v1201_v4 = vadd.f32 %v1200_v30, %v1068_v61  ;;  %v115_v61 = vld [vmem:[#allocation2 + $0x170] sm:$0xff] }
 0x1f3   :  { %v1263_v5 = vadd.f32 %v1201_v4, %v110_v0  ;;  %v1210_v14 = vpop.f32.mrf.mxu3 }
 0x1f4   :  { %v1364_v2 = vld [vmem:[#allocation2 + $0x140] sm:$0xff] }
 0x1f5   :  { %v1417_v6 = vadd.f32 %v2657_v21, %v1364_v2  ;;  %1313 = vst.msk [vmem:[#allocation2 + $0x148] sm:$0xff] %vm19_vm1, %v1263_v5 }
 0x1f6   :  { %v1070_v7 = vpop.f32.mrf.mxu2  ;;  %v806_v12 = vpop.f32.mrf.mxu0 }
 0x1f7   :  { %v1466_v8 = vmax.f32 %v1417_v6, 0.0  ;;  %v1071_v9 = vadd.f32 %v1070_v7, %v938_v1  ;;  %v939_v42 = vpop.f32.mrf.mxu1 }
 0x1f8   :  { %v940_v18 = vadd.f32 %v939_v42, %v806_v12 }
 0x1f9   :  { %1515 = vst.msk [vmem:[%s2885_s3 + $0x140] sm:$0xff] %vm19_vm1, %v1466_v8  ;;  %v1204_v10 = vadd.f32 %v1203_v37, %v1071_v9  ;;  %v116_v9 = vld [vmem:[#allocation2 + $0x178] sm:$0xff] }
 0x1fb   :  { %v1264_v15 = vadd.f32 %v1204_v10, %v111_v13  ;;  %v1213_v25 = vpop.f32.mrf.mxu3 }
 0x1fc   :  { %v1365_v16 = vld [vmem:[#allocation2 + $0x148] sm:$0xff] }
 0x1fd   :  { %v1418_v11 = vadd.f32 %v2657_v21, %v1365_v16  ;;  %1314 = vst.msk [vmem:[#allocation2 + $0x150] sm:$0xff] %vm19_vm1, %v1264_v15 }
 0x1fe   :  { %v1072_v20 = vpop.f32.mrf.mxu2  ;;  %v809_v22 = vpop.f32.mrf.mxu0 }
 0x1ff   :  { %v1467_v17 = vmax.f32 %v1418_v11, 0.0  ;;  %v1073_v23 = vadd.f32 %v1072_v20, %v940_v18  ;;  %v942_v19 = vpop.f32.mrf.mxu1 }
 0x200   :  { %v943_v30 = vadd.f32 %v942_v19, %v809_v22 }
 0x201   :  { %1516 = vst.msk [vmem:[%s2885_s3 + $0x148] sm:$0xff] %vm19_vm1, %v1467_v17  ;;  %v1206_v26 = vadd.f32 %v1205_v55, %v1073_v23  ;;  %v117_v17 = vld [vmem:[#allocation2 + $0x180] sm:$0xff] }
 0x203   :  { %v1265_v27 = vadd.f32 %v1206_v26, %v112_v24  ;;  %v1215_v39 = vpop.f32.mrf.mxu3 }
 0x204   :  { %v1366_v31 = vld [vmem:[#allocation2 + $0x150] sm:$0xff] }
 0x205   :  { %v1419_v32 = vadd.f32 %v2657_v21, %v1366_v31  ;;  %1315 = vst.msk [vmem:[#allocation2 + $0x158] sm:$0xff] %vm19_vm1, %v1265_v27 }
 0x206   :  { %v1075_v28 = vpop.f32.mrf.mxu2  ;;  %v811_v34 = vpop.f32.mrf.mxu0 }
 0x207   :  { %v1468_v29 = vmax.f32 %v1419_v32, 0.0  ;;  %v1076_v33 = vadd.f32 %v1075_v28, %v943_v30  ;;  %v944_v35 = vpop.f32.mrf.mxu1 }
 0x208   :  { %v945_v43 = vadd.f32 %v944_v35, %v811_v34 }
 0x209   :  { %1517 = vst.msk [vmem:[%s2885_s3 + $0x150] sm:$0xff] %vm19_vm1, %v1468_v29  ;;  %v1209_v40 = vadd.f32 %v1208_v3, %v1076_v33 }
 0x20b   :  { %v1266_v41 = vadd.f32 %v1209_v40, %v113_v36  ;;  %v1218_v47 = vpop.f32.mrf.mxu3 }
 0x20c   :  { %v1367_v37 = vld [vmem:[#allocation2 + $0x158] sm:$0xff] }
 0x20d   :  { %v1420_v38 = vadd.f32 %v2657_v21, %v1367_v37  ;;  %1316 = vst.msk [vmem:[#allocation2 + $0x160] sm:$0xff] %vm19_vm1, %v1266_v41 }
 0x20e   :  { %v1077_v44 = vpop.f32.mrf.mxu2  ;;  %v814_v50 = vpop.f32.mrf.mxu0 }
 0x20f   :  { %v1469_v45 = vmax.f32 %v1420_v38, 0.0  ;;  %v1078_v46 = vadd.f32 %v1077_v44, %v945_v43  ;;  %v947_v51 = vpop.f32.mrf.mxu1 }
 0x210   :  { %v948_v55 = vadd.f32 %v947_v51, %v814_v50 }
 0x211   :  { %1518 = vst.msk [vmem:[%s2885_s3 + $0x158] sm:$0xff] %vm19_vm1, %v1469_v45  ;;  %v1211_v53 = vadd.f32 %v1210_v14, %v1078_v46 }
 0x213   :  { %v1267_v54 = vadd.f32 %v1211_v53, %v114_v52  ;;  %v1220_v62 = vpop.f32.mrf.mxu3 }
 0x214   :  { %v1368_v49 = vld [vmem:[#allocation2 + $0x160] sm:$0xff] }
 0x215   :  { %v1421_v56 = vadd.f32 %v2657_v21, %v1368_v49  ;;  %1317 = vst.msk [vmem:[#allocation2 + $0x168] sm:$0xff] %vm19_vm1, %v1267_v54 }
 0x216   :  { %v1080_v58 = vpop.f32.mrf.mxu2  ;;  %v816_v57 = vpop.f32.mrf.mxu0 }
 0x217   :  { %v1470_v59 = vmax.f32 %v1421_v56, 0.0  ;;  %v1081_v60 = vadd.f32 %v1080_v58, %v948_v55  ;;  %v949_v48 = vpop.f32.mrf.mxu1 }
 0x218   :  { %v950_v5 = vadd.f32 %v949_v48, %v816_v57 }
 0x219   :  { %1519 = vst.msk [vmem:[%s2885_s3 + $0x160] sm:$0xff] %vm19_vm1, %v1470_v59  ;;  %v1214_v63 = vadd.f32 %v1213_v25, %v1081_v60 }
 0x21b   :  { %v1268_v0 = vadd.f32 %v1214_v63, %v115_v61 }
 0x21c   :  { %v1369_v3 = vld [vmem:[#allocation2 + $0x168] sm:$0xff] }
 0x21d   :  { %v1422_v4 = vadd.f32 %v2657_v21, %v1369_v3  ;;  %1318 = vst.msk [vmem:[#allocation2 + $0x170] sm:$0xff] %vm19_vm1, %v1268_v0 }
 0x21e   :  { %v1082_v1 = vpop.f32.mrf.mxu2  ;;  %v819_v7 = vpop.f32.mrf.mxu0 }
 0x21f   :  { %v1471_v2 = vmax.f32 %v1422_v4, 0.0  ;;  %v1083_v6 = vadd.f32 %v1082_v1, %v950_v5  ;;  %v952_v8 = vpop.f32.mrf.mxu1 }
 0x220   :  { %v953_v13 = vadd.f32 %v952_v8, %v819_v7 }
 0x221   :  { %1520 = vst.msk [vmem:[%s2885_s3 + $0x168] sm:$0xff] %vm19_vm1, %v1471_v2  ;;  %v1216_v12 = vadd.f32 %v1215_v39, %v1083_v6 }
 0x223   :  { %v1269_v42 = vadd.f32 %v1216_v12, %v116_v9 }
 0x224   :  { %v1370_v14 = vld [vmem:[#allocation2 + $0x170] sm:$0xff] }
 0x225   :  { %v1423_v10 = vadd.f32 %v2657_v21, %v1370_v14  ;;  %1319 = vst.msk [vmem:[#allocation2 + $0x178] sm:$0xff] %vm19_vm1, %v1269_v42 }
 0x226   :  { %v1085_v15 = vpop.f32.mrf.mxu2  ;;  %v821_v18 = vpop.f32.mrf.mxu0 }
 0x227   :  { %v1472_v16 = vmax.f32 %v1423_v10, 0.0  ;;  %v1086_v11 = vadd.f32 %v1085_v15, %v953_v13  ;;  %v954_v20 = vpop.f32.mrf.mxu1 }
 0x229   :  { %1521 = vst.msk [vmem:[%s2885_s3 + $0x170] sm:$0xff] %vm19_vm1, %v1472_v16  ;;  %v1219_v23 = vadd.f32 %v1218_v47, %v1086_v11 }
 0x22b   :  { %v1270_v22 = vadd.f32 %v1219_v23, %v117_v17 }
 0x22c   :  { %v1371_v19 = vld [vmem:[#allocation2 + $0x178] sm:$0xff] }
 0x22d   :  { %v1424_v24 = vadd.f32 %v2657_v21, %v1371_v19  ;;  %1320 = vst.msk [vmem:[#allocation2 + $0x180] sm:$0xff] %vm19_vm1, %v1270_v22 }
 0x22e   :  { %v1087_v25 = vpop.f32.mrf.mxu2 }
 0x22f   :  { %v1473_v26 = vmax.f32 %v1424_v24, 0.0 }
 0x231   :  { %1522 = vst.msk [vmem:[%s2885_s3 + $0x178] sm:$0xff] %vm19_vm1, %v1473_v26 }
 0x234   :  { %v1372_v27 = vld [vmem:[#allocation2 + $0x180] sm:$0xff] }
 0x235   :  { %v1425_v30 = vadd.f32 %v2657_v21, %v1372_v27 }
 0x237   :  { %v1474_v31 = vmax.f32 %v1425_v30, 0.0 }
 0x239   :  { %1523 = vst.msk [vmem:[%s2885_s3 + $0x180] sm:$0xff] %vm19_vm1, %v1474_v31 }

// kernel: model_forward.12
= control target key start
LH: loop header
LB: loop body
LE: loop exit
PB: predicated region body
PF: predicated region fallthrough
CT: control target
= control target key end

     0   :  { %vm51_vm0 = vcmask 1041408   ;;  %s185_s0 = inlined_call_operand.vmem [shape: f32[9,18,128], index: 0, kind: input, shape index: {}]   ;;  %s186_s1 = inlined_call_operand.vmem [shape: f32[18,128], index: 1, kind: output, shape index: {}]  }
   0x1   :  { %v8_v0 = vld [vmem:[%s185_s0] sm:$0xff]  ;;  %v11_v1 = vld [vmem:[%s185_s0 + $0x18] sm:$0xff]  ;;  %v14_v2 = vld [vmem:[%s185_s0 + $0x30] sm:$0xff] }
   0x2   :  { %v17_v3 = vld [vmem:[%s185_s0 + $0x48] sm:$0xff]  ;;  %v20_v4 = vld [vmem:[%s185_s0 + $0x60] sm:$0xff]  ;;  %v23_v5 = vld [vmem:[%s185_s0 + $0x78] sm:$0xff]  ;;  %v35_v6 = vmax.f32 %v8_v0, %v14_v2 }
   0x3   :  { %v26_v7 = vld [vmem:[%s185_s0 + $0x90] sm:$0xff]  ;;  %v29_v8 = vld [vmem:[%s185_s0 + $0xa8] sm:$0xff]  ;;  %v32_v9 = vld [vmem:[%s185_s0 + $0xc0] sm:$0xff]  ;;  %v36_v10 = vmax.f32 %v11_v1, %v17_v3 }
   0x4   :  { %v37_v11 = vmax.f32 %v35_v6, %v20_v4  ;;  %v9_v12 = vld [vmem:[%s185_s0 + $0x8] sm:$0xff]  ;;  %v12_v13 = vld [vmem:[%s185_s0 + $0x20] sm:$0xff]  ;;  %v15_v14 = vld [vmem:[%s185_s0 + $0x38] sm:$0xff] }
   0x5   :  { %v38_v15 = vmax.f32 %v36_v10, %v23_v5  ;;  %v18_v16 = vld [vmem:[%s185_s0 + $0x50] sm:$0xff]  ;;  %v21_v17 = vld [vmem:[%s185_s0 + $0x68] sm:$0xff]  ;;  %v24_v18 = vld [vmem:[%s185_s0 + $0x80] sm:$0xff]  ;;  %v43_v19 = vmax.f32 %v9_v12, %v15_v14 }
   0x6   :  { %v39_v20 = vmax.f32 %v37_v11, %v26_v7  ;;  %v27_v21 = vld [vmem:[%s185_s0 + $0x98] sm:$0xff]  ;;  %v30_v22 = vld [vmem:[%s185_s0 + $0xb0] sm:$0xff]  ;;  %v44_v23 = vmax.f32 %v12_v13, %v18_v16  ;;  %v33_v25 = vld [vmem:[%s185_s0 + $0xc8] sm:$0xff] }
   0x7   :  { %v40_v24 = vmax.f32 %v38_v15, %v29_v8  ;;  %v45_v26 = vmax.f32 %v43_v19, %v21_v17  ;;  %v10_v27 = vld [vmem:[%s185_s0 + $0x10] sm:$0x3]  ;;  %v13_v28 = vld [vmem:[%s185_s0 + $0x28] sm:$0x3]  ;;  %v16_v31 = vld [vmem:[%s185_s0 + $0x40] sm:$0x3] }
   0x8   :  { %v41_v29 = vmax.f32 %v39_v20, %v32_v9  ;;  %v46_v30 = vmax.f32 %v44_v23, %v24_v18  ;;  %v19_v32 = vld [vmem:[%s185_s0 + $0x58] sm:$0x3]  ;;  %v22_v33 = vld [vmem:[%s185_s0 + $0x70] sm:$0x3]  ;;  %v25_v35 = vld [vmem:[%s185_s0 + $0x88] sm:$0x3] }
   0x9   :  { %v47_v34 = vmax.f32 %v45_v26, %v27_v21  ;;  %v28_v38 = vld [vmem:[%s185_s0 + $0xa0] sm:$0x3]  ;;  %v31_v39 = vld [vmem:[%s185_s0 + $0xb8] sm:$0x3]  ;;  %v52_v40 = vsel %vm51_vm0, %v10_v27, -inf  ;;  %v53_v41 = vsel %vm51_vm0, %v13_v28, -inf }
   0xa   :  { %v42_v36 = vmax.f32 %v41_v29, %v40_v24  ;;  %v48_v37 = vmax.f32 %v46_v30, %v30_v22  ;;  %v54_v43 = vsel %vm51_vm0, %v16_v31, -inf  ;;  %v56_v44 = vsel %vm51_vm0, %v19_v32, -inf  ;;  %v34_v46 = vld [vmem:[%s185_s0 + $0xd0] sm:$0x3] }
   0xb   :  { %v49_v42 = vmax.f32 %v47_v34, %v33_v25  ;;  %v58_v45 = vsel %vm51_vm0, %v22_v33, -inf  ;;  %v55_v47 = vmax.f32 %v52_v40, %v54_v43  ;;  %v57_v48 = vmax.f32 %v53_v41, %v56_v44 }
   0xc   :  { %69 = vst [vmem:[%s186_s1] sm:$0xff] %v42_v36  ;;  %v60_v49 = vsel %vm51_vm0, %v25_v35, -inf  ;;  %v62_v51 = vsel %vm51_vm0, %v28_v38, -inf  ;;  %v64_v52 = vsel %vm51_vm0, %v31_v39, -inf  ;;  %v66_v55 = vsel %vm51_vm0, %v34_v46, -inf }
   0xd   :  { %v50_v50 = vmax.f32 %v49_v42, %v48_v37  ;;  %v59_v53 = vmax.f32 %v55_v47, %v58_v45  ;;  %v61_v54 = vmax.f32 %v57_v48, %v60_v49 }
   0xf   :  { %70 = vst [vmem:[%s186_s1 + $0x8] sm:$0xff] %v50_v50  ;;  %v63_v56 = vmax.f32 %v59_v53, %v62_v51  ;;  %v65_v57 = vmax.f32 %v61_v54, %v64_v52 }
  0x11   :  { %v67_v58 = vmax.f32 %v63_v56, %v66_v55 }
  0x13   :  { %v68_v59 = vmax.f32 %v67_v58, %v65_v57 }
  0x15   :  { %71 = vst [vmem:[%s186_s1 + $0x10] sm:$0x3] %v68_v59 }

// kernel: model_forward.13
= control target key start
LH: loop header
LB: loop body
LE: loop exit
PB: predicated region body
PF: predicated region fallthrough
CT: control target
= control target key end

     0   :  { %vm224_vm0 = vcmask 261120   ;;  %vm19_vm1 = vcmask 392192   ;;  %v518_v60 = vmov 0.0   ;;  %s747_s1 = inlined_call_operand.vmem [shape: bf16[288,48], index: 1, kind: input, shape index: {}]   ;;  %s748_s0 = inlined_call_operand.vmem [shape: f32[72,288], index: 0, kind: input, shape index: {}]   ;;  %s749_s2 = inlined_call_operand.vmem [shape: f32[1,48], index: 2, kind: input, shape index: {}]   ;;  %s750_s3 = inlined_call_operand.vmem [shape: f32[72,48], index: 3, kind: output, shape index: {}]  }
   0x1   :  { %v489_v0 = vld [vmem:[%s747_s1 + $0x38] sm:$0xff]  ;;  %v499_v2 = vld [vmem:[%s747_s1 + $0x88] sm:$0xff]  ;;  %v488_v3 = vld [vmem:[%s747_s1 + $0x30] sm:$0xff]  ;;  %22 = vst.msk [vmem:[#allocation2 + $0x10] sm:$0xff] %vm19_vm1, %v518_v60 }
   0x2   :  { %v497_v1 = vld [vmem:[%s747_s1 + $0x78] sm:$0xff]  ;;  %240 = vmatpush.bf16.msra.mxu0 %v489_v0  ;;  %500 = vmatpush.bf16.msra.mxu3 %v489_v0  ;;  %v496_v4 = vld [vmem:[%s747_s1 + $0x70] sm:$0xff]  ;;  %v498_v5 = vld [vmem:[%s747_s1 + $0x80] sm:$0xff]  ;;  %20 = vst.msk [vmem:[#allocation2] sm:$0xff] %vm19_vm1, %v518_v60 }
   0x3   :  { %508 = vmatpush.bf16.msra.mxu1 %v497_v1  ;;  %312 = vmatpush.bf16.msra.mxu2 %v499_v2  ;;  %v40_v6 = vld [vmem:[%s748_s0 + $0x10] sm:$0xff]  ;;  %v43_v7 = vld [vmem:[%s748_s0 + $0x28] sm:$0xff]  ;;  %v486_v11 = vld [vmem:[%s747_s1 + $0x20] sm:$0xff]  ;;  %21 = vst.msk [vmem:[#allocation2 + $0x8] sm:$0xff] %vm19_vm1, %v518_v60 }
   0x4   :  { %v487_v8 = vld [vmem:[%s747_s1 + $0x28] sm:$0xff]  ;;  %v67_v10 = vpack.c.bf16 %v43_v7, %v40_v6  ;;  %v494_v12 = vld [vmem:[%s747_s1 + $0x60] sm:$0xff]  ;;  %v485_v13 = vld [vmem:[%s747_s1 + $0x18] sm:$0xff]  ;;  %23 = vst.msk [vmem:[#allocation2 + $0x18] sm:$0xff] %vm19_vm1, %v518_v60 }
   0x5   :  { %v495_v9 = vld [vmem:[%s747_s1 + $0x68] sm:$0xff]  ;;  %v493_v14 = vld [vmem:[%s747_s1 + $0x58] sm:$0xff]  ;;  %v484_v15 = vld [vmem:[%s747_s1 + $0x10] sm:$0xff]  ;;  %24 = vst.msk [vmem:[#allocation2 + $0x20] sm:$0xff] %vm19_vm1, %v518_v60 }
   0x6   :  { %241 = vmatpush.bf16.msra.mxu0 %v488_v3  ;;  %501 = vmatpush.bf16.msra.mxu3 %v488_v3  ;;  %v492_v16 = vld [vmem:[%s747_s1 + $0x50] sm:$0xff]  ;;  %v46_v17 = vld [vmem:[%s748_s0 + $0x40] sm:$0xff]  ;;  %v49_v18 = vld [vmem:[%s748_s0 + $0x58] sm:$0xff]  ;;  %25 = vst.msk [vmem:[#allocation2 + $0x28] sm:$0xff] %vm19_vm1, %v518_v60 }
   0x7   :  { %509 = vmatpush.bf16.msra.mxu1 %v496_v4  ;;  %313 = vmatpush.bf16.msra.mxu2 %v498_v5  ;;  %v483_v19 = vld [vmem:[%s747_s1 + $0x8] sm:$0xff]  ;;  %v70_v21 = vpack.c.bf16 %v49_v18, %v46_v17  ;;  %v482_v22 = vld [vmem:[%s747_s1] sm:$0xff]  ;;  %v44_v23 = vld [vmem:[%s748_s0 + $0x30] sm:$0xff]  ;;  %26 = vst.msk [vmem:[#allocation2 + $0x30] sm:$0xff] %vm19_vm1, %v518_v60 }
   0x8   :  { %v491_v20 = vld [vmem:[%s747_s1 + $0x48] sm:$0xff]  ;;  %v38_v25 = vld [vmem:[%s748_s0] sm:$0xff]  ;;  %v41_v26 = vld [vmem:[%s748_s0 + $0x18] sm:$0xff]  ;;  %27 = vst.msk [vmem:[#allocation2 + $0x38] sm:$0xff] %vm19_vm1, %v518_v60 }
   0x9   :  { %v47_v24 = vld [vmem:[%s748_s0 + $0x48] sm:$0xff]  ;;  %v490_v27 = vld [vmem:[%s747_s1 + $0x40] sm:$0xff]  ;;  %v45_v28 = vld [vmem:[%s748_s0 + $0x38] sm:$0xff]  ;;  %v65_v31 = vpack.c.bf16 %v41_v26, %v38_v25  ;;  %28 = vst.msk [vmem:[#allocation2 + $0x40] sm:$0xff] %vm19_vm1, %v518_v60 }
   0xa   :  { %242 = vmatpush.bf16.msra.mxu0 %v487_v8  ;;  %502 = vmatpush.bf16.msra.mxu3 %v487_v8  ;;  %v48_v29 = vld [vmem:[%s748_s0 + $0x50] sm:$0xff]  ;;  %v68_v30 = vpack.c.bf16 %v47_v24, %v44_v23  ;;  %v55_v34 = vld [vmem:[%s748_s0 + $0x88] sm:$0xff]  ;;  %v50_v36 = vld [vmem:[%s748_s0 + $0x60] sm:$0xff] }
   0xb   :  { %510 = vmatpush.bf16.msra.mxu1 %v495_v9  ;;  %477 = vmatmul.msk.bf16.vlgmr.msra.gmra.mxu2 %vm224_vm0, %v67_v10  ;;  %v69_v32 = vpack.c.bf16 %v48_v29, %v45_v28  ;;  %v52_v33 = vld [vmem:[%s748_s0 + $0x70] sm:$0xff]  ;;  %v53_v37 = vld [vmem:[%s748_s0 + $0x78] sm:$0xff]  ;;  %v51_v38 = vld [vmem:[%s748_s0 + $0x68] sm:$0xff] }
   0xc   :  { %v73_v35 = vpack.c.bf16 %v55_v34, %v52_v33  ;;  %v54_v39 = vld [vmem:[%s748_s0 + $0x80] sm:$0xff]  ;;  %v71_v40 = vpack.c.bf16 %v53_v37, %v50_v36  ;;  %v61_v43 = vld [vmem:[%s748_s0 + $0xb8] sm:$0xff]  ;;  %v39_v45 = vld [vmem:[%s748_s0 + $0x8] sm:$0xff] }
   0xd   :  { %v72_v41 = vpack.c.bf16 %v54_v39, %v51_v38  ;;  %v58_v42 = vld [vmem:[%s748_s0 + $0xa0] sm:$0xff]  ;;  %v56_v48 = vld [vmem:[%s748_s0 + $0x90] sm:$0xff]  ;;  %v59_v49 = vld [vmem:[%s748_s0 + $0xa8] sm:$0xff] }
   0xe   :  { %243 = vmatpush.bf16.msra.mxu0 %v486_v11  ;;  %503 = vmatpush.bf16.msra.mxu3 %v486_v11  ;;  %v76_v44 = vpack.c.bf16 %v61_v43, %v58_v42  ;;  %v42_v46 = vld [vmem:[%s748_s0 + $0x20] sm:$0xff]  ;;  %v57_v50 = vld [vmem:[%s748_s0 + $0x98] sm:$0xff]  ;;  %v60_v51 = vld [vmem:[%s748_s0 + $0xb0] sm:$0xff]  ;;  %v74_v52 = vpack.c.bf16 %v59_v49, %v56_v48 }
   0xf   :  { %511 = vmatpush.bf16.msra.mxu1 %v494_v12  ;;  %v66_v47 = vpack.c.bf16 %v42_v46, %v39_v45  ;;  %v75_v53 = vpack.c.bf16 %v60_v51, %v57_v50  ;;  %v64_v54 = vld [vmem:[%s748_s0 + $0xd0] sm:$0xff]  ;;  %v62_v56 = vld [vmem:[%s748_s0 + $0xc0] sm:$0xff]  ;;  %v63_v57 = vld [vmem:[%s748_s0 + $0xc8] sm:$0xff] }
  0x10   :  { %v79_v55 = vpack.c.bf16 %v64_v54, %v64_v54  ;;  %v77_v58 = vpack.c.bf16 %v62_v56, %v62_v56  ;;  %v78_v59 = vpack.c.bf16 %v63_v57, %v63_v57  ;;  %v31_v3 = vld [vmem:[#allocation2 + $0x10] sm:$0xff]  ;;  %v32_v11 = vld [vmem:[#allocation2 + $0x18] sm:$0xff]  ;;  %v33_v23 = vld [vmem:[#allocation2 + $0x20] sm:$0xff] }
  0x11   :  { %v29_v34 = vld [vmem:[#allocation2] sm:$0xff]  ;;  %v34_v37 = vld [vmem:[#allocation2 + $0x28] sm:$0xff] }
  0x12   :  { %244 = vmatpush.bf16.msra.mxu0 %v485_v13  ;;  %504 = vmatpush.bf16.msra.mxu3 %v485_v13  ;;  %v692_v13 = vld [vmem:[%s749_s2] ss:$0 sm:$0xff]  ;;  %v30_v49 = vld [vmem:[#allocation2 + $0x8] sm:$0xff] }
  0x13   :  { %512 = vmatpush.bf16.msra.mxu1 %v493_v14 }
  0x16   :  { %245 = vmatpush.bf16.msra.mxu0 %v484_v15  ;;  %505 = vmatpush.bf16.msra.mxu3 %v484_v15 }
  0x17   :  { %513 = vmatpush.bf16.msra.mxu1 %v492_v16 }
  0x1a   :  { %246 = vmatpush.bf16.msra.mxu0 %v483_v19  ;;  %506 = vmatpush.bf16.msra.mxu3 %v483_v19 }
  0x1b   :  { %514 = vmatpush.bf16.msra.mxu1 %v491_v20  ;;  %478 = vmatmul.msk.bf16.gmra.mxu2 %vm224_vm0, %v70_v21 }
  0x1e   :  { %247 = vmatpush.bf16.msra.mxu0 %v482_v22  ;;  %507 = vmatpush.bf16.msra.mxu3 %v482_v22 }
  0x1f   :  { %515 = vmatpush.bf16.msra.mxu1 %v490_v27 }
  0x21   :  { %253 = vmatmul.bf16.vlgmr.msra.gmra.mxu3 %v68_v30  ;;  %248 = vmatmul.bf16.vlgmr.msra.gmra.mxu0 %v65_v31 }
  0x22   :  { %273 = vmatpush.bf16.msrb.mxu0 %v497_v1  ;;  %286 = vmatmul.bf16.vlgmr.msra.gmra.mxu1 %v69_v32 }
  0x26   :  { %274 = vmatpush.bf16.msrb.mxu0 %v496_v4 }
  0x2a   :  { %275 = vmatpush.bf16.msrb.mxu0 %v495_v9 }
  0x2b   :  { %479 = vmatmul.msk.bf16.gmra.mxu2 %vm224_vm0, %v73_v35 }
  0x2e   :  { %276 = vmatpush.bf16.msrb.mxu0 %v494_v12 }
  0x31   :  { %258 = vmatmul.bf16.gmra.mxu3 %v71_v40 }
  0x32   :  { %277 = vmatpush.bf16.msrb.mxu0 %v493_v14  ;;  %291 = vmatmul.bf16.gmra.mxu1 %v72_v41 }
  0x36   :  { %278 = vmatpush.bf16.msrb.mxu0 %v492_v16 }
  0x3a   :  { %279 = vmatpush.bf16.msrb.mxu0 %v491_v20 }
  0x3b   :  { %480 = vmatmul.msk.bf16.gmra.mxu2 %vm224_vm0, %v76_v44 }
  0x3e   :  { %280 = vmatpush.bf16.msrb.mxu0 %v490_v27 }
  0x41   :  { %281 = vmatmul.bf16.vlgmr.msrb.gmra.mxu0 %v66_v47  ;;  %263 = vmatmul.bf16.gmra.mxu3 %v74_v52  ;;  %v35_v52 = vld [vmem:[#allocation2 + $0x30] sm:$0xff] }
  0x42   :  { %296 = vmatmul.bf16.gmra.mxu1 %v75_v53 }
  0x4b   :  { %481 = vmatmul.msk.bf16.gmra.mxu2 %vm224_vm0, %v79_v55 }
  0x51   :  { %268 = vmatmul.bf16.gmra.mxu3 %v77_v58 }
  0x52   :  { %301 = vmatmul.bf16.gmra.mxu1 %v78_v59 }
  0x8e   :  { %v315_v61 = vpop.f32.mrf.mxu2 }
  0x96   :  { %v317_v62 = vpop.f32.mrf.mxu2 }
  0x9e   :  { %v320_v63 = vpop.f32.mrf.mxu2  ;;  %v249_v7 = vpop.f32.mrf.mxu0 }
  0x9f   :  { %v287_v0 = vpop.f32.mrf.mxu1 }
  0xa4   :  { %v254_v1 = vpop.f32.mrf.mxu3 }
  0xa5   :  { %v288_v2 = vadd.f32 %v287_v0, %v254_v1 }
  0xa6   :  { %v322_v4 = vpop.f32.mrf.mxu2  ;;  %v251_v17 = vpop.f32.mrf.mxu0 }
  0xa7   :  { %v321_v5 = vadd.f32 %v320_v63, %v288_v2  ;;  %v289_v6 = vpop.f32.mrf.mxu1  ;;  %v36_v2 = vld [vmem:[#allocation2 + $0x38] sm:$0xff] }
  0xa9   :  { %v341_v8 = vadd.f32 %v321_v5, %v31_v3 }
  0xab   :  { %351 = vst.msk [vmem:[#allocation2 + $0x10] sm:$0xff] %vm19_vm1, %v341_v8 }
  0xac   :  { %v256_v9 = vpop.f32.mrf.mxu3 }
  0xad   :  { %v290_v10 = vadd.f32 %v289_v6, %v256_v9 }
  0xae   :  { %v325_v12 = vpop.f32.mrf.mxu2 }
  0xaf   :  { %v323_v14 = vadd.f32 %v322_v4, %v290_v10  ;;  %v292_v15 = vpop.f32.mrf.mxu1 }
  0xb1   :  { %v342_v16 = vadd.f32 %v323_v14, %v32_v11 }
  0xb2   :  { %v363_v18 = vld [vmem:[#allocation2 + $0x10] sm:$0xff] }
  0xb3   :  { %v376_v19 = vadd.f32 %v692_v13, %v363_v18  ;;  %352 = vst.msk [vmem:[#allocation2 + $0x18] sm:$0xff] %vm19_vm1, %v342_v16  ;;  %v37_v16 = vld [vmem:[#allocation2 + $0x40] sm:$0xff] }
  0xb4   :  { %v259_v20 = vpop.f32.mrf.mxu3 }
  0xb5   :  { %v385_v21 = vmax.f32 %v376_v19, 0.0  ;;  %v293_v22 = vadd.f32 %v292_v15, %v259_v20 }
  0xb6   :  { %v327_v24 = vpop.f32.mrf.mxu2 }
  0xb7   :  { %394 = vst.msk [vmem:[%s750_s3 + $0x10] sm:$0xff] %vm19_vm1, %v385_v21  ;;  %v326_v25 = vadd.f32 %v325_v12, %v293_v22  ;;  %v294_v26 = vpop.f32.mrf.mxu1 }
  0xb9   :  { %v343_v27 = vadd.f32 %v326_v25, %v33_v23 }
  0xba   :  { %v364_v28 = vld [vmem:[#allocation2 + $0x18] sm:$0xff] }
  0xbb   :  { %v377_v29 = vadd.f32 %v692_v13, %v364_v28  ;;  %353 = vst.msk [vmem:[#allocation2 + $0x20] sm:$0xff] %vm19_vm1, %v343_v27 }
  0xbc   :  { %v261_v32 = vpop.f32.mrf.mxu3 }
  0xbd   :  { %v386_v33 = vmax.f32 %v377_v29, 0.0  ;;  %v295_v35 = vadd.f32 %v294_v26, %v261_v32 }
  0xbe   :  { %v282_v30 = vpop.f32.mrf.mxu0  ;;  %v330_v38 = vpop.f32.mrf.mxu2 }
  0xbf   :  { %v283_v31 = vadd.f32 %v282_v30, %v249_v7  ;;  %395 = vst.msk [vmem:[%s750_s3 + $0x18] sm:$0xff] %vm19_vm1, %v386_v33  ;;  %v328_v39 = vadd.f32 %v327_v24, %v295_v35  ;;  %v297_v40 = vpop.f32.mrf.mxu1 }
  0xc1   :  { %v316_v36 = vadd.f32 %v315_v61, %v283_v31  ;;  %v344_v42 = vadd.f32 %v328_v39, %v34_v37 }
  0xc2   :  { %v365_v43 = vld [vmem:[#allocation2 + $0x20] sm:$0xff] }
  0xc3   :  { %v339_v41 = vadd.f32 %v316_v36, %v29_v34  ;;  %v378_v44 = vadd.f32 %v692_v13, %v365_v43  ;;  %354 = vst.msk [vmem:[#allocation2 + $0x28] sm:$0xff] %vm19_vm1, %v344_v42 }
  0xc4   :  { %v264_v47 = vpop.f32.mrf.mxu3 }
  0xc5   :  { %349 = vst.msk [vmem:[#allocation2] sm:$0xff] %vm19_vm1, %v339_v41  ;;  %v387_v48 = vmax.f32 %v378_v44, 0.0  ;;  %v298_v50 = vadd.f32 %v297_v40, %v264_v47 }
  0xc6   :  { %v284_v45 = vpop.f32.mrf.mxu0  ;;  %v332_v53 = vpop.f32.mrf.mxu2 }
  0xc7   :  { %v285_v46 = vadd.f32 %v284_v45, %v251_v17  ;;  %396 = vst.msk [vmem:[%s750_s3 + $0x20] sm:$0xff] %vm19_vm1, %v387_v48  ;;  %v331_v54 = vadd.f32 %v330_v38, %v298_v50  ;;  %v299_v55 = vpop.f32.mrf.mxu1 }
  0xc9   :  { %v318_v51 = vadd.f32 %v317_v62, %v285_v46  ;;  %v345_v58 = vadd.f32 %v331_v54, %v35_v52 }
  0xca   :  { %v366_v60 = vld [vmem:[#allocation2 + $0x28] sm:$0xff] }
  0xcb   :  { %v340_v56 = vadd.f32 %v318_v51, %v30_v49  ;;  %v379_v61 = vadd.f32 %v692_v13, %v366_v60  ;;  %355 = vst.msk [vmem:[#allocation2 + $0x30] sm:$0xff] %vm19_vm1, %v345_v58 }
  0xcc   :  { %v361_v57 = vld [vmem:[#allocation2] sm:$0xff]  ;;  %v266_v63 = vpop.f32.mrf.mxu3 }
  0xcd   :  { %v374_v59 = vadd.f32 %v692_v13, %v361_v57  ;;  %350 = vst.msk [vmem:[#allocation2 + $0x8] sm:$0xff] %vm19_vm1, %v340_v56  ;;  %v388_v0 = vmax.f32 %v379_v61, 0.0  ;;  %v300_v1 = vadd.f32 %v299_v55, %v266_v63 }
  0xce   :  { %v335_v3 = vpop.f32.mrf.mxu2 }
  0xcf   :  { %v383_v62 = vmax.f32 %v374_v59, 0.0  ;;  %397 = vst.msk [vmem:[%s750_s3 + $0x28] sm:$0xff] %vm19_vm1, %v388_v0  ;;  %v333_v4 = vadd.f32 %v332_v53, %v300_v1  ;;  %v302_v5 = vpop.f32.mrf.mxu1 }
  0xd1   :  { %392 = vst.msk [vmem:[%s750_s3] sm:$0xff] %vm19_vm1, %v383_v62  ;;  %v346_v7 = vadd.f32 %v333_v4, %v36_v2 }
  0xd2   :  { %v367_v9 = vld [vmem:[#allocation2 + $0x30] sm:$0xff] }
  0xd3   :  { %v380_v10 = vadd.f32 %v692_v13, %v367_v9  ;;  %356 = vst.msk [vmem:[#allocation2 + $0x38] sm:$0xff] %vm19_vm1, %v346_v7 }
  0xd4   :  { %v362_v6 = vld [vmem:[#allocation2 + $0x8] sm:$0xff]  ;;  %v269_v12 = vpop.f32.mrf.mxu3 }
  0xd5   :  { %v375_v8 = vadd.f32 %v692_v13, %v362_v6  ;;  %v389_v14 = vmax.f32 %v380_v10, 0.0  ;;  %v303_v15 = vadd.f32 %v302_v5, %v269_v12 }
  0xd6   :  { %v337_v17 = vpop.f32.mrf.mxu2 }
  0xd7   :  { %v384_v11 = vmax.f32 %v375_v8, 0.0  ;;  %398 = vst.msk [vmem:[%s750_s3 + $0x30] sm:$0xff] %vm19_vm1, %v389_v14  ;;  %v336_v18 = vadd.f32 %v335_v3, %v303_v15  ;;  %v304_v19 = vpop.f32.mrf.mxu1 }
  0xd9   :  { %393 = vst.msk [vmem:[%s750_s3 + $0x8] sm:$0xff] %vm19_vm1, %v384_v11  ;;  %v347_v20 = vadd.f32 %v336_v18, %v37_v16 }
  0xda   :  { %v368_v21 = vld [vmem:[#allocation2 + $0x38] sm:$0xff] }
  0xdb   :  { %v381_v22 = vadd.f32 %v692_v13, %v368_v21  ;;  %357 = vst.msk [vmem:[#allocation2 + $0x40] sm:$0xff] %vm19_vm1, %v347_v20 }
  0xdc   :  { %v271_v23 = vpop.f32.mrf.mxu3 }
  0xdd   :  { %v390_v24 = vmax.f32 %v381_v22, 0.0 }
  0xdf   :  { %399 = vst.msk [vmem:[%s750_s3 + $0x38] sm:$0xff] %vm19_vm1, %v390_v24 }
  0xe2   :  { %v369_v25 = vld [vmem:[#allocation2 + $0x40] sm:$0xff] }
  0xe3   :  { %v382_v26 = vadd.f32 %v692_v13, %v369_v25 }
  0xe5   :  { %v391_v27 = vmax.f32 %v382_v26, 0.0 }
  0xe7   :  { %400 = vst.msk [vmem:[%s750_s3 + $0x40] sm:$0xff] %vm19_vm1, %v391_v27 }

// kernel: model_forward.15
= control target key start
LH: loop header
LB: loop body
LE: loop exit
PB: predicated region body
PF: predicated region fallthrough
CT: control target
= control target key end

     0   :  { %vm19_vm0 = vcmask 261120   ;;  %v517_v60 = vmov 0.0   ;;  %s746_s1 = inlined_call_operand.vmem [shape: bf16[288,32], index: 1, kind: input, shape index: {}]   ;;  %s747_s0 = inlined_call_operand.vmem [shape: f32[72,288], index: 0, kind: input, shape index: {}]   ;;  %s748_s2 = inlined_call_operand.vmem [shape: f32[1,32], index: 2, kind: input, shape index: {}]   ;;  %s749_s3 = inlined_call_operand.vmem [shape: f32[72,32], index: 3, kind: output, shape index: {}]  }
   0x1   :  { %v488_v0 = vld [vmem:[%s746_s1 + $0x38] sm:$0xff]  ;;  %v498_v2 = vld [vmem:[%s746_s1 + $0x88] sm:$0xff]  ;;  %v487_v3 = vld [vmem:[%s746_s1 + $0x30] sm:$0xff]  ;;  %22 = vst.msk [vmem:[#allocation2 + $0x10] sm:$0xff] %vm19_vm0, %v517_v60 }
   0x2   :  { %v496_v1 = vld [vmem:[%s746_s1 + $0x78] sm:$0xff]  ;;  %240 = vmatpush.bf16.msra.mxu0 %v488_v0  ;;  %499 = vmatpush.bf16.msra.mxu3 %v488_v0  ;;  %v495_v4 = vld [vmem:[%s746_s1 + $0x70] sm:$0xff]  ;;  %v497_v5 = vld [vmem:[%s746_s1 + $0x80] sm:$0xff]  ;;  %20 = vst.msk [vmem:[#allocation2] sm:$0xff] %vm19_vm0, %v517_v60 }
   0x3   :  { %507 = vmatpush.bf16.msra.mxu1 %v496_v1  ;;  %312 = vmatpush.bf16.msra.mxu2 %v498_v2  ;;  %v40_v6 = vld [vmem:[%s747_s0 + $0x10] sm:$0xff]  ;;  %v43_v7 = vld [vmem:[%s747_s0 + $0x28] sm:$0xff]  ;;  %v485_v11 = vld [vmem:[%s746_s1 + $0x20] sm:$0xff]  ;;  %21 = vst.msk [vmem:[#allocation2 + $0x8] sm:$0xff] %vm19_vm0, %v517_v60 }
   0x4   :  { %v486_v8 = vld [vmem:[%s746_s1 + $0x28] sm:$0xff]  ;;  %v67_v10 = vpack.c.bf16 %v43_v7, %v40_v6  ;;  %v493_v12 = vld [vmem:[%s746_s1 + $0x60] sm:$0xff]  ;;  %v484_v13 = vld [vmem:[%s746_s1 + $0x18] sm:$0xff]  ;;  %23 = vst.msk [vmem:[#allocation2 + $0x18] sm:$0xff] %vm19_vm0, %v517_v60 }
   0x5   :  { %v494_v9 = vld [vmem:[%s746_s1 + $0x68] sm:$0xff]  ;;  %v492_v14 = vld [vmem:[%s746_s1 + $0x58] sm:$0xff]  ;;  %v483_v15 = vld [vmem:[%s746_s1 + $0x10] sm:$0xff]  ;;  %24 = vst.msk [vmem:[#allocation2 + $0x20] sm:$0xff] %vm19_vm0, %v517_v60 }
   0x6   :  { %241 = vmatpush.bf16.msra.mxu0 %v487_v3  ;;  %500 = vmatpush.bf16.msra.mxu3 %v487_v3  ;;  %v491_v16 = vld [vmem:[%s746_s1 + $0x50] sm:$0xff]  ;;  %v46_v17 = vld [vmem:[%s747_s0 + $0x40] sm:$0xff]  ;;  %v49_v18 = vld [vmem:[%s747_s0 + $0x58] sm:$0xff]  ;;  %25 = vst.msk [vmem:[#allocation2 + $0x28] sm:$0xff] %vm19_vm0, %v517_v60 }
   0x7   :  { %508 = vmatpush.bf16.msra.mxu1 %v495_v4  ;;  %313 = vmatpush.bf16.msra.mxu2 %v497_v5  ;;  %v482_v19 = vld [vmem:[%s746_s1 + $0x8] sm:$0xff]  ;;  %v70_v21 = vpack.c.bf16 %v49_v18, %v46_v17  ;;  %v481_v22 = vld [vmem:[%s746_s1] sm:$0xff]  ;;  %v44_v23 = vld [vmem:[%s747_s0 + $0x30] sm:$0xff]  ;;  %26 = vst.msk [vmem:[#allocation2 + $0x30] sm:$0xff] %vm19_vm0, %v517_v60 }
   0x8   :  { %v490_v20 = vld [vmem:[%s746_s1 + $0x48] sm:$0xff]  ;;  %v38_v25 = vld [vmem:[%s747_s0] sm:$0xff]  ;;  %v41_v26 = vld [vmem:[%s747_s0 + $0x18] sm:$0xff]  ;;  %27 = vst.msk [vmem:[#allocation2 + $0x38] sm:$0xff] %vm19_vm0, %v517_v60 }
   0x9   :  { %v47_v24 = vld [vmem:[%s747_s0 + $0x48] sm:$0xff]  ;;  %v489_v27 = vld [vmem:[%s746_s1 + $0x40] sm:$0xff]  ;;  %v45_v28 = vld [vmem:[%s747_s0 + $0x38] sm:$0xff]  ;;  %v65_v31 = vpack.c.bf16 %v41_v26, %v38_v25  ;;  %28 = vst.msk [vmem:[#allocation2 + $0x40] sm:$0xff] %vm19_vm0, %v517_v60 }
   0xa   :  { %242 = vmatpush.bf16.msra.mxu0 %v486_v8  ;;  %501 = vmatpush.bf16.msra.mxu3 %v486_v8  ;;  %v48_v29 = vld [vmem:[%s747_s0 + $0x50] sm:$0xff]  ;;  %v68_v30 = vpack.c.bf16 %v47_v24, %v44_v23  ;;  %v55_v34 = vld [vmem:[%s747_s0 + $0x88] sm:$0xff]  ;;  %v50_v36 = vld [vmem:[%s747_s0 + $0x60] sm:$0xff] }
   0xb   :  { %509 = vmatpush.bf16.msra.mxu1 %v494_v9  ;;  %476 = vmatmul.msk.bf16.vlgmr.msra.gmra.mxu2 %vm19_vm0, %v67_v10  ;;  %v69_v32 = vpack.c.bf16 %v48_v29, %v45_v28  ;;  %v52_v33 = vld [vmem:[%s747_s0 + $0x70] sm:$0xff]  ;;  %v53_v37 = vld [vmem:[%s747_s0 + $0x78] sm:$0xff]  ;;  %v51_v38 = vld [vmem:[%s747_s0 + $0x68] sm:$0xff] }
   0xc   :  { %v73_v35 = vpack.c.bf16 %v55_v34, %v52_v33  ;;  %v54_v39 = vld [vmem:[%s747_s0 + $0x80] sm:$0xff]  ;;  %v71_v40 = vpack.c.bf16 %v53_v37, %v50_v36  ;;  %v61_v43 = vld [vmem:[%s747_s0 + $0xb8] sm:$0xff]  ;;  %v39_v45 = vld [vmem:[%s747_s0 + $0x8] sm:$0xff] }
   0xd   :  { %v72_v41 = vpack.c.bf16 %v54_v39, %v51_v38  ;;  %v58_v42 = vld [vmem:[%s747_s0 + $0xa0] sm:$0xff]  ;;  %v56_v48 = vld [vmem:[%s747_s0 + $0x90] sm:$0xff]  ;;  %v59_v49 = vld [vmem:[%s747_s0 + $0xa8] sm:$0xff] }
   0xe   :  { %243 = vmatpush.bf16.msra.mxu0 %v485_v11  ;;  %502 = vmatpush.bf16.msra.mxu3 %v485_v11  ;;  %v76_v44 = vpack.c.bf16 %v61_v43, %v58_v42  ;;  %v42_v46 = vld [vmem:[%s747_s0 + $0x20] sm:$0xff]  ;;  %v57_v50 = vld [vmem:[%s747_s0 + $0x98] sm:$0xff]  ;;  %v60_v51 = vld [vmem:[%s747_s0 + $0xb0] sm:$0xff]  ;;  %v74_v52 = vpack.c.bf16 %v59_v49, %v56_v48 }
   0xf   :  { %510 = vmatpush.bf16.msra.mxu1 %v493_v12  ;;  %v66_v47 = vpack.c.bf16 %v42_v46, %v39_v45  ;;  %v75_v53 = vpack.c.bf16 %v60_v51, %v57_v50  ;;  %v64_v54 = vld [vmem:[%s747_s0 + $0xd0] sm:$0xff]  ;;  %v62_v56 = vld [vmem:[%s747_s0 + $0xc0] sm:$0xff]  ;;  %v63_v57 = vld [vmem:[%s747_s0 + $0xc8] sm:$0xff] }
  0x10   :  { %v79_v55 = vpack.c.bf16 %v64_v54, %v64_v54  ;;  %v77_v58 = vpack.c.bf16 %v62_v56, %v62_v56  ;;  %v78_v59 = vpack.c.bf16 %v63_v57, %v63_v57  ;;  %v31_v3 = vld [vmem:[#allocation2 + $0x10] sm:$0xff]  ;;  %v32_v11 = vld [vmem:[#allocation2 + $0x18] sm:$0xff]  ;;  %v33_v23 = vld [vmem:[#allocation2 + $0x20] sm:$0xff] }
  0x11   :  { %v29_v34 = vld [vmem:[#allocation2] sm:$0xff]  ;;  %v34_v37 = vld [vmem:[#allocation2 + $0x28] sm:$0xff] }
  0x12   :  { %244 = vmatpush.bf16.msra.mxu0 %v484_v13  ;;  %503 = vmatpush.bf16.msra.mxu3 %v484_v13  ;;  %v691_v13 = vld [vmem:[%s748_s2] ss:$0 sm:$0xff]  ;;  %v30_v49 = vld [vmem:[#allocation2 + $0x8] sm:$0xff] }
  0x13   :  { %511 = vmatpush.bf16.msra.mxu1 %v492_v14 }
  0x16   :  { %245 = vmatpush.bf16.msra.mxu0 %v483_v15  ;;  %504 = vmatpush.bf16.msra.mxu3 %v483_v15 }
  0x17   :  { %512 = vmatpush.bf16.msra.mxu1 %v491_v16 }
  0x1a   :  { %246 = vmatpush.bf16.msra.mxu0 %v482_v19  ;;  %505 = vmatpush.bf16.msra.mxu3 %v482_v19 }
  0x1b   :  { %513 = vmatpush.bf16.msra.mxu1 %v490_v20  ;;  %477 = vmatmul.msk.bf16.gmra.mxu2 %vm19_vm0, %v70_v21 }
  0x1e   :  { %247 = vmatpush.bf16.msra.mxu0 %v481_v22  ;;  %506 = vmatpush.bf16.msra.mxu3 %v481_v22 }
  0x1f   :  { %514 = vmatpush.bf16.msra.mxu1 %v489_v27 }
  0x21   :  { %253 = vmatmul.bf16.vlgmr.msra.gmra.mxu3 %v68_v30  ;;  %248 = vmatmul.bf16.vlgmr.msra.gmra.mxu0 %v65_v31 }
  0x22   :  { %273 = vmatpush.bf16.msrb.mxu0 %v496_v1  ;;  %286 = vmatmul.bf16.vlgmr.msra.gmra.mxu1 %v69_v32 }
  0x26   :  { %274 = vmatpush.bf16.msrb.mxu0 %v495_v4 }
  0x2a   :  { %275 = vmatpush.bf16.msrb.mxu0 %v494_v9 }
  0x2b   :  { %478 = vmatmul.msk.bf16.gmra.mxu2 %vm19_vm0, %v73_v35 }
  0x2e   :  { %276 = vmatpush.bf16.msrb.mxu0 %v493_v12 }
  0x31   :  { %258 = vmatmul.bf16.gmra.mxu3 %v71_v40 }
  0x32   :  { %277 = vmatpush.bf16.msrb.mxu0 %v492_v14  ;;  %291 = vmatmul.bf16.gmra.mxu1 %v72_v41 }
  0x36   :  { %278 = vmatpush.bf16.msrb.mxu0 %v491_v16 }
  0x3a   :  { %279 = vmatpush.bf16.msrb.mxu0 %v490_v20 }
  0x3b   :  { %479 = vmatmul.msk.bf16.gmra.mxu2 %vm19_vm0, %v76_v44 }
  0x3e   :  { %280 = vmatpush.bf16.msrb.mxu0 %v489_v27 }
  0x41   :  { %281 = vmatmul.bf16.vlgmr.msrb.gmra.mxu0 %v66_v47  ;;  %263 = vmatmul.bf16.gmra.mxu3 %v74_v52  ;;  %v35_v52 = vld [vmem:[#allocation2 + $0x30] sm:$0xff] }
  0x42   :  { %296 = vmatmul.bf16.gmra.mxu1 %v75_v53 }
  0x4b   :  { %480 = vmatmul.msk.bf16.gmra.mxu2 %vm19_vm0, %v79_v55 }
  0x51   :  { %268 = vmatmul.bf16.gmra.mxu3 %v77_v58 }
  0x52   :  { %301 = vmatmul.bf16.gmra.mxu1 %v78_v59 }
  0x8e   :  { %v315_v61 = vpop.f32.mrf.mxu2 }
  0x96   :  { %v317_v62 = vpop.f32.mrf.mxu2 }
  0x9e   :  { %v320_v63 = vpop.f32.mrf.mxu2  ;;  %v249_v7 = vpop.f32.mrf.mxu0 }
  0x9f   :  { %v287_v0 = vpop.f32.mrf.mxu1 }
  0xa4   :  { %v254_v1 = vpop.f32.mrf.mxu3 }
  0xa5   :  { %v288_v2 = vadd.f32 %v287_v0, %v254_v1 }
  0xa6   :  { %v322_v4 = vpop.f32.mrf.mxu2  ;;  %v251_v17 = vpop.f32.mrf.mxu0 }
  0xa7   :  { %v321_v5 = vadd.f32 %v320_v63, %v288_v2  ;;  %v289_v6 = vpop.f32.mrf.mxu1  ;;  %v36_v2 = vld [vmem:[#allocation2 + $0x38] sm:$0xff] }
  0xa9   :  { %v341_v8 = vadd.f32 %v321_v5, %v31_v3 }
  0xab   :  { %350 = vst.msk [vmem:[#allocation2 + $0x10] sm:$0xff] %vm19_vm0, %v341_v8 }
  0xac   :  { %v256_v9 = vpop.f32.mrf.mxu3 }
  0xad   :  { %v290_v10 = vadd.f32 %v289_v6, %v256_v9 }
  0xae   :  { %v325_v12 = vpop.f32.mrf.mxu2 }
  0xaf   :  { %v323_v14 = vadd.f32 %v322_v4, %v290_v10  ;;  %v292_v15 = vpop.f32.mrf.mxu1 }
  0xb1   :  { %v342_v16 = vadd.f32 %v323_v14, %v32_v11 }
  0xb2   :  { %v362_v18 = vld [vmem:[#allocation2 + $0x10] sm:$0xff] }
  0xb3   :  { %v375_v19 = vadd.f32 %v691_v13, %v362_v18  ;;  %351 = vst.msk [vmem:[#allocation2 + $0x18] sm:$0xff] %vm19_vm0, %v342_v16  ;;  %v37_v16 = vld [vmem:[#allocation2 + $0x40] sm:$0xff] }
  0xb4   :  { %v259_v20 = vpop.f32.mrf.mxu3 }
  0xb5   :  { %v384_v21 = vmax.f32 %v375_v19, 0.0  ;;  %v293_v22 = vadd.f32 %v292_v15, %v259_v20 }
  0xb6   :  { %v327_v24 = vpop.f32.mrf.mxu2 }
  0xb7   :  { %393 = vst.msk [vmem:[%s749_s3 + $0x10] sm:$0xff] %vm19_vm0, %v384_v21  ;;  %v326_v25 = vadd.f32 %v325_v12, %v293_v22  ;;  %v294_v26 = vpop.f32.mrf.mxu1 }
  0xb9   :  { %v343_v27 = vadd.f32 %v326_v25, %v33_v23 }
  0xba   :  { %v363_v28 = vld [vmem:[#allocation2 + $0x18] sm:$0xff] }
  0xbb   :  { %v376_v29 = vadd.f32 %v691_v13, %v363_v28  ;;  %352 = vst.msk [vmem:[#allocation2 + $0x20] sm:$0xff] %vm19_vm0, %v343_v27 }
  0xbc   :  { %v261_v32 = vpop.f32.mrf.mxu3 }
  0xbd   :  { %v385_v33 = vmax.f32 %v376_v29, 0.0  ;;  %v295_v35 = vadd.f32 %v294_v26, %v261_v32 }
  0xbe   :  { %v282_v30 = vpop.f32.mrf.mxu0  ;;  %v330_v38 = vpop.f32.mrf.mxu2 }
  0xbf   :  { %v283_v31 = vadd.f32 %v282_v30, %v249_v7  ;;  %394 = vst.msk [vmem:[%s749_s3 + $0x18] sm:$0xff] %vm19_vm0, %v385_v33  ;;  %v328_v39 = vadd.f32 %v327_v24, %v295_v35  ;;  %v297_v40 = vpop.f32.mrf.mxu1 }
  0xc1   :  { %v316_v36 = vadd.f32 %v315_v61, %v283_v31  ;;  %v344_v42 = vadd.f32 %v328_v39, %v34_v37 }
  0xc2   :  { %v364_v43 = vld [vmem:[#allocation2 + $0x20] sm:$0xff] }
  0xc3   :  { %v339_v41 = vadd.f32 %v316_v36, %v29_v34  ;;  %v377_v44 = vadd.f32 %v691_v13, %v364_v43  ;;  %353 = vst.msk [vmem:[#allocation2 + $0x28] sm:$0xff] %vm19_vm0, %v344_v42 }
  0xc4   :  { %v264_v47 = vpop.f32.mrf.mxu3 }
  0xc5   :  { %348 = vst.msk [vmem:[#allocation2] sm:$0xff] %vm19_vm0, %v339_v41  ;;  %v386_v48 = vmax.f32 %v377_v44, 0.0  ;;  %v298_v50 = vadd.f32 %v297_v40, %v264_v47 }
  0xc6   :  { %v284_v45 = vpop.f32.mrf.mxu0  ;;  %v332_v53 = vpop.f32.mrf.mxu2 }
  0xc7   :  { %v285_v46 = vadd.f32 %v284_v45, %v251_v17  ;;  %395 = vst.msk [vmem:[%s749_s3 + $0x20] sm:$0xff] %vm19_vm0, %v386_v48  ;;  %v331_v54 = vadd.f32 %v330_v38, %v298_v50  ;;  %v299_v55 = vpop.f32.mrf.mxu1 }
  0xc9   :  { %v318_v51 = vadd.f32 %v317_v62, %v285_v46  ;;  %v345_v58 = vadd.f32 %v331_v54, %v35_v52 }
  0xca   :  { %v365_v60 = vld [vmem:[#allocation2 + $0x28] sm:$0xff] }
  0xcb   :  { %v340_v56 = vadd.f32 %v318_v51, %v30_v49  ;;  %v378_v61 = vadd.f32 %v691_v13, %v365_v60  ;;  %354 = vst.msk [vmem:[#allocation2 + $0x30] sm:$0xff] %vm19_vm0, %v345_v58 }
  0xcc   :  { %v360_v57 = vld [vmem:[#allocation2] sm:$0xff]  ;;  %v266_v63 = vpop.f32.mrf.mxu3 }
  0xcd   :  { %v373_v59 = vadd.f32 %v691_v13, %v360_v57  ;;  %349 = vst.msk [vmem:[#allocation2 + $0x8] sm:$0xff] %vm19_vm0, %v340_v56  ;;  %v387_v0 = vmax.f32 %v378_v61, 0.0  ;;  %v300_v1 = vadd.f32 %v299_v55, %v266_v63 }
  0xce   :  { %v335_v3 = vpop.f32.mrf.mxu2 }
  0xcf   :  { %v382_v62 = vmax.f32 %v373_v59, 0.0  ;;  %396 = vst.msk [vmem:[%s749_s3 + $0x28] sm:$0xff] %vm19_vm0, %v387_v0  ;;  %v333_v4 = vadd.f32 %v332_v53, %v300_v1  ;;  %v302_v5 = vpop.f32.mrf.mxu1 }
  0xd1   :  { %391 = vst.msk [vmem:[%s749_s3] sm:$0xff] %vm19_vm0, %v382_v62  ;;  %v346_v7 = vadd.f32 %v333_v4, %v36_v2 }
  0xd2   :  { %v366_v9 = vld [vmem:[#allocation2 + $0x30] sm:$0xff] }
  0xd3   :  { %v379_v10 = vadd.f32 %v691_v13, %v366_v9  ;;  %355 = vst.msk [vmem:[#allocation2 + $0x38] sm:$0xff] %vm19_vm0, %v346_v7 }
  0xd4   :  { %v361_v6 = vld [vmem:[#allocation2 + $0x8] sm:$0xff]  ;;  %v269_v12 = vpop.f32.mrf.mxu3 }
  0xd5   :  { %v374_v8 = vadd.f32 %v691_v13, %v361_v6  ;;  %v388_v14 = vmax.f32 %v379_v10, 0.0  ;;  %v303_v15 = vadd.f32 %v302_v5, %v269_v12 }
  0xd6   :  { %v337_v17 = vpop.f32.mrf.mxu2 }
  0xd7   :  { %v383_v11 = vmax.f32 %v374_v8, 0.0  ;;  %397 = vst.msk [vmem:[%s749_s3 + $0x30] sm:$0xff] %vm19_vm0, %v388_v14  ;;  %v336_v18 = vadd.f32 %v335_v3, %v303_v15  ;;  %v304_v19 = vpop.f32.mrf.mxu1 }
  0xd9   :  { %392 = vst.msk [vmem:[%s749_s3 + $0x8] sm:$0xff] %vm19_vm0, %v383_v11  ;;  %v347_v20 = vadd.f32 %v336_v18, %v37_v16 }
  0xda   :  { %v367_v21 = vld [vmem:[#allocation2 + $0x38] sm:$0xff] }
  0xdb   :  { %v380_v22 = vadd.f32 %v691_v13, %v367_v21  ;;  %356 = vst.msk [vmem:[#allocation2 + $0x40] sm:$0xff] %vm19_vm0, %v347_v20 }
  0xdc   :  { %v271_v23 = vpop.f32.mrf.mxu3 }
  0xdd   :  { %v389_v24 = vmax.f32 %v380_v22, 0.0 }
  0xdf   :  { %398 = vst.msk [vmem:[%s749_s3 + $0x38] sm:$0xff] %vm19_vm0, %v389_v24 }
  0xe2   :  { %v368_v25 = vld [vmem:[#allocation2 + $0x40] sm:$0xff] }
  0xe3   :  { %v381_v26 = vadd.f32 %v691_v13, %v368_v25 }
  0xe5   :  { %v390_v27 = vmax.f32 %v381_v26, 0.0 }
  0xe7   :  { %399 = vst.msk [vmem:[%s749_s3 + $0x40] sm:$0xff] %vm19_vm0, %v390_v27 }

// kernel: model_forward.14
= control target key start
LH: loop header
LB: loop body
LE: loop exit
PB: predicated region body
PF: predicated region fallthrough
CT: control target
= control target key end

     0   :  { %vm310_vm0 = vcmask 392192   ;;  %vm19_vm1 = vcmask 261120   ;;  %s949_s1 = inlined_call_operand.vmem [shape: bf16[432,32], index: 1, kind: input, shape index: {}]   ;;  %s950_s0 = inlined_call_operand.vmem [shape: f32[72,432], index: 0, kind: input, shape index: {}]   ;;  %s951_s2 = inlined_call_operand.vmem [shape: f32[1,32], index: 2, kind: input, shape index: {}]   ;;  %s952_s3 = inlined_call_operand.vmem [shape: f32[72,32], index: 3, kind: output, shape index: {}]  }
   0x1   :  { %v644_v0 = vld [vmem:[%s949_s1 + $0x38] sm:$0xff]  ;;  %v643_v3 = vld [vmem:[%s949_s1 + $0x30] sm:$0xff]  ;;  %v642_v7 = vld [vmem:[%s949_s1 + $0x28] sm:$0xff] }
   0x2   :  { %v652_v1 = vld [vmem:[%s949_s1 + $0x78] sm:$0xff]  ;;  %326 = vmatpush.bf16.msra.mxu0 %v644_v0  ;;  %v651_v4 = vld [vmem:[%s949_s1 + $0x70] sm:$0xff]  ;;  %v650_v8 = vld [vmem:[%s949_s1 + $0x68] sm:$0xff] }
   0x3   :  { %v660_v2 = vld [vmem:[%s949_s1 + $0xb8] sm:$0xff]  ;;  %359 = vmatpush.bf16.msra.mxu1 %v652_v1  ;;  %v659_v5 = vld [vmem:[%s949_s1 + $0xb0] sm:$0xff]  ;;  %v658_v9 = vld [vmem:[%s949_s1 + $0xa8] sm:$0xff] }
   0x4   :  { %392 = vmatpush.bf16.msra.mxu2 %v660_v2  ;;  %v663_v6 = vld [vmem:[%s949_s1 + $0xd0] sm:$0xff]  ;;  %v662_v10 = vld [vmem:[%s949_s1 + $0xc8] sm:$0xff]  ;;  %v641_v11 = vld [vmem:[%s949_s1 + $0x20] sm:$0xff] }
   0x5   :  { %430 = vmatpush.bf16.msra.mxu3 %v663_v6  ;;  %v649_v12 = vld [vmem:[%s949_s1 + $0x60] sm:$0xff]  ;;  %v41_v15 = vld [vmem:[%s950_s0 + $0x18] sm:$0xff]  ;;  %v639_v21 = vld [vmem:[%s949_s1 + $0x10] sm:$0xff] }
   0x6   :  { %327 = vmatpush.bf16.msra.mxu0 %v643_v3  ;;  %v657_v13 = vld [vmem:[%s949_s1 + $0xa0] sm:$0xff]  ;;  %v45_v16 = vld [vmem:[%s950_s0 + $0x38] sm:$0xff]  ;;  %v647_v22 = vld [vmem:[%s949_s1 + $0x50] sm:$0xff] }
   0x7   :  { %360 = vmatpush.bf16.msra.mxu1 %v651_v4  ;;  %v661_v14 = vld [vmem:[%s949_s1 + $0xc0] sm:$0xff]  ;;  %v640_v17 = vld [vmem:[%s949_s1 + $0x18] sm:$0xff]  ;;  %v77_v20 = vpack.c.bf16 %v45_v16, %v41_v15  ;;  %v655_v23 = vld [vmem:[%s949_s1 + $0x90] sm:$0xff] }
   0x8   :  { %393 = vmatpush.bf16.msra.mxu2 %v659_v5  ;;  %v648_v18 = vld [vmem:[%s949_s1 + $0x58] sm:$0xff]  ;;  %v638_v24 = vld [vmem:[%s949_s1 + $0x8] sm:$0xff]  ;;  %v637_v27 = vld [vmem:[%s949_s1] sm:$0xff] }
   0x9   :  { %431 = vmatpush.bf16.msra.mxu3 %v662_v10  ;;  %v656_v19 = vld [vmem:[%s949_s1 + $0x98] sm:$0xff]  ;;  %v646_v25 = vld [vmem:[%s949_s1 + $0x48] sm:$0xff]  ;;  %v645_v28 = vld [vmem:[%s949_s1 + $0x40] sm:$0xff] }
   0xa   :  { %328 = vmatpush.bf16.msra.mxu0 %v642_v7  ;;  %v654_v26 = vld [vmem:[%s949_s1 + $0x88] sm:$0xff]  ;;  %v38_v29 = vld [vmem:[%s950_s0] sm:$0xff]  ;;  %v40_v34 = vld [vmem:[%s950_s0 + $0x10] sm:$0xff] }
   0xb   :  { %361 = vmatpush.bf16.msra.mxu1 %v650_v8  ;;  %v42_v30 = vld [vmem:[%s950_s0 + $0x20] sm:$0xff]  ;;  %v39_v31 = vld [vmem:[%s950_s0 + $0x8] sm:$0xff]  ;;  %v44_v35 = vld [vmem:[%s950_s0 + $0x30] sm:$0xff] }
   0xc   :  { %394 = vmatpush.bf16.msra.mxu2 %v658_v9  ;;  %v43_v32 = vld [vmem:[%s950_s0 + $0x28] sm:$0xff]  ;;  %v653_v33 = vld [vmem:[%s949_s1 + $0x80] sm:$0xff]  ;;  %v49_v36 = vld [vmem:[%s950_s0 + $0x58] sm:$0xff]  ;;  %v74_v38 = vpack.c.bf16 %v42_v30, %v38_v29  ;;  %v76_v40 = vpack.c.bf16 %v44_v35, %v40_v34 }
   0xd   :  { %432 = vmatpush.bf16.msra.mxu3 %v661_v14  ;;  %v53_v37 = vld [vmem:[%s950_s0 + $0x78] sm:$0xff]  ;;  %v75_v39 = vpack.c.bf16 %v43_v32, %v39_v31  ;;  %v46_v42 = vld [vmem:[%s950_s0 + $0x40] sm:$0xff]  ;;  %v47_v44 = vld [vmem:[%s950_s0 + $0x48] sm:$0xff] }
   0xe   :  { %329 = vmatpush.bf16.msra.mxu0 %v641_v11  ;;  %v81_v41 = vpack.c.bf16 %v53_v37, %v49_v36  ;;  %v50_v43 = vld [vmem:[%s950_s0 + $0x60] sm:$0xff]  ;;  %v51_v45 = vld [vmem:[%s950_s0 + $0x68] sm:$0xff]  ;;  %v48_v46 = vld [vmem:[%s950_s0 + $0x50] sm:$0xff] }
   0xf   :  { %362 = vmatpush.bf16.msra.mxu1 %v649_v12  ;;  %v52_v47 = vld [vmem:[%s950_s0 + $0x70] sm:$0xff]  ;;  %v57_v48 = vld [vmem:[%s950_s0 + $0x98] sm:$0xff]  ;;  %v78_v50 = vpack.c.bf16 %v50_v43, %v46_v42  ;;  %v79_v51 = vpack.c.bf16 %v51_v45, %v47_v44  ;;  %v54_v54 = vld [vmem:[%s950_s0 + $0x80] sm:$0xff] }
  0x10   :  { %395 = vmatpush.bf16.msra.mxu2 %v657_v13  ;;  %632 = vmatmul.msk.bf16.vlgmr.msra.gmra.mxu3 %vm310_vm0, %v77_v20  ;;  %v61_v49 = vld [vmem:[%s950_s0 + $0xb8] sm:$0xff]  ;;  %v80_v52 = vpack.c.bf16 %v52_v47, %v48_v46  ;;  %v58_v55 = vld [vmem:[%s950_s0 + $0xa0] sm:$0xff]  ;;  %v55_v56 = vld [vmem:[%s950_s0 + $0x88] sm:$0xff] }
  0x11   :  { %v85_v53 = vpack.c.bf16 %v61_v49, %v57_v48  ;;  %v59_v57 = vld [vmem:[%s950_s0 + $0xa8] sm:$0xff]  ;;  %v56_v58 = vld [vmem:[%s950_s0 + $0x90] sm:$0xff]  ;;  %v65_v60 = vld [vmem:[%s950_s0 + $0xd8] sm:$0xff]  ;;  %v82_v62 = vpack.c.bf16 %v58_v55, %v54_v54 }
  0x12   :  { %330 = vmatpush.bf16.msra.mxu0 %v640_v17  ;;  %v60_v59 = vld [vmem:[%s950_s0 + $0xb0] sm:$0xff]  ;;  %v69_v61 = vld [vmem:[%s950_s0 + $0xf8] sm:$0xff]  ;;  %v83_v63 = vpack.c.bf16 %v59_v57, %v55_v56  ;;  %v62_v2 = vld [vmem:[%s950_s0 + $0xc0] sm:$0xff] }
  0x13   :  { %363 = vmatpush.bf16.msra.mxu1 %v648_v18  ;;  %v84_v0 = vpack.c.bf16 %v60_v59, %v56_v58  ;;  %v89_v1 = vpack.c.bf16 %v69_v61, %v65_v60  ;;  %v66_v3 = vld [vmem:[%s950_s0 + $0xe0] sm:$0xff]  ;;  %v63_v4 = vld [vmem:[%s950_s0 + $0xc8] sm:$0xff]  ;;  %v64_v6 = vld [vmem:[%s950_s0 + $0xd0] sm:$0xff] }
  0x14   :  { %396 = vmatpush.bf16.msra.mxu2 %v656_v19  ;;  %v67_v5 = vld [vmem:[%s950_s0 + $0xe8] sm:$0xff]  ;;  %v68_v7 = vld [vmem:[%s950_s0 + $0xf0] sm:$0xff]  ;;  %v73_v8 = vld [vmem:[%s950_s0 + $0x118] sm:$0xff]  ;;  %v86_v9 = vpack.c.bf16 %v66_v3, %v62_v2  ;;  %v666_v19 = vmov 0.0  }
  0x15   :  { %v87_v10 = vpack.c.bf16 %v67_v5, %v63_v4  ;;  %v88_v11 = vpack.c.bf16 %v68_v7, %v64_v6  ;;  %v93_v12 = vpack.c.bf16 %v73_v8, %v73_v8  ;;  %v70_v13 = vld [vmem:[%s950_s0 + $0x100] sm:$0xff]  ;;  %v71_v14 = vld [vmem:[%s950_s0 + $0x108] sm:$0xff]  ;;  %v72_v15 = vld [vmem:[%s950_s0 + $0x110] sm:$0xff]  ;;  %20 = vst.msk [vmem:[#allocation2] sm:$0xff] %vm19_vm1, %v666_v19 }
  0x16   :  { %331 = vmatpush.bf16.msra.mxu0 %v639_v21  ;;  %v90_v16 = vpack.c.bf16 %v70_v13, %v70_v13  ;;  %v91_v17 = vpack.c.bf16 %v71_v14, %v71_v14  ;;  %v92_v18 = vpack.c.bf16 %v72_v15, %v72_v15  ;;  %21 = vst.msk [vmem:[#allocation2 + $0x8] sm:$0xff] %vm19_vm1, %v666_v19 }
  0x17   :  { %364 = vmatpush.bf16.msra.mxu1 %v647_v22  ;;  %22 = vst.msk [vmem:[#allocation2 + $0x10] sm:$0xff] %vm19_vm1, %v666_v19 }
  0x18   :  { %397 = vmatpush.bf16.msra.mxu2 %v655_v23  ;;  %23 = vst.msk [vmem:[#allocation2 + $0x18] sm:$0xff] %vm19_vm1, %v666_v19 }
  0x19   :  { %24 = vst.msk [vmem:[#allocation2 + $0x20] sm:$0xff] %vm19_vm1, %v666_v19 }
  0x1a   :  { %332 = vmatpush.bf16.msra.mxu0 %v638_v24  ;;  %25 = vst.msk [vmem:[#allocation2 + $0x28] sm:$0xff] %vm19_vm1, %v666_v19 }
  0x1b   :  { %365 = vmatpush.bf16.msra.mxu1 %v646_v25  ;;  %26 = vst.msk [vmem:[#allocation2 + $0x30] sm:$0xff] %vm19_vm1, %v666_v19 }
  0x1c   :  { %398 = vmatpush.bf16.msra.mxu2 %v654_v26  ;;  %27 = vst.msk [vmem:[#allocation2 + $0x38] sm:$0xff] %vm19_vm1, %v666_v19  ;;  %v29_v29 = vld [vmem:[#allocation2] sm:$0xff] }
  0x1d   :  { %28 = vst.msk [vmem:[#allocation2 + $0x40] sm:$0xff] %vm19_vm1, %v666_v19 }
  0x1e   :  { %333 = vmatpush.bf16.msra.mxu0 %v637_v27 }
  0x1f   :  { %366 = vmatpush.bf16.msra.mxu1 %v645_v28 }
  0x20   :  { %399 = vmatpush.bf16.msra.mxu2 %v653_v33  ;;  %633 = vmatmul.msk.bf16.gmra.mxu3 %vm310_vm0, %v81_v41 }
  0x21   :  { %334 = vmatmul.bf16.vlgmr.msra.gmra.mxu0 %v74_v38  ;;  %v30_v38 = vld [vmem:[#allocation2 + $0x8] sm:$0xff] }
  0x22   :  { %367 = vmatmul.bf16.vlgmr.msra.gmra.mxu1 %v75_v39 }
  0x23   :  { %400 = vmatmul.bf16.vlgmr.msra.gmra.mxu2 %v76_v40  ;;  %v894_v40 = vld [vmem:[%s951_s2] ss:$0 sm:$0xff] }
  0x30   :  { %634 = vmatmul.msk.bf16.gmra.mxu3 %vm310_vm0, %v85_v53 }
  0x31   :  { %339 = vmatmul.bf16.gmra.mxu0 %v78_v50 }
  0x32   :  { %372 = vmatmul.bf16.gmra.mxu1 %v79_v51  ;;  %v31_v51 = vld [vmem:[#allocation2 + $0x10] sm:$0xff] }
  0x33   :  { %405 = vmatmul.bf16.gmra.mxu2 %v80_v52 }
  0x40   :  { %635 = vmatmul.msk.bf16.gmra.mxu3 %vm310_vm0, %v89_v1 }
  0x41   :  { %344 = vmatmul.bf16.gmra.mxu0 %v82_v62 }
  0x42   :  { %377 = vmatmul.bf16.gmra.mxu1 %v83_v63  ;;  %v32_v63 = vld [vmem:[#allocation2 + $0x18] sm:$0xff] }
  0x43   :  { %410 = vmatmul.bf16.gmra.mxu2 %v84_v0 }
  0x50   :  { %636 = vmatmul.msk.bf16.gmra.mxu3 %vm310_vm0, %v93_v12 }
  0x51   :  { %349 = vmatmul.bf16.gmra.mxu0 %v86_v9 }
  0x52   :  { %382 = vmatmul.bf16.gmra.mxu1 %v87_v10 }
  0x53   :  { %415 = vmatmul.bf16.gmra.mxu2 %v88_v11  ;;  %v33_v11 = vld [vmem:[#allocation2 + $0x20] sm:$0xff] }
  0x61   :  { %354 = vmatmul.bf16.gmra.mxu0 %v90_v16 }
  0x62   :  { %387 = vmatmul.bf16.gmra.mxu1 %v91_v17 }
  0x63   :  { %420 = vmatmul.bf16.gmra.mxu2 %v92_v18 }
  0x93   :  { %v434_v20 = vpop.f32.mrf.mxu3 }
  0x9b   :  { %v436_v23 = vpop.f32.mrf.mxu3 }
  0x9e   :  { %v335_v21 = vpop.f32.mrf.mxu0 }
  0x9f   :  { %v368_v22 = vpop.f32.mrf.mxu1 }
  0xa0   :  { %v369_v24 = vadd.f32 %v368_v22, %v335_v21 }
  0xa3   :  { %v439_v30 = vpop.f32.mrf.mxu3 }
  0xa6   :  { %v401_v25 = vpop.f32.mrf.mxu2  ;;  %v337_v27 = vpop.f32.mrf.mxu0 }
  0xa7   :  { %v402_v26 = vadd.f32 %v401_v25, %v369_v24  ;;  %v370_v28 = vpop.f32.mrf.mxu1 }
  0xa8   :  { %v371_v33 = vadd.f32 %v370_v28, %v337_v27 }
  0xa9   :  { %v435_v31 = vadd.f32 %v434_v20, %v402_v26 }
  0xab   :  { %v458_v32 = vadd.f32 %v435_v31, %v29_v29  ;;  %v441_v39 = vpop.f32.mrf.mxu3 }
  0xad   :  { %468 = vst.msk [vmem:[#allocation2] sm:$0xff] %vm19_vm1, %v458_v32 }
  0xae   :  { %v403_v34 = vpop.f32.mrf.mxu2  ;;  %v340_v36 = vpop.f32.mrf.mxu0 }
  0xaf   :  { %v404_v35 = vadd.f32 %v403_v34, %v371_v33  ;;  %v373_v37 = vpop.f32.mrf.mxu1 }
  0xb0   :  { %v374_v43 = vadd.f32 %v373_v37, %v340_v36 }
  0xb1   :  { %v437_v41 = vadd.f32 %v436_v23, %v404_v35  ;;  %v34_v23 = vld [vmem:[#allocation2 + $0x28] sm:$0xff]  ;;  %v35_v35 = vld [vmem:[#allocation2 + $0x30] sm:$0xff] }
  0xb3   :  { %v459_v42 = vadd.f32 %v437_v41, %v30_v38  ;;  %v444_v52 = vpop.f32.mrf.mxu3 }
  0xb4   :  { %v480_v44 = vld [vmem:[#allocation2] sm:$0xff] }
  0xb5   :  { %v493_v45 = vadd.f32 %v894_v40, %v480_v44  ;;  %469 = vst.msk [vmem:[#allocation2 + $0x8] sm:$0xff] %vm19_vm1, %v459_v42 }
  0xb6   :  { %v406_v46 = vpop.f32.mrf.mxu2  ;;  %v342_v49 = vpop.f32.mrf.mxu0 }
  0xb7   :  { %v502_v47 = vmax.f32 %v493_v45, 0.0  ;;  %v407_v48 = vadd.f32 %v406_v46, %v374_v43  ;;  %v375_v50 = vpop.f32.mrf.mxu1 }
  0xb8   :  { %v376_v57 = vadd.f32 %v375_v50, %v342_v49 }
  0xb9   :  { %511 = vst.msk [vmem:[%s952_s3] sm:$0xff] %vm19_vm1, %v502_v47  ;;  %v440_v53 = vadd.f32 %v439_v30, %v407_v48  ;;  %v36_v48 = vld [vmem:[#allocation2 + $0x38] sm:$0xff] }
  0xbb   :  { %v460_v54 = vadd.f32 %v440_v53, %v31_v51  ;;  %v446_v0 = vpop.f32.mrf.mxu3 }
  0xbc   :  { %v481_v55 = vld [vmem:[#allocation2 + $0x8] sm:$0xff] }
  0xbd   :  { %v494_v56 = vadd.f32 %v894_v40, %v481_v55  ;;  %470 = vst.msk [vmem:[#allocation2 + $0x10] sm:$0xff] %vm19_vm1, %v460_v54 }
  0xbe   :  { %v408_v58 = vpop.f32.mrf.mxu2  ;;  %v345_v61 = vpop.f32.mrf.mxu0 }
  0xbf   :  { %v503_v59 = vmax.f32 %v494_v56, 0.0  ;;  %v409_v60 = vadd.f32 %v408_v58, %v376_v57  ;;  %v378_v62 = vpop.f32.mrf.mxu1 }
  0xc0   :  { %v379_v3 = vadd.f32 %v378_v62, %v345_v61 }
  0xc1   :  { %512 = vst.msk [vmem:[%s952_s3 + $0x8] sm:$0xff] %vm19_vm1, %v503_v59  ;;  %v442_v1 = vadd.f32 %v441_v39, %v409_v60  ;;  %v37_v60 = vld [vmem:[#allocation2 + $0x40] sm:$0xff] }
  0xc3   :  { %v461_v2 = vadd.f32 %v442_v1, %v32_v63  ;;  %v449_v12 = vpop.f32.mrf.mxu3 }
  0xc4   :  { %v482_v4 = vld [vmem:[#allocation2 + $0x10] sm:$0xff] }
  0xc5   :  { %v495_v5 = vadd.f32 %v894_v40, %v482_v4  ;;  %471 = vst.msk [vmem:[#allocation2 + $0x18] sm:$0xff] %vm19_vm1, %v461_v2 }
  0xc6   :  { %v411_v6 = vpop.f32.mrf.mxu2  ;;  %v347_v9 = vpop.f32.mrf.mxu0 }
  0xc7   :  { %v504_v7 = vmax.f32 %v495_v5, 0.0  ;;  %v412_v8 = vadd.f32 %v411_v6, %v379_v3  ;;  %v380_v10 = vpop.f32.mrf.mxu1 }
  0xc8   :  { %v381_v17 = vadd.f32 %v380_v10, %v347_v9 }
  0xc9   :  { %513 = vst.msk [vmem:[%s952_s3 + $0x10] sm:$0xff] %vm19_vm1, %v504_v7  ;;  %v445_v13 = vadd.f32 %v444_v52, %v412_v8 }
  0xcb   :  { %v462_v14 = vadd.f32 %v445_v13, %v33_v11  ;;  %v451_v24 = vpop.f32.mrf.mxu3 }
  0xcc   :  { %v483_v15 = vld [vmem:[#allocation2 + $0x18] sm:$0xff] }
  0xcd   :  { %v496_v16 = vadd.f32 %v894_v40, %v483_v15  ;;  %472 = vst.msk [vmem:[#allocation2 + $0x20] sm:$0xff] %vm19_vm1, %v462_v14 }
  0xce   :  { %v413_v18 = vpop.f32.mrf.mxu2  ;;  %v350_v21 = vpop.f32.mrf.mxu0 }
  0xcf   :  { %v505_v19 = vmax.f32 %v496_v16, 0.0  ;;  %v414_v20 = vadd.f32 %v413_v18, %v381_v17  ;;  %v383_v22 = vpop.f32.mrf.mxu1 }
  0xd0   :  { %v384_v27 = vadd.f32 %v383_v22, %v350_v21 }
  0xd1   :  { %514 = vst.msk [vmem:[%s952_s3 + $0x18] sm:$0xff] %vm19_vm1, %v505_v19  ;;  %v447_v25 = vadd.f32 %v446_v0, %v414_v20 }
  0xd3   :  { %v463_v26 = vadd.f32 %v447_v25, %v34_v23  ;;  %v454_v36 = vpop.f32.mrf.mxu3 }
  0xd4   :  { %v484_v28 = vld [vmem:[#allocation2 + $0x20] sm:$0xff] }
  0xd5   :  { %v497_v29 = vadd.f32 %v894_v40, %v484_v28  ;;  %473 = vst.msk [vmem:[#allocation2 + $0x28] sm:$0xff] %vm19_vm1, %v463_v26 }
  0xd6   :  { %v416_v30 = vpop.f32.mrf.mxu2  ;;  %v352_v33 = vpop.f32.mrf.mxu0 }
  0xd7   :  { %v506_v31 = vmax.f32 %v497_v29, 0.0  ;;  %v417_v32 = vadd.f32 %v416_v30, %v384_v27  ;;  %v385_v34 = vpop.f32.mrf.mxu1 }
  0xd8   :  { %v386_v42 = vadd.f32 %v385_v34, %v352_v33 }
  0xd9   :  { %515 = vst.msk [vmem:[%s952_s3 + $0x20] sm:$0xff] %vm19_vm1, %v506_v31  ;;  %v450_v37 = vadd.f32 %v449_v12, %v417_v32 }
  0xdb   :  { %v464_v38 = vadd.f32 %v450_v37, %v35_v35  ;;  %v456_v49 = vpop.f32.mrf.mxu3 }
  0xdc   :  { %v485_v39 = vld [vmem:[#allocation2 + $0x28] sm:$0xff] }
  0xdd   :  { %v498_v41 = vadd.f32 %v894_v40, %v485_v39  ;;  %474 = vst.msk [vmem:[#allocation2 + $0x30] sm:$0xff] %vm19_vm1, %v464_v38 }
  0xde   :  { %v418_v43 = vpop.f32.mrf.mxu2  ;;  %v355_v46 = vpop.f32.mrf.mxu0 }
  0xdf   :  { %v507_v44 = vmax.f32 %v498_v41, 0.0  ;;  %v419_v45 = vadd.f32 %v418_v43, %v386_v42  ;;  %v388_v47 = vpop.f32.mrf.mxu1 }
  0xe0   :  { %v389_v52 = vadd.f32 %v388_v47, %v355_v46 }
  0xe1   :  { %516 = vst.msk [vmem:[%s952_s3 + $0x28] sm:$0xff] %vm19_vm1, %v507_v44  ;;  %v452_v50 = vadd.f32 %v451_v24, %v419_v45 }
  0xe3   :  { %v465_v51 = vadd.f32 %v452_v50, %v36_v48 }
  0xe4   :  { %v486_v53 = vld [vmem:[#allocation2 + $0x30] sm:$0xff] }
  0xe5   :  { %v499_v54 = vadd.f32 %v894_v40, %v486_v53  ;;  %475 = vst.msk [vmem:[#allocation2 + $0x38] sm:$0xff] %vm19_vm1, %v465_v51 }
  0xe6   :  { %v421_v55 = vpop.f32.mrf.mxu2  ;;  %v357_v58 = vpop.f32.mrf.mxu0 }
  0xe7   :  { %v508_v56 = vmax.f32 %v499_v54, 0.0  ;;  %v422_v57 = vadd.f32 %v421_v55, %v389_v52  ;;  %v390_v59 = vpop.f32.mrf.mxu1 }
  0xe9   :  { %517 = vst.msk [vmem:[%s952_s3 + $0x30] sm:$0xff] %vm19_vm1, %v508_v56  ;;  %v455_v61 = vadd.f32 %v454_v36, %v422_v57 }
  0xeb   :  { %v466_v62 = vadd.f32 %v455_v61, %v37_v60 }
  0xec   :  { %v487_v63 = vld [vmem:[#allocation2 + $0x38] sm:$0xff] }
  0xed   :  { %v500_v0 = vadd.f32 %v894_v40, %v487_v63  ;;  %476 = vst.msk [vmem:[#allocation2 + $0x40] sm:$0xff] %vm19_vm1, %v466_v62 }
  0xee   :  { %v423_v1 = vpop.f32.mrf.mxu2 }
  0xef   :  { %v509_v2 = vmax.f32 %v500_v0, 0.0 }
  0xf1   :  { %518 = vst.msk [vmem:[%s952_s3 + $0x38] sm:$0xff] %vm19_vm1, %v509_v2 }
  0xf4   :  { %v488_v3 = vld [vmem:[#allocation2 + $0x40] sm:$0xff] }
  0xf5   :  { %v501_v4 = vadd.f32 %v894_v40, %v488_v3 }
  0xf7   :  { %v510_v5 = vmax.f32 %v501_v4, 0.0 }
  0xf9   :  { %519 = vst.msk [vmem:[%s952_s3 + $0x40] sm:$0xff] %vm19_vm1, %v510_v5 }

// kernel: model_forward.16
= control target key start
LH: loop header
LB: loop body
LE: loop exit
PB: predicated region body
PF: predicated region fallthrough
CT: control target
= control target key end

     0   :  { %vm17_vm0 = vcmask 1041408   ;;  %s89_s0 = inlined_call_operand.vmem [shape: f32[9,2,128], index: 0, kind: input, shape index: {}]   ;;  %s90_s1 = inlined_call_operand.vmem [shape: f32[2,128], index: 1, kind: output, shape index: {}]  }
   0x1   :  { %v8_v0 = vld [vmem:[%s89_s0] sm:$0x3]  ;;  %v9_v1 = vld [vmem:[%s89_s0 + $0x2] sm:$0x3]  ;;  %v10_v2 = vld [vmem:[%s89_s0 + $0x4] sm:$0x3] }
   0x2   :  { %v11_v3 = vld [vmem:[%s89_s0 + $0x6] sm:$0x3]  ;;  %v12_v4 = vld [vmem:[%s89_s0 + $0x8] sm:$0x3]  ;;  %v13_v5 = vld [vmem:[%s89_s0 + $0xa] sm:$0x3] }
   0x3   :  { %v14_v6 = vld [vmem:[%s89_s0 + $0xc] sm:$0x3]  ;;  %v15_v7 = vld [vmem:[%s89_s0 + $0xe] sm:$0x3]  ;;  %v16_v8 = vld [vmem:[%s89_s0 + $0x10] sm:$0x3] }
   0x4   :  { %v18_v9 = vsel %vm17_vm0, %v8_v0, -inf  ;;  %v19_v10 = vsel %vm17_vm0, %v9_v1, -inf  ;;  %v20_v11 = vsel %vm17_vm0, %v10_v2, -inf  ;;  %v21_v12 = vsel %vm17_vm0, %v11_v3, -inf }
   0x5   :  { %v22_v13 = vsel %vm17_vm0, %v12_v4, -inf  ;;  %v24_v14 = vsel %vm17_vm0, %v13_v5, -inf  ;;  %v26_v15 = vsel %vm17_vm0, %v14_v6, -inf  ;;  %v28_v16 = vsel %vm17_vm0, %v15_v7, -inf }
   0x6   :  { %v23_v17 = vmax.f32 %v18_v9, %v22_v13  ;;  %v25_v18 = vmax.f32 %v19_v10, %v24_v14  ;;  %v27_v19 = vmax.f32 %v20_v11, %v26_v15  ;;  %v29_v20 = vmax.f32 %v21_v12, %v28_v16 }
   0x7   :  { %v30_v21 = vsel %vm17_vm0, %v16_v8, -inf }
   0x8   :  { %v31_v22 = vmax.f32 %v23_v17, %v30_v21  ;;  %v33_v23 = vmax.f32 %v27_v19, %v29_v20 }
   0xa   :  { %v32_v24 = vmax.f32 %v31_v22, %v25_v18 }
   0xc   :  { %v34_v25 = vmax.f32 %v32_v24, %v33_v23 }
   0xe   :  { %35 = vst [vmem:[%s90_s1] sm:$0x3] %v34_v25 }

// kernel: model_forward.17
= control target key start
LH: loop header
LB: loop body
LE: loop exit
PB: predicated region body
PF: predicated region fallthrough
CT: control target
= control target key end

     0   :  { %vm32_vm0 = vcmask 254976   ;;  %s383_s0 = inlined_call_operand.vmem [shape: f32[4,2,32], index: 0, kind: input, shape index: {}]   ;;  %s384_s1 = inlined_call_operand.vmem [shape: bf16[32,64], index: 1, kind: input, shape index: {}]   ;;  %s385_s2 = inlined_call_operand.vmem [shape: f32[1,64], index: 2, kind: input, shape index: {}]   ;;  %s386_s3 = inlined_call_operand.vmem [shape: bf16[64,64], index: 3, kind: input, shape index: {}]   ;;  %s387_s4 = inlined_call_operand.vmem [shape: f32[1,64], index: 4, kind: input, shape index: {}]   ;;  %s388_s5 = inlined_call_operand.vmem [shape: bf16[64,10], index: 5, kind: input, shape index: {}]   ;;  %s389_s6 = inlined_call_operand.vmem [shape: f32[1,10], index: 6, kind: input, shape index: {}]   ;;  %s390_s7 = inlined_call_operand.hbm [shape: f32[2,10], index: 7, kind: output, shape index: {}]  }
   0x1   :  { %v249_v0 = vld [vmem:[%s384_s1 + $0x8] sm:$0xff]  ;;  %v28_v1 = vld [vmem:[%s383_s0] sm:$0x3]  ;;  %v29_v2 = vld [vmem:[%s383_s0 + $0x2] sm:$0x3] }
   0x2   :  { %v30_v3 = vld [vmem:[%s383_s0 + $0x4] sm:$0x3]  ;;  %v31_v4 = vld [vmem:[%s383_s0 + $0x6] sm:$0x3]  ;;  %71 = vmatpush.bf16.msra.mxu0 %v249_v0  ;;  %v33_v6 = vsel %vm32_vm0, %v28_v1, -inf  ;;  %v34_v7 = vsel %vm32_vm0, %v29_v2, -inf }
   0x3   :  { %v248_v5 = vld [vmem:[%s384_s1] sm:$0xff]  ;;  %v35_v8 = vsel %vm32_vm0, %v30_v3, -inf  ;;  %v36_v9 = vsel %vm32_vm0, %v31_v4, -inf  ;;  %v253_v10 = vld [vmem:[%s386_s3 + $0x18] sm:$0xff]  ;;  %v37_v11 = vmax.f32 %v33_v6, %v34_v7  ;;  %v252_v13 = vld [vmem:[%s386_s3 + $0x10] sm:$0xff] }
   0x4   :  { %v38_v12 = vmax.f32 %v35_v8, %v36_v9  ;;  %124 = vmatpush.bf16.msra.mxu1 %v253_v10 }
   0x5   :  { %12 = vsyncpa [#allocation3], 0  ;;  %vm61_vm1 = vcmask 261120   ;;  %v251_v16 = vld [vmem:[%s386_s3 + $0x8] sm:$0xff]  ;;  %v250_v17 = vld [vmem:[%s386_s3] sm:$0xff]  ;;  %vm116_vm2 = vcmask 523264  }
   0x6   :  { %v39_v14 = vmax.f32 %v37_v11, %v38_v12  ;;  %72 = vmatpush.bf16.msra.mxu0 %v248_v5  ;;  %v257_v18 = vld [vmem:[%s388_s5 + $0x18] sm:$0xff]  ;;  %v256_v19 = vld [vmem:[%s388_s5 + $0x10] sm:$0xff]  ;;  %v259_v20 = vld [vmem:[%s385_s2] ss:$0 sm:$0xff]  ;;  %s288_s8 = smov [#allocation2]   ;;  %vm187_vm3 = vcmask 74752  }
   0x7   :  { %178 = vmatpush.bf16.msra.mxu2 %v257_v18  ;;  %v255_v26 = vld [vmem:[%s388_s5 + $0x8] sm:$0xff]  ;;  %v254_v27 = vld [vmem:[%s388_s5] sm:$0xff]  ;;  %s194_s9 = sshll.u32 %s288_s8, 4  ;;  %s196_s5 = sshll.u32 %s390_s7, 4  ;;  %s195_s9 = int_to_ptr.vmem [resolvable:$true] %s194_s9  ;;  %s197_s5 = int_to_ptr.hbm [resolvable:$true] %s196_s5 }
   0x8   :  { %v40_v15 = vpack.c.bf16 %v39_v14, %v39_v14  ;;  %125 = vmatpush.bf16.msra.mxu1 %v252_v13  ;;  %v260_v28 = vld [vmem:[%s387_s4] ss:$0 sm:$0xff] }
   0x9   :  { %v261_v34 = vld [vmem:[%s389_s6] ss:$0 sm:$0xff] }
   0xa   :  { %213 = vmatmul.msk.bf16.vlgmr.msra.gmra.mxu0 %vm61_vm1, %v40_v15 }
   0xb   :  { %179 = vmatpush.bf16.msra.mxu2 %v256_v19 }
   0xc   :  { %126 = vmatpush.bf16.msra.mxu1 %v251_v16 }
   0xf   :  { %180 = vmatpush.bf16.msra.mxu2 %v255_v26 }
  0x10   :  { %127 = vmatpush.bf16.msra.mxu1 %v250_v17 }
  0x13   :  { %181 = vmatpush.bf16.msra.mxu2 %v254_v27 }
  0x87   :  { %v74_v21 = vpop.f32.mrf.mxu0 }
  0x88   :  { %v75_v22 = vadd.f32 %v259_v20, %v74_v21 }
  0x8a   :  { %v78_v23 = vmax.f32 %v75_v22, 0.0 }
  0x8c   :  { %v79_v24 = vpack.c.bf16 %v78_v23, %v78_v23 }
  0x8e   :  { %230 = vmatmul.msk.bf16.vlgmr.msra.gmra.mxu1 %vm116_vm2, %v79_v24 }
  0x8f   :  { %v76_v25 = vpop.f32.mrf.mxu0 }
 0x10b   :  { %v129_v29 = vpop.f32.mrf.mxu1 }
 0x10c   :  { %v130_v30 = vadd.f32 %v260_v28, %v129_v29 }
 0x10e   :  { %v133_v31 = vmax.f32 %v130_v30, 0.0 }
 0x110   :  { %v134_v32 = vpack.c.bf16 %v133_v31, %v133_v31 }
 0x112   :  { %247 = vmatmul.msk.bf16.vlgmr.msra.gmra.mxu2 %vm116_vm2, %v134_v32 }
 0x113   :  { %v131_v33 = vpop.f32.mrf.mxu1 }
 0x195   :  { %v183_v35 = vpop.f32.mrf.mxu2 }
 0x196   :  { %v184_v36 = vadd.f32 %v261_v34, %v183_v35 }
 0x198   :  { %188 = vst.msk [vmem:[#allocation2] sm:$0x3] %vm187_vm3, %v184_v36 }
 0x199   :  { %199 = dma.vmem_to_hbm [thread:$0]  %s195_s9, 32, %s197_s5, [#allocation3]  }
 0x19d   :  { %v185_v37 = vpop.f32.mrf.mxu2 }
 0x19e   :  { %286 = dma.done.wait [#allocation3], 32  }
 0x19f   :  { %287 = vsyncadd [#allocation3], 4294967264 }
 0x1a0   :  { %204 = vsyncpa [#allocation3], 1 }

</bundles_post_ra>
